<compile_context>
chip_gen: v7x
topology: tpu7x:2x2x1
jax: 0.10.0
libtpu: 0.0.40
codegen_flags: <defaults>
</compile_context>

<pallas_src>
import math

import jax
import jax.numpy as jnp
from jax.experimental import pallas as pl
from jax.experimental.pallas import tpu as pltpu

LEN_OF_SEGMENTS = 400
LEN_OF_INPUT = 4 * LEN_OF_SEGMENTS    # 1600
LEN_OF_OUTPUT = 5 * LEN_OF_SEGMENTS   # 2000
K1_PAD = 1664                         # 13 * 128 : lane-dense fc1 contraction
OUT_PAD = 2048                        # 16 * 128 : lane-dense fc_last output

# True (in, out) per layer, exactly as the PyTorch module (modulo the fc6 fix).
LAYER_DIMS = [
    (LEN_OF_INPUT, 512),   # fc1
    (512, 1024),           # fc2
    (1024, 1024),          # fc3
    (1024, 1024),          # fc4
    (1024, 1024),          # fc5
    (1024, 512),           # fc6 (see TODO above)
    (512, LEN_OF_OUTPUT),  # fc_last
]
# Padded (in, out) actually used by the kernel (weights stored transposed,
# y = x @ W + b).
KERNEL_DIMS = [
    (K1_PAD, 512),
    (512, 1024),
    (1024, 1024),
    (1024, 1024),
    (1024, 1024),
    (1024, 512),
    (512, OUT_PAD),
]
NUM_LAYERS = len(KERNEL_DIMS)

# Static lane-aligned (multiple-of-128) offsets into the packed bias operand.
BIAS_OFFSETS = []
_off = 0
for _, _fo in KERNEL_DIMS:
    BIAS_OFFSETS.append(_off)
    _off += _fo
BIAS_TOTAL = _off  # 7168 = 56 * 128


def netfc_kernel(
    x_ref, bias_ref,                                          # tiled VMEM inputs
    w1_hbm, w2_hbm, w3_hbm, w4_hbm, w5_hbm, w6_hbm, w7_hbm,   # untiled HBM weights
    out_ref,                                                  # tiled VMEM output
    w1_v, w2_v, w3_v, w4_v, w5_v, w6_v, w7_v,                 # persistent VMEM scratch
    sem,                                                      # DMA semaphores (7,)
):
    """Whole MLP chain for one batch tile; weights loaded once on grid step 0."""
    w_hbm = (w1_hbm, w2_hbm, w3_hbm, w4_hbm, w5_hbm, w6_hbm, w7_hbm)
    w_vmem = (w1_v, w2_v, w3_v, w4_v, w5_v, w6_v, w7_v)

    is_first = pl.program_id(0) == 0

    # Issue all 7 weight copies up front (only on the first grid step; the VMEM
    # scratch persists across the batch grid, so later steps reuse it).
    @pl.when(is_first)
    def _start_weight_dma():
        for i in range(NUM_LAYERS):
            pltpu.make_async_copy(w_hbm[i], w_vmem[i], sem.at[i]).start()

    h = x_ref[...]                                            # (TB, 1664) bf16
    for i, (_, n_out) in enumerate(KERNEL_DIMS):
        # Per-layer wait (first step only): later-layer DMA overlaps the MXU
        # work of earlier layers.
        @pl.when(is_first)
        def _wait_weight_dma(i=i):
            pltpu.make_async_copy(w_hbm[i], w_vmem[i], sem.at[i]).wait()

        off = BIAS_OFFSETS[i]
        b = bias_ref[:, off:off + n_out]                      # (1, n_out) f32
        y = jnp.dot(h, w_vmem[i][...],
                    preferred_element_type=jnp.float32) + b   # f32 accumulate
        if i < NUM_LAYERS - 1:
            h = jnp.maximum(y, 0.0).astype(jnp.bfloat16)      # ReLU f32, cast once
        else:
            out_ref[...] = y                                  # (TB, 2048) lane-dense


def init_params(key):
    """PyTorch-default-style init U(-1/sqrt(fan_in), +) on the TRUE shapes,
    zero-padded to the kernel shapes; weights bf16, biases packed f32."""
    weights, bias_parts = [], []
    for (fi, fo), (kfi, kfo) in zip(LAYER_DIMS, KERNEL_DIMS):
        key, kw, kb = jax.random.split(key, 3)
        bound = 1.0 / math.sqrt(fi)
        w = jax.random.uniform(kw, (fi, fo), jnp.float32, minval=-bound, maxval=bound)
        b = jax.random.uniform(kb, (1, fo), jnp.float32, minval=-bound, maxval=bound)
        w = jnp.pad(w, ((0, kfi - fi), (0, kfo - fo)))        # zero padding
        b = jnp.pad(b, ((0, 0), (0, kfo - fo)))
        weights.append(w.astype(jnp.bfloat16))
        bias_parts.append(b)
    bias = jnp.concatenate(bias_parts, axis=1)                # (1, 7168) f32
    return weights, bias


def _round_up(n, m):
    return (n + m - 1) // m * m


def _vmem_limit_bytes():
    """~3/4 of per-core VMEM (96 MiB on v5e/v6e, 48 MiB on v7x)."""
    try:
        cap = int(pltpu.get_tpu_info().vmem_capacity_bytes)
    except Exception:
        cap = 64 * 1024 * 1024                                # v7x-safe fallback
    return min(cap * 3 // 4, 100 * 1024 * 1024)


def netfc_forward(x, weights, bias, batch_tile=256):
    """x: any shape whose trailing dims flatten to LEN_OF_INPUT per example."""
    flat = x.reshape(-1, LEN_OF_INPUT)
    batch = flat.shape[0]

    tb = min(batch_tile, _round_up(batch, 8))                 # batch tile (mult of 8)
    padded_batch = _round_up(batch, tb)
    flat = jnp.pad(flat.astype(jnp.bfloat16),
                   ((0, padded_batch - batch), (0, K1_PAD - LEN_OF_INPUT)))
    grid = (padded_batch // tb,)

    flops = 2 * padded_batch * sum(fi * fo for fi, fo in KERNEL_DIMS)
    weight_bytes = sum(fi * fo * 2 for fi, fo in KERNEL_DIMS)  # bf16, read once
    bytes_accessed = (weight_bytes + BIAS_TOTAL * 4
                      + padded_batch * K1_PAD * 2
                      + padded_batch * OUT_PAD * 4)

    out_padded = pl.pallas_call(
        netfc_kernel,
        out_shape=jax.ShapeDtypeStruct((padded_batch, OUT_PAD), jnp.float32),
        grid_spec=pltpu.PrefetchScalarGridSpec(
            num_scalar_prefetch=0,
            grid=grid,
            in_specs=(
                [pl.BlockSpec((tb, K1_PAD), lambda i: (i, 0)),        # x tile
                 pl.BlockSpec((1, BIAS_TOTAL), lambda i: (0, 0))]     # bias, loaded once
                + [pl.BlockSpec(memory_space=pl.ANY)] * NUM_LAYERS),  # weights in HBM
            out_specs=pl.BlockSpec((tb, OUT_PAD), lambda i: (i, 0)),
            scratch_shapes=(
                [pltpu.VMEM((fi, fo), jnp.bfloat16) for fi, fo in KERNEL_DIMS]
                + [pltpu.SemaphoreType.DMA((NUM_LAYERS,))])),
        compiler_params=pltpu.CompilerParams(
            # Must stay "arbitrary": weight DMA is gated on program_id(0)==0,
            # so the batch axis cannot be megacore-sharded.
            # TODO(synk): on v7x with very large batches, split batch across
            # the 2 TCs with per-core weight loads instead.
            dimension_semantics=("arbitrary",),
            vmem_limit_bytes=_vmem_limit_bytes()),
        cost_estimate=pl.CostEstimate(
            flops=int(flops), transcendentals=0,
            bytes_accessed=int(bytes_accessed)),
    )(flat, bias, *weights)

    # Strip batch padding and the fc_last lane padding (cols 2000:2047 are zero).
    return out_padded[:batch, :LEN_OF_OUTPUT]


def netfc_reference(x, weights, bias):
    """Pure-JAX reference with the same bf16 activation/weight numerics."""
    h = x.reshape(-1, LEN_OF_INPUT).astype(jnp.bfloat16)
    h = jnp.pad(h, ((0, 0), (0, K1_PAD - LEN_OF_INPUT)))
    for i, (_, n_out) in enumerate(KERNEL_DIMS):
        off = BIAS_OFFSETS[i]
        b = bias[:, off:off + n_out]
        y = jnp.dot(h, weights[i], preferred_element_type=jnp.float32) + b
        if i < NUM_LAYERS - 1:
            h = jnp.maximum(y, 0.0).astype(jnp.bfloat16)
        else:
            h = y
    return h[:, :LEN_OF_OUTPUT]


if __name__ == "__main__":
    key = jax.random.PRNGKey(0)
    key, pkey, xkey = jax.random.split(key, 3)

    weights, bias = init_params(pkey)

    # Matches the module's expected input layout: (batch, 1, LEN_OF_INPUT).
    batch = 8
    x = jax.random.normal(xkey, (batch, 1, LEN_OF_INPUT), dtype=jnp.float32)

    out = jax.block_until_ready(netfc_forward(x, weights, bias))
    assert out.shape == (batch, LEN_OF_OUTPUT), out.shape
    assert out.dtype == jnp.float32, out.dtype

    ref = jax.block_until_ready(netfc_reference(x, weights, bias))
    max_err = float(jnp.max(jnp.abs(out - ref)))
    assert jnp.allclose(out, ref, rtol=5e-2, atol=5e-2), max_err

    print("KERNEL_OK")
</pallas_src>

<mosaic_0001>
module attributes {stable_mosaic.version = 11 : i64} {
  func.func @netfc_kernel(%arg0: i32, %arg1: memref<8x1664xbf16, #tpu.memory_space<vmem>>, %arg2: memref<1x7168xf32, #tpu.memory_space<vmem>>, %arg3: memref<1664x512xbf16, #tpu.memory_space<any>>, %arg4: memref<512x1024xbf16, #tpu.memory_space<any>>, %arg5: memref<1024x1024xbf16, #tpu.memory_space<any>>, %arg6: memref<1024x1024xbf16, #tpu.memory_space<any>>, %arg7: memref<1024x1024xbf16, #tpu.memory_space<any>>, %arg8: memref<1024x512xbf16, #tpu.memory_space<any>>, %arg9: memref<512x2048xbf16, #tpu.memory_space<any>>, %arg10: memref<8x2048xf32, #tpu.memory_space<vmem>>, %arg11: memref<1664x512xbf16, #tpu.memory_space<vmem>>, %arg12: memref<512x1024xbf16, #tpu.memory_space<vmem>>, %arg13: memref<1024x1024xbf16, #tpu.memory_space<vmem>>, %arg14: memref<1024x1024xbf16, #tpu.memory_space<vmem>>, %arg15: memref<1024x1024xbf16, #tpu.memory_space<vmem>>, %arg16: memref<1024x512xbf16, #tpu.memory_space<vmem>>, %arg17: memref<512x2048xbf16, #tpu.memory_space<vmem>>, %arg18: memref<7x!tpu.dma_semaphore, #tpu.memory_space<semaphore_mem>>) attributes {dimension_semantics = [#tpu.dimension_semantics<arbitrary>], iteration_bounds = array<i64: 1>, scalar_prefetch = 0 : i64, scratch_operands = 8 : i64, tpu.core_type = #tpu.core_type<tc>, window_params = [{transform_indices = @transform_0, window_bounds = array<i64: 8, 1664>}, {pipeline_mode = #tpu.pipeline_mode<synchronous>, transform_indices = @transform_1, window_bounds = array<i64: 1, 7168>}, {}, {}, {}, {}, {}, {}, {}, {transform_indices = @transform_9, window_bounds = array<i64: 8, 2048>}]} {
    %c0_i32 = arith.constant 0 : i32
    %0 = arith.cmpi eq, %arg0, %c0_i32 : i32
    %1 = arith.extui %0 : i1 to i32
    %c0_i32_0 = arith.constant 0 : i32
    %2 = arith.cmpi ne, %1, %c0_i32_0 : i32
    scf.if %2 {
      %c0_i32_45 = arith.constant 0 : i32
      %72 = tpu.memref_slice %arg18[%c0_i32_45] : memref<7x!tpu.dma_semaphore, #tpu.memory_space<semaphore_mem>> -> memref<1x!tpu.dma_semaphore, #tpu.memory_space<semaphore_mem>>
      %73 = tpu.memref_squeeze %72 : memref<1x!tpu.dma_semaphore, #tpu.memory_space<semaphore_mem>> -> memref<!tpu.dma_semaphore, #tpu.memory_space<semaphore_mem>>
      tpu.enqueue_dma source(%arg3 : memref<1664x512xbf16, #tpu.memory_space<any>>) target(%arg11 : memref<1664x512xbf16, #tpu.memory_space<vmem>>) target_semaphore(%73 : memref<!tpu.dma_semaphore, #tpu.memory_space<semaphore_mem>>)
      %c1_i32 = arith.constant 1 : i32
      %74 = tpu.memref_slice %arg18[%c1_i32] : memref<7x!tpu.dma_semaphore, #tpu.memory_space<semaphore_mem>> -> memref<1x!tpu.dma_semaphore, #tpu.memory_space<semaphore_mem>>
      %75 = tpu.memref_squeeze %74 : memref<1x!tpu.dma_semaphore, #tpu.memory_space<semaphore_mem>> -> memref<!tpu.dma_semaphore, #tpu.memory_space<semaphore_mem>>
      tpu.enqueue_dma source(%arg4 : memref<512x1024xbf16, #tpu.memory_space<any>>) target(%arg12 : memref<512x1024xbf16, #tpu.memory_space<vmem>>) target_semaphore(%75 : memref<!tpu.dma_semaphore, #tpu.memory_space<semaphore_mem>>)
      %c2_i32 = arith.constant 2 : i32
      %76 = tpu.memref_slice %arg18[%c2_i32] : memref<7x!tpu.dma_semaphore, #tpu.memory_space<semaphore_mem>> -> memref<1x!tpu.dma_semaphore, #tpu.memory_space<semaphore_mem>>
      %77 = tpu.memref_squeeze %76 : memref<1x!tpu.dma_semaphore, #tpu.memory_space<semaphore_mem>> -> memref<!tpu.dma_semaphore, #tpu.memory_space<semaphore_mem>>
      tpu.enqueue_dma source(%arg5 : memref<1024x1024xbf16, #tpu.memory_space<any>>) target(%arg13 : memref<1024x1024xbf16, #tpu.memory_space<vmem>>) target_semaphore(%77 : memref<!tpu.dma_semaphore, #tpu.memory_space<semaphore_mem>>)
      %c3_i32 = arith.constant 3 : i32
      %78 = tpu.memref_slice %arg18[%c3_i32] : memref<7x!tpu.dma_semaphore, #tpu.memory_space<semaphore_mem>> -> memref<1x!tpu.dma_semaphore, #tpu.memory_space<semaphore_mem>>
      %79 = tpu.memref_squeeze %78 : memref<1x!tpu.dma_semaphore, #tpu.memory_space<semaphore_mem>> -> memref<!tpu.dma_semaphore, #tpu.memory_space<semaphore_mem>>
      tpu.enqueue_dma source(%arg6 : memref<1024x1024xbf16, #tpu.memory_space<any>>) target(%arg14 : memref<1024x1024xbf16, #tpu.memory_space<vmem>>) target_semaphore(%79 : memref<!tpu.dma_semaphore, #tpu.memory_space<semaphore_mem>>)
      %c4_i32 = arith.constant 4 : i32
      %80 = tpu.memref_slice %arg18[%c4_i32] : memref<7x!tpu.dma_semaphore, #tpu.memory_space<semaphore_mem>> -> memref<1x!tpu.dma_semaphore, #tpu.memory_space<semaphore_mem>>
      %81 = tpu.memref_squeeze %80 : memref<1x!tpu.dma_semaphore, #tpu.memory_space<semaphore_mem>> -> memref<!tpu.dma_semaphore, #tpu.memory_space<semaphore_mem>>
      tpu.enqueue_dma source(%arg7 : memref<1024x1024xbf16, #tpu.memory_space<any>>) target(%arg15 : memref<1024x1024xbf16, #tpu.memory_space<vmem>>) target_semaphore(%81 : memref<!tpu.dma_semaphore, #tpu.memory_space<semaphore_mem>>)
      %c5_i32 = arith.constant 5 : i32
      %82 = tpu.memref_slice %arg18[%c5_i32] : memref<7x!tpu.dma_semaphore, #tpu.memory_space<semaphore_mem>> -> memref<1x!tpu.dma_semaphore, #tpu.memory_space<semaphore_mem>>
      %83 = tpu.memref_squeeze %82 : memref<1x!tpu.dma_semaphore, #tpu.memory_space<semaphore_mem>> -> memref<!tpu.dma_semaphore, #tpu.memory_space<semaphore_mem>>
      tpu.enqueue_dma source(%arg8 : memref<1024x512xbf16, #tpu.memory_space<any>>) target(%arg16 : memref<1024x512xbf16, #tpu.memory_space<vmem>>) target_semaphore(%83 : memref<!tpu.dma_semaphore, #tpu.memory_space<semaphore_mem>>)
      %c6_i32 = arith.constant 6 : i32
      %84 = tpu.memref_slice %arg18[%c6_i32] : memref<7x!tpu.dma_semaphore, #tpu.memory_space<semaphore_mem>> -> memref<1x!tpu.dma_semaphore, #tpu.memory_space<semaphore_mem>>
      %85 = tpu.memref_squeeze %84 : memref<1x!tpu.dma_semaphore, #tpu.memory_space<semaphore_mem>> -> memref<!tpu.dma_semaphore, #tpu.memory_space<semaphore_mem>>
      tpu.enqueue_dma source(%arg9 : memref<512x2048xbf16, #tpu.memory_space<any>>) target(%arg17 : memref<512x2048xbf16, #tpu.memory_space<vmem>>) target_semaphore(%85 : memref<!tpu.dma_semaphore, #tpu.memory_space<semaphore_mem>>)
    } else {
    }
    %c0 = arith.constant 0 : index
    %c0_1 = arith.constant 0 : index
    %3 = vector.load %arg1[%c0, %c0_1] : memref<8x1664xbf16, #tpu.memory_space<vmem>>, vector<8x1664xbf16>
    %4 = arith.extui %0 : i1 to i32
    %c0_i32_2 = arith.constant 0 : i32
    %5 = arith.cmpi ne, %4, %c0_i32_2 : i32
    scf.if %5 {
      %c0_i32_45 = arith.constant 0 : i32
      %72 = tpu.memref_slice %arg18[%c0_i32_45] : memref<7x!tpu.dma_semaphore, #tpu.memory_space<semaphore_mem>> -> memref<1x!tpu.dma_semaphore, #tpu.memory_space<semaphore_mem>>
      %73 = tpu.memref_squeeze %72 : memref<1x!tpu.dma_semaphore, #tpu.memory_space<semaphore_mem>> -> memref<!tpu.dma_semaphore, #tpu.memory_space<semaphore_mem>>
      tpu.wait_dma2 semaphore(%73 : memref<!tpu.dma_semaphore, #tpu.memory_space<semaphore_mem>>) src(%arg3 : memref<1664x512xbf16, #tpu.memory_space<any>>) dst(%arg11 : memref<1664x512xbf16, #tpu.memory_space<vmem>>)
    } else {
    }
    %c0_3 = arith.constant 0 : index
    %c0_4 = arith.constant 0 : index
    %6 = vector.load %arg2[%c0_3, %c0_4] : memref<1x7168xf32, #tpu.memory_space<vmem>>, vector<1x512xf32>
    %c0_5 = arith.constant 0 : index
    %c0_6 = arith.constant 0 : index
    %7 = vector.load %arg11[%c0_5, %c0_6] : memref<1664x512xbf16, #tpu.memory_space<vmem>>, vector<1664x512xbf16>
    %cst = arith.constant dense<0.000000e+00> : vector<8x512xf32>
    %8 = tpu.matmul %3, %7, %cst {dimension_numbers = #tpu.dot_dimension_numbers<[1], [0], [0], [1], [0, 0, 1, 1], [], []>} : vector<8x1664xbf16>, vector<1664x512xbf16>, vector<8x512xf32> -> vector<8x512xf32>
    %9 = vector.broadcast %6 : vector<1x512xf32> to vector<8x512xf32>
    %10 = arith.addf %8, %9 : vector<8x512xf32>
    %cst_7 = arith.constant 0.000000e+00 : f32
    %11 = vector.broadcast %cst_7 : f32 to vector<8x512xf32>
    %12 = arith.maximumf %10, %11 : vector<8x512xf32>
    %13 = arith.truncf %12 : vector<8x512xf32> to vector<8x512xbf16>
    %14 = arith.extui %0 : i1 to i32
    %c0_i32_8 = arith.constant 0 : i32
    %15 = arith.cmpi ne, %14, %c0_i32_8 : i32
    scf.if %15 {
      %c1_i32 = arith.constant 1 : i32
      %72 = tpu.memref_slice %arg18[%c1_i32] : memref<7x!tpu.dma_semaphore, #tpu.memory_space<semaphore_mem>> -> memref<1x!tpu.dma_semaphore, #tpu.memory_space<semaphore_mem>>
      %73 = tpu.memref_squeeze %72 : memref<1x!tpu.dma_semaphore, #tpu.memory_space<semaphore_mem>> -> memref<!tpu.dma_semaphore, #tpu.memory_space<semaphore_mem>>
      tpu.wait_dma2 semaphore(%73 : memref<!tpu.dma_semaphore, #tpu.memory_space<semaphore_mem>>) src(%arg4 : memref<512x1024xbf16, #tpu.memory_space<any>>) dst(%arg12 : memref<512x1024xbf16, #tpu.memory_space<vmem>>)
    } else {
    }
    %c0_9 = arith.constant 0 : index
    %c512 = arith.constant 512 : index
    %16 = vector.load %arg2[%c0_9, %c512] : memref<1x7168xf32, #tpu.memory_space<vmem>>, vector<1x1024xf32>
    %c0_10 = arith.constant 0 : index
    %c0_11 = arith.constant 0 : index
    %17 = vector.load %arg12[%c0_10, %c0_11] : memref<512x1024xbf16, #tpu.memory_space<vmem>>, vector<512x1024xbf16>
    %cst_12 = arith.constant dense<0.000000e+00> : vector<8x1024xf32>
    %18 = tpu.matmul %13, %17, %cst_12 {dimension_numbers = #tpu.dot_dimension_numbers<[1], [0], [0], [1], [0, 0, 1, 1], [], []>} : vector<8x512xbf16>, vector<512x1024xbf16>, vector<8x1024xf32> -> vector<8x1024xf32>
    %19 = vector.broadcast %16 : vector<1x1024xf32> to vector<8x1024xf32>
    %20 = arith.addf %18, %19 : vector<8x1024xf32>
    %cst_13 = arith.constant 0.000000e+00 : f32
    %21 = vector.broadcast %cst_13 : f32 to vector<8x1024xf32>
    %22 = arith.maximumf %20, %21 : vector<8x1024xf32>
    %23 = arith.truncf %22 : vector<8x1024xf32> to vector<8x1024xbf16>
    %24 = arith.extui %0 : i1 to i32
    %c0_i32_14 = arith.constant 0 : i32
    %25 = arith.cmpi ne, %24, %c0_i32_14 : i32
    scf.if %25 {
      %c2_i32 = arith.constant 2 : i32
      %72 = tpu.memref_slice %arg18[%c2_i32] : memref<7x!tpu.dma_semaphore, #tpu.memory_space<semaphore_mem>> -> memref<1x!tpu.dma_semaphore, #tpu.memory_space<semaphore_mem>>
      %73 = tpu.memref_squeeze %72 : memref<1x!tpu.dma_semaphore, #tpu.memory_space<semaphore_mem>> -> memref<!tpu.dma_semaphore, #tpu.memory_space<semaphore_mem>>
      tpu.wait_dma2 semaphore(%73 : memref<!tpu.dma_semaphore, #tpu.memory_space<semaphore_mem>>) src(%arg5 : memref<1024x1024xbf16, #tpu.memory_space<any>>) dst(%arg13 : memref<1024x1024xbf16, #tpu.memory_space<vmem>>)
    } else {
    }
    %c0_15 = arith.constant 0 : index
    %c1536 = arith.constant 1536 : index
    %26 = vector.load %arg2[%c0_15, %c1536] : memref<1x7168xf32, #tpu.memory_space<vmem>>, vector<1x1024xf32>
    %c0_16 = arith.constant 0 : index
    %c0_17 = arith.constant 0 : index
    %27 = vector.load %arg13[%c0_16, %c0_17] : memref<1024x1024xbf16, #tpu.memory_space<vmem>>, vector<1024x1024xbf16>
    %cst_18 = arith.constant dense<0.000000e+00> : vector<8x1024xf32>
    %28 = tpu.matmul %23, %27, %cst_18 {dimension_numbers = #tpu.dot_dimension_numbers<[1], [0], [0], [1], [0, 0, 1, 1], [], []>} : vector<8x1024xbf16>, vector<1024x1024xbf16>, vector<8x1024xf32> -> vector<8x1024xf32>
    %29 = vector.broadcast %26 : vector<1x1024xf32> to vector<8x1024xf32>
    %30 = arith.addf %28, %29 : vector<8x1024xf32>
    %cst_19 = arith.constant 0.000000e+00 : f32
    %31 = vector.broadcast %cst_19 : f32 to vector<8x1024xf32>
    %32 = arith.maximumf %30, %31 : vector<8x1024xf32>
    %33 = arith.truncf %32 : vector<8x1024xf32> to vector<8x1024xbf16>
    %34 = arith.extui %0 : i1 to i32
    %c0_i32_20 = arith.constant 0 : i32
    %35 = arith.cmpi ne, %34, %c0_i32_20 : i32
    scf.if %35 {
      %c3_i32 = arith.constant 3 : i32
      %72 = tpu.memref_slice %arg18[%c3_i32] : memref<7x!tpu.dma_semaphore, #tpu.memory_space<semaphore_mem>> -> memref<1x!tpu.dma_semaphore, #tpu.memory_space<semaphore_mem>>
      %73 = tpu.memref_squeeze %72 : memref<1x!tpu.dma_semaphore, #tpu.memory_space<semaphore_mem>> -> memref<!tpu.dma_semaphore, #tpu.memory_space<semaphore_mem>>
      tpu.wait_dma2 semaphore(%73 : memref<!tpu.dma_semaphore, #tpu.memory_space<semaphore_mem>>) src(%arg6 : memref<1024x1024xbf16, #tpu.memory_space<any>>) dst(%arg14 : memref<1024x1024xbf16, #tpu.memory_space<vmem>>)
    } else {
    }
    %c0_21 = arith.constant 0 : index
    %c2560 = arith.constant 2560 : index
    %36 = vector.load %arg2[%c0_21, %c2560] : memref<1x7168xf32, #tpu.memory_space<vmem>>, vector<1x1024xf32>
    %c0_22 = arith.constant 0 : index
    %c0_23 = arith.constant 0 : index
    %37 = vector.load %arg14[%c0_22, %c0_23] : memref<1024x1024xbf16, #tpu.memory_space<vmem>>, vector<1024x1024xbf16>
    %cst_24 = arith.constant dense<0.000000e+00> : vector<8x1024xf32>
    %38 = tpu.matmul %33, %37, %cst_24 {dimension_numbers = #tpu.dot_dimension_numbers<[1], [0], [0], [1], [0, 0, 1, 1], [], []>} : vector<8x1024xbf16>, vector<1024x1024xbf16>, vector<8x1024xf32> -> vector<8x1024xf32>
    %39 = vector.broadcast %36 : vector<1x1024xf32> to vector<8x1024xf32>
    %40 = arith.addf %38, %39 : vector<8x1024xf32>
    %cst_25 = arith.constant 0.000000e+00 : f32
    %41 = vector.broadcast %cst_25 : f32 to vector<8x1024xf32>
    %42 = arith.maximumf %40, %41 : vector<8x1024xf32>
    %43 = arith.truncf %42 : vector<8x1024xf32> to vector<8x1024xbf16>
    %44 = arith.extui %0 : i1 to i32
    %c0_i32_26 = arith.constant 0 : i32
    %45 = arith.cmpi ne, %44, %c0_i32_26 : i32
    scf.if %45 {
      %c4_i32 = arith.constant 4 : i32
      %72 = tpu.memref_slice %arg18[%c4_i32] : memref<7x!tpu.dma_semaphore, #tpu.memory_space<semaphore_mem>> -> memref<1x!tpu.dma_semaphore, #tpu.memory_space<semaphore_mem>>
      %73 = tpu.memref_squeeze %72 : memref<1x!tpu.dma_semaphore, #tpu.memory_space<semaphore_mem>> -> memref<!tpu.dma_semaphore, #tpu.memory_space<semaphore_mem>>
      tpu.wait_dma2 semaphore(%73 : memref<!tpu.dma_semaphore, #tpu.memory_space<semaphore_mem>>) src(%arg7 : memref<1024x1024xbf16, #tpu.memory_space<any>>) dst(%arg15 : memref<1024x1024xbf16, #tpu.memory_space<vmem>>)
    } else {
    }
    %c0_27 = arith.constant 0 : index
    %c3584 = arith.constant 3584 : index
    %46 = vector.load %arg2[%c0_27, %c3584] : memref<1x7168xf32, #tpu.memory_space<vmem>>, vector<1x1024xf32>
    %c0_28 = arith.constant 0 : index
    %c0_29 = arith.constant 0 : index
    %47 = vector.load %arg15[%c0_28, %c0_29] : memref<1024x1024xbf16, #tpu.memory_space<vmem>>, vector<1024x1024xbf16>
    %cst_30 = arith.constant dense<0.000000e+00> : vector<8x1024xf32>
    %48 = tpu.matmul %43, %47, %cst_30 {dimension_numbers = #tpu.dot_dimension_numbers<[1], [0], [0], [1], [0, 0, 1, 1], [], []>} : vector<8x1024xbf16>, vector<1024x1024xbf16>, vector<8x1024xf32> -> vector<8x1024xf32>
    %49 = vector.broadcast %46 : vector<1x1024xf32> to vector<8x1024xf32>
    %50 = arith.addf %48, %49 : vector<8x1024xf32>
    %cst_31 = arith.constant 0.000000e+00 : f32
    %51 = vector.broadcast %cst_31 : f32 to vector<8x1024xf32>
    %52 = arith.maximumf %50, %51 : vector<8x1024xf32>
    %53 = arith.truncf %52 : vector<8x1024xf32> to vector<8x1024xbf16>
    %54 = arith.extui %0 : i1 to i32
    %c0_i32_32 = arith.constant 0 : i32
    %55 = arith.cmpi ne, %54, %c0_i32_32 : i32
    scf.if %55 {
      %c5_i32 = arith.constant 5 : i32
      %72 = tpu.memref_slice %arg18[%c5_i32] : memref<7x!tpu.dma_semaphore, #tpu.memory_space<semaphore_mem>> -> memref<1x!tpu.dma_semaphore, #tpu.memory_space<semaphore_mem>>
      %73 = tpu.memref_squeeze %72 : memref<1x!tpu.dma_semaphore, #tpu.memory_space<semaphore_mem>> -> memref<!tpu.dma_semaphore, #tpu.memory_space<semaphore_mem>>
      tpu.wait_dma2 semaphore(%73 : memref<!tpu.dma_semaphore, #tpu.memory_space<semaphore_mem>>) src(%arg8 : memref<1024x512xbf16, #tpu.memory_space<any>>) dst(%arg16 : memref<1024x512xbf16, #tpu.memory_space<vmem>>)
    } else {
    }
    %c0_33 = arith.constant 0 : index
    %c4608 = arith.constant 4608 : index
    %56 = vector.load %arg2[%c0_33, %c4608] : memref<1x7168xf32, #tpu.memory_space<vmem>>, vector<1x512xf32>
    %c0_34 = arith.constant 0 : index
    %c0_35 = arith.constant 0 : index
    %57 = vector.load %arg16[%c0_34, %c0_35] : memref<1024x512xbf16, #tpu.memory_space<vmem>>, vector<1024x512xbf16>
    %cst_36 = arith.constant dense<0.000000e+00> : vector<8x512xf32>
    %58 = tpu.matmul %53, %57, %cst_36 {dimension_numbers = #tpu.dot_dimension_numbers<[1], [0], [0], [1], [0, 0, 1, 1], [], []>} : vector<8x1024xbf16>, vector<1024x512xbf16>, vector<8x512xf32> -> vector<8x512xf32>
    %59 = vector.broadcast %56 : vector<1x512xf32> to vector<8x512xf32>
    %60 = arith.addf %58, %59 : vector<8x512xf32>
    %cst_37 = arith.constant 0.000000e+00 : f32
    %61 = vector.broadcast %cst_37 : f32 to vector<8x512xf32>
    %62 = arith.maximumf %60, %61 : vector<8x512xf32>
    %63 = arith.truncf %62 : vector<8x512xf32> to vector<8x512xbf16>
    %64 = arith.extui %0 : i1 to i32
    %c0_i32_38 = arith.constant 0 : i32
    %65 = arith.cmpi ne, %64, %c0_i32_38 : i32
    scf.if %65 {
      %c6_i32 = arith.constant 6 : i32
      %72 = tpu.memref_slice %arg18[%c6_i32] : memref<7x!tpu.dma_semaphore, #tpu.memory_space<semaphore_mem>> -> memref<1x!tpu.dma_semaphore, #tpu.memory_space<semaphore_mem>>
      %73 = tpu.memref_squeeze %72 : memref<1x!tpu.dma_semaphore, #tpu.memory_space<semaphore_mem>> -> memref<!tpu.dma_semaphore, #tpu.memory_space<semaphore_mem>>
      tpu.wait_dma2 semaphore(%73 : memref<!tpu.dma_semaphore, #tpu.memory_space<semaphore_mem>>) src(%arg9 : memref<512x2048xbf16, #tpu.memory_space<any>>) dst(%arg17 : memref<512x2048xbf16, #tpu.memory_space<vmem>>)
    } else {
    }
    %c0_39 = arith.constant 0 : index
    %c5120 = arith.constant 5120 : index
    %66 = vector.load %arg2[%c0_39, %c5120] : memref<1x7168xf32, #tpu.memory_space<vmem>>, vector<1x2048xf32>
    %c0_40 = arith.constant 0 : index
    %c0_41 = arith.constant 0 : index
    %67 = vector.load %arg17[%c0_40, %c0_41] : memref<512x2048xbf16, #tpu.memory_space<vmem>>, vector<512x2048xbf16>
    %cst_42 = arith.constant dense<0.000000e+00> : vector<8x2048xf32>
    %68 = tpu.matmul %63, %67, %cst_42 {dimension_numbers = #tpu.dot_dimension_numbers<[1], [0], [0], [1], [0, 0, 1, 1], [], []>} : vector<8x512xbf16>, vector<512x2048xbf16>, vector<8x2048xf32> -> vector<8x2048xf32>
    %69 = vector.broadcast %66 : vector<1x2048xf32> to vector<8x2048xf32>
    %70 = arith.addf %68, %69 : vector<8x2048xf32>
    %c0_43 = arith.constant 0 : index
    %c0_44 = arith.constant 0 : index
    %71 = vector.load %arg10[%c0_43, %c0_44] : memref<8x2048xf32, #tpu.memory_space<vmem>>, vector<8x2048xf32>
    tpu.vector_store %arg10[%c0_43, %c0_44], %70 {strides = array<i32>} : memref<8x2048xf32, #tpu.memory_space<vmem>>, vector<8x2048xf32>,
    return
  }
  func.func @transform_0(%arg0: i32) -> (i32, i32) {
    %c0_i32 = arith.constant 0 : i32
    %c0_i32_0 = arith.constant 0 : i32
    return %arg0, %c0_i32 : i32, i32
  }
  func.func @transform_1(%arg0: i32) -> (i32, i32) {
    %c0_i32 = arith.constant 0 : i32
    %c0_i32_0 = arith.constant 0 : i32
    %c0_i32_1 = arith.constant 0 : i32
    return %c0_i32, %c0_i32_0 : i32, i32
  }
  func.func @transform_9(%arg0: i32) -> (i32, i32) {
    %c0_i32 = arith.constant 0 : i32
    %c0_i32_0 = arith.constant 0 : i32
    return %arg0, %c0_i32 : i32, i32
  }
}

</mosaic_0001>

<bundles_post_ra>
// kernel: tpu_custom_call.1
= control target key start
LH: loop header
LB: loop body
LE: loop exit
PB: predicated region body
PF: predicated region fallthrough
CT: control target
= control target key end

     0   :  { %14 = vsyncpa [#allocation11], 0  ;;  %s8775_s0 = inlined_call_operand.hbm [shape: bf16[8,1664], index: 0, kind: input, shape index: {}]   ;;  %s8776_s1 = inlined_call_operand.hbm [shape: f32[1,7168], index: 1, kind: input, shape index: {}]   ;;  %s8777_s2 = inlined_call_operand.hbm [shape: bf16[1664,512], index: 2, kind: input, shape index: {}]   ;;  %s8778_s3 = inlined_call_operand.hbm [shape: bf16[512,1024], index: 3, kind: input, shape index: {}]   ;;  %s8779_s4 = inlined_call_operand.hbm [shape: bf16[1024,1024], index: 4, kind: input, shape index: {}]   ;;  %s8780_s5 = inlined_call_operand.hbm [shape: bf16[1024,1024], index: 5, kind: input, shape index: {}]   ;;  %s8781_s6 = inlined_call_operand.hbm [shape: bf16[1024,1024], index: 6, kind: input, shape index: {}]   ;;  %s8782_s7 = inlined_call_operand.hbm [shape: bf16[1024,512], index: 7, kind: input, shape index: {}]   ;;  %s8783_s8 = inlined_call_operand.hbm [shape: bf16[512,2048], index: 8, kind: input, shape index: {}]   ;;  %s8784_s9 = inlined_call_operand.hbm [shape: f32[8,2048], index: 9, kind: output, shape index: {}]  }
   0x1   :  { %15 = vsyncpa [#allocation14], 0 }
   0x2   :  { %16 = vsyncpa [#allocation12], 0  ;;  %s8162_s30 = smov [#allocation10]   ;;  %s8163_s11 = smov [#allocation13]  }
   0x3   :  { %s23_s10 = sshll.u32 %s8162_s30, 4  ;;  %s33_s12 = sshll.u32 %s8163_s11, 4  ;;  %s24_s10 = int_to_ptr.vmem [resolvable:$true] %s23_s10  ;;  %s34_s12 = int_to_ptr.vmem [resolvable:$true] %s33_s12 }
   0x4   :  { %s8076_s15 = scalar_lea.hbm %s8775_s0, 832 }
   0x5   :  { %p8077_p0 = scmp.ne.s32.totalorder %s8775_s0, %s8076_s15  ;;  %p8080_p1 = scmp.lt.u32.totalorder %s8076_s15, %s8775_s0 }
   0x7   :  { %p8082_p2 = pnand %p8080_p1, %p8077_p0 }
   0x9   :  { %8085 = shalt.err (!%p8082_p2)
}
   0xa   :  { %s8086_s20 = scalar_lea.vmem %s24_s10, 832  ;;  %p8091_p4 = scmp.lt.s32.totalorder %s24_s10, %s24_s10 }
   0xb   :  { %p8087_p3 = scmp.ne.s32.totalorder %s24_s10, %s8086_s20  ;;  %p8092_p5 = scmp.lt.s32.totalorder %s8086_s20, %s8086_s20 }
   0xd   :  { %p8093_p6 = por %p8092_p5, %p8091_p4 }
   0xf   :  { %p8094_p7 = pnand %p8093_p6, %p8087_p3 }
  0x11   :  { %8097 = shalt.err (!%p8094_p7)
}
  0x12   :  { %26 = dma.hbm_to_vmem [thread:$0]  %s8775_s0, 832, %s24_s10, [#allocation11]  }
  0x13   :  { %s8098_s25 = scalar_lea.hbm %s8776_s1, 896 }
  0x14   :  { %p8099_p8 = scmp.ne.s32.totalorder %s8776_s1, %s8098_s25  ;;  %p8102_p9 = scmp.lt.u32.totalorder %s8098_s25, %s8776_s1 }
  0x16   :  { %p8104_p10 = pnand %p8102_p9, %p8099_p8 }
  0x18   :  { %8107 = shalt.err (!%p8104_p10)
}
  0x19   :  { %s8108_s30 = scalar_lea.vmem %s34_s12, 896  ;;  %p8113_p12 = scmp.lt.s32.totalorder %s34_s12, %s34_s12 }
  0x1a   :  { %p8109_p11 = scmp.ne.s32.totalorder %s34_s12, %s8108_s30  ;;  %p8114_p13 = scmp.lt.s32.totalorder %s8108_s30, %s8108_s30 }
  0x1c   :  { %p8115_p0 = por %p8114_p13, %p8113_p12 }
  0x1e   :  { %p8116_p1 = pnand %p8115_p0, %p8109_p11 }
  0x20   :  { %8119 = shalt.err (!%p8116_p1)
}
  0x21   :  { %36 = dma.hbm_to_vmem [thread:$0]  %s8776_s1, 896, %s34_s12, [#allocation14]  }
  0x22   :  { %8142 = dma.done.wait [#allocation11], 832  }
  0x23   :  { %8143 = vsyncadd [#allocation11], 4294966464 }
  0x24   :  { %8144 = dma.done.wait [#allocation14], 896  }
  0x25   :  { %8145 = vsyncadd [#allocation14], 4294966400 }
  0x26   :  { %s52_s11 = sld [smem:[#allocation0]]   ;;  %s8164_s13 = smov [#allocation2]  }
  0x27   :  { %s60_s14 = sshll.u32 %s8164_s13, 4  ;;  %s8165_s15 = smov 512   ;;  %s61_s14 = int_to_ptr.vmem [resolvable:$true] %s60_s14 }
  0x28   :  { %64 = sst [smem:[#allocation17]] %s8165_s15  ;;  %s8166_s16 = smov 4  }
  0x29   :  { %66 = sst [smem:[#allocation17 + $0x1]] %s8165_s15  ;;  %s8167_s17 = smov 64  }
  0x2a   :  { %68 = sst [smem:[#allocation17 + $0x2]] %s8166_s16  ;;  %s8168_s12 = smov 128  }
  0x2b   :  { %70 = sst [smem:[#allocation17 + $0x3]] %s8167_s17  ;;  %s8169_s19 = smov 2  }
  0x2c   :  { %s7687_s1 = sshll.u32 %s52_s11, 26  ;;  %72 = sst [smem:[#allocation17 + $0x4]] %s8168_s12 }
  0x2d   :  { %s8276_s18 = sadd.s32 134217728, %s7687_s1  ;;  %74 = sst [smem:[#allocation17 + $0x5]] %s8169_s19 }
  0x2e   :  { %s8170_s20 = smov 256   ;;  %78 = sst [smem:[#allocation17 + $0x7]] %s8167_s17 }
  0x2f   :  { %76 = sst [smem:[#allocation17 + $0x6]] %s8170_s20  ;;  %s8171_s21 = smov [#allocation9]  }
  0x30   :  { %80 = sst [smem:[#allocation17 + $0x8]] %s8166_s16  ;;  %s8172_s22 = smov [#allocation16]  }
  0x31   :  { %82 = dma.general %s8777_s2, 53248, %s61_s14, %s8171_s21, %s8172_s22, [#allocation17], %s8276_s18, 0  }
  0x32   :  { %s8173_s25 = smov 1024   ;;  %s8174_s26 = smov 8  }
  0x33   :  { %99 = sst [smem:[#allocation19]] %s8173_s25  ;;  %s8175_s27 = smov [#allocation3]  }
  0x34   :  { %101 = sst [smem:[#allocation19 + $0x1]] %s8173_s25  ;;  %s95_s28 = sshll.u32 %s8175_s27, 4  ;;  %s96_s28 = int_to_ptr.vmem [resolvable:$true] %s95_s28 }
  0x35   :  { %103 = sst [smem:[#allocation19 + $0x2]] %s8174_s26  ;;  %s8176_s2 = smov [#allocation9 + $0x1]  }
  0x36   :  { %105 = sst [smem:[#allocation19 + $0x3]] %s8167_s17  ;;  %s8177_s29 = smov [#allocation18]  }
  0x37   :  { %107 = sst [smem:[#allocation19 + $0x4]] %s8168_s12  ;;  %s8178_s10 = smov [#allocation4]  }
  0x38   :  { %109 = sst [smem:[#allocation19 + $0x5]] %s8169_s19  ;;  %s130_s11 = sshll.u32 %s8178_s10, 4  ;;  %s131_s11 = int_to_ptr.vmem [resolvable:$true] %s130_s11 }
  0x39   :  { %111 = sst [smem:[#allocation19 + $0x6]] %s8165_s15  ;;  %s8180_s13 = smov [#allocation20]  }
  0x3a   :  { %113 = sst [smem:[#allocation19 + $0x7]] %s8167_s17  ;;  %s8181_s21 = smov [#allocation5]  }
  0x3b   :  { %115 = sst [smem:[#allocation19 + $0x8]] %s8166_s16  ;;  %s165_s22 = sshll.u32 %s8181_s21, 4  ;;  %s166_s22 = int_to_ptr.vmem [resolvable:$true] %s165_s22 }
  0x3c   :  { %117 = dma.general %s8778_s3, 32768, %s96_s28, %s8176_s2, %s8177_s29, [#allocation19], %s8276_s18, 0  }
  0x3d   :  { %134 = sst [smem:[#allocation21]] %s8173_s25  ;;  %s8179_s3 = smov [#allocation9 + $0x2]  }
  0x3e   :  { %136 = sst [smem:[#allocation21 + $0x1]] %s8173_s25  ;;  %s8183_s23 = smov [#allocation22]  }
  0x3f   :  { %138 = sst [smem:[#allocation21 + $0x2]] %s8174_s26  ;;  %s8184_s28 = smov [#allocation6]  }
  0x40   :  { %140 = sst [smem:[#allocation21 + $0x3]] %s8167_s17  ;;  %s200_s2 = sshll.u32 %s8184_s28, 4  ;;  %s201_s2 = int_to_ptr.vmem [resolvable:$true] %s200_s2 }
  0x41   :  { %142 = sst [smem:[#allocation21 + $0x4]] %s8168_s12  ;;  %s8186_s29 = smov [#allocation24]  }
  0x42   :  { %144 = sst [smem:[#allocation21 + $0x5]] %s8169_s19  ;;  %s8191_s14 = smov [#allocation8]  }
  0x43   :  { %146 = sst [smem:[#allocation21 + $0x6]] %s8165_s15  ;;  %s270_s1 = sshll.u32 %s8191_s14, 4  ;;  %s271_s1 = int_to_ptr.vmem [resolvable:$true] %s270_s1 }
  0x44   :  { %148 = sst [smem:[#allocation21 + $0x7]] %s8167_s17  ;;  %s8192_s21 = smov 16  }
  0x45   :  { %150 = sst [smem:[#allocation21 + $0x8]] %s8166_s16 }
  0x46   :  { %152 = dma.general %s8779_s4, 65536, %s131_s11, %s8179_s3, %s8180_s13, [#allocation21], %s8276_s18, 0  }
  0x47   :  { %169 = sst [smem:[#allocation23]] %s8173_s25  ;;  %s8182_s4 = smov [#allocation9 + $0x3]  }
  0x48   :  { %171 = sst [smem:[#allocation23 + $0x1]] %s8173_s25  ;;  %s8189_s11 = smov [#allocation26]  }
  0x49   :  { %173 = sst [smem:[#allocation23 + $0x2]] %s8174_s26 }
  0x4a   :  { %175 = sst [smem:[#allocation23 + $0x3]] %s8167_s17 }
  0x4b   :  { %177 = sst [smem:[#allocation23 + $0x4]] %s8168_s12 }
  0x4c   :  { %179 = sst [smem:[#allocation23 + $0x5]] %s8169_s19 }
  0x4d   :  { %181 = sst [smem:[#allocation23 + $0x6]] %s8165_s15 }
  0x4e   :  { %183 = sst [smem:[#allocation23 + $0x7]] %s8167_s17 }
  0x4f   :  { %185 = sst [smem:[#allocation23 + $0x8]] %s8166_s16 }
  0x50   :  { %187 = dma.general %s8780_s5, 65536, %s166_s22, %s8182_s4, %s8183_s23, [#allocation23], %s8276_s18, 0  }
  0x51   :  { %204 = sst [smem:[#allocation25]] %s8173_s25  ;;  %s8185_s5 = smov [#allocation9 + $0x4]  }
  0x52   :  { %206 = sst [smem:[#allocation25 + $0x1]] %s8173_s25 }
  0x53   :  { %208 = sst [smem:[#allocation25 + $0x2]] %s8174_s26  ;;  %s8187_s26 = smov [#allocation7]  }
  0x54   :  { %210 = sst [smem:[#allocation25 + $0x3]] %s8167_s17  ;;  %s235_s10 = sshll.u32 %s8187_s26, 4  ;;  %s236_s10 = int_to_ptr.vmem [resolvable:$true] %s235_s10 }
  0x55   :  { %212 = sst [smem:[#allocation25 + $0x4]] %s8168_s12 }
  0x56   :  { %214 = sst [smem:[#allocation25 + $0x5]] %s8169_s19 }
  0x57   :  { %216 = sst [smem:[#allocation25 + $0x6]] %s8165_s15 }
  0x58   :  { %218 = sst [smem:[#allocation25 + $0x7]] %s8167_s17 }
  0x59   :  { %220 = sst [smem:[#allocation25 + $0x8]] %s8166_s16 }
  0x5a   :  { %222 = dma.general %s8781_s6, 65536, %s201_s2, %s8185_s5, %s8186_s29, [#allocation25], %s8276_s18, 0  }
  0x5b   :  { %239 = sst [smem:[#allocation27]] %s8165_s15  ;;  %s8188_s6 = smov [#allocation9 + $0x5]  }
  0x5c   :  { %241 = sst [smem:[#allocation27 + $0x1]] %s8165_s15  ;;  %s8190_s15 = smov 2048  }
  0x5d   :  { %243 = sst [smem:[#allocation27 + $0x2]] %s8166_s16 }
  0x5e   :  { %245 = sst [smem:[#allocation27 + $0x3]] %s8167_s17 }
  0x5f   :  { %247 = sst [smem:[#allocation27 + $0x4]] %s8168_s12 }
  0x60   :  { %249 = sst [smem:[#allocation27 + $0x5]] %s8169_s19 }
  0x61   :  { %251 = sst [smem:[#allocation27 + $0x6]] %s8170_s20  ;;  %s8194_s20 = smov [#allocation28]  }
  0x62   :  { %253 = sst [smem:[#allocation27 + $0x7]] %s8167_s17 }
  0x63   :  { %255 = sst [smem:[#allocation27 + $0x8]] %s8166_s16 }
  0x64   :  { %257 = dma.general %s8782_s7, 32768, %s236_s10, %s8188_s6, %s8189_s11, [#allocation27], %s8276_s18, 0  }
  0x65   :  { %274 = sst [smem:[#allocation29]] %s8190_s15  ;;  %s8193_s7 = smov [#allocation9 + $0x6]  }
  0x66   :  { %276 = sst [smem:[#allocation29 + $0x1]] %s8190_s15 }
  0x67   :  { %278 = sst [smem:[#allocation29 + $0x2]] %s8192_s21 }
  0x68   :  { %280 = sst [smem:[#allocation29 + $0x3]] %s8167_s17 }
  0x69   :  { %282 = sst [smem:[#allocation29 + $0x4]] %s8168_s12 }
  0x6a   :  { %284 = sst [smem:[#allocation29 + $0x5]] %s8169_s19 }
  0x6b   :  { %286 = sst [smem:[#allocation29 + $0x6]] %s8173_s25 }
  0x6c   :  { %288 = sst [smem:[#allocation29 + $0x7]] %s8167_s17 }
  0x6d   :  { %290 = sst [smem:[#allocation29 + $0x8]] %s8166_s16 }
  0x6e   :  { %292 = dma.general %s8783_s8, 65536, %s271_s1, %s8193_s7, %s8194_s20, [#allocation29], %s8276_s18, 0  }
  0x6f   :  { %v8361_v0 = vld [vmem:[#allocation10] sm:$0xff]  ;;  %v8363_v1 = vld [vmem:[#allocation10 + $0x8] sm:$0xff]  ;;  %v8365_v2 = vld [vmem:[#allocation10 + $0x10] sm:$0xff] }
  0x70   :  { %v8367_v3 = vld [vmem:[#allocation10 + $0x18] sm:$0xff]  ;;  %v8369_v4 = vld [vmem:[#allocation10 + $0x20] sm:$0xff]  ;;  %v8371_v5 = vld [vmem:[#allocation10 + $0x28] sm:$0xff] }
  0x71   :  { %v8373_v6 = vld [vmem:[#allocation10 + $0x30] sm:$0xf] }
  0x72   :  { %8146 = dma.done.wait [#allocation9], 53248 }
  0x73   :  { %8147 = vsyncadd [#allocation9], 4294914048  ;;  %v7702_v7 = vcombine.high %v8361_v0, %v8361_v0  ;;  %v309_v8 = vld [vmem:[#allocation2 + $0x8] sm:$0xff]  ;;  %v311_v9 = vld [vmem:[#allocation2 + $0x18] sm:$0xff] }
  0x74   :  { %v308_v10 = vld [vmem:[#allocation2] sm:$0xff]  ;;  %791 = vmatprep.subr.bf16.mxu0 %v309_v8  ;;  %1078 = vmatprep.subr.bf16.mxu1 %v311_v9  ;;  %v310_v11 = vld [vmem:[#allocation2 + $0x10] sm:$0xff]  ;;  %v313_v12 = vld [vmem:[#allocation2 + $0x28] sm:$0xff] }
  0x75   :  { %823 = vmatprep.mubr.bf16.mxu0 %v7702_v7  ;;  %1110 = vmatprep.mubr.bf16.mxu1 %v7702_v7  ;;  %v315_v13 = vld [vmem:[#allocation2 + $0x38] sm:$0xff]  ;;  %v312_v14 = vld [vmem:[#allocation2 + $0x20] sm:$0xff]  ;;  %v314_v15 = vld [vmem:[#allocation2 + $0x30] sm:$0xff] }
  0x76   :  { %792 = vmatpush1.bf16.msra.mxu0 %v308_v10  ;;  %1079 = vmatpush1.bf16.msra.mxu1 %v310_v11  ;;  %v317_v16 = vld [vmem:[#allocation2 + $0x48] sm:$0xff]  ;;  %v319_v17 = vld [vmem:[#allocation2 + $0x58] sm:$0xff]  ;;  %v316_v18 = vld [vmem:[#allocation2 + $0x40] sm:$0xff] }
  0x77   :  { %793 = vmatprep.subr.bf16.mxu0 %v313_v12  ;;  %1080 = vmatprep.subr.bf16.mxu1 %v315_v13  ;;  %v318_v19 = vld [vmem:[#allocation2 + $0x50] sm:$0xff]  ;;  %v321_v20 = vld [vmem:[#allocation2 + $0x68] sm:$0xff]  ;;  %v323_v21 = vld [vmem:[#allocation2 + $0x78] sm:$0xff] }
  0x78   :  { %v320_v22 = vld [vmem:[#allocation2 + $0x60] sm:$0xff]  ;;  %v322_v23 = vld [vmem:[#allocation2 + $0x70] sm:$0xff]  ;;  %v325_v24 = vld [vmem:[#allocation2 + $0x88] sm:$0xff] }
  0x79   :  { %v327_v25 = vld [vmem:[#allocation2 + $0x98] sm:$0xff]  ;;  %v324_v26 = vld [vmem:[#allocation2 + $0x80] sm:$0xff]  ;;  %v326_v27 = vld [vmem:[#allocation2 + $0x90] sm:$0xff] }
  0x7a   :  { %794 = vmatpush1.bf16.msra.mxu0 %v312_v14  ;;  %1081 = vmatpush1.bf16.msra.mxu1 %v314_v15  ;;  %v329_v28 = vld [vmem:[#allocation2 + $0xa8] sm:$0xff]  ;;  %v331_v29 = vld [vmem:[#allocation2 + $0xb8] sm:$0xff]  ;;  %v328_v30 = vld [vmem:[#allocation2 + $0xa0] sm:$0xff] }
  0x7b   :  { %795 = vmatprep.subr.bf16.mxu0 %v317_v16  ;;  %1082 = vmatprep.subr.bf16.mxu1 %v319_v17  ;;  %v330_v31 = vld [vmem:[#allocation2 + $0xb0] sm:$0xff]  ;;  %v333_v32 = vld [vmem:[#allocation2 + $0xc8] sm:$0xff]  ;;  %v335_v33 = vld [vmem:[#allocation2 + $0xd8] sm:$0xff]  ;;  %v7701_v17 = vcombine.low %v8361_v0, %v8361_v0 }
  0x7c   :  { %v332_v34 = vld [vmem:[#allocation2 + $0xc0] sm:$0xff]  ;;  %v334_v35 = vld [vmem:[#allocation2 + $0xd0] sm:$0xff]  ;;  %v337_v36 = vld [vmem:[#allocation2 + $0xe8] sm:$0xff] }
  0x7d   :  { %v339_v37 = vld [vmem:[#allocation2 + $0xf8] sm:$0xff]  ;;  %v336_v38 = vld [vmem:[#allocation2 + $0xe0] sm:$0xff]  ;;  %v338_v39 = vld [vmem:[#allocation2 + $0xf0] sm:$0xff] }
  0x7e   :  { %796 = vmatpush1.bf16.msra.mxu0 %v316_v18  ;;  %1083 = vmatpush1.bf16.msra.mxu1 %v318_v19  ;;  %v341_v40 = vld [vmem:[#allocation2 + $0x108] sm:$0xff]  ;;  %v343_v41 = vld [vmem:[#allocation2 + $0x118] sm:$0xff]  ;;  %v340_v42 = vld [vmem:[#allocation2 + $0x100] sm:$0xff] }
  0x7f   :  { %797 = vmatprep.subr.bf16.mxu0 %v321_v20  ;;  %1084 = vmatprep.subr.bf16.mxu1 %v323_v21  ;;  %v342_v43 = vld [vmem:[#allocation2 + $0x110] sm:$0xff]  ;;  %v345_v44 = vld [vmem:[#allocation2 + $0x128] sm:$0xff]  ;;  %v347_v45 = vld [vmem:[#allocation2 + $0x138] sm:$0xff] }
  0x80   :  { %v344_v46 = vld [vmem:[#allocation2 + $0x120] sm:$0xff]  ;;  %v346_v47 = vld [vmem:[#allocation2 + $0x130] sm:$0xff]  ;;  %v349_v48 = vld [vmem:[#allocation2 + $0x148] sm:$0xff] }
  0x81   :  { %v351_v49 = vld [vmem:[#allocation2 + $0x158] sm:$0xff]  ;;  %v348_v50 = vld [vmem:[#allocation2 + $0x140] sm:$0xff]  ;;  %v350_v51 = vld [vmem:[#allocation2 + $0x150] sm:$0xff] }
  0x82   :  { %798 = vmatpush1.bf16.msra.mxu0 %v320_v22  ;;  %1085 = vmatpush1.bf16.msra.mxu1 %v322_v23  ;;  %v353_v52 = vld [vmem:[#allocation2 + $0x168] sm:$0xff]  ;;  %v355_v53 = vld [vmem:[#allocation2 + $0x178] sm:$0xff]  ;;  %v352_v54 = vld [vmem:[#allocation2 + $0x160] sm:$0xff]  ;;  %v7704_v22 = vcombine.high %v8363_v1, %v8363_v1 }
  0x83   :  { %799 = vmatprep.subr.bf16.mxu0 %v325_v24  ;;  %1086 = vmatprep.subr.bf16.mxu1 %v327_v25  ;;  %v354_v55 = vld [vmem:[#allocation2 + $0x170] sm:$0xff]  ;;  %v357_v56 = vld [vmem:[#allocation2 + $0x188] sm:$0xff]  ;;  %v359_v57 = vld [vmem:[#allocation2 + $0x198] sm:$0xff] }
  0x84   :  { %v356_v58 = vld [vmem:[#allocation2 + $0x180] sm:$0xff]  ;;  %v358_v59 = vld [vmem:[#allocation2 + $0x190] sm:$0xff]  ;;  %v361_v60 = vld [vmem:[#allocation2 + $0x1a8] sm:$0xff] }
  0x85   :  { %v363_v61 = vld [vmem:[#allocation2 + $0x1b8] sm:$0xff]  ;;  %v360_v62 = vld [vmem:[#allocation2 + $0x1a0] sm:$0xff]  ;;  %v362_v63 = vld [vmem:[#allocation2 + $0x1b0] sm:$0xff] }
  0x86   :  { %800 = vmatpush1.bf16.msra.mxu0 %v324_v26  ;;  %1087 = vmatpush1.bf16.msra.mxu1 %v326_v27  ;;  %v365_v7 = vld [vmem:[#allocation2 + $0x1c8] sm:$0xff]  ;;  %v367_v8 = vld [vmem:[#allocation2 + $0x1d8] sm:$0xff]  ;;  %v364_v9 = vld [vmem:[#allocation2 + $0x1c0] sm:$0xff] }
  0x87   :  { %801 = vmatprep.subr.bf16.mxu0 %v329_v28  ;;  %1088 = vmatprep.subr.bf16.mxu1 %v331_v29  ;;  %v366_v10 = vld [vmem:[#allocation2 + $0x1d0] sm:$0xff]  ;;  %v369_v11 = vld [vmem:[#allocation2 + $0x1e8] sm:$0xff]  ;;  %v371_v12 = vld [vmem:[#allocation2 + $0x1f8] sm:$0xff] }
  0x88   :  { %v368_v13 = vld [vmem:[#allocation2 + $0x1e0] sm:$0xff]  ;;  %v370_v14 = vld [vmem:[#allocation2 + $0x1f0] sm:$0xff]  ;;  %v373_v15 = vld [vmem:[#allocation2 + $0x208] sm:$0xff] }
  0x89   :  { %v375_v16 = vld [vmem:[#allocation2 + $0x218] sm:$0xff]  ;;  %v372_v18 = vld [vmem:[#allocation2 + $0x200] sm:$0xff]  ;;  %v374_v19 = vld [vmem:[#allocation2 + $0x210] sm:$0xff] }
  0x8a   :  { %802 = vmatpush1.bf16.msra.mxu0 %v328_v30  ;;  %1089 = vmatpush1.bf16.msra.mxu1 %v330_v31  ;;  %v377_v20 = vld [vmem:[#allocation2 + $0x228] sm:$0xff]  ;;  %v379_v21 = vld [vmem:[#allocation2 + $0x238] sm:$0xff]  ;;  %v376_v23 = vld [vmem:[#allocation2 + $0x220] sm:$0xff] }
  0x8b   :  { %803 = vmatprep.subr.bf16.mxu0 %v333_v32  ;;  %1090 = vmatprep.subr.bf16.mxu1 %v335_v33  ;;  %v378_v24 = vld [vmem:[#allocation2 + $0x230] sm:$0xff]  ;;  %v381_v0 = vld [vmem:[#allocation2 + $0x248] sm:$0xff]  ;;  %v383_v25 = vld [vmem:[#allocation2 + $0x258] sm:$0xff] }
  0x8c   :  { %v380_v26 = vld [vmem:[#allocation2 + $0x240] sm:$0xff]  ;;  %v382_v27 = vld [vmem:[#allocation2 + $0x250] sm:$0xff]  ;;  %v385_v28 = vld [vmem:[#allocation2 + $0x268] sm:$0xff] }
  0x8d   :  { %v387_v29 = vld [vmem:[#allocation2 + $0x278] sm:$0xff]  ;;  %v384_v30 = vld [vmem:[#allocation2 + $0x260] sm:$0xff]  ;;  %v386_v31 = vld [vmem:[#allocation2 + $0x270] sm:$0xff] }
  0x8e   :  { %804 = vmatpush1.bf16.msra.mxu0 %v332_v34  ;;  %1091 = vmatpush1.bf16.msra.mxu1 %v334_v35  ;;  %v389_v32 = vld [vmem:[#allocation2 + $0x288] sm:$0xff]  ;;  %v391_v33 = vld [vmem:[#allocation2 + $0x298] sm:$0xff]  ;;  %v388_v34 = vld [vmem:[#allocation2 + $0x280] sm:$0xff] }
  0x8f   :  { %805 = vmatprep.subr.bf16.mxu0 %v337_v36  ;;  %1092 = vmatprep.subr.bf16.mxu1 %v339_v37  ;;  %v390_v35 = vld [vmem:[#allocation2 + $0x290] sm:$0xff]  ;;  %v393_v36 = vld [vmem:[#allocation2 + $0x2a8] sm:$0xff]  ;;  %v395_v37 = vld [vmem:[#allocation2 + $0x2b8] sm:$0xff] }
  0x92   :  { %806 = vmatpush1.bf16.msra.mxu0 %v336_v38  ;;  %1093 = vmatpush1.bf16.msra.mxu1 %v338_v39  ;;  %v392_v38 = vld [vmem:[#allocation2 + $0x2a0] sm:$0xff]  ;;  %v394_v39 = vld [vmem:[#allocation2 + $0x2b0] sm:$0xff] }
  0x93   :  { %807 = vmatprep.subr.bf16.mxu0 %v341_v40  ;;  %1094 = vmatprep.subr.bf16.mxu1 %v343_v41  ;;  %v397_v40 = vld [vmem:[#allocation2 + $0x2c8] sm:$0xff]  ;;  %v399_v41 = vld [vmem:[#allocation2 + $0x2d8] sm:$0xff] }
  0x96   :  { %808 = vmatpush1.bf16.msra.mxu0 %v340_v42  ;;  %1095 = vmatpush1.bf16.msra.mxu1 %v342_v43  ;;  %v396_v42 = vld [vmem:[#allocation2 + $0x2c0] sm:$0xff]  ;;  %v398_v43 = vld [vmem:[#allocation2 + $0x2d0] sm:$0xff] }
  0x97   :  { %809 = vmatprep.subr.bf16.mxu0 %v345_v44  ;;  %1096 = vmatprep.subr.bf16.mxu1 %v347_v45  ;;  %v401_v44 = vld [vmem:[#allocation2 + $0x2e8] sm:$0xff]  ;;  %v403_v45 = vld [vmem:[#allocation2 + $0x2f8] sm:$0xff] }
  0x9a   :  { %810 = vmatpush1.bf16.msra.mxu0 %v344_v46  ;;  %1097 = vmatpush1.bf16.msra.mxu1 %v346_v47  ;;  %v400_v46 = vld [vmem:[#allocation2 + $0x2e0] sm:$0xff]  ;;  %v402_v47 = vld [vmem:[#allocation2 + $0x2f0] sm:$0xff] }
  0x9b   :  { %811 = vmatprep.subr.bf16.mxu0 %v349_v48  ;;  %1098 = vmatprep.subr.bf16.mxu1 %v351_v49  ;;  %v405_v48 = vld [vmem:[#allocation2 + $0x308] sm:$0xff]  ;;  %v407_v49 = vld [vmem:[#allocation2 + $0x318] sm:$0xff] }
  0x9e   :  { %812 = vmatpush1.bf16.msra.mxu0 %v348_v50  ;;  %1099 = vmatpush1.bf16.msra.mxu1 %v350_v51  ;;  %v404_v50 = vld [vmem:[#allocation2 + $0x300] sm:$0xff]  ;;  %v406_v51 = vld [vmem:[#allocation2 + $0x310] sm:$0xff] }
  0x9f   :  { %813 = vmatprep.subr.bf16.mxu0 %v353_v52  ;;  %1100 = vmatprep.subr.bf16.mxu1 %v355_v53  ;;  %v409_v52 = vld [vmem:[#allocation2 + $0x328] sm:$0xff]  ;;  %v411_v53 = vld [vmem:[#allocation2 + $0x338] sm:$0xff] }
  0xa2   :  { %814 = vmatpush1.bf16.msra.mxu0 %v352_v54  ;;  %1101 = vmatpush1.bf16.msra.mxu1 %v354_v55  ;;  %v408_v54 = vld [vmem:[#allocation2 + $0x320] sm:$0xff]  ;;  %v410_v55 = vld [vmem:[#allocation2 + $0x330] sm:$0xff] }
  0xa3   :  { %815 = vmatprep.subr.bf16.mxu0 %v357_v56  ;;  %1102 = vmatprep.subr.bf16.mxu1 %v359_v57  ;;  %v413_v56 = vld [vmem:[#allocation2 + $0x348] sm:$0xff]  ;;  %v415_v57 = vld [vmem:[#allocation2 + $0x358] sm:$0xff] }
  0xa6   :  { %816 = vmatpush1.bf16.msra.mxu0 %v356_v58  ;;  %1103 = vmatpush1.bf16.msra.mxu1 %v358_v59  ;;  %v412_v58 = vld [vmem:[#allocation2 + $0x340] sm:$0xff]  ;;  %v414_v59 = vld [vmem:[#allocation2 + $0x350] sm:$0xff] }
  0xa7   :  { %817 = vmatprep.subr.bf16.mxu0 %v361_v60  ;;  %1104 = vmatprep.subr.bf16.mxu1 %v363_v61  ;;  %v417_v60 = vld [vmem:[#allocation2 + $0x368] sm:$0xff]  ;;  %v419_v61 = vld [vmem:[#allocation2 + $0x378] sm:$0xff] }
  0xaa   :  { %818 = vmatpush1.bf16.msra.mxu0 %v360_v62  ;;  %1105 = vmatpush1.bf16.msra.mxu1 %v362_v63  ;;  %v416_v62 = vld [vmem:[#allocation2 + $0x360] sm:$0xff]  ;;  %v418_v63 = vld [vmem:[#allocation2 + $0x370] sm:$0xff] }
  0xab   :  { %819 = vmatprep.subr.bf16.mxu0 %v365_v7  ;;  %1106 = vmatprep.subr.bf16.mxu1 %v367_v8  ;;  %v421_v7 = vld [vmem:[#allocation2 + $0x388] sm:$0xff]  ;;  %v423_v8 = vld [vmem:[#allocation2 + $0x398] sm:$0xff] }
  0xae   :  { %820 = vmatpush1.bf16.msra.mxu0 %v364_v9  ;;  %1107 = vmatpush1.bf16.msra.mxu1 %v366_v10  ;;  %v420_v9 = vld [vmem:[#allocation2 + $0x380] sm:$0xff]  ;;  %v422_v10 = vld [vmem:[#allocation2 + $0x390] sm:$0xff] }
  0xaf   :  { %821 = vmatprep.subr.bf16.mxu0 %v369_v11  ;;  %1108 = vmatprep.subr.bf16.mxu1 %v371_v12  ;;  %v425_v11 = vld [vmem:[#allocation2 + $0x3a8] sm:$0xff]  ;;  %v427_v12 = vld [vmem:[#allocation2 + $0x3b8] sm:$0xff] }
  0xb2   :  { %822 = vmatpush1.bf16.msra.mxu0 %v368_v13  ;;  %1109 = vmatpush1.bf16.msra.mxu1 %v370_v14  ;;  %v424_v13 = vld [vmem:[#allocation2 + $0x3a0] sm:$0xff]  ;;  %v426_v14 = vld [vmem:[#allocation2 + $0x3b0] sm:$0xff] }
  0xb3   :  { %832 = vmatprep.subr.bf16.mxu0 %v373_v15  ;;  %1119 = vmatprep.subr.bf16.mxu1 %v375_v16  ;;  %v429_v15 = vld [vmem:[#allocation2 + $0x3c8] sm:$0xff]  ;;  %v431_v16 = vld [vmem:[#allocation2 + $0x3d8] sm:$0xff] }
  0xb5   :  { %824 = vmatmul.mubr.bf16.vlgmr.msra.gmra.mrb[0].mxu0 %v7701_v17  ;;  %1111 = vmatmul.mubr.bf16.vlgmr.msra.gmra.mrb[0].mxu1 %v7701_v17  ;;  %v428_v17 = vld [vmem:[#allocation2 + $0x3c0] sm:$0xff] }
  0xb6   :  { %833 = vmatpush1.bf16.msra.mxu0 %v372_v18  ;;  %1120 = vmatpush1.bf16.msra.mxu1 %v374_v19  ;;  %v430_v18 = vld [vmem:[#allocation2 + $0x3d0] sm:$0xff]  ;;  %v433_v19 = vld [vmem:[#allocation2 + $0x3e8] sm:$0xff] }
  0xb7   :  { %834 = vmatprep.subr.bf16.mxu0 %v377_v20  ;;  %1121 = vmatprep.subr.bf16.mxu1 %v379_v21  ;;  %v435_v20 = vld [vmem:[#allocation2 + $0x3f8] sm:$0xff]  ;;  %v432_v21 = vld [vmem:[#allocation2 + $0x3e0] sm:$0xff] }
  0xb8   :  { %864 = vmatprep.mubr.bf16.mxu0 %v7704_v22  ;;  %1151 = vmatprep.mubr.bf16.mxu1 %v7704_v22  ;;  %v434_v22 = vld [vmem:[#allocation2 + $0x3f0] sm:$0xff] }
  0xba   :  { %835 = vmatpush1.bf16.msra.mxu0 %v376_v23  ;;  %1122 = vmatpush1.bf16.msra.mxu1 %v378_v24  ;;  %v437_v23 = vld [vmem:[#allocation2 + $0x408] sm:$0xff]  ;;  %v439_v24 = vld [vmem:[#allocation2 + $0x418] sm:$0xff] }
  0xbb   :  { %836 = vmatprep.subr.bf16.mxu0 %v381_v0  ;;  %1123 = vmatprep.subr.bf16.mxu1 %v383_v25  ;;  %v7703_v0 = vcombine.low %v8363_v1, %v8363_v1  ;;  %v436_v25 = vld [vmem:[#allocation2 + $0x400] sm:$0xff]  ;;  %v445_v1 = vld [vmem:[#allocation2 + $0x448] sm:$0xff] }
  0xbe   :  { %837 = vmatpush1.bf16.msra.mxu0 %v380_v26  ;;  %1124 = vmatpush1.bf16.msra.mxu1 %v382_v27  ;;  %v438_v26 = vld [vmem:[#allocation2 + $0x410] sm:$0xff]  ;;  %v441_v27 = vld [vmem:[#allocation2 + $0x428] sm:$0xff] }
  0xbf   :  { %838 = vmatprep.subr.bf16.mxu0 %v385_v28  ;;  %1125 = vmatprep.subr.bf16.mxu1 %v387_v29  ;;  %v443_v28 = vld [vmem:[#allocation2 + $0x438] sm:$0xff]  ;;  %v7706_v29 = vcombine.high %v8365_v2, %v8365_v2 }
  0xc2   :  { %839 = vmatpush1.bf16.msra.mxu0 %v384_v30  ;;  %1126 = vmatpush1.bf16.msra.mxu1 %v386_v31  ;;  %v440_v30 = vld [vmem:[#allocation2 + $0x420] sm:$0xff]  ;;  %v442_v31 = vld [vmem:[#allocation2 + $0x430] sm:$0xff] }
  0xc3   :  { %840 = vmatprep.subr.bf16.mxu0 %v389_v32  ;;  %1127 = vmatprep.subr.bf16.mxu1 %v391_v33  ;;  %v447_v32 = vld [vmem:[#allocation2 + $0x458] sm:$0xff]  ;;  %v444_v33 = vld [vmem:[#allocation2 + $0x440] sm:$0xff] }
  0xc6   :  { %841 = vmatpush1.bf16.msra.mxu0 %v388_v34  ;;  %1128 = vmatpush1.bf16.msra.mxu1 %v390_v35  ;;  %v446_v34 = vld [vmem:[#allocation2 + $0x450] sm:$0xff]  ;;  %v449_v35 = vld [vmem:[#allocation2 + $0x468] sm:$0xff] }
  0xc7   :  { %842 = vmatprep.subr.bf16.mxu0 %v393_v36  ;;  %1129 = vmatprep.subr.bf16.mxu1 %v395_v37  ;;  %v451_v36 = vld [vmem:[#allocation2 + $0x478] sm:$0xff]  ;;  %v448_v37 = vld [vmem:[#allocation2 + $0x460] sm:$0xff] }
  0xca   :  { %843 = vmatpush1.bf16.msra.mxu0 %v392_v38  ;;  %1130 = vmatpush1.bf16.msra.mxu1 %v394_v39  ;;  %v450_v38 = vld [vmem:[#allocation2 + $0x470] sm:$0xff]  ;;  %v453_v39 = vld [vmem:[#allocation2 + $0x488] sm:$0xff] }
  0xcb   :  { %844 = vmatprep.subr.bf16.mxu0 %v397_v40  ;;  %1131 = vmatprep.subr.bf16.mxu1 %v399_v41  ;;  %v455_v40 = vld [vmem:[#allocation2 + $0x498] sm:$0xff]  ;;  %v452_v41 = vld [vmem:[#allocation2 + $0x480] sm:$0xff] }
  0xce   :  { %845 = vmatpush1.bf16.msra.mxu0 %v396_v42  ;;  %1132 = vmatpush1.bf16.msra.mxu1 %v398_v43  ;;  %v454_v42 = vld [vmem:[#allocation2 + $0x490] sm:$0xff]  ;;  %v457_v43 = vld [vmem:[#allocation2 + $0x4a8] sm:$0xff] }
  0xcf   :  { %846 = vmatprep.subr.bf16.mxu0 %v401_v44  ;;  %1133 = vmatprep.subr.bf16.mxu1 %v403_v45  ;;  %v459_v44 = vld [vmem:[#allocation2 + $0x4b8] sm:$0xff]  ;;  %v456_v45 = vld [vmem:[#allocation2 + $0x4a0] sm:$0xff] }
  0xd2   :  { %847 = vmatpush1.bf16.msra.mxu0 %v400_v46  ;;  %1134 = vmatpush1.bf16.msra.mxu1 %v402_v47  ;;  %v458_v46 = vld [vmem:[#allocation2 + $0x4b0] sm:$0xff]  ;;  %v461_v47 = vld [vmem:[#allocation2 + $0x4c8] sm:$0xff] }
  0xd3   :  { %848 = vmatprep.subr.bf16.mxu0 %v405_v48  ;;  %1135 = vmatprep.subr.bf16.mxu1 %v407_v49  ;;  %v463_v48 = vld [vmem:[#allocation2 + $0x4d8] sm:$0xff]  ;;  %v460_v49 = vld [vmem:[#allocation2 + $0x4c0] sm:$0xff] }
  0xd6   :  { %849 = vmatpush1.bf16.msra.mxu0 %v404_v50  ;;  %1136 = vmatpush1.bf16.msra.mxu1 %v406_v51  ;;  %v462_v50 = vld [vmem:[#allocation2 + $0x4d0] sm:$0xff]  ;;  %v465_v51 = vld [vmem:[#allocation2 + $0x4e8] sm:$0xff] }
  0xd7   :  { %850 = vmatprep.subr.bf16.mxu0 %v409_v52  ;;  %1137 = vmatprep.subr.bf16.mxu1 %v411_v53  ;;  %v467_v52 = vld [vmem:[#allocation2 + $0x4f8] sm:$0xff]  ;;  %v464_v53 = vld [vmem:[#allocation2 + $0x4e0] sm:$0xff] }
  0xda   :  { %851 = vmatpush1.bf16.msra.mxu0 %v408_v54  ;;  %1138 = vmatpush1.bf16.msra.mxu1 %v410_v55  ;;  %v466_v54 = vld [vmem:[#allocation2 + $0x4f0] sm:$0xff]  ;;  %v469_v55 = vld [vmem:[#allocation2 + $0x508] sm:$0xff] }
  0xdb   :  { %852 = vmatprep.subr.bf16.mxu0 %v413_v56  ;;  %1139 = vmatprep.subr.bf16.mxu1 %v415_v57  ;;  %v471_v56 = vld [vmem:[#allocation2 + $0x518] sm:$0xff]  ;;  %v468_v57 = vld [vmem:[#allocation2 + $0x500] sm:$0xff] }
  0xde   :  { %853 = vmatpush1.bf16.msra.mxu0 %v412_v58  ;;  %1140 = vmatpush1.bf16.msra.mxu1 %v414_v59  ;;  %v470_v58 = vld [vmem:[#allocation2 + $0x510] sm:$0xff]  ;;  %v473_v59 = vld [vmem:[#allocation2 + $0x528] sm:$0xff] }
  0xdf   :  { %854 = vmatprep.subr.bf16.mxu0 %v417_v60  ;;  %1141 = vmatprep.subr.bf16.mxu1 %v419_v61  ;;  %v475_v60 = vld [vmem:[#allocation2 + $0x538] sm:$0xff]  ;;  %v472_v61 = vld [vmem:[#allocation2 + $0x520] sm:$0xff] }
  0xe2   :  { %855 = vmatpush1.bf16.msra.mxu0 %v416_v62  ;;  %1142 = vmatpush1.bf16.msra.mxu1 %v418_v63  ;;  %v474_v62 = vld [vmem:[#allocation2 + $0x530] sm:$0xff]  ;;  %v477_v63 = vld [vmem:[#allocation2 + $0x548] sm:$0xff] }
  0xe3   :  { %856 = vmatprep.subr.bf16.mxu0 %v421_v7  ;;  %1143 = vmatprep.subr.bf16.mxu1 %v423_v8  ;;  %v479_v7 = vld [vmem:[#allocation2 + $0x558] sm:$0xff]  ;;  %v476_v8 = vld [vmem:[#allocation2 + $0x540] sm:$0xff] }
  0xe6   :  { %857 = vmatpush1.bf16.msra.mxu0 %v420_v9  ;;  %1144 = vmatpush1.bf16.msra.mxu1 %v422_v10  ;;  %v478_v9 = vld [vmem:[#allocation2 + $0x550] sm:$0xff]  ;;  %v481_v10 = vld [vmem:[#allocation2 + $0x568] sm:$0xff] }
  0xe7   :  { %858 = vmatprep.subr.bf16.mxu0 %v425_v11  ;;  %1145 = vmatprep.subr.bf16.mxu1 %v427_v12  ;;  %v483_v11 = vld [vmem:[#allocation2 + $0x578] sm:$0xff]  ;;  %v480_v12 = vld [vmem:[#allocation2 + $0x560] sm:$0xff] }
  0xea   :  { %859 = vmatpush1.bf16.msra.mxu0 %v424_v13  ;;  %1146 = vmatpush1.bf16.msra.mxu1 %v426_v14  ;;  %v482_v13 = vld [vmem:[#allocation2 + $0x570] sm:$0xff]  ;;  %v485_v14 = vld [vmem:[#allocation2 + $0x588] sm:$0xff] }
  0xeb   :  { %860 = vmatprep.subr.bf16.mxu0 %v429_v15  ;;  %1147 = vmatprep.subr.bf16.mxu1 %v431_v16  ;;  %v487_v15 = vld [vmem:[#allocation2 + $0x598] sm:$0xff]  ;;  %v484_v16 = vld [vmem:[#allocation2 + $0x580] sm:$0xff] }
  0xee   :  { %861 = vmatpush1.bf16.msra.mxu0 %v428_v17  ;;  %1148 = vmatpush1.bf16.msra.mxu1 %v430_v18  ;;  %v486_v17 = vld [vmem:[#allocation2 + $0x590] sm:$0xff]  ;;  %v489_v18 = vld [vmem:[#allocation2 + $0x5a8] sm:$0xff] }
  0xef   :  { %862 = vmatprep.subr.bf16.mxu0 %v433_v19  ;;  %1149 = vmatprep.subr.bf16.mxu1 %v435_v20  ;;  %v491_v19 = vld [vmem:[#allocation2 + $0x5b8] sm:$0xff]  ;;  %v488_v20 = vld [vmem:[#allocation2 + $0x5a0] sm:$0xff] }
  0xf2   :  { %863 = vmatpush1.bf16.msra.mxu0 %v432_v21  ;;  %1150 = vmatpush1.bf16.msra.mxu1 %v434_v22  ;;  %v490_v21 = vld [vmem:[#allocation2 + $0x5b0] sm:$0xff]  ;;  %v493_v22 = vld [vmem:[#allocation2 + $0x5c8] sm:$0xff] }
  0xf3   :  { %873 = vmatprep.subr.bf16.mxu0 %v437_v23  ;;  %1160 = vmatprep.subr.bf16.mxu1 %v439_v24  ;;  %v495_v23 = vld [vmem:[#allocation2 + $0x5d8] sm:$0xff]  ;;  %v492_v24 = vld [vmem:[#allocation2 + $0x5c0] sm:$0xff] }
  0xf5   :  { %865 = vmatmul.mubr.bf16.vlgmr.msra.gmra.mrb[0].mxu0 %v7703_v0  ;;  %1152 = vmatmul.mubr.bf16.vlgmr.msra.gmra.mrb[0].mxu1 %v7703_v0  ;;  %v494_v0 = vld [vmem:[#allocation2 + $0x5d0] sm:$0xff] }
  0xf6   :  { %874 = vmatpush1.bf16.msra.mxu0 %v436_v25  ;;  %1161 = vmatpush1.bf16.msra.mxu1 %v438_v26  ;;  %v497_v25 = vld [vmem:[#allocation2 + $0x5e8] sm:$0xff]  ;;  %v499_v26 = vld [vmem:[#allocation2 + $0x5f8] sm:$0xff] }
  0xf7   :  { %875 = vmatprep.subr.bf16.mxu0 %v441_v27  ;;  %1162 = vmatprep.subr.bf16.mxu1 %v443_v28  ;;  %v496_v27 = vld [vmem:[#allocation2 + $0x5e0] sm:$0xff]  ;;  %v498_v28 = vld [vmem:[#allocation2 + $0x5f0] sm:$0xff] }
  0xf8   :  { %905 = vmatprep.mubr.bf16.mxu0 %v7706_v29  ;;  %1192 = vmatprep.mubr.bf16.mxu1 %v7706_v29  ;;  %v501_v29 = vld [vmem:[#allocation2 + $0x608] sm:$0xff] }
  0xfa   :  { %876 = vmatpush1.bf16.msra.mxu0 %v440_v30  ;;  %1163 = vmatpush1.bf16.msra.mxu1 %v442_v31  ;;  %v503_v30 = vld [vmem:[#allocation2 + $0x618] sm:$0xff]  ;;  %v7705_v31 = vcombine.low %v8365_v2, %v8365_v2  ;;  %v509_v2 = vld [vmem:[#allocation2 + $0x648] sm:$0xff] }
  0xfb   :  { %877 = vmatprep.subr.bf16.mxu0 %v445_v1  ;;  %1164 = vmatprep.subr.bf16.mxu1 %v447_v32  ;;  %v500_v1 = vld [vmem:[#allocation2 + $0x600] sm:$0xff]  ;;  %v502_v32 = vld [vmem:[#allocation2 + $0x610] sm:$0xff] }
  0xfe   :  { %878 = vmatpush1.bf16.msra.mxu0 %v444_v33  ;;  %1165 = vmatpush1.bf16.msra.mxu1 %v446_v34  ;;  %v505_v33 = vld [vmem:[#allocation2 + $0x628] sm:$0xff]  ;;  %v507_v34 = vld [vmem:[#allocation2 + $0x638] sm:$0xff] }
  0xff   :  { %879 = vmatprep.subr.bf16.mxu0 %v449_v35  ;;  %1166 = vmatprep.subr.bf16.mxu1 %v451_v36  ;;  %v7708_v35 = vcombine.high %v8367_v3, %v8367_v3  ;;  %v504_v36 = vld [vmem:[#allocation2 + $0x620] sm:$0xff] }
 0x102   :  { %880 = vmatpush1.bf16.msra.mxu0 %v448_v37  ;;  %1167 = vmatpush1.bf16.msra.mxu1 %v450_v38  ;;  %v506_v37 = vld [vmem:[#allocation2 + $0x630] sm:$0xff]  ;;  %v511_v38 = vld [vmem:[#allocation2 + $0x658] sm:$0xff] }
 0x103   :  { %881 = vmatprep.subr.bf16.mxu0 %v453_v39  ;;  %1168 = vmatprep.subr.bf16.mxu1 %v455_v40  ;;  %v508_v39 = vld [vmem:[#allocation2 + $0x640] sm:$0xff]  ;;  %v510_v40 = vld [vmem:[#allocation2 + $0x650] sm:$0xff] }
 0x106   :  { %882 = vmatpush1.bf16.msra.mxu0 %v452_v41  ;;  %1169 = vmatpush1.bf16.msra.mxu1 %v454_v42  ;;  %v513_v41 = vld [vmem:[#allocation2 + $0x668] sm:$0xff]  ;;  %v515_v42 = vld [vmem:[#allocation2 + $0x678] sm:$0xff] }
 0x107   :  { %883 = vmatprep.subr.bf16.mxu0 %v457_v43  ;;  %1170 = vmatprep.subr.bf16.mxu1 %v459_v44  ;;  %v512_v43 = vld [vmem:[#allocation2 + $0x660] sm:$0xff]  ;;  %v514_v44 = vld [vmem:[#allocation2 + $0x670] sm:$0xff] }
 0x10a   :  { %884 = vmatpush1.bf16.msra.mxu0 %v456_v45  ;;  %1171 = vmatpush1.bf16.msra.mxu1 %v458_v46  ;;  %v517_v45 = vld [vmem:[#allocation2 + $0x688] sm:$0xff]  ;;  %v519_v46 = vld [vmem:[#allocation2 + $0x698] sm:$0xff] }
 0x10b   :  { %885 = vmatprep.subr.bf16.mxu0 %v461_v47  ;;  %1172 = vmatprep.subr.bf16.mxu1 %v463_v48  ;;  %v516_v47 = vld [vmem:[#allocation2 + $0x680] sm:$0xff]  ;;  %v518_v48 = vld [vmem:[#allocation2 + $0x690] sm:$0xff] }
 0x10e   :  { %886 = vmatpush1.bf16.msra.mxu0 %v460_v49  ;;  %1173 = vmatpush1.bf16.msra.mxu1 %v462_v50  ;;  %v521_v49 = vld [vmem:[#allocation2 + $0x6a8] sm:$0xff]  ;;  %v523_v50 = vld [vmem:[#allocation2 + $0x6b8] sm:$0xff] }
 0x10f   :  { %887 = vmatprep.subr.bf16.mxu0 %v465_v51  ;;  %1174 = vmatprep.subr.bf16.mxu1 %v467_v52  ;;  %v520_v51 = vld [vmem:[#allocation2 + $0x6a0] sm:$0xff]  ;;  %v522_v52 = vld [vmem:[#allocation2 + $0x6b0] sm:$0xff] }
 0x112   :  { %888 = vmatpush1.bf16.msra.mxu0 %v464_v53  ;;  %1175 = vmatpush1.bf16.msra.mxu1 %v466_v54  ;;  %v525_v53 = vld [vmem:[#allocation2 + $0x6c8] sm:$0xff]  ;;  %v527_v54 = vld [vmem:[#allocation2 + $0x6d8] sm:$0xff] }
 0x113   :  { %889 = vmatprep.subr.bf16.mxu0 %v469_v55  ;;  %1176 = vmatprep.subr.bf16.mxu1 %v471_v56  ;;  %v524_v55 = vld [vmem:[#allocation2 + $0x6c0] sm:$0xff]  ;;  %v526_v56 = vld [vmem:[#allocation2 + $0x6d0] sm:$0xff] }
 0x116   :  { %890 = vmatpush1.bf16.msra.mxu0 %v468_v57  ;;  %1177 = vmatpush1.bf16.msra.mxu1 %v470_v58  ;;  %v529_v57 = vld [vmem:[#allocation2 + $0x6e8] sm:$0xff]  ;;  %v531_v58 = vld [vmem:[#allocation2 + $0x6f8] sm:$0xff] }
 0x117   :  { %891 = vmatprep.subr.bf16.mxu0 %v473_v59  ;;  %1178 = vmatprep.subr.bf16.mxu1 %v475_v60  ;;  %v528_v59 = vld [vmem:[#allocation2 + $0x6e0] sm:$0xff]  ;;  %v530_v60 = vld [vmem:[#allocation2 + $0x6f0] sm:$0xff] }
 0x11a   :  { %892 = vmatpush1.bf16.msra.mxu0 %v472_v61  ;;  %1179 = vmatpush1.bf16.msra.mxu1 %v474_v62  ;;  %v533_v61 = vld [vmem:[#allocation2 + $0x708] sm:$0xff]  ;;  %v535_v62 = vld [vmem:[#allocation2 + $0x718] sm:$0xff] }
 0x11b   :  { %893 = vmatprep.subr.bf16.mxu0 %v477_v63  ;;  %1180 = vmatprep.subr.bf16.mxu1 %v479_v7  ;;  %v532_v63 = vld [vmem:[#allocation2 + $0x700] sm:$0xff]  ;;  %v534_v7 = vld [vmem:[#allocation2 + $0x710] sm:$0xff] }
 0x11e   :  { %894 = vmatpush1.bf16.msra.mxu0 %v476_v8  ;;  %1181 = vmatpush1.bf16.msra.mxu1 %v478_v9  ;;  %v537_v8 = vld [vmem:[#allocation2 + $0x728] sm:$0xff]  ;;  %v539_v9 = vld [vmem:[#allocation2 + $0x738] sm:$0xff] }
 0x11f   :  { %895 = vmatprep.subr.bf16.mxu0 %v481_v10  ;;  %1182 = vmatprep.subr.bf16.mxu1 %v483_v11  ;;  %v536_v10 = vld [vmem:[#allocation2 + $0x720] sm:$0xff]  ;;  %v538_v11 = vld [vmem:[#allocation2 + $0x730] sm:$0xff] }
 0x122   :  { %896 = vmatpush1.bf16.msra.mxu0 %v480_v12  ;;  %1183 = vmatpush1.bf16.msra.mxu1 %v482_v13  ;;  %v541_v12 = vld [vmem:[#allocation2 + $0x748] sm:$0xff]  ;;  %v543_v13 = vld [vmem:[#allocation2 + $0x758] sm:$0xff] }
 0x123   :  { %897 = vmatprep.subr.bf16.mxu0 %v485_v14  ;;  %1184 = vmatprep.subr.bf16.mxu1 %v487_v15  ;;  %v540_v14 = vld [vmem:[#allocation2 + $0x740] sm:$0xff]  ;;  %v542_v15 = vld [vmem:[#allocation2 + $0x750] sm:$0xff] }
 0x126   :  { %898 = vmatpush1.bf16.msra.mxu0 %v484_v16  ;;  %1185 = vmatpush1.bf16.msra.mxu1 %v486_v17  ;;  %v545_v16 = vld [vmem:[#allocation2 + $0x768] sm:$0xff]  ;;  %v547_v17 = vld [vmem:[#allocation2 + $0x778] sm:$0xff] }
 0x127   :  { %899 = vmatprep.subr.bf16.mxu0 %v489_v18  ;;  %1186 = vmatprep.subr.bf16.mxu1 %v491_v19  ;;  %v544_v18 = vld [vmem:[#allocation2 + $0x760] sm:$0xff]  ;;  %v546_v19 = vld [vmem:[#allocation2 + $0x770] sm:$0xff] }
 0x12a   :  { %900 = vmatpush1.bf16.msra.mxu0 %v488_v20  ;;  %1187 = vmatpush1.bf16.msra.mxu1 %v490_v21  ;;  %v549_v20 = vld [vmem:[#allocation2 + $0x788] sm:$0xff]  ;;  %v551_v21 = vld [vmem:[#allocation2 + $0x798] sm:$0xff] }
 0x12b   :  { %901 = vmatprep.subr.bf16.mxu0 %v493_v22  ;;  %1188 = vmatprep.subr.bf16.mxu1 %v495_v23  ;;  %v548_v22 = vld [vmem:[#allocation2 + $0x780] sm:$0xff]  ;;  %v550_v23 = vld [vmem:[#allocation2 + $0x790] sm:$0xff] }
 0x12e   :  { %902 = vmatpush1.bf16.msra.mxu0 %v492_v24  ;;  %1189 = vmatpush1.bf16.msra.mxu1 %v494_v0  ;;  %v553_v24 = vld [vmem:[#allocation2 + $0x7a8] sm:$0xff]  ;;  %v555_v0 = vld [vmem:[#allocation2 + $0x7b8] sm:$0xff] }
 0x12f   :  { %903 = vmatprep.subr.bf16.mxu0 %v497_v25  ;;  %1190 = vmatprep.subr.bf16.mxu1 %v499_v26  ;;  %v552_v25 = vld [vmem:[#allocation2 + $0x7a0] sm:$0xff]  ;;  %v554_v26 = vld [vmem:[#allocation2 + $0x7b0] sm:$0xff] }
 0x132   :  { %904 = vmatpush1.bf16.msra.mxu0 %v496_v27  ;;  %1191 = vmatpush1.bf16.msra.mxu1 %v498_v28  ;;  %v557_v27 = vld [vmem:[#allocation2 + $0x7c8] sm:$0xff]  ;;  %v559_v28 = vld [vmem:[#allocation2 + $0x7d8] sm:$0xff] }
 0x133   :  { %914 = vmatprep.subr.bf16.mxu0 %v501_v29  ;;  %1201 = vmatprep.subr.bf16.mxu1 %v503_v30  ;;  %v556_v29 = vld [vmem:[#allocation2 + $0x7c0] sm:$0xff]  ;;  %v558_v30 = vld [vmem:[#allocation2 + $0x7d0] sm:$0xff] }
 0x135   :  { %906 = vmatmul.mubr.bf16.vlgmr.msra.gmra.mrb[0].mxu0 %v7705_v31  ;;  %1193 = vmatmul.mubr.bf16.vlgmr.msra.gmra.mrb[0].mxu1 %v7705_v31  ;;  %v561_v31 = vld [vmem:[#allocation2 + $0x7e8] sm:$0xff] }
 0x136   :  { %915 = vmatpush1.bf16.msra.mxu0 %v500_v1  ;;  %1202 = vmatpush1.bf16.msra.mxu1 %v502_v32  ;;  %v563_v1 = vld [vmem:[#allocation2 + $0x7f8] sm:$0xff]  ;;  %v560_v32 = vld [vmem:[#allocation2 + $0x7e0] sm:$0xff] }
 0x137   :  { %916 = vmatprep.subr.bf16.mxu0 %v505_v33  ;;  %1203 = vmatprep.subr.bf16.mxu1 %v507_v34  ;;  %v562_v33 = vld [vmem:[#allocation2 + $0x7f0] sm:$0xff]  ;;  %v565_v34 = vld [vmem:[#allocation2 + $0x808] sm:$0xff] }
 0x138   :  { %946 = vmatprep.mubr.bf16.mxu0 %v7708_v35  ;;  %1233 = vmatprep.mubr.bf16.mxu1 %v7708_v35  ;;  %v567_v35 = vld [vmem:[#allocation2 + $0x818] sm:$0xff] }
 0x13a   :  { %917 = vmatpush1.bf16.msra.mxu0 %v504_v36  ;;  %1204 = vmatpush1.bf16.msra.mxu1 %v506_v37  ;;  %v7707_v36 = vcombine.low %v8367_v3, %v8367_v3  ;;  %v564_v37 = vld [vmem:[#allocation2 + $0x800] sm:$0xff]  ;;  %v573_v3 = vld [vmem:[#allocation2 + $0x848] sm:$0xff] }
 0x13b   :  { %918 = vmatprep.subr.bf16.mxu0 %v509_v2  ;;  %1205 = vmatprep.subr.bf16.mxu1 %v511_v38  ;;  %v566_v2 = vld [vmem:[#allocation2 + $0x810] sm:$0xff]  ;;  %v569_v38 = vld [vmem:[#allocation2 + $0x828] sm:$0xff] }
 0x13e   :  { %919 = vmatpush1.bf16.msra.mxu0 %v508_v39  ;;  %1206 = vmatpush1.bf16.msra.mxu1 %v510_v40  ;;  %v571_v39 = vld [vmem:[#allocation2 + $0x838] sm:$0xff]  ;;  %v7710_v40 = vcombine.high %v8369_v4, %v8369_v4 }
 0x13f   :  { %920 = vmatprep.subr.bf16.mxu0 %v513_v41  ;;  %1207 = vmatprep.subr.bf16.mxu1 %v515_v42  ;;  %v568_v41 = vld [vmem:[#allocation2 + $0x820] sm:$0xff]  ;;  %v570_v42 = vld [vmem:[#allocation2 + $0x830] sm:$0xff] }
 0x142   :  { %921 = vmatpush1.bf16.msra.mxu0 %v512_v43  ;;  %1208 = vmatpush1.bf16.msra.mxu1 %v514_v44  ;;  %v575_v43 = vld [vmem:[#allocation2 + $0x858] sm:$0xff]  ;;  %v572_v44 = vld [vmem:[#allocation2 + $0x840] sm:$0xff] }
 0x143   :  { %922 = vmatprep.subr.bf16.mxu0 %v517_v45  ;;  %1209 = vmatprep.subr.bf16.mxu1 %v519_v46  ;;  %v574_v45 = vld [vmem:[#allocation2 + $0x850] sm:$0xff]  ;;  %v577_v46 = vld [vmem:[#allocation2 + $0x868] sm:$0xff] }
 0x146   :  { %923 = vmatpush1.bf16.msra.mxu0 %v516_v47  ;;  %1210 = vmatpush1.bf16.msra.mxu1 %v518_v48  ;;  %v579_v47 = vld [vmem:[#allocation2 + $0x878] sm:$0xff]  ;;  %v576_v48 = vld [vmem:[#allocation2 + $0x860] sm:$0xff] }
 0x147   :  { %924 = vmatprep.subr.bf16.mxu0 %v521_v49  ;;  %1211 = vmatprep.subr.bf16.mxu1 %v523_v50  ;;  %v578_v49 = vld [vmem:[#allocation2 + $0x870] sm:$0xff]  ;;  %v581_v50 = vld [vmem:[#allocation2 + $0x888] sm:$0xff] }
 0x14a   :  { %925 = vmatpush1.bf16.msra.mxu0 %v520_v51  ;;  %1212 = vmatpush1.bf16.msra.mxu1 %v522_v52  ;;  %v583_v51 = vld [vmem:[#allocation2 + $0x898] sm:$0xff]  ;;  %v580_v52 = vld [vmem:[#allocation2 + $0x880] sm:$0xff] }
 0x14b   :  { %926 = vmatprep.subr.bf16.mxu0 %v525_v53  ;;  %1213 = vmatprep.subr.bf16.mxu1 %v527_v54  ;;  %v582_v53 = vld [vmem:[#allocation2 + $0x890] sm:$0xff]  ;;  %v585_v54 = vld [vmem:[#allocation2 + $0x8a8] sm:$0xff] }
 0x14e   :  { %927 = vmatpush1.bf16.msra.mxu0 %v524_v55  ;;  %1214 = vmatpush1.bf16.msra.mxu1 %v526_v56  ;;  %v587_v55 = vld [vmem:[#allocation2 + $0x8b8] sm:$0xff]  ;;  %v584_v56 = vld [vmem:[#allocation2 + $0x8a0] sm:$0xff] }
 0x14f   :  { %928 = vmatprep.subr.bf16.mxu0 %v529_v57  ;;  %1215 = vmatprep.subr.bf16.mxu1 %v531_v58  ;;  %v586_v57 = vld [vmem:[#allocation2 + $0x8b0] sm:$0xff]  ;;  %v589_v58 = vld [vmem:[#allocation2 + $0x8c8] sm:$0xff] }
 0x152   :  { %929 = vmatpush1.bf16.msra.mxu0 %v528_v59  ;;  %1216 = vmatpush1.bf16.msra.mxu1 %v530_v60  ;;  %v591_v59 = vld [vmem:[#allocation2 + $0x8d8] sm:$0xff]  ;;  %v588_v60 = vld [vmem:[#allocation2 + $0x8c0] sm:$0xff] }
 0x153   :  { %930 = vmatprep.subr.bf16.mxu0 %v533_v61  ;;  %1217 = vmatprep.subr.bf16.mxu1 %v535_v62  ;;  %v590_v61 = vld [vmem:[#allocation2 + $0x8d0] sm:$0xff]  ;;  %v593_v62 = vld [vmem:[#allocation2 + $0x8e8] sm:$0xff] }
 0x156   :  { %931 = vmatpush1.bf16.msra.mxu0 %v532_v63  ;;  %1218 = vmatpush1.bf16.msra.mxu1 %v534_v7  ;;  %v595_v63 = vld [vmem:[#allocation2 + $0x8f8] sm:$0xff]  ;;  %v592_v7 = vld [vmem:[#allocation2 + $0x8e0] sm:$0xff] }
 0x157   :  { %932 = vmatprep.subr.bf16.mxu0 %v537_v8  ;;  %1219 = vmatprep.subr.bf16.mxu1 %v539_v9  ;;  %v594_v8 = vld [vmem:[#allocation2 + $0x8f0] sm:$0xff]  ;;  %v597_v9 = vld [vmem:[#allocation2 + $0x908] sm:$0xff] }
 0x15a   :  { %933 = vmatpush1.bf16.msra.mxu0 %v536_v10  ;;  %1220 = vmatpush1.bf16.msra.mxu1 %v538_v11  ;;  %v599_v10 = vld [vmem:[#allocation2 + $0x918] sm:$0xff]  ;;  %v596_v11 = vld [vmem:[#allocation2 + $0x900] sm:$0xff] }
 0x15b   :  { %934 = vmatprep.subr.bf16.mxu0 %v541_v12  ;;  %1221 = vmatprep.subr.bf16.mxu1 %v543_v13  ;;  %v598_v12 = vld [vmem:[#allocation2 + $0x910] sm:$0xff]  ;;  %v601_v13 = vld [vmem:[#allocation2 + $0x928] sm:$0xff] }
 0x15e   :  { %935 = vmatpush1.bf16.msra.mxu0 %v540_v14  ;;  %1222 = vmatpush1.bf16.msra.mxu1 %v542_v15  ;;  %v603_v14 = vld [vmem:[#allocation2 + $0x938] sm:$0xff]  ;;  %v600_v15 = vld [vmem:[#allocation2 + $0x920] sm:$0xff] }
 0x15f   :  { %936 = vmatprep.subr.bf16.mxu0 %v545_v16  ;;  %1223 = vmatprep.subr.bf16.mxu1 %v547_v17  ;;  %v602_v16 = vld [vmem:[#allocation2 + $0x930] sm:$0xff]  ;;  %v605_v17 = vld [vmem:[#allocation2 + $0x948] sm:$0xff] }
 0x162   :  { %937 = vmatpush1.bf16.msra.mxu0 %v544_v18  ;;  %1224 = vmatpush1.bf16.msra.mxu1 %v546_v19  ;;  %v607_v18 = vld [vmem:[#allocation2 + $0x958] sm:$0xff]  ;;  %v604_v19 = vld [vmem:[#allocation2 + $0x940] sm:$0xff] }
 0x163   :  { %938 = vmatprep.subr.bf16.mxu0 %v549_v20  ;;  %1225 = vmatprep.subr.bf16.mxu1 %v551_v21  ;;  %v606_v20 = vld [vmem:[#allocation2 + $0x950] sm:$0xff]  ;;  %v609_v21 = vld [vmem:[#allocation2 + $0x968] sm:$0xff] }
 0x166   :  { %939 = vmatpush1.bf16.msra.mxu0 %v548_v22  ;;  %1226 = vmatpush1.bf16.msra.mxu1 %v550_v23  ;;  %v611_v22 = vld [vmem:[#allocation2 + $0x978] sm:$0xff]  ;;  %v608_v23 = vld [vmem:[#allocation2 + $0x960] sm:$0xff] }
 0x167   :  { %940 = vmatprep.subr.bf16.mxu0 %v553_v24  ;;  %1227 = vmatprep.subr.bf16.mxu1 %v555_v0  ;;  %v610_v24 = vld [vmem:[#allocation2 + $0x970] sm:$0xff]  ;;  %v613_v0 = vld [vmem:[#allocation2 + $0x988] sm:$0xff] }
 0x16a   :  { %941 = vmatpush1.bf16.msra.mxu0 %v552_v25  ;;  %1228 = vmatpush1.bf16.msra.mxu1 %v554_v26  ;;  %v615_v25 = vld [vmem:[#allocation2 + $0x998] sm:$0xff]  ;;  %v612_v26 = vld [vmem:[#allocation2 + $0x980] sm:$0xff] }
 0x16b   :  { %942 = vmatprep.subr.bf16.mxu0 %v557_v27  ;;  %1229 = vmatprep.subr.bf16.mxu1 %v559_v28  ;;  %v614_v27 = vld [vmem:[#allocation2 + $0x990] sm:$0xff]  ;;  %v617_v28 = vld [vmem:[#allocation2 + $0x9a8] sm:$0xff] }
 0x16e   :  { %943 = vmatpush1.bf16.msra.mxu0 %v556_v29  ;;  %1230 = vmatpush1.bf16.msra.mxu1 %v558_v30  ;;  %v619_v29 = vld [vmem:[#allocation2 + $0x9b8] sm:$0xff]  ;;  %v616_v30 = vld [vmem:[#allocation2 + $0x9a0] sm:$0xff] }
 0x16f   :  { %944 = vmatprep.subr.bf16.mxu0 %v561_v31  ;;  %1231 = vmatprep.subr.bf16.mxu1 %v563_v1  ;;  %v618_v31 = vld [vmem:[#allocation2 + $0x9b0] sm:$0xff]  ;;  %v621_v1 = vld [vmem:[#allocation2 + $0x9c8] sm:$0xff] }
 0x172   :  { %945 = vmatpush1.bf16.msra.mxu0 %v560_v32  ;;  %1232 = vmatpush1.bf16.msra.mxu1 %v562_v33  ;;  %v623_v32 = vld [vmem:[#allocation2 + $0x9d8] sm:$0xff]  ;;  %v620_v33 = vld [vmem:[#allocation2 + $0x9c0] sm:$0xff] }
 0x173   :  { %955 = vmatprep.subr.bf16.mxu0 %v565_v34  ;;  %1242 = vmatprep.subr.bf16.mxu1 %v567_v35  ;;  %v622_v34 = vld [vmem:[#allocation2 + $0x9d0] sm:$0xff]  ;;  %v625_v35 = vld [vmem:[#allocation2 + $0x9e8] sm:$0xff] }
 0x175   :  { %947 = vmatmul.mubr.bf16.vlgmr.msra.gmra.mrb[0].mxu0 %v7707_v36  ;;  %1234 = vmatmul.mubr.bf16.vlgmr.msra.gmra.mrb[0].mxu1 %v7707_v36  ;;  %v627_v36 = vld [vmem:[#allocation2 + $0x9f8] sm:$0xff] }
 0x176   :  { %956 = vmatpush1.bf16.msra.mxu0 %v564_v37  ;;  %1243 = vmatpush1.bf16.msra.mxu1 %v566_v2  ;;  %v624_v37 = vld [vmem:[#allocation2 + $0x9e0] sm:$0xff]  ;;  %v626_v2 = vld [vmem:[#allocation2 + $0x9f0] sm:$0xff] }
 0x177   :  { %957 = vmatprep.subr.bf16.mxu0 %v569_v38  ;;  %1244 = vmatprep.subr.bf16.mxu1 %v571_v39  ;;  %v629_v38 = vld [vmem:[#allocation2 + $0xa08] sm:$0xff]  ;;  %v631_v39 = vld [vmem:[#allocation2 + $0xa18] sm:$0xff] }
 0x178   :  { %987 = vmatprep.mubr.bf16.mxu0 %v7710_v40  ;;  %1274 = vmatprep.mubr.bf16.mxu1 %v7710_v40  ;;  %v7709_v40 = vcombine.low %v8369_v4, %v8369_v4  ;;  %v637_v4 = vld [vmem:[#allocation2 + $0xa48] sm:$0xff] }
 0x17a   :  { %958 = vmatpush1.bf16.msra.mxu0 %v568_v41  ;;  %1245 = vmatpush1.bf16.msra.mxu1 %v570_v42  ;;  %v628_v41 = vld [vmem:[#allocation2 + $0xa00] sm:$0xff]  ;;  %v630_v42 = vld [vmem:[#allocation2 + $0xa10] sm:$0xff] }
 0x17b   :  { %959 = vmatprep.subr.bf16.mxu0 %v573_v3  ;;  %1246 = vmatprep.subr.bf16.mxu1 %v575_v43  ;;  %v633_v3 = vld [vmem:[#allocation2 + $0xa28] sm:$0xff]  ;;  %v635_v43 = vld [vmem:[#allocation2 + $0xa38] sm:$0xff] }
 0x17e   :  { %960 = vmatpush1.bf16.msra.mxu0 %v572_v44  ;;  %1247 = vmatpush1.bf16.msra.mxu1 %v574_v45  ;;  %v7712_v44 = vcombine.high %v8371_v5, %v8371_v5  ;;  %v632_v45 = vld [vmem:[#allocation2 + $0xa20] sm:$0xff] }
 0x17f   :  { %961 = vmatprep.subr.bf16.mxu0 %v577_v46  ;;  %1248 = vmatprep.subr.bf16.mxu1 %v579_v47  ;;  %v634_v46 = vld [vmem:[#allocation2 + $0xa30] sm:$0xff]  ;;  %v639_v47 = vld [vmem:[#allocation2 + $0xa58] sm:$0xff] }
 0x182   :  { %962 = vmatpush1.bf16.msra.mxu0 %v576_v48  ;;  %1249 = vmatpush1.bf16.msra.mxu1 %v578_v49  ;;  %v636_v48 = vld [vmem:[#allocation2 + $0xa40] sm:$0xff]  ;;  %v638_v49 = vld [vmem:[#allocation2 + $0xa50] sm:$0xff] }
 0x183   :  { %963 = vmatprep.subr.bf16.mxu0 %v581_v50  ;;  %1250 = vmatprep.subr.bf16.mxu1 %v583_v51  ;;  %v641_v50 = vld [vmem:[#allocation2 + $0xa68] sm:$0xff]  ;;  %v643_v51 = vld [vmem:[#allocation2 + $0xa78] sm:$0xff] }
 0x186   :  { %964 = vmatpush1.bf16.msra.mxu0 %v580_v52  ;;  %1251 = vmatpush1.bf16.msra.mxu1 %v582_v53  ;;  %v640_v52 = vld [vmem:[#allocation2 + $0xa60] sm:$0xff]  ;;  %v642_v53 = vld [vmem:[#allocation2 + $0xa70] sm:$0xff] }
 0x187   :  { %965 = vmatprep.subr.bf16.mxu0 %v585_v54  ;;  %1252 = vmatprep.subr.bf16.mxu1 %v587_v55  ;;  %v645_v54 = vld [vmem:[#allocation2 + $0xa88] sm:$0xff]  ;;  %v647_v55 = vld [vmem:[#allocation2 + $0xa98] sm:$0xff] }
 0x18a   :  { %966 = vmatpush1.bf16.msra.mxu0 %v584_v56  ;;  %1253 = vmatpush1.bf16.msra.mxu1 %v586_v57  ;;  %v644_v56 = vld [vmem:[#allocation2 + $0xa80] sm:$0xff]  ;;  %v646_v57 = vld [vmem:[#allocation2 + $0xa90] sm:$0xff] }
 0x18b   :  { %967 = vmatprep.subr.bf16.mxu0 %v589_v58  ;;  %1254 = vmatprep.subr.bf16.mxu1 %v591_v59  ;;  %v649_v58 = vld [vmem:[#allocation2 + $0xaa8] sm:$0xff]  ;;  %v651_v59 = vld [vmem:[#allocation2 + $0xab8] sm:$0xff] }
 0x18e   :  { %968 = vmatpush1.bf16.msra.mxu0 %v588_v60  ;;  %1255 = vmatpush1.bf16.msra.mxu1 %v590_v61  ;;  %v648_v60 = vld [vmem:[#allocation2 + $0xaa0] sm:$0xff]  ;;  %v650_v61 = vld [vmem:[#allocation2 + $0xab0] sm:$0xff] }
 0x18f   :  { %969 = vmatprep.subr.bf16.mxu0 %v593_v62  ;;  %1256 = vmatprep.subr.bf16.mxu1 %v595_v63  ;;  %v653_v62 = vld [vmem:[#allocation2 + $0xac8] sm:$0xff]  ;;  %v655_v63 = vld [vmem:[#allocation2 + $0xad8] sm:$0xff] }
 0x192   :  { %970 = vmatpush1.bf16.msra.mxu0 %v592_v7  ;;  %1257 = vmatpush1.bf16.msra.mxu1 %v594_v8  ;;  %v652_v7 = vld [vmem:[#allocation2 + $0xac0] sm:$0xff]  ;;  %v654_v8 = vld [vmem:[#allocation2 + $0xad0] sm:$0xff] }
 0x193   :  { %971 = vmatprep.subr.bf16.mxu0 %v597_v9  ;;  %1258 = vmatprep.subr.bf16.mxu1 %v599_v10  ;;  %v657_v9 = vld [vmem:[#allocation2 + $0xae8] sm:$0xff]  ;;  %v659_v10 = vld [vmem:[#allocation2 + $0xaf8] sm:$0xff] }
 0x196   :  { %972 = vmatpush1.bf16.msra.mxu0 %v596_v11  ;;  %1259 = vmatpush1.bf16.msra.mxu1 %v598_v12  ;;  %v656_v11 = vld [vmem:[#allocation2 + $0xae0] sm:$0xff]  ;;  %v658_v12 = vld [vmem:[#allocation2 + $0xaf0] sm:$0xff] }
 0x197   :  { %973 = vmatprep.subr.bf16.mxu0 %v601_v13  ;;  %1260 = vmatprep.subr.bf16.mxu1 %v603_v14  ;;  %v661_v13 = vld [vmem:[#allocation2 + $0xb08] sm:$0xff]  ;;  %v663_v14 = vld [vmem:[#allocation2 + $0xb18] sm:$0xff] }
 0x19a   :  { %974 = vmatpush1.bf16.msra.mxu0 %v600_v15  ;;  %1261 = vmatpush1.bf16.msra.mxu1 %v602_v16  ;;  %v660_v15 = vld [vmem:[#allocation2 + $0xb00] sm:$0xff]  ;;  %v662_v16 = vld [vmem:[#allocation2 + $0xb10] sm:$0xff] }
 0x19b   :  { %975 = vmatprep.subr.bf16.mxu0 %v605_v17  ;;  %1262 = vmatprep.subr.bf16.mxu1 %v607_v18  ;;  %v665_v17 = vld [vmem:[#allocation2 + $0xb28] sm:$0xff]  ;;  %v667_v18 = vld [vmem:[#allocation2 + $0xb38] sm:$0xff] }
 0x19e   :  { %976 = vmatpush1.bf16.msra.mxu0 %v604_v19  ;;  %1263 = vmatpush1.bf16.msra.mxu1 %v606_v20  ;;  %v664_v19 = vld [vmem:[#allocation2 + $0xb20] sm:$0xff]  ;;  %v666_v20 = vld [vmem:[#allocation2 + $0xb30] sm:$0xff] }
 0x19f   :  { %977 = vmatprep.subr.bf16.mxu0 %v609_v21  ;;  %1264 = vmatprep.subr.bf16.mxu1 %v611_v22  ;;  %v669_v21 = vld [vmem:[#allocation2 + $0xb48] sm:$0xff]  ;;  %v671_v22 = vld [vmem:[#allocation2 + $0xb58] sm:$0xff] }
 0x1a2   :  { %978 = vmatpush1.bf16.msra.mxu0 %v608_v23  ;;  %1265 = vmatpush1.bf16.msra.mxu1 %v610_v24  ;;  %v668_v23 = vld [vmem:[#allocation2 + $0xb40] sm:$0xff]  ;;  %v670_v24 = vld [vmem:[#allocation2 + $0xb50] sm:$0xff] }
 0x1a3   :  { %979 = vmatprep.subr.bf16.mxu0 %v613_v0  ;;  %1266 = vmatprep.subr.bf16.mxu1 %v615_v25  ;;  %v673_v0 = vld [vmem:[#allocation2 + $0xb68] sm:$0xff]  ;;  %v675_v25 = vld [vmem:[#allocation2 + $0xb78] sm:$0xff] }
 0x1a6   :  { %980 = vmatpush1.bf16.msra.mxu0 %v612_v26  ;;  %1267 = vmatpush1.bf16.msra.mxu1 %v614_v27  ;;  %v672_v26 = vld [vmem:[#allocation2 + $0xb60] sm:$0xff]  ;;  %v674_v27 = vld [vmem:[#allocation2 + $0xb70] sm:$0xff] }
 0x1a7   :  { %981 = vmatprep.subr.bf16.mxu0 %v617_v28  ;;  %1268 = vmatprep.subr.bf16.mxu1 %v619_v29  ;;  %v677_v28 = vld [vmem:[#allocation2 + $0xb88] sm:$0xff]  ;;  %v679_v29 = vld [vmem:[#allocation2 + $0xb98] sm:$0xff] }
 0x1aa   :  { %982 = vmatpush1.bf16.msra.mxu0 %v616_v30  ;;  %1269 = vmatpush1.bf16.msra.mxu1 %v618_v31  ;;  %v676_v30 = vld [vmem:[#allocation2 + $0xb80] sm:$0xff]  ;;  %v678_v31 = vld [vmem:[#allocation2 + $0xb90] sm:$0xff] }
 0x1ab   :  { %983 = vmatprep.subr.bf16.mxu0 %v621_v1  ;;  %1270 = vmatprep.subr.bf16.mxu1 %v623_v32  ;;  %v681_v1 = vld [vmem:[#allocation2 + $0xba8] sm:$0xff]  ;;  %v683_v32 = vld [vmem:[#allocation2 + $0xbb8] sm:$0xff] }
 0x1ae   :  { %984 = vmatpush1.bf16.msra.mxu0 %v620_v33  ;;  %1271 = vmatpush1.bf16.msra.mxu1 %v622_v34  ;;  %v680_v33 = vld [vmem:[#allocation2 + $0xba0] sm:$0xff]  ;;  %v682_v34 = vld [vmem:[#allocation2 + $0xbb0] sm:$0xff] }
 0x1af   :  { %985 = vmatprep.subr.bf16.mxu0 %v625_v35  ;;  %1272 = vmatprep.subr.bf16.mxu1 %v627_v36  ;;  %v685_v35 = vld [vmem:[#allocation2 + $0xbc8] sm:$0xff]  ;;  %v687_v36 = vld [vmem:[#allocation2 + $0xbd8] sm:$0xff] }
 0x1b2   :  { %986 = vmatpush1.bf16.msra.mxu0 %v624_v37  ;;  %1273 = vmatpush1.bf16.msra.mxu1 %v626_v2  ;;  %v684_v37 = vld [vmem:[#allocation2 + $0xbc0] sm:$0xff]  ;;  %v686_v2 = vld [vmem:[#allocation2 + $0xbd0] sm:$0xff] }
 0x1b3   :  { %996 = vmatprep.subr.bf16.mxu0 %v629_v38  ;;  %1283 = vmatprep.subr.bf16.mxu1 %v631_v39  ;;  %v689_v38 = vld [vmem:[#allocation2 + $0xbe8] sm:$0xff]  ;;  %v691_v39 = vld [vmem:[#allocation2 + $0xbf8] sm:$0xff] }
 0x1b5   :  { %988 = vmatmul.mubr.bf16.vlgmr.msra.gmra.mrb[0].mxu0 %v7709_v40  ;;  %1275 = vmatmul.mubr.bf16.vlgmr.msra.gmra.mrb[0].mxu1 %v7709_v40  ;;  %v688_v40 = vld [vmem:[#allocation2 + $0xbe0] sm:$0xff] }
 0x1b6   :  { %997 = vmatpush1.bf16.msra.mxu0 %v628_v41  ;;  %1284 = vmatpush1.bf16.msra.mxu1 %v630_v42  ;;  %v690_v41 = vld [vmem:[#allocation2 + $0xbf0] sm:$0xff]  ;;  %v693_v42 = vld [vmem:[#allocation2 + $0xc08] sm:$0xff] }
 0x1b7   :  { %998 = vmatprep.subr.bf16.mxu0 %v633_v3  ;;  %1285 = vmatprep.subr.bf16.mxu1 %v635_v43  ;;  %v695_v3 = vld [vmem:[#allocation2 + $0xc18] sm:$0xff]  ;;  %v7711_v43 = vcombine.low %v8371_v5, %v8371_v5  ;;  %v700_v5 = vld [vmem:[#allocation2 + $0xc40] sm:$0xff] }
 0x1b8   :  { %1028 = vmatprep.mubr.bf16.mxu0 %v7712_v44  ;;  %1315 = vmatprep.mubr.bf16.mxu1 %v7712_v44  ;;  %v692_v44 = vld [vmem:[#allocation2 + $0xc00] sm:$0xff] }
 0x1ba   :  { %999 = vmatpush1.bf16.msra.mxu0 %v632_v45  ;;  %1286 = vmatpush1.bf16.msra.mxu1 %v634_v46  ;;  %v694_v45 = vld [vmem:[#allocation2 + $0xc10] sm:$0xff]  ;;  %v697_v46 = vld [vmem:[#allocation2 + $0xc28] sm:$0xff] }
 0x1bb   :  { %1000 = vmatprep.subr.bf16.mxu0 %v637_v4  ;;  %1287 = vmatprep.subr.bf16.mxu1 %v639_v47  ;;  %v699_v4 = vld [vmem:[#allocation2 + $0xc38] sm:$0xff]  ;;  %v696_v47 = vld [vmem:[#allocation2 + $0xc20] sm:$0xff] }
 0x1be   :  { %1001 = vmatpush1.bf16.msra.mxu0 %v636_v48  ;;  %1288 = vmatpush1.bf16.msra.mxu1 %v638_v49  ;;  %v698_v48 = vld [vmem:[#allocation2 + $0xc30] sm:$0xff]  ;;  %v701_v49 = vld [vmem:[#allocation2 + $0xc48] sm:$0xff] }
 0x1bf   :  { %1002 = vmatprep.subr.bf16.mxu0 %v641_v50  ;;  %1289 = vmatprep.subr.bf16.mxu1 %v643_v51  ;;  %v703_v50 = vld [vmem:[#allocation2 + $0xc58] sm:$0xff]  ;;  %v8195_v51 = vmov 0  }
 0x1c2   :  { %1003 = vmatpush1.bf16.msra.mxu0 %v640_v52  ;;  %1290 = vmatpush1.bf16.msra.mxu1 %v642_v53  ;;  %v702_v52 = vld [vmem:[#allocation2 + $0xc50] sm:$0xff]  ;;  %v705_v53 = vld [vmem:[#allocation2 + $0xc68] sm:$0xff] }
 0x1c3   :  { %1004 = vmatprep.subr.bf16.mxu0 %v645_v54  ;;  %1291 = vmatprep.subr.bf16.mxu1 %v647_v55  ;;  %v707_v54 = vld [vmem:[#allocation2 + $0xc78] sm:$0xff]  ;;  %v704_v55 = vld [vmem:[#allocation2 + $0xc60] sm:$0xff] }
 0x1c6   :  { %1005 = vmatpush1.bf16.msra.mxu0 %v644_v56  ;;  %1292 = vmatpush1.bf16.msra.mxu1 %v646_v57  ;;  %v706_v56 = vld [vmem:[#allocation2 + $0xc70] sm:$0xff]  ;;  %v709_v57 = vld [vmem:[#allocation2 + $0xc88] sm:$0xff] }
 0x1c7   :  { %1006 = vmatprep.subr.bf16.mxu0 %v649_v58  ;;  %1293 = vmatprep.subr.bf16.mxu1 %v651_v59  ;;  %v711_v58 = vld [vmem:[#allocation2 + $0xc98] sm:$0xff]  ;;  %v708_v59 = vld [vmem:[#allocation2 + $0xc80] sm:$0xff] }
 0x1ca   :  { %1007 = vmatpush1.bf16.msra.mxu0 %v648_v60  ;;  %1294 = vmatpush1.bf16.msra.mxu1 %v650_v61  ;;  %v710_v60 = vld [vmem:[#allocation2 + $0xc90] sm:$0xff]  ;;  %v713_v61 = vld [vmem:[#allocation2 + $0xca8] sm:$0xff] }
 0x1cb   :  { %1008 = vmatprep.subr.bf16.mxu0 %v653_v62  ;;  %1295 = vmatprep.subr.bf16.mxu1 %v655_v63  ;;  %v715_v62 = vld [vmem:[#allocation2 + $0xcb8] sm:$0xff]  ;;  %v712_v63 = vld [vmem:[#allocation2 + $0xca0] sm:$0xff] }
 0x1ce   :  { %1009 = vmatpush1.bf16.msra.mxu0 %v652_v7  ;;  %1296 = vmatpush1.bf16.msra.mxu1 %v654_v8  ;;  %v714_v7 = vld [vmem:[#allocation2 + $0xcb0] sm:$0xff]  ;;  %v717_v8 = vld [vmem:[#allocation2 + $0xcc8] sm:$0xff] }
 0x1cf   :  { %1010 = vmatprep.subr.bf16.mxu0 %v657_v9  ;;  %1297 = vmatprep.subr.bf16.mxu1 %v659_v10  ;;  %v719_v9 = vld [vmem:[#allocation2 + $0xcd8] sm:$0xff]  ;;  %v716_v10 = vld [vmem:[#allocation2 + $0xcc0] sm:$0xff] }
 0x1d2   :  { %1011 = vmatpush1.bf16.msra.mxu0 %v656_v11  ;;  %1298 = vmatpush1.bf16.msra.mxu1 %v658_v12  ;;  %v718_v11 = vld [vmem:[#allocation2 + $0xcd0] sm:$0xff]  ;;  %v721_v12 = vld [vmem:[#allocation2 + $0xce8] sm:$0xff] }
 0x1d3   :  { %1012 = vmatprep.subr.bf16.mxu0 %v661_v13  ;;  %1299 = vmatprep.subr.bf16.mxu1 %v663_v14  ;;  %v723_v13 = vld [vmem:[#allocation2 + $0xcf8] sm:$0xff]  ;;  %v720_v14 = vld [vmem:[#allocation2 + $0xce0] sm:$0xff] }
 0x1d6   :  { %1013 = vmatpush1.bf16.msra.mxu0 %v660_v15  ;;  %1300 = vmatpush1.bf16.msra.mxu1 %v662_v16  ;;  %v722_v15 = vld [vmem:[#allocation2 + $0xcf0] sm:$0xff]  ;;  %v7713_v16 = vcombine.low %v8373_v6, %v8373_v6 }
 0x1d7   :  { %1014 = vmatprep.subr.bf16.mxu0 %v665_v17  ;;  %1301 = vmatprep.subr.bf16.mxu1 %v667_v18  ;;  %v725_v17 = vlaneseq }
 0x1d9   :  { %v8401_v18 = vshrl.u32 %v725_v17, 7 }
 0x1da   :  { %1015 = vmatpush1.bf16.msra.mxu0 %v664_v19  ;;  %1302 = vmatpush1.bf16.msra.mxu1 %v666_v20 }
 0x1db   :  { %1016 = vmatprep.subr.bf16.mxu0 %v669_v21  ;;  %1303 = vmatprep.subr.bf16.mxu1 %v671_v22  ;;  %v8404_v19 = vsub.s32 0, %v8401_v18  ;;  %v8407_v20 = vsub.s32 2, %v8401_v18  ;;  %v307_v21 = vld [vmem:[#allocation13] sm:$0xf]  ;;  %v8410_v22 = vsub.s32 1, %v8401_v18 }
 0x1dd   :  { %v728_v6 = vrot.slane %v307_v21, %v8404_v19 }
 0x1de   :  { %1017 = vmatpush1.bf16.msra.mxu0 %v668_v23  ;;  %1304 = vmatpush1.bf16.msra.mxu1 %v670_v24  ;;  %v8413_v23 = vsub.s32 3, %v8401_v18  ;;  %v736_v24 = vrot.slane %v307_v21, %v8407_v20 }
 0x1df   :  { %1018 = vmatprep.subr.bf16.mxu0 %v673_v0  ;;  %1305 = vmatprep.subr.bf16.mxu1 %v675_v25  ;;  %v732_v0 = vrot.slane %v307_v21, %v8410_v22 }
 0x1e0   :  { %v740_v25 = vrot.slane %v307_v21, %v8413_v23 }
 0x1e2   :  { %1019 = vmatpush1.bf16.msra.mxu0 %v672_v26  ;;  %1306 = vmatpush1.bf16.msra.mxu1 %v674_v27 }
 0x1e3   :  { %1020 = vmatprep.subr.bf16.mxu0 %v677_v28  ;;  %1307 = vmatprep.subr.bf16.mxu1 %v679_v29 }
 0x1e6   :  { %1021 = vmatpush1.bf16.msra.mxu0 %v676_v30  ;;  %1308 = vmatpush1.bf16.msra.mxu1 %v678_v31 }
 0x1e7   :  { %1022 = vmatprep.subr.bf16.mxu0 %v681_v1  ;;  %1309 = vmatprep.subr.bf16.mxu1 %v683_v32 }
 0x1ea   :  { %1023 = vmatpush1.bf16.msra.mxu0 %v680_v33  ;;  %1310 = vmatpush1.bf16.msra.mxu1 %v682_v34 }
 0x1eb   :  { %1024 = vmatprep.subr.bf16.mxu0 %v685_v35  ;;  %1311 = vmatprep.subr.bf16.mxu1 %v687_v36 }
 0x1ee   :  { %1025 = vmatpush1.bf16.msra.mxu0 %v684_v37  ;;  %1312 = vmatpush1.bf16.msra.mxu1 %v686_v2 }
 0x1ef   :  { %1026 = vmatprep.subr.bf16.mxu0 %v689_v38  ;;  %1313 = vmatprep.subr.bf16.mxu1 %v691_v39 }
 0x1f2   :  { %1027 = vmatpush1.bf16.msra.mxu0 %v688_v40  ;;  %1314 = vmatpush1.bf16.msra.mxu1 %v690_v41 }
 0x1f3   :  { %1037 = vmatprep.subr.bf16.mxu0 %v693_v42  ;;  %1324 = vmatprep.subr.bf16.mxu1 %v695_v3 }
 0x1f5   :  { %1029 = vmatmul.mubr.bf16.vlgmr.msra.gmra.mrb[0].mxu0 %v7711_v43  ;;  %1316 = vmatmul.mubr.bf16.vlgmr.msra.gmra.mrb[0].mxu1 %v7711_v43 }
 0x1f6   :  { %1038 = vmatpush1.bf16.msra.mxu0 %v692_v44  ;;  %1325 = vmatpush1.bf16.msra.mxu1 %v694_v45 }
 0x1f7   :  { %1039 = vmatprep.subr.bf16.mxu0 %v697_v46  ;;  %1326 = vmatprep.subr.bf16.mxu1 %v699_v4 }
 0x1f8   :  { %1069 = vmatprep.mubr.bf16.mxu0 %v8195_v51  ;;  %1356 = vmatprep.mubr.bf16.mxu1 %v8195_v51 }
 0x1fa   :  { %1040 = vmatpush1.bf16.msra.mxu0 %v696_v47  ;;  %1327 = vmatpush1.bf16.msra.mxu1 %v698_v48 }
 0x1fb   :  { %1041 = vmatprep.subr.bf16.mxu0 %v701_v49  ;;  %1328 = vmatprep.subr.bf16.mxu1 %v703_v50 }
 0x1fe   :  { %1042 = vmatpush1.bf16.msra.mxu0 %v700_v5  ;;  %1329 = vmatpush1.bf16.msra.mxu1 %v702_v52 }
 0x1ff   :  { %1043 = vmatprep.subr.bf16.mxu0 %v705_v53  ;;  %1330 = vmatprep.subr.bf16.mxu1 %v707_v54 }
 0x202   :  { %1044 = vmatpush1.bf16.msra.mxu0 %v704_v55  ;;  %1331 = vmatpush1.bf16.msra.mxu1 %v706_v56 }
 0x203   :  { %1045 = vmatprep.subr.bf16.mxu0 %v709_v57  ;;  %1332 = vmatprep.subr.bf16.mxu1 %v711_v58 }
 0x206   :  { %1046 = vmatpush1.bf16.msra.mxu0 %v708_v59  ;;  %1333 = vmatpush1.bf16.msra.mxu1 %v710_v60 }
 0x207   :  { %1047 = vmatprep.subr.bf16.mxu0 %v713_v61  ;;  %1334 = vmatprep.subr.bf16.mxu1 %v715_v62 }
 0x20a   :  { %1048 = vmatpush1.bf16.msra.mxu0 %v712_v63  ;;  %1335 = vmatpush1.bf16.msra.mxu1 %v714_v7 }
 0x20b   :  { %1049 = vmatprep.subr.bf16.mxu0 %v717_v8  ;;  %1336 = vmatprep.subr.bf16.mxu1 %v719_v9 }
 0x20e   :  { %1050 = vmatpush1.bf16.msra.mxu0 %v716_v10  ;;  %1337 = vmatpush1.bf16.msra.mxu1 %v718_v11 }
 0x20f   :  { %1051 = vmatprep.subr.bf16.mxu0 %v721_v12  ;;  %1338 = vmatprep.subr.bf16.mxu1 %v723_v13 }
 0x212   :  { %1052 = vmatpush1.bf16.msra.mxu0 %v720_v14  ;;  %1339 = vmatpush1.bf16.msra.mxu1 %v722_v15 }
 0x215   :  { %1070 = vmatmul.mubr.bf16.vlgmr.msra.gmra.mrb[0].mxu0 %v7713_v16  ;;  %1357 = vmatmul.mubr.bf16.vlgmr.msra.gmra.mrb[0].mxu1 %v7713_v16 }
 0x2e8   :  { %v1071_v26 = vpop.f32.mrb[0].mxu0  ;;  %v1358_v27 = vpop.f32.mrb[0].mxu1 }
 0x2e9   :  { %v7721_v28 = vadd.f32 %v1071_v26, %v728_v6  ;;  %v7723_v29 = vadd.f32 %v1358_v27, %v736_v24  ;;  %v1073_v30 = vpop.f32.mrb[1].mxu0  ;;  %v1360_v31 = vpop.f32.mrb[1].mxu1 }
 0x2ea   :  { %v7722_v1 = vadd.f32 %v1073_v30, %v732_v0  ;;  %v7724_v32 = vadd.f32 %v1360_v31, %v740_v25  ;;  %v1075_v33 = vpop.f32.mrb[2].mxu0  ;;  %v1362_v34 = vpop.f32.mrb[2].mxu1 }
 0x2eb   :  { %v1365_v35 = vmax.f32 %v7721_v28, 0.0  ;;  %v1367_v36 = vmax.f32 %v7723_v29, 0.0  ;;  %v1076_v37 = vpop.f32.mrb[3].mxu0  ;;  %v1363_v2 = vpop.f32.mrb[3].mxu1 }
 0x2ec   :  { %v1366_v38 = vmax.f32 %v7722_v1, 0.0  ;;  %v1368_v39 = vmax.f32 %v7724_v32, 0.0 }
 0x2ed   :  { %v8419_v40 = vpack.c.bf16 %v1365_v35, %v1365_v35  ;;  %v8421_v41 = vpack.c.bf16 %v1367_v36, %v1367_v36 }
 0x2ee   :  { %v8423_v42 = vpack.c.bf16 %v1366_v38, %v1366_v38  ;;  %v8425_v3 = vpack.c.bf16 %v1368_v39, %v1368_v39 }
 0x2ef   :  { %8148 = dma.done.wait [#allocation9 + $0x1], 32768 }
 0x2f0   :  { %8149 = vsyncadd [#allocation9 + $0x1], 4294934528  ;;  %1711 = vmatprep.mubr.bf16.mxu0 %v8423_v42  ;;  %1793 = vmatprep.mubr.bf16.mxu1 %v8423_v42  ;;  %v1383_v43 = vld [vmem:[#allocation3 + $0x8] sm:$0xff]  ;;  %v1385_v44 = vld [vmem:[#allocation3 + $0x18] sm:$0xff] }
 0x2f1   :  { %v1382_v45 = vld [vmem:[#allocation3] sm:$0xff]  ;;  %1679 = vmatprep.subr.bf16.mxu0 %v1383_v43  ;;  %1761 = vmatprep.subr.bf16.mxu1 %v1385_v44  ;;  %v1384_v46 = vld [vmem:[#allocation3 + $0x10] sm:$0xff]  ;;  %v1391_v4 = vld [vmem:[#allocation3 + $0x48] sm:$0xff] }
 0x2f2   :  { %v1393_v47 = vld [vmem:[#allocation3 + $0x58] sm:$0xff]  ;;  %1680 = vmatpush1.bf16.msra.mxu0 %v1382_v45  ;;  %1762 = vmatpush1.bf16.msra.mxu1 %v1384_v46  ;;  %v1390_v48 = vld [vmem:[#allocation3 + $0x40] sm:$0xff]  ;;  %v1392_v49 = vld [vmem:[#allocation3 + $0x50] sm:$0xff] }
 0x2f3   :  { %1681 = vmatprep.subr.bf16.mxu0 %v1391_v4  ;;  %1763 = vmatprep.subr.bf16.mxu1 %v1393_v47  ;;  %v1399_v50 = vld [vmem:[#allocation3 + $0x88] sm:$0xff]  ;;  %v1401_v51 = vld [vmem:[#allocation3 + $0x98] sm:$0xff]  ;;  %v1398_v5 = vld [vmem:[#allocation3 + $0x80] sm:$0xff] }
 0x2f4   :  { %v1400_v52 = vld [vmem:[#allocation3 + $0x90] sm:$0xff]  ;;  %v1407_v53 = vld [vmem:[#allocation3 + $0xc8] sm:$0xff]  ;;  %v1409_v54 = vld [vmem:[#allocation3 + $0xd8] sm:$0xff] }
 0x2f5   :  { %v1406_v55 = vld [vmem:[#allocation3 + $0xc0] sm:$0xff]  ;;  %v1408_v56 = vld [vmem:[#allocation3 + $0xd0] sm:$0xff]  ;;  %v1415_v57 = vld [vmem:[#allocation3 + $0x108] sm:$0xff] }
 0x2f6   :  { %1682 = vmatpush1.bf16.msra.mxu0 %v1390_v48  ;;  %1764 = vmatpush1.bf16.msra.mxu1 %v1392_v49  ;;  %v1417_v58 = vld [vmem:[#allocation3 + $0x118] sm:$0xff]  ;;  %v1414_v59 = vld [vmem:[#allocation3 + $0x100] sm:$0xff]  ;;  %v1416_v60 = vld [vmem:[#allocation3 + $0x110] sm:$0xff] }
 0x2f7   :  { %1683 = vmatprep.subr.bf16.mxu0 %v1399_v50  ;;  %1765 = vmatprep.subr.bf16.mxu1 %v1401_v51  ;;  %v1423_v61 = vld [vmem:[#allocation3 + $0x148] sm:$0xff]  ;;  %v1425_v62 = vld [vmem:[#allocation3 + $0x158] sm:$0xff]  ;;  %v1422_v63 = vld [vmem:[#allocation3 + $0x140] sm:$0xff] }
 0x2f8   :  { %v1424_v7 = vld [vmem:[#allocation3 + $0x150] sm:$0xff]  ;;  %v1431_v8 = vld [vmem:[#allocation3 + $0x188] sm:$0xff]  ;;  %v1433_v9 = vld [vmem:[#allocation3 + $0x198] sm:$0xff] }
 0x2f9   :  { %v1430_v10 = vld [vmem:[#allocation3 + $0x180] sm:$0xff]  ;;  %v1432_v11 = vld [vmem:[#allocation3 + $0x190] sm:$0xff]  ;;  %v1439_v12 = vld [vmem:[#allocation3 + $0x1c8] sm:$0xff] }
 0x2fa   :  { %1684 = vmatpush1.bf16.msra.mxu0 %v1398_v5  ;;  %1766 = vmatpush1.bf16.msra.mxu1 %v1400_v52  ;;  %v1441_v13 = vld [vmem:[#allocation3 + $0x1d8] sm:$0xff]  ;;  %v1438_v14 = vld [vmem:[#allocation3 + $0x1c0] sm:$0xff]  ;;  %v1440_v15 = vld [vmem:[#allocation3 + $0x1d0] sm:$0xff] }
 0x2fb   :  { %1685 = vmatprep.subr.bf16.mxu0 %v1407_v53  ;;  %1767 = vmatprep.subr.bf16.mxu1 %v1409_v54  ;;  %v1447_v16 = vld [vmem:[#allocation3 + $0x208] sm:$0xff]  ;;  %v1449_v17 = vld [vmem:[#allocation3 + $0x218] sm:$0xff]  ;;  %v1446_v21 = vld [vmem:[#allocation3 + $0x200] sm:$0xff] }
 0x2fc   :  { %v1448_v6 = vld [vmem:[#allocation3 + $0x210] sm:$0xff]  ;;  %v1455_v24 = vld [vmem:[#allocation3 + $0x248] sm:$0xff]  ;;  %v1457_v0 = vld [vmem:[#allocation3 + $0x258] sm:$0xff] }
 0x2fd   :  { %v1454_v25 = vld [vmem:[#allocation3 + $0x240] sm:$0xff]  ;;  %v1456_v26 = vld [vmem:[#allocation3 + $0x250] sm:$0xff]  ;;  %v1463_v27 = vld [vmem:[#allocation3 + $0x288] sm:$0xff] }
 0x2fe   :  { %1686 = vmatpush1.bf16.msra.mxu0 %v1406_v55  ;;  %1768 = vmatpush1.bf16.msra.mxu1 %v1408_v56  ;;  %v1465_v28 = vld [vmem:[#allocation3 + $0x298] sm:$0xff]  ;;  %v1462_v29 = vld [vmem:[#allocation3 + $0x280] sm:$0xff]  ;;  %v1464_v30 = vld [vmem:[#allocation3 + $0x290] sm:$0xff] }
 0x2ff   :  { %1687 = vmatprep.subr.bf16.mxu0 %v1415_v57  ;;  %1769 = vmatprep.subr.bf16.mxu1 %v1417_v58  ;;  %v1471_v31 = vld [vmem:[#allocation3 + $0x2c8] sm:$0xff]  ;;  %v1473_v1 = vld [vmem:[#allocation3 + $0x2d8] sm:$0xff]  ;;  %v1470_v32 = vld [vmem:[#allocation3 + $0x2c0] sm:$0xff] }
 0x300   :  { %v1472_v33 = vld [vmem:[#allocation3 + $0x2d0] sm:$0xff]  ;;  %v1479_v34 = vld [vmem:[#allocation3 + $0x308] sm:$0xff]  ;;  %v1481_v35 = vld [vmem:[#allocation3 + $0x318] sm:$0xff] }
 0x301   :  { %v1478_v36 = vld [vmem:[#allocation3 + $0x300] sm:$0xff]  ;;  %v1480_v37 = vld [vmem:[#allocation3 + $0x310] sm:$0xff]  ;;  %v1487_v2 = vld [vmem:[#allocation3 + $0x348] sm:$0xff] }
 0x302   :  { %1688 = vmatpush1.bf16.msra.mxu0 %v1414_v59  ;;  %1770 = vmatpush1.bf16.msra.mxu1 %v1416_v60  ;;  %v1489_v38 = vld [vmem:[#allocation3 + $0x358] sm:$0xff]  ;;  %v1486_v39 = vld [vmem:[#allocation3 + $0x340] sm:$0xff]  ;;  %v1488_v43 = vld [vmem:[#allocation3 + $0x350] sm:$0xff] }
 0x303   :  { %1689 = vmatprep.subr.bf16.mxu0 %v1423_v61  ;;  %1771 = vmatprep.subr.bf16.mxu1 %v1425_v62  ;;  %v1495_v44 = vld [vmem:[#allocation3 + $0x388] sm:$0xff]  ;;  %v1497_v45 = vld [vmem:[#allocation3 + $0x398] sm:$0xff]  ;;  %v1494_v46 = vld [vmem:[#allocation3 + $0x380] sm:$0xff] }
 0x304   :  { %v1496_v4 = vld [vmem:[#allocation3 + $0x390] sm:$0xff]  ;;  %v1503_v47 = vld [vmem:[#allocation3 + $0x3c8] sm:$0xff]  ;;  %v1505_v48 = vld [vmem:[#allocation3 + $0x3d8] sm:$0xff] }
 0x305   :  { %v1502_v49 = vld [vmem:[#allocation3 + $0x3c0] sm:$0xff]  ;;  %v1504_v50 = vld [vmem:[#allocation3 + $0x3d0] sm:$0xff]  ;;  %v1511_v51 = vld [vmem:[#allocation3 + $0x408] sm:$0xff] }
 0x306   :  { %1690 = vmatpush1.bf16.msra.mxu0 %v1422_v63  ;;  %1772 = vmatpush1.bf16.msra.mxu1 %v1424_v7  ;;  %v1513_v5 = vld [vmem:[#allocation3 + $0x418] sm:$0xff]  ;;  %v1510_v52 = vld [vmem:[#allocation3 + $0x400] sm:$0xff]  ;;  %v1512_v53 = vld [vmem:[#allocation3 + $0x410] sm:$0xff] }
 0x307   :  { %1691 = vmatprep.subr.bf16.mxu0 %v1431_v8  ;;  %1773 = vmatprep.subr.bf16.mxu1 %v1433_v9  ;;  %v1519_v54 = vld [vmem:[#allocation3 + $0x448] sm:$0xff]  ;;  %v1521_v55 = vld [vmem:[#allocation3 + $0x458] sm:$0xff]  ;;  %v1518_v56 = vld [vmem:[#allocation3 + $0x440] sm:$0xff] }
 0x308   :  { %v1520_v57 = vld [vmem:[#allocation3 + $0x450] sm:$0xff]  ;;  %v1527_v58 = vld [vmem:[#allocation3 + $0x488] sm:$0xff]  ;;  %v1529_v59 = vld [vmem:[#allocation3 + $0x498] sm:$0xff] }
 0x309   :  { %v1526_v60 = vld [vmem:[#allocation3 + $0x480] sm:$0xff]  ;;  %v1528_v61 = vld [vmem:[#allocation3 + $0x490] sm:$0xff]  ;;  %v1535_v62 = vld [vmem:[#allocation3 + $0x4c8] sm:$0xff] }
 0x30a   :  { %1692 = vmatpush1.bf16.msra.mxu0 %v1430_v10  ;;  %1774 = vmatpush1.bf16.msra.mxu1 %v1432_v11  ;;  %v1537_v63 = vld [vmem:[#allocation3 + $0x4d8] sm:$0xff]  ;;  %v1534_v7 = vld [vmem:[#allocation3 + $0x4c0] sm:$0xff]  ;;  %v1536_v8 = vld [vmem:[#allocation3 + $0x4d0] sm:$0xff] }
 0x30b   :  { %1693 = vmatprep.subr.bf16.mxu0 %v1439_v12  ;;  %1775 = vmatprep.subr.bf16.mxu1 %v1441_v13  ;;  %v1543_v9 = vld [vmem:[#allocation3 + $0x508] sm:$0xff]  ;;  %v1545_v10 = vld [vmem:[#allocation3 + $0x518] sm:$0xff]  ;;  %v1542_v11 = vld [vmem:[#allocation3 + $0x500] sm:$0xff] }
 0x30c   :  { %v1544_v12 = vld [vmem:[#allocation3 + $0x510] sm:$0xff]  ;;  %v1551_v13 = vld [vmem:[#allocation3 + $0x548] sm:$0xff] }
 0x30e   :  { %1694 = vmatpush1.bf16.msra.mxu0 %v1438_v14  ;;  %1776 = vmatpush1.bf16.msra.mxu1 %v1440_v15  ;;  %v1553_v14 = vld [vmem:[#allocation3 + $0x558] sm:$0xff]  ;;  %v1550_v15 = vld [vmem:[#allocation3 + $0x540] sm:$0xff] }
 0x30f   :  { %1695 = vmatprep.subr.bf16.mxu0 %v1447_v16  ;;  %1777 = vmatprep.subr.bf16.mxu1 %v1449_v17  ;;  %v1552_v16 = vld [vmem:[#allocation3 + $0x550] sm:$0xff]  ;;  %v1559_v17 = vld [vmem:[#allocation3 + $0x588] sm:$0xff] }
 0x312   :  { %1696 = vmatpush1.bf16.msra.mxu0 %v1446_v21  ;;  %1778 = vmatpush1.bf16.msra.mxu1 %v1448_v6  ;;  %v1561_v21 = vld [vmem:[#allocation3 + $0x598] sm:$0xff]  ;;  %v1558_v6 = vld [vmem:[#allocation3 + $0x580] sm:$0xff] }
 0x313   :  { %1697 = vmatprep.subr.bf16.mxu0 %v1455_v24  ;;  %1779 = vmatprep.subr.bf16.mxu1 %v1457_v0  ;;  %v1560_v24 = vld [vmem:[#allocation3 + $0x590] sm:$0xff]  ;;  %v1567_v0 = vld [vmem:[#allocation3 + $0x5c8] sm:$0xff] }
 0x316   :  { %1698 = vmatpush1.bf16.msra.mxu0 %v1454_v25  ;;  %1780 = vmatpush1.bf16.msra.mxu1 %v1456_v26  ;;  %v1569_v25 = vld [vmem:[#allocation3 + $0x5d8] sm:$0xff]  ;;  %v1566_v26 = vld [vmem:[#allocation3 + $0x5c0] sm:$0xff] }
 0x317   :  { %1699 = vmatprep.subr.bf16.mxu0 %v1463_v27  ;;  %1781 = vmatprep.subr.bf16.mxu1 %v1465_v28  ;;  %v1568_v27 = vld [vmem:[#allocation3 + $0x5d0] sm:$0xff]  ;;  %v1575_v28 = vld [vmem:[#allocation3 + $0x608] sm:$0xff] }
 0x31a   :  { %1700 = vmatpush1.bf16.msra.mxu0 %v1462_v29  ;;  %1782 = vmatpush1.bf16.msra.mxu1 %v1464_v30  ;;  %v1577_v29 = vld [vmem:[#allocation3 + $0x618] sm:$0xff]  ;;  %v1574_v30 = vld [vmem:[#allocation3 + $0x600] sm:$0xff] }
 0x31b   :  { %1701 = vmatprep.subr.bf16.mxu0 %v1471_v31  ;;  %1783 = vmatprep.subr.bf16.mxu1 %v1473_v1  ;;  %v1576_v31 = vld [vmem:[#allocation3 + $0x610] sm:$0xff]  ;;  %v1583_v1 = vld [vmem:[#allocation3 + $0x648] sm:$0xff] }
 0x31e   :  { %1702 = vmatpush1.bf16.msra.mxu0 %v1470_v32  ;;  %1784 = vmatpush1.bf16.msra.mxu1 %v1472_v33  ;;  %v1585_v32 = vld [vmem:[#allocation3 + $0x658] sm:$0xff]  ;;  %v1582_v33 = vld [vmem:[#allocation3 + $0x640] sm:$0xff] }
 0x31f   :  { %1703 = vmatprep.subr.bf16.mxu0 %v1479_v34  ;;  %1785 = vmatprep.subr.bf16.mxu1 %v1481_v35  ;;  %v1584_v34 = vld [vmem:[#allocation3 + $0x650] sm:$0xff]  ;;  %v1591_v35 = vld [vmem:[#allocation3 + $0x688] sm:$0xff] }
 0x322   :  { %1704 = vmatpush1.bf16.msra.mxu0 %v1478_v36  ;;  %1786 = vmatpush1.bf16.msra.mxu1 %v1480_v37  ;;  %v1593_v36 = vld [vmem:[#allocation3 + $0x698] sm:$0xff]  ;;  %v1590_v37 = vld [vmem:[#allocation3 + $0x680] sm:$0xff] }
 0x323   :  { %1705 = vmatprep.subr.bf16.mxu0 %v1487_v2  ;;  %1787 = vmatprep.subr.bf16.mxu1 %v1489_v38  ;;  %v1592_v2 = vld [vmem:[#allocation3 + $0x690] sm:$0xff]  ;;  %v1599_v38 = vld [vmem:[#allocation3 + $0x6c8] sm:$0xff] }
 0x326   :  { %1706 = vmatpush1.bf16.msra.mxu0 %v1486_v39  ;;  %1788 = vmatpush1.bf16.msra.mxu1 %v1488_v43  ;;  %v1601_v39 = vld [vmem:[#allocation3 + $0x6d8] sm:$0xff]  ;;  %v1598_v43 = vld [vmem:[#allocation3 + $0x6c0] sm:$0xff] }
 0x327   :  { %1707 = vmatprep.subr.bf16.mxu0 %v1495_v44  ;;  %1789 = vmatprep.subr.bf16.mxu1 %v1497_v45  ;;  %v1600_v44 = vld [vmem:[#allocation3 + $0x6d0] sm:$0xff]  ;;  %v1607_v45 = vld [vmem:[#allocation3 + $0x708] sm:$0xff] }
 0x32a   :  { %1708 = vmatpush1.bf16.msra.mxu0 %v1494_v46  ;;  %1790 = vmatpush1.bf16.msra.mxu1 %v1496_v4  ;;  %v1609_v46 = vld [vmem:[#allocation3 + $0x718] sm:$0xff]  ;;  %v1606_v4 = vld [vmem:[#allocation3 + $0x700] sm:$0xff] }
 0x32b   :  { %1709 = vmatprep.subr.bf16.mxu0 %v1503_v47  ;;  %1791 = vmatprep.subr.bf16.mxu1 %v1505_v48  ;;  %v1608_v47 = vld [vmem:[#allocation3 + $0x710] sm:$0xff]  ;;  %v1615_v48 = vld [vmem:[#allocation3 + $0x748] sm:$0xff] }
 0x32e   :  { %1710 = vmatpush1.bf16.msra.mxu0 %v1502_v49  ;;  %1792 = vmatpush1.bf16.msra.mxu1 %v1504_v50  ;;  %v1617_v49 = vld [vmem:[#allocation3 + $0x758] sm:$0xff]  ;;  %v1614_v50 = vld [vmem:[#allocation3 + $0x740] sm:$0xff] }
 0x32f   :  { %1720 = vmatprep.subr.bf16.mxu0 %v1511_v51  ;;  %1802 = vmatprep.subr.bf16.mxu1 %v1513_v5  ;;  %v1616_v51 = vld [vmem:[#allocation3 + $0x750] sm:$0xff]  ;;  %v1623_v5 = vld [vmem:[#allocation3 + $0x788] sm:$0xff] }
 0x331   :  { %1712 = vmatmul.mubr.bf16.vlgmr.msra.gmra.mrb[4].mxu0 %v8419_v40  ;;  %1794 = vmatmul.mubr.bf16.vlgmr.msra.gmra.mrb[4].mxu1 %v8419_v40 }
 0x332   :  { %1721 = vmatpush1.bf16.msra.mxu0 %v1510_v52  ;;  %1803 = vmatpush1.bf16.msra.mxu1 %v1512_v53  ;;  %v1625_v52 = vld [vmem:[#allocation3 + $0x798] sm:$0xff]  ;;  %v1622_v53 = vld [vmem:[#allocation3 + $0x780] sm:$0xff] }
 0x333   :  { %1722 = vmatprep.subr.bf16.mxu0 %v1519_v54  ;;  %1804 = vmatprep.subr.bf16.mxu1 %v1521_v55  ;;  %v1624_v54 = vld [vmem:[#allocation3 + $0x790] sm:$0xff]  ;;  %v1631_v55 = vld [vmem:[#allocation3 + $0x7c8] sm:$0xff] }
 0x334   :  { %1752 = vmatprep.mubr.bf16.mxu0 %v8425_v3  ;;  %1834 = vmatprep.mubr.bf16.mxu1 %v8425_v3 }
 0x336   :  { %1723 = vmatpush1.bf16.msra.mxu0 %v1518_v56  ;;  %1805 = vmatpush1.bf16.msra.mxu1 %v1520_v57  ;;  %v1633_v56 = vld [vmem:[#allocation3 + $0x7d8] sm:$0xff]  ;;  %v1630_v57 = vld [vmem:[#allocation3 + $0x7c0] sm:$0xff] }
 0x337   :  { %1724 = vmatprep.subr.bf16.mxu0 %v1527_v58  ;;  %1806 = vmatprep.subr.bf16.mxu1 %v1529_v59  ;;  %v1632_v58 = vld [vmem:[#allocation3 + $0x7d0] sm:$0xff]  ;;  %v1387_v59 = vld [vmem:[#allocation3 + $0x28] sm:$0xff] }
 0x33a   :  { %1725 = vmatpush1.bf16.msra.mxu0 %v1526_v60  ;;  %1807 = vmatpush1.bf16.msra.mxu1 %v1528_v61  ;;  %v1389_v60 = vld [vmem:[#allocation3 + $0x38] sm:$0xff]  ;;  %v1386_v61 = vld [vmem:[#allocation3 + $0x20] sm:$0xff] }
 0x33b   :  { %1726 = vmatprep.subr.bf16.mxu0 %v1535_v62  ;;  %1808 = vmatprep.subr.bf16.mxu1 %v1537_v63  ;;  %v1388_v62 = vld [vmem:[#allocation3 + $0x30] sm:$0xff]  ;;  %v1395_v63 = vld [vmem:[#allocation3 + $0x68] sm:$0xff] }
 0x33e   :  { %1727 = vmatpush1.bf16.msra.mxu0 %v1534_v7  ;;  %1809 = vmatpush1.bf16.msra.mxu1 %v1536_v8  ;;  %v1397_v7 = vld [vmem:[#allocation3 + $0x78] sm:$0xff]  ;;  %v1394_v8 = vld [vmem:[#allocation3 + $0x60] sm:$0xff] }
 0x33f   :  { %1728 = vmatprep.subr.bf16.mxu0 %v1543_v9  ;;  %1810 = vmatprep.subr.bf16.mxu1 %v1545_v10  ;;  %v1396_v9 = vld [vmem:[#allocation3 + $0x70] sm:$0xff]  ;;  %v1403_v10 = vld [vmem:[#allocation3 + $0xa8] sm:$0xff] }
 0x342   :  { %1729 = vmatpush1.bf16.msra.mxu0 %v1542_v11  ;;  %1811 = vmatpush1.bf16.msra.mxu1 %v1544_v12  ;;  %v1405_v11 = vld [vmem:[#allocation3 + $0xb8] sm:$0xff]  ;;  %v1402_v12 = vld [vmem:[#allocation3 + $0xa0] sm:$0xff] }
 0x343   :  { %1730 = vmatprep.subr.bf16.mxu0 %v1551_v13  ;;  %1812 = vmatprep.subr.bf16.mxu1 %v1553_v14  ;;  %v1404_v13 = vld [vmem:[#allocation3 + $0xb0] sm:$0xff]  ;;  %v1411_v14 = vld [vmem:[#allocation3 + $0xe8] sm:$0xff] }
 0x346   :  { %1731 = vmatpush1.bf16.msra.mxu0 %v1550_v15  ;;  %1813 = vmatpush1.bf16.msra.mxu1 %v1552_v16  ;;  %v1413_v15 = vld [vmem:[#allocation3 + $0xf8] sm:$0xff]  ;;  %v1410_v16 = vld [vmem:[#allocation3 + $0xe0] sm:$0xff] }
 0x347   :  { %1732 = vmatprep.subr.bf16.mxu0 %v1559_v17  ;;  %1814 = vmatprep.subr.bf16.mxu1 %v1561_v21  ;;  %v1412_v17 = vld [vmem:[#allocation3 + $0xf0] sm:$0xff]  ;;  %v1419_v21 = vld [vmem:[#allocation3 + $0x128] sm:$0xff] }
 0x34a   :  { %1733 = vmatpush1.bf16.msra.mxu0 %v1558_v6  ;;  %1815 = vmatpush1.bf16.msra.mxu1 %v1560_v24  ;;  %v1421_v6 = vld [vmem:[#allocation3 + $0x138] sm:$0xff]  ;;  %v1420_v24 = vld [vmem:[#allocation3 + $0x130] sm:$0xff] }
 0x34b   :  { %1734 = vmatprep.subr.bf16.mxu0 %v1567_v0  ;;  %1816 = vmatprep.subr.bf16.mxu1 %v1569_v25  ;;  %v1427_v0 = vld [vmem:[#allocation3 + $0x168] sm:$0xff]  ;;  %v1429_v25 = vld [vmem:[#allocation3 + $0x178] sm:$0xff] }
 0x34e   :  { %1735 = vmatpush1.bf16.msra.mxu0 %v1566_v26  ;;  %1817 = vmatpush1.bf16.msra.mxu1 %v1568_v27  ;;  %v1426_v26 = vld [vmem:[#allocation3 + $0x160] sm:$0xff]  ;;  %v1428_v27 = vld [vmem:[#allocation3 + $0x170] sm:$0xff] }
 0x34f   :  { %1736 = vmatprep.subr.bf16.mxu0 %v1575_v28  ;;  %1818 = vmatprep.subr.bf16.mxu1 %v1577_v29  ;;  %v1435_v28 = vld [vmem:[#allocation3 + $0x1a8] sm:$0xff]  ;;  %v1437_v29 = vld [vmem:[#allocation3 + $0x1b8] sm:$0xff] }
 0x352   :  { %1737 = vmatpush1.bf16.msra.mxu0 %v1574_v30  ;;  %1819 = vmatpush1.bf16.msra.mxu1 %v1576_v31  ;;  %v1434_v30 = vld [vmem:[#allocation3 + $0x1a0] sm:$0xff]  ;;  %v1436_v31 = vld [vmem:[#allocation3 + $0x1b0] sm:$0xff] }
 0x353   :  { %1738 = vmatprep.subr.bf16.mxu0 %v1583_v1  ;;  %1820 = vmatprep.subr.bf16.mxu1 %v1585_v32  ;;  %v1443_v1 = vld [vmem:[#allocation3 + $0x1e8] sm:$0xff]  ;;  %v1445_v32 = vld [vmem:[#allocation3 + $0x1f8] sm:$0xff] }
 0x356   :  { %1739 = vmatpush1.bf16.msra.mxu0 %v1582_v33  ;;  %1821 = vmatpush1.bf16.msra.mxu1 %v1584_v34  ;;  %v1442_v33 = vld [vmem:[#allocation3 + $0x1e0] sm:$0xff]  ;;  %v1444_v34 = vld [vmem:[#allocation3 + $0x1f0] sm:$0xff] }
 0x357   :  { %1740 = vmatprep.subr.bf16.mxu0 %v1591_v35  ;;  %1822 = vmatprep.subr.bf16.mxu1 %v1593_v36  ;;  %v1451_v35 = vld [vmem:[#allocation3 + $0x228] sm:$0xff]  ;;  %v1453_v36 = vld [vmem:[#allocation3 + $0x238] sm:$0xff] }
 0x35a   :  { %1741 = vmatpush1.bf16.msra.mxu0 %v1590_v37  ;;  %1823 = vmatpush1.bf16.msra.mxu1 %v1592_v2  ;;  %v1450_v37 = vld [vmem:[#allocation3 + $0x220] sm:$0xff]  ;;  %v1452_v2 = vld [vmem:[#allocation3 + $0x230] sm:$0xff] }
 0x35b   :  { %1742 = vmatprep.subr.bf16.mxu0 %v1599_v38  ;;  %1824 = vmatprep.subr.bf16.mxu1 %v1601_v39  ;;  %v1459_v38 = vld [vmem:[#allocation3 + $0x268] sm:$0xff]  ;;  %v1461_v39 = vld [vmem:[#allocation3 + $0x278] sm:$0xff] }
 0x35e   :  { %1743 = vmatpush1.bf16.msra.mxu0 %v1598_v43  ;;  %1825 = vmatpush1.bf16.msra.mxu1 %v1600_v44  ;;  %v1458_v43 = vld [vmem:[#allocation3 + $0x260] sm:$0xff]  ;;  %v1460_v44 = vld [vmem:[#allocation3 + $0x270] sm:$0xff] }
 0x35f   :  { %1744 = vmatprep.subr.bf16.mxu0 %v1607_v45  ;;  %1826 = vmatprep.subr.bf16.mxu1 %v1609_v46  ;;  %v1467_v45 = vld [vmem:[#allocation3 + $0x2a8] sm:$0xff]  ;;  %v1469_v46 = vld [vmem:[#allocation3 + $0x2b8] sm:$0xff] }
 0x362   :  { %1745 = vmatpush1.bf16.msra.mxu0 %v1606_v4  ;;  %1827 = vmatpush1.bf16.msra.mxu1 %v1608_v47  ;;  %v1466_v4 = vld [vmem:[#allocation3 + $0x2a0] sm:$0xff]  ;;  %v1468_v47 = vld [vmem:[#allocation3 + $0x2b0] sm:$0xff] }
 0x363   :  { %1746 = vmatprep.subr.bf16.mxu0 %v1615_v48  ;;  %1828 = vmatprep.subr.bf16.mxu1 %v1617_v49  ;;  %v1475_v48 = vld [vmem:[#allocation3 + $0x2e8] sm:$0xff]  ;;  %v1477_v49 = vld [vmem:[#allocation3 + $0x2f8] sm:$0xff] }
 0x366   :  { %1747 = vmatpush1.bf16.msra.mxu0 %v1614_v50  ;;  %1829 = vmatpush1.bf16.msra.mxu1 %v1616_v51  ;;  %v1474_v50 = vld [vmem:[#allocation3 + $0x2e0] sm:$0xff]  ;;  %v1476_v51 = vld [vmem:[#allocation3 + $0x2f0] sm:$0xff] }
 0x367   :  { %1748 = vmatprep.subr.bf16.mxu0 %v1623_v5  ;;  %1830 = vmatprep.subr.bf16.mxu1 %v1625_v52  ;;  %v1483_v5 = vld [vmem:[#allocation3 + $0x328] sm:$0xff]  ;;  %v1485_v52 = vld [vmem:[#allocation3 + $0x338] sm:$0xff] }
 0x36a   :  { %1749 = vmatpush1.bf16.msra.mxu0 %v1622_v53  ;;  %1831 = vmatpush1.bf16.msra.mxu1 %v1624_v54  ;;  %v1482_v53 = vld [vmem:[#allocation3 + $0x320] sm:$0xff]  ;;  %v1484_v54 = vld [vmem:[#allocation3 + $0x330] sm:$0xff] }
 0x36b   :  { %1750 = vmatprep.subr.bf16.mxu0 %v1631_v55  ;;  %1832 = vmatprep.subr.bf16.mxu1 %v1633_v56  ;;  %v1491_v55 = vld [vmem:[#allocation3 + $0x368] sm:$0xff]  ;;  %v1493_v56 = vld [vmem:[#allocation3 + $0x378] sm:$0xff] }
 0x36e   :  { %1751 = vmatpush1.bf16.msra.mxu0 %v1630_v57  ;;  %1833 = vmatpush1.bf16.msra.mxu1 %v1632_v58  ;;  %v1490_v57 = vld [vmem:[#allocation3 + $0x360] sm:$0xff]  ;;  %v1492_v58 = vld [vmem:[#allocation3 + $0x370] sm:$0xff] }
 0x36f   :  { %1843 = vmatprep.subr.bf16.mxu0 %v1387_v59  ;;  %1925 = vmatprep.subr.bf16.mxu1 %v1389_v60  ;;  %v1499_v59 = vld [vmem:[#allocation3 + $0x3a8] sm:$0xff]  ;;  %v1501_v60 = vld [vmem:[#allocation3 + $0x3b8] sm:$0xff] }
 0x371   :  { %1753 = vmatmul.mubr.bf16.vlgmr.msra.gmra.mrb[4].mxu0 %v8421_v41  ;;  %1835 = vmatmul.mubr.bf16.vlgmr.msra.gmra.mrb[4].mxu1 %v8421_v41 }
 0x372   :  { %1844 = vmatpush1.bf16.msra.mxu0 %v1386_v61  ;;  %1926 = vmatpush1.bf16.msra.mxu1 %v1388_v62  ;;  %v1498_v61 = vld [vmem:[#allocation3 + $0x3a0] sm:$0xff]  ;;  %v1500_v62 = vld [vmem:[#allocation3 + $0x3b0] sm:$0xff] }
 0x373   :  { %1845 = vmatprep.subr.bf16.mxu0 %v1395_v63  ;;  %1927 = vmatprep.subr.bf16.mxu1 %v1397_v7  ;;  %v1507_v63 = vld [vmem:[#allocation3 + $0x3e8] sm:$0xff]  ;;  %v1509_v7 = vld [vmem:[#allocation3 + $0x3f8] sm:$0xff] }
 0x374   :  { %1875 = vmatprep.mubr.bf16.mxu0 %v8423_v42  ;;  %1957 = vmatprep.mubr.bf16.mxu1 %v8423_v42  ;;  %v1418_v42 = vld [vmem:[#allocation3 + $0x120] sm:$0xff] }
 0x376   :  { %1846 = vmatpush1.bf16.msra.mxu0 %v1394_v8  ;;  %1928 = vmatpush1.bf16.msra.mxu1 %v1396_v9  ;;  %v1506_v8 = vld [vmem:[#allocation3 + $0x3e0] sm:$0xff]  ;;  %v1508_v9 = vld [vmem:[#allocation3 + $0x3f0] sm:$0xff] }
 0x377   :  { %1847 = vmatprep.subr.bf16.mxu0 %v1403_v10  ;;  %1929 = vmatprep.subr.bf16.mxu1 %v1405_v11  ;;  %v1515_v10 = vld [vmem:[#allocation3 + $0x428] sm:$0xff]  ;;  %v1517_v11 = vld [vmem:[#allocation3 + $0x438] sm:$0xff] }
 0x37a   :  { %1848 = vmatpush1.bf16.msra.mxu0 %v1402_v12  ;;  %1930 = vmatpush1.bf16.msra.mxu1 %v1404_v13  ;;  %v1514_v12 = vld [vmem:[#allocation3 + $0x420] sm:$0xff]  ;;  %v1516_v13 = vld [vmem:[#allocation3 + $0x430] sm:$0xff] }
 0x37b   :  { %1849 = vmatprep.subr.bf16.mxu0 %v1411_v14  ;;  %1931 = vmatprep.subr.bf16.mxu1 %v1413_v15  ;;  %v1523_v14 = vld [vmem:[#allocation3 + $0x468] sm:$0xff]  ;;  %v1525_v15 = vld [vmem:[#allocation3 + $0x478] sm:$0xff] }
 0x37e   :  { %1850 = vmatpush1.bf16.msra.mxu0 %v1410_v16  ;;  %1932 = vmatpush1.bf16.msra.mxu1 %v1412_v17  ;;  %v1522_v16 = vld [vmem:[#allocation3 + $0x460] sm:$0xff]  ;;  %v1524_v17 = vld [vmem:[#allocation3 + $0x470] sm:$0xff] }
 0x37f   :  { %1851 = vmatprep.subr.bf16.mxu0 %v1419_v21  ;;  %1933 = vmatprep.subr.bf16.mxu1 %v1421_v6  ;;  %v1531_v21 = vld [vmem:[#allocation3 + $0x4a8] sm:$0xff]  ;;  %v1533_v6 = vld [vmem:[#allocation3 + $0x4b8] sm:$0xff] }
 0x382   :  { %1852 = vmatpush1.bf16.msra.mxu0 %v1418_v42  ;;  %1934 = vmatpush1.bf16.msra.mxu1 %v1420_v24  ;;  %v1530_v42 = vld [vmem:[#allocation3 + $0x4a0] sm:$0xff]  ;;  %v1532_v24 = vld [vmem:[#allocation3 + $0x4b0] sm:$0xff] }
 0x383   :  { %1853 = vmatprep.subr.bf16.mxu0 %v1427_v0  ;;  %1935 = vmatprep.subr.bf16.mxu1 %v1429_v25  ;;  %v1539_v0 = vld [vmem:[#allocation3 + $0x4e8] sm:$0xff]  ;;  %v1538_v25 = vld [vmem:[#allocation3 + $0x4e0] sm:$0xff] }
 0x386   :  { %1854 = vmatpush1.bf16.msra.mxu0 %v1426_v26  ;;  %1936 = vmatpush1.bf16.msra.mxu1 %v1428_v27  ;;  %v1540_v26 = vld [vmem:[#allocation3 + $0x4f0] sm:$0xff]  ;;  %v1547_v27 = vld [vmem:[#allocation3 + $0x528] sm:$0xff] }
 0x387   :  { %1855 = vmatprep.subr.bf16.mxu0 %v1435_v28  ;;  %1937 = vmatprep.subr.bf16.mxu1 %v1437_v29  ;;  %v1549_v28 = vld [vmem:[#allocation3 + $0x538] sm:$0xff]  ;;  %v1548_v29 = vld [vmem:[#allocation3 + $0x530] sm:$0xff] }
 0x38a   :  { %1856 = vmatpush1.bf16.msra.mxu0 %v1434_v30  ;;  %1938 = vmatpush1.bf16.msra.mxu1 %v1436_v31  ;;  %v1555_v30 = vld [vmem:[#allocation3 + $0x568] sm:$0xff]  ;;  %v1557_v31 = vld [vmem:[#allocation3 + $0x578] sm:$0xff] }
 0x38b   :  { %1857 = vmatprep.subr.bf16.mxu0 %v1443_v1  ;;  %1939 = vmatprep.subr.bf16.mxu1 %v1445_v32  ;;  %v1554_v1 = vld [vmem:[#allocation3 + $0x560] sm:$0xff]  ;;  %v1556_v32 = vld [vmem:[#allocation3 + $0x570] sm:$0xff] }
 0x38e   :  { %1858 = vmatpush1.bf16.msra.mxu0 %v1442_v33  ;;  %1940 = vmatpush1.bf16.msra.mxu1 %v1444_v34  ;;  %v1563_v33 = vld [vmem:[#allocation3 + $0x5a8] sm:$0xff]  ;;  %v1565_v34 = vld [vmem:[#allocation3 + $0x5b8] sm:$0xff] }
 0x38f   :  { %1859 = vmatprep.subr.bf16.mxu0 %v1451_v35  ;;  %1941 = vmatprep.subr.bf16.mxu1 %v1453_v36  ;;  %v1562_v35 = vld [vmem:[#allocation3 + $0x5a0] sm:$0xff]  ;;  %v1564_v36 = vld [vmem:[#allocation3 + $0x5b0] sm:$0xff] }
 0x392   :  { %1860 = vmatpush1.bf16.msra.mxu0 %v1450_v37  ;;  %1942 = vmatpush1.bf16.msra.mxu1 %v1452_v2  ;;  %v1571_v37 = vld [vmem:[#allocation3 + $0x5e8] sm:$0xff]  ;;  %v1573_v2 = vld [vmem:[#allocation3 + $0x5f8] sm:$0xff] }
 0x393   :  { %1861 = vmatprep.subr.bf16.mxu0 %v1459_v38  ;;  %1943 = vmatprep.subr.bf16.mxu1 %v1461_v39  ;;  %v1570_v38 = vld [vmem:[#allocation3 + $0x5e0] sm:$0xff]  ;;  %v1572_v39 = vld [vmem:[#allocation3 + $0x5f0] sm:$0xff] }
 0x396   :  { %1862 = vmatpush1.bf16.msra.mxu0 %v1458_v43  ;;  %1944 = vmatpush1.bf16.msra.mxu1 %v1460_v44  ;;  %v1579_v43 = vld [vmem:[#allocation3 + $0x628] sm:$0xff]  ;;  %v1581_v44 = vld [vmem:[#allocation3 + $0x638] sm:$0xff] }
 0x397   :  { %1863 = vmatprep.subr.bf16.mxu0 %v1467_v45  ;;  %1945 = vmatprep.subr.bf16.mxu1 %v1469_v46  ;;  %v1578_v45 = vld [vmem:[#allocation3 + $0x620] sm:$0xff]  ;;  %v1580_v46 = vld [vmem:[#allocation3 + $0x630] sm:$0xff] }
 0x39a   :  { %1864 = vmatpush1.bf16.msra.mxu0 %v1466_v4  ;;  %1946 = vmatpush1.bf16.msra.mxu1 %v1468_v47  ;;  %v1587_v4 = vld [vmem:[#allocation3 + $0x668] sm:$0xff]  ;;  %v1589_v47 = vld [vmem:[#allocation3 + $0x678] sm:$0xff] }
 0x39b   :  { %1865 = vmatprep.subr.bf16.mxu0 %v1475_v48  ;;  %1947 = vmatprep.subr.bf16.mxu1 %v1477_v49  ;;  %v1586_v48 = vld [vmem:[#allocation3 + $0x660] sm:$0xff]  ;;  %v1588_v49 = vld [vmem:[#allocation3 + $0x670] sm:$0xff] }
 0x39e   :  { %1866 = vmatpush1.bf16.msra.mxu0 %v1474_v50  ;;  %1948 = vmatpush1.bf16.msra.mxu1 %v1476_v51  ;;  %v1595_v50 = vld [vmem:[#allocation3 + $0x6a8] sm:$0xff]  ;;  %v1597_v51 = vld [vmem:[#allocation3 + $0x6b8] sm:$0xff] }
 0x39f   :  { %1867 = vmatprep.subr.bf16.mxu0 %v1483_v5  ;;  %1949 = vmatprep.subr.bf16.mxu1 %v1485_v52  ;;  %v1594_v5 = vld [vmem:[#allocation3 + $0x6a0] sm:$0xff]  ;;  %v1596_v52 = vld [vmem:[#allocation3 + $0x6b0] sm:$0xff] }
 0x3a2   :  { %1868 = vmatpush1.bf16.msra.mxu0 %v1482_v53  ;;  %1950 = vmatpush1.bf16.msra.mxu1 %v1484_v54  ;;  %v1603_v53 = vld [vmem:[#allocation3 + $0x6e8] sm:$0xff]  ;;  %v1605_v54 = vld [vmem:[#allocation3 + $0x6f8] sm:$0xff] }
 0x3a3   :  { %1869 = vmatprep.subr.bf16.mxu0 %v1491_v55  ;;  %1951 = vmatprep.subr.bf16.mxu1 %v1493_v56  ;;  %v1602_v55 = vld [vmem:[#allocation3 + $0x6e0] sm:$0xff]  ;;  %v1604_v56 = vld [vmem:[#allocation3 + $0x6f0] sm:$0xff] }
 0x3a6   :  { %1870 = vmatpush1.bf16.msra.mxu0 %v1490_v57  ;;  %1952 = vmatpush1.bf16.msra.mxu1 %v1492_v58  ;;  %v1611_v57 = vld [vmem:[#allocation3 + $0x728] sm:$0xff]  ;;  %v1613_v58 = vld [vmem:[#allocation3 + $0x738] sm:$0xff] }
 0x3a7   :  { %1871 = vmatprep.subr.bf16.mxu0 %v1499_v59  ;;  %1953 = vmatprep.subr.bf16.mxu1 %v1501_v60  ;;  %v1610_v59 = vld [vmem:[#allocation3 + $0x720] sm:$0xff]  ;;  %v1612_v60 = vld [vmem:[#allocation3 + $0x730] sm:$0xff] }
 0x3aa   :  { %1872 = vmatpush1.bf16.msra.mxu0 %v1498_v61  ;;  %1954 = vmatpush1.bf16.msra.mxu1 %v1500_v62  ;;  %v1619_v61 = vld [vmem:[#allocation3 + $0x768] sm:$0xff]  ;;  %v1621_v62 = vld [vmem:[#allocation3 + $0x778] sm:$0xff] }
 0x3ab   :  { %1873 = vmatprep.subr.bf16.mxu0 %v1507_v63  ;;  %1955 = vmatprep.subr.bf16.mxu1 %v1509_v7  ;;  %v1618_v63 = vld [vmem:[#allocation3 + $0x760] sm:$0xff]  ;;  %v1620_v7 = vld [vmem:[#allocation3 + $0x770] sm:$0xff] }
 0x3ae   :  { %1874 = vmatpush1.bf16.msra.mxu0 %v1506_v8  ;;  %1956 = vmatpush1.bf16.msra.mxu1 %v1508_v9  ;;  %v1627_v8 = vld [vmem:[#allocation3 + $0x7a8] sm:$0xff]  ;;  %v1629_v9 = vld [vmem:[#allocation3 + $0x7b8] sm:$0xff] }
 0x3af   :  { %1884 = vmatprep.subr.bf16.mxu0 %v1515_v10  ;;  %1966 = vmatprep.subr.bf16.mxu1 %v1517_v11  ;;  %v1626_v10 = vld [vmem:[#allocation3 + $0x7a0] sm:$0xff]  ;;  %v1628_v11 = vld [vmem:[#allocation3 + $0x7b0] sm:$0xff] }
 0x3b1   :  { %1876 = vmatmul.mubr.bf16.vlgmr.msra.gmra.mrb[8].mxu0 %v8419_v40  ;;  %1958 = vmatmul.mubr.bf16.vlgmr.msra.gmra.mrb[8].mxu1 %v8419_v40  ;;  %v1541_v40 = vld [vmem:[#allocation3 + $0x4f8] sm:$0xff] }
 0x3b2   :  { %1885 = vmatpush1.bf16.msra.mxu0 %v1514_v12  ;;  %1967 = vmatpush1.bf16.msra.mxu1 %v1516_v13  ;;  %v1635_v12 = vld [vmem:[#allocation3 + $0x7e8] sm:$0xff]  ;;  %v1637_v13 = vld [vmem:[#allocation3 + $0x7f8] sm:$0xff] }
 0x3b3   :  { %1886 = vmatprep.subr.bf16.mxu0 %v1523_v14  ;;  %1968 = vmatprep.subr.bf16.mxu1 %v1525_v15  ;;  %v1634_v14 = vld [vmem:[#allocation3 + $0x7e0] sm:$0xff]  ;;  %v1636_v15 = vld [vmem:[#allocation3 + $0x7f0] sm:$0xff] }
 0x3b4   :  { %1916 = vmatprep.mubr.bf16.mxu0 %v8425_v3  ;;  %1998 = vmatprep.mubr.bf16.mxu1 %v8425_v3  ;;  %v1546_v3 = vld [vmem:[#allocation3 + $0x520] sm:$0xff] }
 0x3b6   :  { %1887 = vmatpush1.bf16.msra.mxu0 %v1522_v16  ;;  %1969 = vmatpush1.bf16.msra.mxu1 %v1524_v17  ;;  %v1381_v16 = vld [vmem:[#allocation13 + $0x4] sm:$0xff] }
 0x3b7   :  { %1888 = vmatprep.subr.bf16.mxu0 %v1531_v21  ;;  %1970 = vmatprep.subr.bf16.mxu1 %v1533_v6  ;;  %v1642_v17 = vrot.slane %v1381_v16, %v8404_v19  ;;  %v1650_v21 = vrot.slane %v1381_v16, %v8407_v20  ;;  %v1646_v6 = vrot.slane %v1381_v16, %v8410_v22 }
 0x3ba   :  { %1889 = vmatpush1.bf16.msra.mxu0 %v1530_v42  ;;  %1971 = vmatpush1.bf16.msra.mxu1 %v1532_v24  ;;  %v1654_v42 = vrot.slane %v1381_v16, %v8413_v23 }
 0x3bb   :  { %1890 = vmatprep.subr.bf16.mxu0 %v1539_v0  ;;  %1972 = vmatprep.subr.bf16.mxu1 %v1541_v40 }
 0x3be   :  { %1891 = vmatpush1.bf16.msra.mxu0 %v1538_v25  ;;  %1973 = vmatpush1.bf16.msra.mxu1 %v1540_v26 }
 0x3bf   :  { %1892 = vmatprep.subr.bf16.mxu0 %v1547_v27  ;;  %1974 = vmatprep.subr.bf16.mxu1 %v1549_v28 }
 0x3c2   :  { %1893 = vmatpush1.bf16.msra.mxu0 %v1546_v3  ;;  %1975 = vmatpush1.bf16.msra.mxu1 %v1548_v29 }
 0x3c3   :  { %1894 = vmatprep.subr.bf16.mxu0 %v1555_v30  ;;  %1976 = vmatprep.subr.bf16.mxu1 %v1557_v31 }
 0x3c6   :  { %1895 = vmatpush1.bf16.msra.mxu0 %v1554_v1  ;;  %1977 = vmatpush1.bf16.msra.mxu1 %v1556_v32 }
 0x3c7   :  { %1896 = vmatprep.subr.bf16.mxu0 %v1563_v33  ;;  %1978 = vmatprep.subr.bf16.mxu1 %v1565_v34 }
 0x3ca   :  { %1897 = vmatpush1.bf16.msra.mxu0 %v1562_v35  ;;  %1979 = vmatpush1.bf16.msra.mxu1 %v1564_v36 }
 0x3cb   :  { %1898 = vmatprep.subr.bf16.mxu0 %v1571_v37  ;;  %1980 = vmatprep.subr.bf16.mxu1 %v1573_v2 }
 0x3ce   :  { %1899 = vmatpush1.bf16.msra.mxu0 %v1570_v38  ;;  %1981 = vmatpush1.bf16.msra.mxu1 %v1572_v39  ;;  %v8456_v38 = vsub.s32 4, %v8401_v18  ;;  %v8459_v39 = vsub.s32 6, %v8401_v18 }
 0x3cf   :  { %1900 = vmatprep.subr.bf16.mxu0 %v1579_v43  ;;  %1982 = vmatprep.subr.bf16.mxu1 %v1581_v44  ;;  %v8462_v43 = vsub.s32 5, %v8401_v18  ;;  %v8465_v44 = vsub.s32 7, %v8401_v18 }
 0x3d2   :  { %1901 = vmatpush1.bf16.msra.mxu0 %v1578_v45  ;;  %1983 = vmatpush1.bf16.msra.mxu1 %v1580_v46  ;;  %v1658_v45 = vrot.slane %v1381_v16, %v8456_v38  ;;  %v1666_v46 = vrot.slane %v1381_v16, %v8459_v39 }
 0x3d3   :  { %1902 = vmatprep.subr.bf16.mxu0 %v1587_v4  ;;  %1984 = vmatprep.subr.bf16.mxu1 %v1589_v47  ;;  %v1662_v4 = vrot.slane %v1381_v16, %v8462_v43  ;;  %v1670_v47 = vrot.slane %v1381_v16, %v8465_v44 }
 0x3d6   :  { %1903 = vmatpush1.bf16.msra.mxu0 %v1586_v48  ;;  %1985 = vmatpush1.bf16.msra.mxu1 %v1588_v49 }
 0x3d7   :  { %1904 = vmatprep.subr.bf16.mxu0 %v1595_v50  ;;  %1986 = vmatprep.subr.bf16.mxu1 %v1597_v51 }
 0x3da   :  { %1905 = vmatpush1.bf16.msra.mxu0 %v1594_v5  ;;  %1987 = vmatpush1.bf16.msra.mxu1 %v1596_v52 }
 0x3db   :  { %1906 = vmatprep.subr.bf16.mxu0 %v1603_v53  ;;  %1988 = vmatprep.subr.bf16.mxu1 %v1605_v54 }
 0x3de   :  { %1907 = vmatpush1.bf16.msra.mxu0 %v1602_v55  ;;  %1989 = vmatpush1.bf16.msra.mxu1 %v1604_v56 }
 0x3df   :  { %1908 = vmatprep.subr.bf16.mxu0 %v1611_v57  ;;  %1990 = vmatprep.subr.bf16.mxu1 %v1613_v58 }
 0x3e2   :  { %1909 = vmatpush1.bf16.msra.mxu0 %v1610_v59  ;;  %1991 = vmatpush1.bf16.msra.mxu1 %v1612_v60 }
 0x3e3   :  { %1910 = vmatprep.subr.bf16.mxu0 %v1619_v61  ;;  %1992 = vmatprep.subr.bf16.mxu1 %v1621_v62 }
 0x3e6   :  { %1911 = vmatpush1.bf16.msra.mxu0 %v1618_v63  ;;  %1993 = vmatpush1.bf16.msra.mxu1 %v1620_v7 }
 0x3e7   :  { %1912 = vmatprep.subr.bf16.mxu0 %v1627_v8  ;;  %1994 = vmatprep.subr.bf16.mxu1 %v1629_v9 }
 0x3ea   :  { %1913 = vmatpush1.bf16.msra.mxu0 %v1626_v10  ;;  %1995 = vmatpush1.bf16.msra.mxu1 %v1628_v11 }
 0x3eb   :  { %1914 = vmatprep.subr.bf16.mxu0 %v1635_v12  ;;  %1996 = vmatprep.subr.bf16.mxu1 %v1637_v13 }
 0x3ee   :  { %1915 = vmatpush1.bf16.msra.mxu0 %v1634_v14  ;;  %1997 = vmatpush1.bf16.msra.mxu1 %v1636_v15 }
 0x3f1   :  { %1917 = vmatmul.mubr.bf16.vlgmr.msra.gmra.mrb[8].mxu0 %v8421_v41  ;;  %1999 = vmatmul.mubr.bf16.vlgmr.msra.gmra.mrb[8].mxu1 %v8421_v41 }
 0x444   :  { %v1754_v24 = vpop.f32.mrb[4].mxu0  ;;  %v1836_v0 = vpop.f32.mrb[4].mxu1 }
 0x445   :  { %v7725_v40 = vadd.f32 %v1754_v24, %v1642_v17  ;;  %v7727_v25 = vadd.f32 %v1836_v0, %v1650_v21  ;;  %v1756_v26 = vpop.f32.mrb[5].mxu0  ;;  %v1838_v27 = vpop.f32.mrb[5].mxu1 }
 0x446   :  { %v7726_v28 = vadd.f32 %v1756_v26, %v1646_v6  ;;  %v7728_v3 = vadd.f32 %v1838_v27, %v1654_v42  ;;  %v1758_v29 = vpop.f32.mrb[6].mxu0  ;;  %v1840_v30 = vpop.f32.mrb[6].mxu1 }
 0x447   :  { %v2007_v41 = vmax.f32 %v7725_v40, 0.0  ;;  %v2009_v31 = vmax.f32 %v7727_v25, 0.0  ;;  %v1759_v1 = vpop.f32.mrb[7].mxu0  ;;  %v1841_v32 = vpop.f32.mrb[7].mxu1 }
 0x448   :  { %v2008_v33 = vmax.f32 %v7726_v28, 0.0  ;;  %v2010_v34 = vmax.f32 %v7728_v3, 0.0 }
 0x449   :  { %v8447_v35 = vpack.c.bf16 %v2007_v41, %v2007_v41  ;;  %v8449_v36 = vpack.c.bf16 %v2009_v31, %v2009_v31 }
 0x44a   :  { %v8451_v37 = vpack.c.bf16 %v2008_v33, %v2008_v33  ;;  %v8453_v2 = vpack.c.bf16 %v2010_v34, %v2010_v34 }
 0x4c4   :  { %v1918_v48 = vpop.f32.mrb[8].mxu0  ;;  %v2000_v49 = vpop.f32.mrb[8].mxu1 }
 0x4c5   :  { %v7729_v50 = vadd.f32 %v1918_v48, %v1658_v45  ;;  %v7731_v51 = vadd.f32 %v2000_v49, %v1666_v46  ;;  %v1920_v5 = vpop.f32.mrb[9].mxu0  ;;  %v2002_v52 = vpop.f32.mrb[9].mxu1 }
 0x4c6   :  { %v7730_v53 = vadd.f32 %v1920_v5, %v1662_v4  ;;  %v7732_v54 = vadd.f32 %v2002_v52, %v1670_v47  ;;  %v1922_v55 = vpop.f32.mrb[10].mxu0  ;;  %v2004_v56 = vpop.f32.mrb[10].mxu1 }
 0x4c7   :  { %v2011_v18 = vmax.f32 %v7729_v50, 0.0  ;;  %v2013_v57 = vmax.f32 %v7731_v51, 0.0  ;;  %v1923_v58 = vpop.f32.mrb[11].mxu0  ;;  %v2005_v59 = vpop.f32.mrb[11].mxu1 }
 0x4c8   :  { %v2012_v60 = vmax.f32 %v7730_v53, 0.0  ;;  %v2014_v61 = vmax.f32 %v7732_v54, 0.0 }
 0x4c9   :  { %v8471_v62 = vpack.c.bf16 %v2011_v18, %v2011_v18  ;;  %v8473_v63 = vpack.c.bf16 %v2013_v57, %v2013_v57 }
 0x4ca   :  { %v8475_v7 = vpack.c.bf16 %v2012_v60, %v2012_v60  ;;  %v8477_v8 = vpack.c.bf16 %v2014_v61, %v2014_v61 }
 0x4cb   :  { %8150 = dma.done.wait [#allocation9 + $0x2], 65536 }
 0x4cc   :  { %8151 = vsyncadd [#allocation9 + $0x2], 4294901760  ;;  %2617 = vmatprep.mubr.bf16.mxu0 %v8451_v37  ;;  %2781 = vmatprep.mubr.bf16.mxu1 %v8451_v37  ;;  %v2033_v9 = vld [vmem:[#allocation4 + $0x8] sm:$0xff]  ;;  %v2035_v10 = vld [vmem:[#allocation4 + $0x18] sm:$0xff] }
 0x4cd   :  { %v2032_v11 = vld [vmem:[#allocation4] sm:$0xff]  ;;  %2585 = vmatprep.subr.bf16.mxu0 %v2033_v9  ;;  %2749 = vmatprep.subr.bf16.mxu1 %v2035_v10  ;;  %v2034_v12 = vld [vmem:[#allocation4 + $0x10] sm:$0xff]  ;;  %v2041_v13 = vld [vmem:[#allocation4 + $0x48] sm:$0xff] }
 0x4ce   :  { %v2043_v14 = vld [vmem:[#allocation4 + $0x58] sm:$0xff]  ;;  %2586 = vmatpush1.bf16.msra.mxu0 %v2032_v11  ;;  %2750 = vmatpush1.bf16.msra.mxu1 %v2034_v12  ;;  %v2040_v15 = vld [vmem:[#allocation4 + $0x40] sm:$0xff]  ;;  %v2042_v16 = vld [vmem:[#allocation4 + $0x50] sm:$0xff] }
 0x4cf   :  { %2587 = vmatprep.subr.bf16.mxu0 %v2041_v13  ;;  %2751 = vmatprep.subr.bf16.mxu1 %v2043_v14  ;;  %v2049_v17 = vld [vmem:[#allocation4 + $0x88] sm:$0xff]  ;;  %v2051_v21 = vld [vmem:[#allocation4 + $0x98] sm:$0xff]  ;;  %v2048_v6 = vld [vmem:[#allocation4 + $0x80] sm:$0xff] }
 0x4d0   :  { %v2050_v42 = vld [vmem:[#allocation4 + $0x90] sm:$0xff]  ;;  %v2057_v24 = vld [vmem:[#allocation4 + $0xc8] sm:$0xff]  ;;  %v2059_v0 = vld [vmem:[#allocation4 + $0xd8] sm:$0xff] }
 0x4d1   :  { %v2056_v40 = vld [vmem:[#allocation4 + $0xc0] sm:$0xff]  ;;  %v2058_v25 = vld [vmem:[#allocation4 + $0xd0] sm:$0xff]  ;;  %v2065_v26 = vld [vmem:[#allocation4 + $0x108] sm:$0xff] }
 0x4d2   :  { %2588 = vmatpush1.bf16.msra.mxu0 %v2040_v15  ;;  %2752 = vmatpush1.bf16.msra.mxu1 %v2042_v16  ;;  %v2067_v27 = vld [vmem:[#allocation4 + $0x118] sm:$0xff]  ;;  %v2064_v28 = vld [vmem:[#allocation4 + $0x100] sm:$0xff]  ;;  %v2066_v3 = vld [vmem:[#allocation4 + $0x110] sm:$0xff] }
 0x4d3   :  { %2589 = vmatprep.subr.bf16.mxu0 %v2049_v17  ;;  %2753 = vmatprep.subr.bf16.mxu1 %v2051_v21  ;;  %v2073_v29 = vld [vmem:[#allocation4 + $0x148] sm:$0xff]  ;;  %v2075_v30 = vld [vmem:[#allocation4 + $0x158] sm:$0xff]  ;;  %v2072_v41 = vld [vmem:[#allocation4 + $0x140] sm:$0xff] }
 0x4d4   :  { %v2074_v31 = vld [vmem:[#allocation4 + $0x150] sm:$0xff]  ;;  %v2081_v1 = vld [vmem:[#allocation4 + $0x188] sm:$0xff]  ;;  %v2083_v32 = vld [vmem:[#allocation4 + $0x198] sm:$0xff] }
 0x4d5   :  { %v2080_v33 = vld [vmem:[#allocation4 + $0x180] sm:$0xff]  ;;  %v2082_v34 = vld [vmem:[#allocation4 + $0x190] sm:$0xff]  ;;  %v2089_v45 = vld [vmem:[#allocation4 + $0x1c8] sm:$0xff] }
 0x4d6   :  { %2590 = vmatpush1.bf16.msra.mxu0 %v2048_v6  ;;  %2754 = vmatpush1.bf16.msra.mxu1 %v2050_v42  ;;  %v2091_v46 = vld [vmem:[#allocation4 + $0x1d8] sm:$0xff]  ;;  %v2088_v4 = vld [vmem:[#allocation4 + $0x1c0] sm:$0xff]  ;;  %v2090_v47 = vld [vmem:[#allocation4 + $0x1d0] sm:$0xff] }
 0x4d7   :  { %2591 = vmatprep.subr.bf16.mxu0 %v2057_v24  ;;  %2755 = vmatprep.subr.bf16.mxu1 %v2059_v0  ;;  %v2097_v48 = vld [vmem:[#allocation4 + $0x208] sm:$0xff]  ;;  %v2099_v49 = vld [vmem:[#allocation4 + $0x218] sm:$0xff]  ;;  %v2096_v50 = vld [vmem:[#allocation4 + $0x200] sm:$0xff] }
 0x4d8   :  { %v2098_v51 = vld [vmem:[#allocation4 + $0x210] sm:$0xff]  ;;  %v2105_v5 = vld [vmem:[#allocation4 + $0x248] sm:$0xff]  ;;  %v2107_v52 = vld [vmem:[#allocation4 + $0x258] sm:$0xff] }
 0x4d9   :  { %v2104_v53 = vld [vmem:[#allocation4 + $0x240] sm:$0xff]  ;;  %v2106_v54 = vld [vmem:[#allocation4 + $0x250] sm:$0xff]  ;;  %v2113_v55 = vld [vmem:[#allocation4 + $0x288] sm:$0xff] }
 0x4da   :  { %2592 = vmatpush1.bf16.msra.mxu0 %v2056_v40  ;;  %2756 = vmatpush1.bf16.msra.mxu1 %v2058_v25  ;;  %v2115_v56 = vld [vmem:[#allocation4 + $0x298] sm:$0xff]  ;;  %v2112_v18 = vld [vmem:[#allocation4 + $0x280] sm:$0xff]  ;;  %v2114_v57 = vld [vmem:[#allocation4 + $0x290] sm:$0xff] }
 0x4db   :  { %2593 = vmatprep.subr.bf16.mxu0 %v2065_v26  ;;  %2757 = vmatprep.subr.bf16.mxu1 %v2067_v27  ;;  %v2121_v58 = vld [vmem:[#allocation4 + $0x2c8] sm:$0xff]  ;;  %v2123_v59 = vld [vmem:[#allocation4 + $0x2d8] sm:$0xff]  ;;  %v2120_v60 = vld [vmem:[#allocation4 + $0x2c0] sm:$0xff] }
 0x4dc   :  { %v2122_v61 = vld [vmem:[#allocation4 + $0x2d0] sm:$0xff]  ;;  %v2129_v9 = vld [vmem:[#allocation4 + $0x308] sm:$0xff]  ;;  %v2131_v10 = vld [vmem:[#allocation4 + $0x318] sm:$0xff] }
 0x4dd   :  { %v2128_v11 = vld [vmem:[#allocation4 + $0x300] sm:$0xff]  ;;  %v2130_v12 = vld [vmem:[#allocation4 + $0x310] sm:$0xff]  ;;  %v2137_v13 = vld [vmem:[#allocation4 + $0x348] sm:$0xff] }
 0x4de   :  { %2594 = vmatpush1.bf16.msra.mxu0 %v2064_v28  ;;  %2758 = vmatpush1.bf16.msra.mxu1 %v2066_v3  ;;  %v2139_v14 = vld [vmem:[#allocation4 + $0x358] sm:$0xff]  ;;  %v2136_v15 = vld [vmem:[#allocation4 + $0x340] sm:$0xff]  ;;  %v2138_v16 = vld [vmem:[#allocation4 + $0x350] sm:$0xff] }
 0x4df   :  { %2595 = vmatprep.subr.bf16.mxu0 %v2073_v29  ;;  %2759 = vmatprep.subr.bf16.mxu1 %v2075_v30  ;;  %v2145_v17 = vld [vmem:[#allocation4 + $0x388] sm:$0xff]  ;;  %v2147_v21 = vld [vmem:[#allocation4 + $0x398] sm:$0xff]  ;;  %v2144_v6 = vld [vmem:[#allocation4 + $0x380] sm:$0xff] }
 0x4e0   :  { %v2146_v42 = vld [vmem:[#allocation4 + $0x390] sm:$0xff]  ;;  %v2153_v24 = vld [vmem:[#allocation4 + $0x3c8] sm:$0xff]  ;;  %v2155_v0 = vld [vmem:[#allocation4 + $0x3d8] sm:$0xff] }
 0x4e1   :  { %v2152_v40 = vld [vmem:[#allocation4 + $0x3c0] sm:$0xff]  ;;  %v2154_v25 = vld [vmem:[#allocation4 + $0x3d0] sm:$0xff]  ;;  %v2161_v26 = vld [vmem:[#allocation4 + $0x408] sm:$0xff] }
 0x4e2   :  { %2596 = vmatpush1.bf16.msra.mxu0 %v2072_v41  ;;  %2760 = vmatpush1.bf16.msra.mxu1 %v2074_v31  ;;  %v2163_v27 = vld [vmem:[#allocation4 + $0x418] sm:$0xff]  ;;  %v2160_v28 = vld [vmem:[#allocation4 + $0x400] sm:$0xff]  ;;  %v2162_v3 = vld [vmem:[#allocation4 + $0x410] sm:$0xff] }
 0x4e3   :  { %2597 = vmatprep.subr.bf16.mxu0 %v2081_v1  ;;  %2761 = vmatprep.subr.bf16.mxu1 %v2083_v32  ;;  %v2169_v29 = vld [vmem:[#allocation4 + $0x448] sm:$0xff]  ;;  %v2171_v30 = vld [vmem:[#allocation4 + $0x458] sm:$0xff]  ;;  %v2168_v41 = vld [vmem:[#allocation4 + $0x440] sm:$0xff] }
 0x4e4   :  { %v2170_v31 = vld [vmem:[#allocation4 + $0x450] sm:$0xff]  ;;  %v2177_v1 = vld [vmem:[#allocation4 + $0x488] sm:$0xff]  ;;  %v2179_v32 = vld [vmem:[#allocation4 + $0x498] sm:$0xff] }
 0x4e6   :  { %2598 = vmatpush1.bf16.msra.mxu0 %v2080_v33  ;;  %2762 = vmatpush1.bf16.msra.mxu1 %v2082_v34  ;;  %v2176_v33 = vld [vmem:[#allocation4 + $0x480] sm:$0xff]  ;;  %v2178_v34 = vld [vmem:[#allocation4 + $0x490] sm:$0xff] }
 0x4e7   :  { %2599 = vmatprep.subr.bf16.mxu0 %v2089_v45  ;;  %2763 = vmatprep.subr.bf16.mxu1 %v2091_v46  ;;  %v2185_v45 = vld [vmem:[#allocation4 + $0x4c8] sm:$0xff]  ;;  %v2187_v46 = vld [vmem:[#allocation4 + $0x4d8] sm:$0xff] }
 0x4ea   :  { %2600 = vmatpush1.bf16.msra.mxu0 %v2088_v4  ;;  %2764 = vmatpush1.bf16.msra.mxu1 %v2090_v47  ;;  %v2184_v4 = vld [vmem:[#allocation4 + $0x4c0] sm:$0xff]  ;;  %v2186_v47 = vld [vmem:[#allocation4 + $0x4d0] sm:$0xff] }
 0x4eb   :  { %2601 = vmatprep.subr.bf16.mxu0 %v2097_v48  ;;  %2765 = vmatprep.subr.bf16.mxu1 %v2099_v49  ;;  %v2193_v48 = vld [vmem:[#allocation4 + $0x508] sm:$0xff]  ;;  %v2195_v49 = vld [vmem:[#allocation4 + $0x518] sm:$0xff] }
 0x4ee   :  { %2602 = vmatpush1.bf16.msra.mxu0 %v2096_v50  ;;  %2766 = vmatpush1.bf16.msra.mxu1 %v2098_v51  ;;  %v2192_v50 = vld [vmem:[#allocation4 + $0x500] sm:$0xff]  ;;  %v2194_v51 = vld [vmem:[#allocation4 + $0x510] sm:$0xff] }
 0x4ef   :  { %2603 = vmatprep.subr.bf16.mxu0 %v2105_v5  ;;  %2767 = vmatprep.subr.bf16.mxu1 %v2107_v52  ;;  %v2201_v5 = vld [vmem:[#allocation4 + $0x548] sm:$0xff]  ;;  %v2203_v52 = vld [vmem:[#allocation4 + $0x558] sm:$0xff] }
 0x4f2   :  { %2604 = vmatpush1.bf16.msra.mxu0 %v2104_v53  ;;  %2768 = vmatpush1.bf16.msra.mxu1 %v2106_v54  ;;  %v2200_v53 = vld [vmem:[#allocation4 + $0x540] sm:$0xff]  ;;  %v2202_v54 = vld [vmem:[#allocation4 + $0x550] sm:$0xff] }
 0x4f3   :  { %2605 = vmatprep.subr.bf16.mxu0 %v2113_v55  ;;  %2769 = vmatprep.subr.bf16.mxu1 %v2115_v56  ;;  %v2209_v55 = vld [vmem:[#allocation4 + $0x588] sm:$0xff]  ;;  %v2211_v56 = vld [vmem:[#allocation4 + $0x598] sm:$0xff] }
 0x4f6   :  { %2606 = vmatpush1.bf16.msra.mxu0 %v2112_v18  ;;  %2770 = vmatpush1.bf16.msra.mxu1 %v2114_v57  ;;  %v2208_v18 = vld [vmem:[#allocation4 + $0x580] sm:$0xff]  ;;  %v2210_v57 = vld [vmem:[#allocation4 + $0x590] sm:$0xff] }
 0x4f7   :  { %2607 = vmatprep.subr.bf16.mxu0 %v2121_v58  ;;  %2771 = vmatprep.subr.bf16.mxu1 %v2123_v59  ;;  %v2217_v58 = vld [vmem:[#allocation4 + $0x5c8] sm:$0xff]  ;;  %v2219_v59 = vld [vmem:[#allocation4 + $0x5d8] sm:$0xff] }
 0x4fa   :  { %2608 = vmatpush1.bf16.msra.mxu0 %v2120_v60  ;;  %2772 = vmatpush1.bf16.msra.mxu1 %v2122_v61  ;;  %v2216_v60 = vld [vmem:[#allocation4 + $0x5c0] sm:$0xff]  ;;  %v2218_v61 = vld [vmem:[#allocation4 + $0x5d0] sm:$0xff] }
 0x4fb   :  { %2609 = vmatprep.subr.bf16.mxu0 %v2129_v9  ;;  %2773 = vmatprep.subr.bf16.mxu1 %v2131_v10  ;;  %v2225_v9 = vld [vmem:[#allocation4 + $0x608] sm:$0xff]  ;;  %v2227_v10 = vld [vmem:[#allocation4 + $0x618] sm:$0xff] }
 0x4fe   :  { %2610 = vmatpush1.bf16.msra.mxu0 %v2128_v11  ;;  %2774 = vmatpush1.bf16.msra.mxu1 %v2130_v12  ;;  %v2224_v11 = vld [vmem:[#allocation4 + $0x600] sm:$0xff]  ;;  %v2226_v12 = vld [vmem:[#allocation4 + $0x610] sm:$0xff] }
 0x4ff   :  { %2611 = vmatprep.subr.bf16.mxu0 %v2137_v13  ;;  %2775 = vmatprep.subr.bf16.mxu1 %v2139_v14  ;;  %v2233_v13 = vld [vmem:[#allocation4 + $0x648] sm:$0xff]  ;;  %v2235_v14 = vld [vmem:[#allocation4 + $0x658] sm:$0xff] }
 0x502   :  { %2612 = vmatpush1.bf16.msra.mxu0 %v2136_v15  ;;  %2776 = vmatpush1.bf16.msra.mxu1 %v2138_v16  ;;  %v2232_v15 = vld [vmem:[#allocation4 + $0x640] sm:$0xff]  ;;  %v2234_v16 = vld [vmem:[#allocation4 + $0x650] sm:$0xff] }
 0x503   :  { %2613 = vmatprep.subr.bf16.mxu0 %v2145_v17  ;;  %2777 = vmatprep.subr.bf16.mxu1 %v2147_v21  ;;  %v2241_v17 = vld [vmem:[#allocation4 + $0x688] sm:$0xff]  ;;  %v2243_v21 = vld [vmem:[#allocation4 + $0x698] sm:$0xff] }
 0x506   :  { %2614 = vmatpush1.bf16.msra.mxu0 %v2144_v6  ;;  %2778 = vmatpush1.bf16.msra.mxu1 %v2146_v42  ;;  %v2240_v6 = vld [vmem:[#allocation4 + $0x680] sm:$0xff]  ;;  %v2242_v42 = vld [vmem:[#allocation4 + $0x690] sm:$0xff] }
 0x507   :  { %2615 = vmatprep.subr.bf16.mxu0 %v2153_v24  ;;  %2779 = vmatprep.subr.bf16.mxu1 %v2155_v0  ;;  %v2249_v24 = vld [vmem:[#allocation4 + $0x6c8] sm:$0xff]  ;;  %v2251_v0 = vld [vmem:[#allocation4 + $0x6d8] sm:$0xff] }
 0x50a   :  { %2616 = vmatpush1.bf16.msra.mxu0 %v2152_v40  ;;  %2780 = vmatpush1.bf16.msra.mxu1 %v2154_v25  ;;  %v2248_v40 = vld [vmem:[#allocation4 + $0x6c0] sm:$0xff]  ;;  %v2250_v25 = vld [vmem:[#allocation4 + $0x6d0] sm:$0xff] }
 0x50b   :  { %2626 = vmatprep.subr.bf16.mxu0 %v2161_v26  ;;  %2790 = vmatprep.subr.bf16.mxu1 %v2163_v27  ;;  %v2257_v26 = vld [vmem:[#allocation4 + $0x708] sm:$0xff]  ;;  %v2259_v27 = vld [vmem:[#allocation4 + $0x718] sm:$0xff] }
 0x50d   :  { %2618 = vmatmul.mubr.bf16.vlgmr.msra.gmra.mrb[12].mxu0 %v8447_v35  ;;  %2782 = vmatmul.mubr.bf16.vlgmr.msra.gmra.mrb[12].mxu1 %v8447_v35 }
 0x50e   :  { %2627 = vmatpush1.bf16.msra.mxu0 %v2160_v28  ;;  %2791 = vmatpush1.bf16.msra.mxu1 %v2162_v3  ;;  %v2256_v28 = vld [vmem:[#allocation4 + $0x700] sm:$0xff]  ;;  %v2258_v3 = vld [vmem:[#allocation4 + $0x710] sm:$0xff] }
 0x50f   :  { %2628 = vmatprep.subr.bf16.mxu0 %v2169_v29  ;;  %2792 = vmatprep.subr.bf16.mxu1 %v2171_v30  ;;  %v2265_v29 = vld [vmem:[#allocation4 + $0x748] sm:$0xff]  ;;  %v2267_v30 = vld [vmem:[#allocation4 + $0x758] sm:$0xff] }
 0x510   :  { %2658 = vmatprep.mubr.bf16.mxu0 %v8453_v2  ;;  %2822 = vmatprep.mubr.bf16.mxu1 %v8453_v2 }
 0x512   :  { %2629 = vmatpush1.bf16.msra.mxu0 %v2168_v41  ;;  %2793 = vmatpush1.bf16.msra.mxu1 %v2170_v31  ;;  %v2264_v41 = vld [vmem:[#allocation4 + $0x740] sm:$0xff]  ;;  %v2266_v31 = vld [vmem:[#allocation4 + $0x750] sm:$0xff] }
 0x513   :  { %2630 = vmatprep.subr.bf16.mxu0 %v2177_v1  ;;  %2794 = vmatprep.subr.bf16.mxu1 %v2179_v32  ;;  %v2273_v1 = vld [vmem:[#allocation4 + $0x788] sm:$0xff]  ;;  %v2275_v32 = vld [vmem:[#allocation4 + $0x798] sm:$0xff] }
 0x516   :  { %2631 = vmatpush1.bf16.msra.mxu0 %v2176_v33  ;;  %2795 = vmatpush1.bf16.msra.mxu1 %v2178_v34  ;;  %v2272_v33 = vld [vmem:[#allocation4 + $0x780] sm:$0xff]  ;;  %v2274_v34 = vld [vmem:[#allocation4 + $0x790] sm:$0xff] }
 0x517   :  { %2632 = vmatprep.subr.bf16.mxu0 %v2185_v45  ;;  %2796 = vmatprep.subr.bf16.mxu1 %v2187_v46  ;;  %v2281_v45 = vld [vmem:[#allocation4 + $0x7c8] sm:$0xff]  ;;  %v2283_v46 = vld [vmem:[#allocation4 + $0x7d8] sm:$0xff] }
 0x51a   :  { %2633 = vmatpush1.bf16.msra.mxu0 %v2184_v4  ;;  %2797 = vmatpush1.bf16.msra.mxu1 %v2186_v47  ;;  %v2280_v4 = vld [vmem:[#allocation4 + $0x7c0] sm:$0xff]  ;;  %v2282_v47 = vld [vmem:[#allocation4 + $0x7d0] sm:$0xff] }
 0x51b   :  { %2634 = vmatprep.subr.bf16.mxu0 %v2193_v48  ;;  %2798 = vmatprep.subr.bf16.mxu1 %v2195_v49  ;;  %v2289_v48 = vld [vmem:[#allocation4 + $0x808] sm:$0xff]  ;;  %v2291_v49 = vld [vmem:[#allocation4 + $0x818] sm:$0xff] }
 0x51e   :  { %2635 = vmatpush1.bf16.msra.mxu0 %v2192_v50  ;;  %2799 = vmatpush1.bf16.msra.mxu1 %v2194_v51  ;;  %v2288_v50 = vld [vmem:[#allocation4 + $0x800] sm:$0xff]  ;;  %v2290_v51 = vld [vmem:[#allocation4 + $0x810] sm:$0xff] }
 0x51f   :  { %2636 = vmatprep.subr.bf16.mxu0 %v2201_v5  ;;  %2800 = vmatprep.subr.bf16.mxu1 %v2203_v52  ;;  %v2297_v5 = vld [vmem:[#allocation4 + $0x848] sm:$0xff]  ;;  %v2299_v52 = vld [vmem:[#allocation4 + $0x858] sm:$0xff] }
 0x522   :  { %2637 = vmatpush1.bf16.msra.mxu0 %v2200_v53  ;;  %2801 = vmatpush1.bf16.msra.mxu1 %v2202_v54  ;;  %v2296_v53 = vld [vmem:[#allocation4 + $0x840] sm:$0xff]  ;;  %v2298_v54 = vld [vmem:[#allocation4 + $0x850] sm:$0xff] }
 0x523   :  { %2638 = vmatprep.subr.bf16.mxu0 %v2209_v55  ;;  %2802 = vmatprep.subr.bf16.mxu1 %v2211_v56  ;;  %v2305_v55 = vld [vmem:[#allocation4 + $0x888] sm:$0xff]  ;;  %v2307_v56 = vld [vmem:[#allocation4 + $0x898] sm:$0xff] }
 0x526   :  { %2639 = vmatpush1.bf16.msra.mxu0 %v2208_v18  ;;  %2803 = vmatpush1.bf16.msra.mxu1 %v2210_v57  ;;  %v2304_v18 = vld [vmem:[#allocation4 + $0x880] sm:$0xff]  ;;  %v2306_v57 = vld [vmem:[#allocation4 + $0x890] sm:$0xff] }
 0x527   :  { %2640 = vmatprep.subr.bf16.mxu0 %v2217_v58  ;;  %2804 = vmatprep.subr.bf16.mxu1 %v2219_v59  ;;  %v2313_v58 = vld [vmem:[#allocation4 + $0x8c8] sm:$0xff]  ;;  %v2315_v59 = vld [vmem:[#allocation4 + $0x8d8] sm:$0xff] }
 0x52a   :  { %2641 = vmatpush1.bf16.msra.mxu0 %v2216_v60  ;;  %2805 = vmatpush1.bf16.msra.mxu1 %v2218_v61  ;;  %v2312_v60 = vld [vmem:[#allocation4 + $0x8c0] sm:$0xff]  ;;  %v2314_v61 = vld [vmem:[#allocation4 + $0x8d0] sm:$0xff] }
 0x52b   :  { %2642 = vmatprep.subr.bf16.mxu0 %v2225_v9  ;;  %2806 = vmatprep.subr.bf16.mxu1 %v2227_v10  ;;  %v2321_v9 = vld [vmem:[#allocation4 + $0x908] sm:$0xff]  ;;  %v2323_v10 = vld [vmem:[#allocation4 + $0x918] sm:$0xff] }
 0x52e   :  { %2643 = vmatpush1.bf16.msra.mxu0 %v2224_v11  ;;  %2807 = vmatpush1.bf16.msra.mxu1 %v2226_v12  ;;  %v2320_v11 = vld [vmem:[#allocation4 + $0x900] sm:$0xff]  ;;  %v2322_v12 = vld [vmem:[#allocation4 + $0x910] sm:$0xff] }
 0x52f   :  { %2644 = vmatprep.subr.bf16.mxu0 %v2233_v13  ;;  %2808 = vmatprep.subr.bf16.mxu1 %v2235_v14  ;;  %v2329_v13 = vld [vmem:[#allocation4 + $0x948] sm:$0xff]  ;;  %v2331_v14 = vld [vmem:[#allocation4 + $0x958] sm:$0xff] }
 0x532   :  { %2645 = vmatpush1.bf16.msra.mxu0 %v2232_v15  ;;  %2809 = vmatpush1.bf16.msra.mxu1 %v2234_v16  ;;  %v2328_v15 = vld [vmem:[#allocation4 + $0x940] sm:$0xff]  ;;  %v2330_v16 = vld [vmem:[#allocation4 + $0x950] sm:$0xff] }
 0x533   :  { %2646 = vmatprep.subr.bf16.mxu0 %v2241_v17  ;;  %2810 = vmatprep.subr.bf16.mxu1 %v2243_v21  ;;  %v2337_v17 = vld [vmem:[#allocation4 + $0x988] sm:$0xff]  ;;  %v2339_v21 = vld [vmem:[#allocation4 + $0x998] sm:$0xff] }
 0x536   :  { %2647 = vmatpush1.bf16.msra.mxu0 %v2240_v6  ;;  %2811 = vmatpush1.bf16.msra.mxu1 %v2242_v42  ;;  %v2336_v6 = vld [vmem:[#allocation4 + $0x980] sm:$0xff]  ;;  %v2338_v42 = vld [vmem:[#allocation4 + $0x990] sm:$0xff] }
 0x537   :  { %2648 = vmatprep.subr.bf16.mxu0 %v2249_v24  ;;  %2812 = vmatprep.subr.bf16.mxu1 %v2251_v0  ;;  %v2345_v24 = vld [vmem:[#allocation4 + $0x9c8] sm:$0xff]  ;;  %v2347_v0 = vld [vmem:[#allocation4 + $0x9d8] sm:$0xff] }
 0x53a   :  { %2649 = vmatpush1.bf16.msra.mxu0 %v2248_v40  ;;  %2813 = vmatpush1.bf16.msra.mxu1 %v2250_v25  ;;  %v2344_v40 = vld [vmem:[#allocation4 + $0x9c0] sm:$0xff]  ;;  %v2346_v25 = vld [vmem:[#allocation4 + $0x9d0] sm:$0xff] }
 0x53b   :  { %2650 = vmatprep.subr.bf16.mxu0 %v2257_v26  ;;  %2814 = vmatprep.subr.bf16.mxu1 %v2259_v27  ;;  %v2353_v26 = vld [vmem:[#allocation4 + $0xa08] sm:$0xff]  ;;  %v2355_v27 = vld [vmem:[#allocation4 + $0xa18] sm:$0xff] }
 0x53e   :  { %2651 = vmatpush1.bf16.msra.mxu0 %v2256_v28  ;;  %2815 = vmatpush1.bf16.msra.mxu1 %v2258_v3  ;;  %v2352_v28 = vld [vmem:[#allocation4 + $0xa00] sm:$0xff]  ;;  %v2354_v3 = vld [vmem:[#allocation4 + $0xa10] sm:$0xff] }
 0x53f   :  { %2652 = vmatprep.subr.bf16.mxu0 %v2265_v29  ;;  %2816 = vmatprep.subr.bf16.mxu1 %v2267_v30  ;;  %v2361_v29 = vld [vmem:[#allocation4 + $0xa48] sm:$0xff]  ;;  %v2363_v30 = vld [vmem:[#allocation4 + $0xa58] sm:$0xff] }
 0x542   :  { %2653 = vmatpush1.bf16.msra.mxu0 %v2264_v41  ;;  %2817 = vmatpush1.bf16.msra.mxu1 %v2266_v31  ;;  %v2360_v41 = vld [vmem:[#allocation4 + $0xa40] sm:$0xff]  ;;  %v2362_v31 = vld [vmem:[#allocation4 + $0xa50] sm:$0xff] }
 0x543   :  { %2654 = vmatprep.subr.bf16.mxu0 %v2273_v1  ;;  %2818 = vmatprep.subr.bf16.mxu1 %v2275_v32  ;;  %v2369_v1 = vld [vmem:[#allocation4 + $0xa88] sm:$0xff]  ;;  %v2371_v32 = vld [vmem:[#allocation4 + $0xa98] sm:$0xff] }
 0x546   :  { %2655 = vmatpush1.bf16.msra.mxu0 %v2272_v33  ;;  %2819 = vmatpush1.bf16.msra.mxu1 %v2274_v34  ;;  %v2368_v33 = vld [vmem:[#allocation4 + $0xa80] sm:$0xff]  ;;  %v2370_v34 = vld [vmem:[#allocation4 + $0xa90] sm:$0xff] }
 0x547   :  { %2656 = vmatprep.subr.bf16.mxu0 %v2281_v45  ;;  %2820 = vmatprep.subr.bf16.mxu1 %v2283_v46  ;;  %v2377_v45 = vld [vmem:[#allocation4 + $0xac8] sm:$0xff]  ;;  %v2379_v46 = vld [vmem:[#allocation4 + $0xad8] sm:$0xff] }
 0x54a   :  { %2657 = vmatpush1.bf16.msra.mxu0 %v2280_v4  ;;  %2821 = vmatpush1.bf16.msra.mxu1 %v2282_v47  ;;  %v2376_v4 = vld [vmem:[#allocation4 + $0xac0] sm:$0xff]  ;;  %v2378_v47 = vld [vmem:[#allocation4 + $0xad0] sm:$0xff] }
 0x54b   :  { %2667 = vmatprep.subr.bf16.mxu0 %v2289_v48  ;;  %2831 = vmatprep.subr.bf16.mxu1 %v2291_v49  ;;  %v2385_v48 = vld [vmem:[#allocation4 + $0xb08] sm:$0xff]  ;;  %v2387_v49 = vld [vmem:[#allocation4 + $0xb18] sm:$0xff] }
 0x54d   :  { %2659 = vmatmul.mubr.bf16.vlgmr.msra.gmra.mrb[12].mxu0 %v8449_v36  ;;  %2823 = vmatmul.mubr.bf16.vlgmr.msra.gmra.mrb[12].mxu1 %v8449_v36 }
 0x54e   :  { %2668 = vmatpush1.bf16.msra.mxu0 %v2288_v50  ;;  %2832 = vmatpush1.bf16.msra.mxu1 %v2290_v51  ;;  %v2384_v50 = vld [vmem:[#allocation4 + $0xb00] sm:$0xff]  ;;  %v2386_v51 = vld [vmem:[#allocation4 + $0xb10] sm:$0xff] }
 0x54f   :  { %2669 = vmatprep.subr.bf16.mxu0 %v2297_v5  ;;  %2833 = vmatprep.subr.bf16.mxu1 %v2299_v52  ;;  %v2393_v5 = vld [vmem:[#allocation4 + $0xb48] sm:$0xff]  ;;  %v2395_v52 = vld [vmem:[#allocation4 + $0xb58] sm:$0xff] }
 0x550   :  { %2699 = vmatprep.mubr.bf16.mxu0 %v8475_v7  ;;  %2863 = vmatprep.mubr.bf16.mxu1 %v8475_v7 }
 0x552   :  { %2670 = vmatpush1.bf16.msra.mxu0 %v2296_v53  ;;  %2834 = vmatpush1.bf16.msra.mxu1 %v2298_v54  ;;  %v2392_v53 = vld [vmem:[#allocation4 + $0xb40] sm:$0xff]  ;;  %v2394_v54 = vld [vmem:[#allocation4 + $0xb50] sm:$0xff] }
 0x553   :  { %2671 = vmatprep.subr.bf16.mxu0 %v2305_v55  ;;  %2835 = vmatprep.subr.bf16.mxu1 %v2307_v56  ;;  %v2401_v55 = vld [vmem:[#allocation4 + $0xb88] sm:$0xff]  ;;  %v2403_v56 = vld [vmem:[#allocation4 + $0xb98] sm:$0xff] }
 0x556   :  { %2672 = vmatpush1.bf16.msra.mxu0 %v2304_v18  ;;  %2836 = vmatpush1.bf16.msra.mxu1 %v2306_v57  ;;  %v2400_v18 = vld [vmem:[#allocation4 + $0xb80] sm:$0xff]  ;;  %v2402_v57 = vld [vmem:[#allocation4 + $0xb90] sm:$0xff] }
 0x557   :  { %2673 = vmatprep.subr.bf16.mxu0 %v2313_v58  ;;  %2837 = vmatprep.subr.bf16.mxu1 %v2315_v59  ;;  %v2409_v58 = vld [vmem:[#allocation4 + $0xbc8] sm:$0xff]  ;;  %v2411_v59 = vld [vmem:[#allocation4 + $0xbd8] sm:$0xff] }
 0x55a   :  { %2674 = vmatpush1.bf16.msra.mxu0 %v2312_v60  ;;  %2838 = vmatpush1.bf16.msra.mxu1 %v2314_v61  ;;  %v2408_v60 = vld [vmem:[#allocation4 + $0xbc0] sm:$0xff]  ;;  %v2410_v61 = vld [vmem:[#allocation4 + $0xbd0] sm:$0xff] }
 0x55b   :  { %2675 = vmatprep.subr.bf16.mxu0 %v2321_v9  ;;  %2839 = vmatprep.subr.bf16.mxu1 %v2323_v10  ;;  %v2417_v9 = vld [vmem:[#allocation4 + $0xc08] sm:$0xff]  ;;  %v2419_v10 = vld [vmem:[#allocation4 + $0xc18] sm:$0xff] }
 0x55e   :  { %2676 = vmatpush1.bf16.msra.mxu0 %v2320_v11  ;;  %2840 = vmatpush1.bf16.msra.mxu1 %v2322_v12  ;;  %v2416_v11 = vld [vmem:[#allocation4 + $0xc00] sm:$0xff]  ;;  %v2418_v12 = vld [vmem:[#allocation4 + $0xc10] sm:$0xff] }
 0x55f   :  { %2677 = vmatprep.subr.bf16.mxu0 %v2329_v13  ;;  %2841 = vmatprep.subr.bf16.mxu1 %v2331_v14  ;;  %v2425_v13 = vld [vmem:[#allocation4 + $0xc48] sm:$0xff]  ;;  %v2427_v14 = vld [vmem:[#allocation4 + $0xc58] sm:$0xff] }
 0x562   :  { %2678 = vmatpush1.bf16.msra.mxu0 %v2328_v15  ;;  %2842 = vmatpush1.bf16.msra.mxu1 %v2330_v16  ;;  %v2424_v15 = vld [vmem:[#allocation4 + $0xc40] sm:$0xff]  ;;  %v2426_v16 = vld [vmem:[#allocation4 + $0xc50] sm:$0xff] }
 0x563   :  { %2679 = vmatprep.subr.bf16.mxu0 %v2337_v17  ;;  %2843 = vmatprep.subr.bf16.mxu1 %v2339_v21  ;;  %v2433_v17 = vld [vmem:[#allocation4 + $0xc88] sm:$0xff]  ;;  %v2435_v21 = vld [vmem:[#allocation4 + $0xc98] sm:$0xff] }
 0x566   :  { %2680 = vmatpush1.bf16.msra.mxu0 %v2336_v6  ;;  %2844 = vmatpush1.bf16.msra.mxu1 %v2338_v42  ;;  %v2432_v6 = vld [vmem:[#allocation4 + $0xc80] sm:$0xff]  ;;  %v2434_v42 = vld [vmem:[#allocation4 + $0xc90] sm:$0xff] }
 0x567   :  { %2681 = vmatprep.subr.bf16.mxu0 %v2345_v24  ;;  %2845 = vmatprep.subr.bf16.mxu1 %v2347_v0  ;;  %v2441_v24 = vld [vmem:[#allocation4 + $0xcc8] sm:$0xff]  ;;  %v2443_v0 = vld [vmem:[#allocation4 + $0xcd8] sm:$0xff] }
 0x56a   :  { %2682 = vmatpush1.bf16.msra.mxu0 %v2344_v40  ;;  %2846 = vmatpush1.bf16.msra.mxu1 %v2346_v25  ;;  %v2440_v40 = vld [vmem:[#allocation4 + $0xcc0] sm:$0xff]  ;;  %v2442_v25 = vld [vmem:[#allocation4 + $0xcd0] sm:$0xff] }
 0x56b   :  { %2683 = vmatprep.subr.bf16.mxu0 %v2353_v26  ;;  %2847 = vmatprep.subr.bf16.mxu1 %v2355_v27  ;;  %v2449_v26 = vld [vmem:[#allocation4 + $0xd08] sm:$0xff]  ;;  %v2451_v27 = vld [vmem:[#allocation4 + $0xd18] sm:$0xff] }
 0x56e   :  { %2684 = vmatpush1.bf16.msra.mxu0 %v2352_v28  ;;  %2848 = vmatpush1.bf16.msra.mxu1 %v2354_v3  ;;  %v2448_v28 = vld [vmem:[#allocation4 + $0xd00] sm:$0xff]  ;;  %v2450_v3 = vld [vmem:[#allocation4 + $0xd10] sm:$0xff] }
 0x56f   :  { %2685 = vmatprep.subr.bf16.mxu0 %v2361_v29  ;;  %2849 = vmatprep.subr.bf16.mxu1 %v2363_v30  ;;  %v2457_v29 = vld [vmem:[#allocation4 + $0xd48] sm:$0xff]  ;;  %v2459_v30 = vld [vmem:[#allocation4 + $0xd58] sm:$0xff] }
 0x572   :  { %2686 = vmatpush1.bf16.msra.mxu0 %v2360_v41  ;;  %2850 = vmatpush1.bf16.msra.mxu1 %v2362_v31  ;;  %v2456_v41 = vld [vmem:[#allocation4 + $0xd40] sm:$0xff]  ;;  %v2458_v31 = vld [vmem:[#allocation4 + $0xd50] sm:$0xff] }
 0x573   :  { %2687 = vmatprep.subr.bf16.mxu0 %v2369_v1  ;;  %2851 = vmatprep.subr.bf16.mxu1 %v2371_v32  ;;  %v2465_v1 = vld [vmem:[#allocation4 + $0xd88] sm:$0xff]  ;;  %v2467_v32 = vld [vmem:[#allocation4 + $0xd98] sm:$0xff] }
 0x576   :  { %2688 = vmatpush1.bf16.msra.mxu0 %v2368_v33  ;;  %2852 = vmatpush1.bf16.msra.mxu1 %v2370_v34  ;;  %v2464_v33 = vld [vmem:[#allocation4 + $0xd80] sm:$0xff]  ;;  %v2466_v34 = vld [vmem:[#allocation4 + $0xd90] sm:$0xff] }
 0x577   :  { %2689 = vmatprep.subr.bf16.mxu0 %v2377_v45  ;;  %2853 = vmatprep.subr.bf16.mxu1 %v2379_v46  ;;  %v2473_v45 = vld [vmem:[#allocation4 + $0xdc8] sm:$0xff]  ;;  %v2475_v46 = vld [vmem:[#allocation4 + $0xdd8] sm:$0xff] }
 0x57a   :  { %2690 = vmatpush1.bf16.msra.mxu0 %v2376_v4  ;;  %2854 = vmatpush1.bf16.msra.mxu1 %v2378_v47  ;;  %v2472_v4 = vld [vmem:[#allocation4 + $0xdc0] sm:$0xff]  ;;  %v2474_v47 = vld [vmem:[#allocation4 + $0xdd0] sm:$0xff] }
 0x57b   :  { %2691 = vmatprep.subr.bf16.mxu0 %v2385_v48  ;;  %2855 = vmatprep.subr.bf16.mxu1 %v2387_v49  ;;  %v2481_v48 = vld [vmem:[#allocation4 + $0xe08] sm:$0xff]  ;;  %v2483_v49 = vld [vmem:[#allocation4 + $0xe18] sm:$0xff] }
 0x57e   :  { %2692 = vmatpush1.bf16.msra.mxu0 %v2384_v50  ;;  %2856 = vmatpush1.bf16.msra.mxu1 %v2386_v51  ;;  %v2480_v50 = vld [vmem:[#allocation4 + $0xe00] sm:$0xff]  ;;  %v2482_v51 = vld [vmem:[#allocation4 + $0xe10] sm:$0xff] }
 0x57f   :  { %2693 = vmatprep.subr.bf16.mxu0 %v2393_v5  ;;  %2857 = vmatprep.subr.bf16.mxu1 %v2395_v52  ;;  %v2489_v5 = vld [vmem:[#allocation4 + $0xe48] sm:$0xff]  ;;  %v2491_v52 = vld [vmem:[#allocation4 + $0xe58] sm:$0xff] }
 0x582   :  { %2694 = vmatpush1.bf16.msra.mxu0 %v2392_v53  ;;  %2858 = vmatpush1.bf16.msra.mxu1 %v2394_v54  ;;  %v2488_v53 = vld [vmem:[#allocation4 + $0xe40] sm:$0xff]  ;;  %v2490_v54 = vld [vmem:[#allocation4 + $0xe50] sm:$0xff] }
 0x583   :  { %2695 = vmatprep.subr.bf16.mxu0 %v2401_v55  ;;  %2859 = vmatprep.subr.bf16.mxu1 %v2403_v56  ;;  %v2497_v55 = vld [vmem:[#allocation4 + $0xe88] sm:$0xff]  ;;  %v2499_v56 = vld [vmem:[#allocation4 + $0xe98] sm:$0xff] }
 0x586   :  { %2696 = vmatpush1.bf16.msra.mxu0 %v2400_v18  ;;  %2860 = vmatpush1.bf16.msra.mxu1 %v2402_v57  ;;  %v2496_v18 = vld [vmem:[#allocation4 + $0xe80] sm:$0xff]  ;;  %v2498_v57 = vld [vmem:[#allocation4 + $0xe90] sm:$0xff] }
 0x587   :  { %2697 = vmatprep.subr.bf16.mxu0 %v2409_v58  ;;  %2861 = vmatprep.subr.bf16.mxu1 %v2411_v59  ;;  %v2505_v58 = vld [vmem:[#allocation4 + $0xec8] sm:$0xff]  ;;  %v2507_v59 = vld [vmem:[#allocation4 + $0xed8] sm:$0xff] }
 0x58a   :  { %2698 = vmatpush1.bf16.msra.mxu0 %v2408_v60  ;;  %2862 = vmatpush1.bf16.msra.mxu1 %v2410_v61  ;;  %v2504_v60 = vld [vmem:[#allocation4 + $0xec0] sm:$0xff]  ;;  %v2506_v61 = vld [vmem:[#allocation4 + $0xed0] sm:$0xff] }
 0x58b   :  { %2708 = vmatprep.subr.bf16.mxu0 %v2417_v9  ;;  %2872 = vmatprep.subr.bf16.mxu1 %v2419_v10  ;;  %v2513_v9 = vld [vmem:[#allocation4 + $0xf08] sm:$0xff]  ;;  %v2515_v10 = vld [vmem:[#allocation4 + $0xf18] sm:$0xff] }
 0x58d   :  { %2700 = vmatmul.mubr.bf16.vlgmr.msra.gmra.mrb[12].mxu0 %v8471_v62  ;;  %2864 = vmatmul.mubr.bf16.vlgmr.msra.gmra.mrb[12].mxu1 %v8471_v62 }
 0x58e   :  { %2709 = vmatpush1.bf16.msra.mxu0 %v2416_v11  ;;  %2873 = vmatpush1.bf16.msra.mxu1 %v2418_v12  ;;  %v2512_v11 = vld [vmem:[#allocation4 + $0xf00] sm:$0xff]  ;;  %v2514_v12 = vld [vmem:[#allocation4 + $0xf10] sm:$0xff] }
 0x58f   :  { %2710 = vmatprep.subr.bf16.mxu0 %v2425_v13  ;;  %2874 = vmatprep.subr.bf16.mxu1 %v2427_v14  ;;  %v2521_v13 = vld [vmem:[#allocation4 + $0xf48] sm:$0xff]  ;;  %v2523_v14 = vld [vmem:[#allocation4 + $0xf58] sm:$0xff] }
 0x590   :  { %2740 = vmatprep.mubr.bf16.mxu0 %v8477_v8  ;;  %2904 = vmatprep.mubr.bf16.mxu1 %v8477_v8 }
 0x592   :  { %2711 = vmatpush1.bf16.msra.mxu0 %v2424_v15  ;;  %2875 = vmatpush1.bf16.msra.mxu1 %v2426_v16  ;;  %v2520_v15 = vld [vmem:[#allocation4 + $0xf40] sm:$0xff]  ;;  %v2522_v16 = vld [vmem:[#allocation4 + $0xf50] sm:$0xff] }
 0x593   :  { %2712 = vmatprep.subr.bf16.mxu0 %v2433_v17  ;;  %2876 = vmatprep.subr.bf16.mxu1 %v2435_v21  ;;  %v2529_v17 = vld [vmem:[#allocation4 + $0xf88] sm:$0xff]  ;;  %v2531_v21 = vld [vmem:[#allocation4 + $0xf98] sm:$0xff] }
 0x596   :  { %2713 = vmatpush1.bf16.msra.mxu0 %v2432_v6  ;;  %2877 = vmatpush1.bf16.msra.mxu1 %v2434_v42  ;;  %v2528_v6 = vld [vmem:[#allocation4 + $0xf80] sm:$0xff]  ;;  %v2530_v42 = vld [vmem:[#allocation4 + $0xf90] sm:$0xff] }
 0x597   :  { %2714 = vmatprep.subr.bf16.mxu0 %v2441_v24  ;;  %2878 = vmatprep.subr.bf16.mxu1 %v2443_v0  ;;  %v2537_v24 = vld [vmem:[#allocation4 + $0xfc8] sm:$0xff]  ;;  %v2539_v0 = vld [vmem:[#allocation4 + $0xfd8] sm:$0xff] }
 0x59a   :  { %2715 = vmatpush1.bf16.msra.mxu0 %v2440_v40  ;;  %2879 = vmatpush1.bf16.msra.mxu1 %v2442_v25  ;;  %v2536_v40 = vld [vmem:[#allocation4 + $0xfc0] sm:$0xff]  ;;  %v2538_v25 = vld [vmem:[#allocation4 + $0xfd0] sm:$0xff] }
 0x59b   :  { %2716 = vmatprep.subr.bf16.mxu0 %v2449_v26  ;;  %2880 = vmatprep.subr.bf16.mxu1 %v2451_v27  ;;  %v2037_v26 = vld [vmem:[#allocation4 + $0x28] sm:$0xff]  ;;  %v2039_v27 = vld [vmem:[#allocation4 + $0x38] sm:$0xff] }
 0x59e   :  { %2717 = vmatpush1.bf16.msra.mxu0 %v2448_v28  ;;  %2881 = vmatpush1.bf16.msra.mxu1 %v2450_v3  ;;  %v2036_v28 = vld [vmem:[#allocation4 + $0x20] sm:$0xff]  ;;  %v2038_v3 = vld [vmem:[#allocation4 + $0x30] sm:$0xff] }
 0x59f   :  { %2718 = vmatprep.subr.bf16.mxu0 %v2457_v29  ;;  %2882 = vmatprep.subr.bf16.mxu1 %v2459_v30  ;;  %v2045_v29 = vld [vmem:[#allocation4 + $0x68] sm:$0xff]  ;;  %v2047_v30 = vld [vmem:[#allocation4 + $0x78] sm:$0xff] }
 0x5a2   :  { %2719 = vmatpush1.bf16.msra.mxu0 %v2456_v41  ;;  %2883 = vmatpush1.bf16.msra.mxu1 %v2458_v31  ;;  %v2044_v41 = vld [vmem:[#allocation4 + $0x60] sm:$0xff]  ;;  %v2046_v31 = vld [vmem:[#allocation4 + $0x70] sm:$0xff] }
 0x5a3   :  { %2720 = vmatprep.subr.bf16.mxu0 %v2465_v1  ;;  %2884 = vmatprep.subr.bf16.mxu1 %v2467_v32  ;;  %v2053_v1 = vld [vmem:[#allocation4 + $0xa8] sm:$0xff]  ;;  %v2055_v32 = vld [vmem:[#allocation4 + $0xb8] sm:$0xff] }
 0x5a6   :  { %2721 = vmatpush1.bf16.msra.mxu0 %v2464_v33  ;;  %2885 = vmatpush1.bf16.msra.mxu1 %v2466_v34  ;;  %v2052_v33 = vld [vmem:[#allocation4 + $0xa0] sm:$0xff]  ;;  %v2054_v34 = vld [vmem:[#allocation4 + $0xb0] sm:$0xff] }
 0x5a7   :  { %2722 = vmatprep.subr.bf16.mxu0 %v2473_v45  ;;  %2886 = vmatprep.subr.bf16.mxu1 %v2475_v46  ;;  %v2061_v45 = vld [vmem:[#allocation4 + $0xe8] sm:$0xff]  ;;  %v2063_v46 = vld [vmem:[#allocation4 + $0xf8] sm:$0xff] }
 0x5aa   :  { %2723 = vmatpush1.bf16.msra.mxu0 %v2472_v4  ;;  %2887 = vmatpush1.bf16.msra.mxu1 %v2474_v47  ;;  %v2060_v4 = vld [vmem:[#allocation4 + $0xe0] sm:$0xff]  ;;  %v2062_v47 = vld [vmem:[#allocation4 + $0xf0] sm:$0xff] }
 0x5ab   :  { %2724 = vmatprep.subr.bf16.mxu0 %v2481_v48  ;;  %2888 = vmatprep.subr.bf16.mxu1 %v2483_v49  ;;  %v2069_v48 = vld [vmem:[#allocation4 + $0x128] sm:$0xff]  ;;  %v2071_v49 = vld [vmem:[#allocation4 + $0x138] sm:$0xff] }
 0x5ae   :  { %2725 = vmatpush1.bf16.msra.mxu0 %v2480_v50  ;;  %2889 = vmatpush1.bf16.msra.mxu1 %v2482_v51  ;;  %v2070_v50 = vld [vmem:[#allocation4 + $0x130] sm:$0xff]  ;;  %v2077_v51 = vld [vmem:[#allocation4 + $0x168] sm:$0xff] }
 0x5af   :  { %2726 = vmatprep.subr.bf16.mxu0 %v2489_v5  ;;  %2890 = vmatprep.subr.bf16.mxu1 %v2491_v52  ;;  %v2079_v5 = vld [vmem:[#allocation4 + $0x178] sm:$0xff]  ;;  %v2076_v52 = vld [vmem:[#allocation4 + $0x160] sm:$0xff] }
 0x5b2   :  { %2727 = vmatpush1.bf16.msra.mxu0 %v2488_v53  ;;  %2891 = vmatpush1.bf16.msra.mxu1 %v2490_v54  ;;  %v2078_v53 = vld [vmem:[#allocation4 + $0x170] sm:$0xff]  ;;  %v2085_v54 = vld [vmem:[#allocation4 + $0x1a8] sm:$0xff] }
 0x5b3   :  { %2728 = vmatprep.subr.bf16.mxu0 %v2497_v55  ;;  %2892 = vmatprep.subr.bf16.mxu1 %v2499_v56  ;;  %v2087_v55 = vld [vmem:[#allocation4 + $0x1b8] sm:$0xff]  ;;  %v2084_v56 = vld [vmem:[#allocation4 + $0x1a0] sm:$0xff] }
 0x5b6   :  { %2729 = vmatpush1.bf16.msra.mxu0 %v2496_v18  ;;  %2893 = vmatpush1.bf16.msra.mxu1 %v2498_v57  ;;  %v2086_v18 = vld [vmem:[#allocation4 + $0x1b0] sm:$0xff]  ;;  %v2093_v57 = vld [vmem:[#allocation4 + $0x1e8] sm:$0xff] }
 0x5b7   :  { %2730 = vmatprep.subr.bf16.mxu0 %v2505_v58  ;;  %2894 = vmatprep.subr.bf16.mxu1 %v2507_v59  ;;  %v2095_v58 = vld [vmem:[#allocation4 + $0x1f8] sm:$0xff]  ;;  %v2092_v59 = vld [vmem:[#allocation4 + $0x1e0] sm:$0xff] }
 0x5ba   :  { %2731 = vmatpush1.bf16.msra.mxu0 %v2504_v60  ;;  %2895 = vmatpush1.bf16.msra.mxu1 %v2506_v61  ;;  %v2094_v60 = vld [vmem:[#allocation4 + $0x1f0] sm:$0xff]  ;;  %v2101_v61 = vld [vmem:[#allocation4 + $0x228] sm:$0xff] }
 0x5bb   :  { %2732 = vmatprep.subr.bf16.mxu0 %v2513_v9  ;;  %2896 = vmatprep.subr.bf16.mxu1 %v2515_v10  ;;  %v2103_v9 = vld [vmem:[#allocation4 + $0x238] sm:$0xff]  ;;  %v2100_v10 = vld [vmem:[#allocation4 + $0x220] sm:$0xff] }
 0x5be   :  { %2733 = vmatpush1.bf16.msra.mxu0 %v2512_v11  ;;  %2897 = vmatpush1.bf16.msra.mxu1 %v2514_v12  ;;  %v2102_v11 = vld [vmem:[#allocation4 + $0x230] sm:$0xff]  ;;  %v2109_v12 = vld [vmem:[#allocation4 + $0x268] sm:$0xff] }
 0x5bf   :  { %2734 = vmatprep.subr.bf16.mxu0 %v2521_v13  ;;  %2898 = vmatprep.subr.bf16.mxu1 %v2523_v14  ;;  %v2111_v13 = vld [vmem:[#allocation4 + $0x278] sm:$0xff]  ;;  %v2108_v14 = vld [vmem:[#allocation4 + $0x260] sm:$0xff] }
 0x5c2   :  { %2735 = vmatpush1.bf16.msra.mxu0 %v2520_v15  ;;  %2899 = vmatpush1.bf16.msra.mxu1 %v2522_v16  ;;  %v2110_v15 = vld [vmem:[#allocation4 + $0x270] sm:$0xff]  ;;  %v2117_v16 = vld [vmem:[#allocation4 + $0x2a8] sm:$0xff] }
 0x5c3   :  { %2736 = vmatprep.subr.bf16.mxu0 %v2529_v17  ;;  %2900 = vmatprep.subr.bf16.mxu1 %v2531_v21  ;;  %v2119_v17 = vld [vmem:[#allocation4 + $0x2b8] sm:$0xff]  ;;  %v2116_v21 = vld [vmem:[#allocation4 + $0x2a0] sm:$0xff] }
 0x5c6   :  { %2737 = vmatpush1.bf16.msra.mxu0 %v2528_v6  ;;  %2901 = vmatpush1.bf16.msra.mxu1 %v2530_v42  ;;  %v2118_v6 = vld [vmem:[#allocation4 + $0x2b0] sm:$0xff]  ;;  %v2125_v42 = vld [vmem:[#allocation4 + $0x2e8] sm:$0xff] }
 0x5c7   :  { %2738 = vmatprep.subr.bf16.mxu0 %v2537_v24  ;;  %2902 = vmatprep.subr.bf16.mxu1 %v2539_v0  ;;  %v2127_v24 = vld [vmem:[#allocation4 + $0x2f8] sm:$0xff]  ;;  %v2124_v0 = vld [vmem:[#allocation4 + $0x2e0] sm:$0xff] }
 0x5ca   :  { %2739 = vmatpush1.bf16.msra.mxu0 %v2536_v40  ;;  %2903 = vmatpush1.bf16.msra.mxu1 %v2538_v25  ;;  %v2126_v40 = vld [vmem:[#allocation4 + $0x2f0] sm:$0xff]  ;;  %v2133_v25 = vld [vmem:[#allocation4 + $0x328] sm:$0xff] }
 0x5cb   :  { %2913 = vmatprep.subr.bf16.mxu0 %v2037_v26  ;;  %3077 = vmatprep.subr.bf16.mxu1 %v2039_v27  ;;  %v2135_v26 = vld [vmem:[#allocation4 + $0x338] sm:$0xff]  ;;  %v2132_v27 = vld [vmem:[#allocation4 + $0x320] sm:$0xff] }
 0x5cd   :  { %2741 = vmatmul.mubr.bf16.vlgmr.msra.gmra.mrb[12].mxu0 %v8473_v63  ;;  %2905 = vmatmul.mubr.bf16.vlgmr.msra.gmra.mrb[12].mxu1 %v8473_v63 }
 0x5ce   :  { %2914 = vmatpush1.bf16.msra.mxu0 %v2036_v28  ;;  %3078 = vmatpush1.bf16.msra.mxu1 %v2038_v3  ;;  %v2134_v28 = vld [vmem:[#allocation4 + $0x330] sm:$0xff]  ;;  %v2141_v3 = vld [vmem:[#allocation4 + $0x368] sm:$0xff] }
 0x5cf   :  { %2915 = vmatprep.subr.bf16.mxu0 %v2045_v29  ;;  %3079 = vmatprep.subr.bf16.mxu1 %v2047_v30  ;;  %v2143_v29 = vld [vmem:[#allocation4 + $0x378] sm:$0xff]  ;;  %v2140_v30 = vld [vmem:[#allocation4 + $0x360] sm:$0xff] }
 0x5d0   :  { %2945 = vmatprep.mubr.bf16.mxu0 %v8451_v37  ;;  %3109 = vmatprep.mubr.bf16.mxu1 %v8451_v37  ;;  %v2068_v37 = vld [vmem:[#allocation4 + $0x120] sm:$0xff] }
 0x5d2   :  { %2916 = vmatpush1.bf16.msra.mxu0 %v2044_v41  ;;  %3080 = vmatpush1.bf16.msra.mxu1 %v2046_v31  ;;  %v2142_v41 = vld [vmem:[#allocation4 + $0x370] sm:$0xff]  ;;  %v2149_v31 = vld [vmem:[#allocation4 + $0x3a8] sm:$0xff] }
 0x5d3   :  { %2917 = vmatprep.subr.bf16.mxu0 %v2053_v1  ;;  %3081 = vmatprep.subr.bf16.mxu1 %v2055_v32  ;;  %v2151_v1 = vld [vmem:[#allocation4 + $0x3b8] sm:$0xff]  ;;  %v2148_v32 = vld [vmem:[#allocation4 + $0x3a0] sm:$0xff] }
 0x5d6   :  { %2918 = vmatpush1.bf16.msra.mxu0 %v2052_v33  ;;  %3082 = vmatpush1.bf16.msra.mxu1 %v2054_v34  ;;  %v2150_v33 = vld [vmem:[#allocation4 + $0x3b0] sm:$0xff]  ;;  %v2157_v34 = vld [vmem:[#allocation4 + $0x3e8] sm:$0xff] }
 0x5d7   :  { %2919 = vmatprep.subr.bf16.mxu0 %v2061_v45  ;;  %3083 = vmatprep.subr.bf16.mxu1 %v2063_v46  ;;  %v2159_v45 = vld [vmem:[#allocation4 + $0x3f8] sm:$0xff]  ;;  %v2156_v46 = vld [vmem:[#allocation4 + $0x3e0] sm:$0xff] }
 0x5da   :  { %2920 = vmatpush1.bf16.msra.mxu0 %v2060_v4  ;;  %3084 = vmatpush1.bf16.msra.mxu1 %v2062_v47  ;;  %v2158_v4 = vld [vmem:[#allocation4 + $0x3f0] sm:$0xff]  ;;  %v2165_v47 = vld [vmem:[#allocation4 + $0x428] sm:$0xff] }
 0x5db   :  { %2921 = vmatprep.subr.bf16.mxu0 %v2069_v48  ;;  %3085 = vmatprep.subr.bf16.mxu1 %v2071_v49  ;;  %v2167_v48 = vld [vmem:[#allocation4 + $0x438] sm:$0xff]  ;;  %v2164_v49 = vld [vmem:[#allocation4 + $0x420] sm:$0xff] }
 0x5de   :  { %2922 = vmatpush1.bf16.msra.mxu0 %v2068_v37  ;;  %3086 = vmatpush1.bf16.msra.mxu1 %v2070_v50  ;;  %v2166_v37 = vld [vmem:[#allocation4 + $0x430] sm:$0xff]  ;;  %v2173_v50 = vld [vmem:[#allocation4 + $0x468] sm:$0xff] }
 0x5df   :  { %2923 = vmatprep.subr.bf16.mxu0 %v2077_v51  ;;  %3087 = vmatprep.subr.bf16.mxu1 %v2079_v5  ;;  %v2175_v51 = vld [vmem:[#allocation4 + $0x478] sm:$0xff]  ;;  %v2172_v5 = vld [vmem:[#allocation4 + $0x460] sm:$0xff] }
 0x5e2   :  { %2924 = vmatpush1.bf16.msra.mxu0 %v2076_v52  ;;  %3088 = vmatpush1.bf16.msra.mxu1 %v2078_v53  ;;  %v2174_v52 = vld [vmem:[#allocation4 + $0x470] sm:$0xff]  ;;  %v2181_v53 = vld [vmem:[#allocation4 + $0x4a8] sm:$0xff] }
 0x5e3   :  { %2925 = vmatprep.subr.bf16.mxu0 %v2085_v54  ;;  %3089 = vmatprep.subr.bf16.mxu1 %v2087_v55  ;;  %v2183_v54 = vld [vmem:[#allocation4 + $0x4b8] sm:$0xff]  ;;  %v2180_v55 = vld [vmem:[#allocation4 + $0x4a0] sm:$0xff] }
 0x5e6   :  { %2926 = vmatpush1.bf16.msra.mxu0 %v2084_v56  ;;  %3090 = vmatpush1.bf16.msra.mxu1 %v2086_v18  ;;  %v2182_v56 = vld [vmem:[#allocation4 + $0x4b0] sm:$0xff]  ;;  %v2189_v18 = vld [vmem:[#allocation4 + $0x4e8] sm:$0xff] }
 0x5e7   :  { %2927 = vmatprep.subr.bf16.mxu0 %v2093_v57  ;;  %3091 = vmatprep.subr.bf16.mxu1 %v2095_v58  ;;  %v2188_v57 = vld [vmem:[#allocation4 + $0x4e0] sm:$0xff]  ;;  %v2190_v58 = vld [vmem:[#allocation4 + $0x4f0] sm:$0xff] }
 0x5ea   :  { %2928 = vmatpush1.bf16.msra.mxu0 %v2092_v59  ;;  %3092 = vmatpush1.bf16.msra.mxu1 %v2094_v60  ;;  %v2197_v59 = vld [vmem:[#allocation4 + $0x528] sm:$0xff]  ;;  %v2199_v60 = vld [vmem:[#allocation4 + $0x538] sm:$0xff] }
 0x5eb   :  { %2929 = vmatprep.subr.bf16.mxu0 %v2101_v61  ;;  %3093 = vmatprep.subr.bf16.mxu1 %v2103_v9  ;;  %v2198_v61 = vld [vmem:[#allocation4 + $0x530] sm:$0xff]  ;;  %v2205_v9 = vld [vmem:[#allocation4 + $0x568] sm:$0xff] }
 0x5ee   :  { %2930 = vmatpush1.bf16.msra.mxu0 %v2100_v10  ;;  %3094 = vmatpush1.bf16.msra.mxu1 %v2102_v11  ;;  %v2207_v10 = vld [vmem:[#allocation4 + $0x578] sm:$0xff]  ;;  %v2204_v11 = vld [vmem:[#allocation4 + $0x560] sm:$0xff] }
 0x5ef   :  { %2931 = vmatprep.subr.bf16.mxu0 %v2109_v12  ;;  %3095 = vmatprep.subr.bf16.mxu1 %v2111_v13  ;;  %v2206_v12 = vld [vmem:[#allocation4 + $0x570] sm:$0xff]  ;;  %v2213_v13 = vld [vmem:[#allocation4 + $0x5a8] sm:$0xff] }
 0x5f2   :  { %2932 = vmatpush1.bf16.msra.mxu0 %v2108_v14  ;;  %3096 = vmatpush1.bf16.msra.mxu1 %v2110_v15  ;;  %v2215_v14 = vld [vmem:[#allocation4 + $0x5b8] sm:$0xff]  ;;  %v2212_v15 = vld [vmem:[#allocation4 + $0x5a0] sm:$0xff] }
 0x5f3   :  { %2933 = vmatprep.subr.bf16.mxu0 %v2117_v16  ;;  %3097 = vmatprep.subr.bf16.mxu1 %v2119_v17  ;;  %v2214_v16 = vld [vmem:[#allocation4 + $0x5b0] sm:$0xff]  ;;  %v2221_v17 = vld [vmem:[#allocation4 + $0x5e8] sm:$0xff] }
 0x5f6   :  { %2934 = vmatpush1.bf16.msra.mxu0 %v2116_v21  ;;  %3098 = vmatpush1.bf16.msra.mxu1 %v2118_v6  ;;  %v2223_v21 = vld [vmem:[#allocation4 + $0x5f8] sm:$0xff]  ;;  %v2220_v6 = vld [vmem:[#allocation4 + $0x5e0] sm:$0xff] }
 0x5f7   :  { %2935 = vmatprep.subr.bf16.mxu0 %v2125_v42  ;;  %3099 = vmatprep.subr.bf16.mxu1 %v2127_v24  ;;  %v2222_v42 = vld [vmem:[#allocation4 + $0x5f0] sm:$0xff]  ;;  %v2229_v24 = vld [vmem:[#allocation4 + $0x628] sm:$0xff] }
 0x5fa   :  { %2936 = vmatpush1.bf16.msra.mxu0 %v2124_v0  ;;  %3100 = vmatpush1.bf16.msra.mxu1 %v2126_v40  ;;  %v2231_v0 = vld [vmem:[#allocation4 + $0x638] sm:$0xff]  ;;  %v2228_v40 = vld [vmem:[#allocation4 + $0x620] sm:$0xff] }
 0x5fb   :  { %2937 = vmatprep.subr.bf16.mxu0 %v2133_v25  ;;  %3101 = vmatprep.subr.bf16.mxu1 %v2135_v26  ;;  %v2230_v25 = vld [vmem:[#allocation4 + $0x630] sm:$0xff]  ;;  %v2237_v26 = vld [vmem:[#allocation4 + $0x668] sm:$0xff] }
 0x5fe   :  { %2938 = vmatpush1.bf16.msra.mxu0 %v2132_v27  ;;  %3102 = vmatpush1.bf16.msra.mxu1 %v2134_v28  ;;  %v2239_v27 = vld [vmem:[#allocation4 + $0x678] sm:$0xff]  ;;  %v2236_v28 = vld [vmem:[#allocation4 + $0x660] sm:$0xff] }
 0x5ff   :  { %2939 = vmatprep.subr.bf16.mxu0 %v2141_v3  ;;  %3103 = vmatprep.subr.bf16.mxu1 %v2143_v29  ;;  %v2238_v3 = vld [vmem:[#allocation4 + $0x670] sm:$0xff]  ;;  %v2245_v29 = vld [vmem:[#allocation4 + $0x6a8] sm:$0xff] }
 0x602   :  { %2940 = vmatpush1.bf16.msra.mxu0 %v2140_v30  ;;  %3104 = vmatpush1.bf16.msra.mxu1 %v2142_v41  ;;  %v2247_v30 = vld [vmem:[#allocation4 + $0x6b8] sm:$0xff]  ;;  %v2244_v41 = vld [vmem:[#allocation4 + $0x6a0] sm:$0xff] }
 0x603   :  { %2941 = vmatprep.subr.bf16.mxu0 %v2149_v31  ;;  %3105 = vmatprep.subr.bf16.mxu1 %v2151_v1  ;;  %v2246_v31 = vld [vmem:[#allocation4 + $0x6b0] sm:$0xff]  ;;  %v2253_v1 = vld [vmem:[#allocation4 + $0x6e8] sm:$0xff] }
 0x606   :  { %2942 = vmatpush1.bf16.msra.mxu0 %v2148_v32  ;;  %3106 = vmatpush1.bf16.msra.mxu1 %v2150_v33  ;;  %v2255_v32 = vld [vmem:[#allocation4 + $0x6f8] sm:$0xff]  ;;  %v2252_v33 = vld [vmem:[#allocation4 + $0x6e0] sm:$0xff] }
 0x607   :  { %2943 = vmatprep.subr.bf16.mxu0 %v2157_v34  ;;  %3107 = vmatprep.subr.bf16.mxu1 %v2159_v45  ;;  %v2254_v34 = vld [vmem:[#allocation4 + $0x6f0] sm:$0xff]  ;;  %v2261_v45 = vld [vmem:[#allocation4 + $0x728] sm:$0xff] }
 0x60a   :  { %2944 = vmatpush1.bf16.msra.mxu0 %v2156_v46  ;;  %3108 = vmatpush1.bf16.msra.mxu1 %v2158_v4  ;;  %v2263_v46 = vld [vmem:[#allocation4 + $0x738] sm:$0xff]  ;;  %v2260_v4 = vld [vmem:[#allocation4 + $0x720] sm:$0xff] }
 0x60b   :  { %2954 = vmatprep.subr.bf16.mxu0 %v2165_v47  ;;  %3118 = vmatprep.subr.bf16.mxu1 %v2167_v48  ;;  %v2262_v47 = vld [vmem:[#allocation4 + $0x730] sm:$0xff]  ;;  %v2269_v48 = vld [vmem:[#allocation4 + $0x768] sm:$0xff] }
 0x60d   :  { %2946 = vmatmul.mubr.bf16.vlgmr.msra.gmra.mrb[16].mxu0 %v8447_v35  ;;  %3110 = vmatmul.mubr.bf16.vlgmr.msra.gmra.mrb[16].mxu1 %v8447_v35  ;;  %v2191_v35 = vld [vmem:[#allocation4 + $0x4f8] sm:$0xff] }
 0x60e   :  { %2955 = vmatpush1.bf16.msra.mxu0 %v2164_v49  ;;  %3119 = vmatpush1.bf16.msra.mxu1 %v2166_v37  ;;  %v2271_v49 = vld [vmem:[#allocation4 + $0x778] sm:$0xff]  ;;  %v2268_v37 = vld [vmem:[#allocation4 + $0x760] sm:$0xff] }
 0x60f   :  { %2956 = vmatprep.subr.bf16.mxu0 %v2173_v50  ;;  %3120 = vmatprep.subr.bf16.mxu1 %v2175_v51  ;;  %v2270_v50 = vld [vmem:[#allocation4 + $0x770] sm:$0xff]  ;;  %v2277_v51 = vld [vmem:[#allocation4 + $0x7a8] sm:$0xff] }
 0x610   :  { %2986 = vmatprep.mubr.bf16.mxu0 %v8453_v2  ;;  %3150 = vmatprep.mubr.bf16.mxu1 %v8453_v2  ;;  %v2196_v2 = vld [vmem:[#allocation4 + $0x520] sm:$0xff] }
 0x612   :  { %2957 = vmatpush1.bf16.msra.mxu0 %v2172_v5  ;;  %3121 = vmatpush1.bf16.msra.mxu1 %v2174_v52  ;;  %v2279_v5 = vld [vmem:[#allocation4 + $0x7b8] sm:$0xff]  ;;  %v2276_v52 = vld [vmem:[#allocation4 + $0x7a0] sm:$0xff] }
 0x613   :  { %2958 = vmatprep.subr.bf16.mxu0 %v2181_v53  ;;  %3122 = vmatprep.subr.bf16.mxu1 %v2183_v54  ;;  %v2278_v53 = vld [vmem:[#allocation4 + $0x7b0] sm:$0xff]  ;;  %v2285_v54 = vld [vmem:[#allocation4 + $0x7e8] sm:$0xff] }
 0x616   :  { %2959 = vmatpush1.bf16.msra.mxu0 %v2180_v55  ;;  %3123 = vmatpush1.bf16.msra.mxu1 %v2182_v56  ;;  %v2287_v55 = vld [vmem:[#allocation4 + $0x7f8] sm:$0xff]  ;;  %v2284_v56 = vld [vmem:[#allocation4 + $0x7e0] sm:$0xff] }
 0x617   :  { %2960 = vmatprep.subr.bf16.mxu0 %v2189_v18  ;;  %3124 = vmatprep.subr.bf16.mxu1 %v2191_v35  ;;  %v2286_v18 = vld [vmem:[#allocation4 + $0x7f0] sm:$0xff]  ;;  %v2293_v35 = vld [vmem:[#allocation4 + $0x828] sm:$0xff] }
 0x61a   :  { %2961 = vmatpush1.bf16.msra.mxu0 %v2188_v57  ;;  %3125 = vmatpush1.bf16.msra.mxu1 %v2190_v58  ;;  %v2295_v57 = vld [vmem:[#allocation4 + $0x838] sm:$0xff]  ;;  %v2292_v58 = vld [vmem:[#allocation4 + $0x820] sm:$0xff] }
 0x61b   :  { %2962 = vmatprep.subr.bf16.mxu0 %v2197_v59  ;;  %3126 = vmatprep.subr.bf16.mxu1 %v2199_v60  ;;  %v2294_v59 = vld [vmem:[#allocation4 + $0x830] sm:$0xff]  ;;  %v2301_v60 = vld [vmem:[#allocation4 + $0x868] sm:$0xff] }
 0x61e   :  { %2963 = vmatpush1.bf16.msra.mxu0 %v2196_v2  ;;  %3127 = vmatpush1.bf16.msra.mxu1 %v2198_v61  ;;  %v2303_v2 = vld [vmem:[#allocation4 + $0x878] sm:$0xff]  ;;  %v2300_v61 = vld [vmem:[#allocation4 + $0x860] sm:$0xff] }
 0x61f   :  { %2964 = vmatprep.subr.bf16.mxu0 %v2205_v9  ;;  %3128 = vmatprep.subr.bf16.mxu1 %v2207_v10  ;;  %v2302_v9 = vld [vmem:[#allocation4 + $0x870] sm:$0xff]  ;;  %v2309_v10 = vld [vmem:[#allocation4 + $0x8a8] sm:$0xff] }
 0x622   :  { %2965 = vmatpush1.bf16.msra.mxu0 %v2204_v11  ;;  %3129 = vmatpush1.bf16.msra.mxu1 %v2206_v12  ;;  %v2311_v11 = vld [vmem:[#allocation4 + $0x8b8] sm:$0xff]  ;;  %v2308_v12 = vld [vmem:[#allocation4 + $0x8a0] sm:$0xff] }
 0x623   :  { %2966 = vmatprep.subr.bf16.mxu0 %v2213_v13  ;;  %3130 = vmatprep.subr.bf16.mxu1 %v2215_v14  ;;  %v2310_v13 = vld [vmem:[#allocation4 + $0x8b0] sm:$0xff]  ;;  %v2317_v14 = vld [vmem:[#allocation4 + $0x8e8] sm:$0xff] }
 0x626   :  { %2967 = vmatpush1.bf16.msra.mxu0 %v2212_v15  ;;  %3131 = vmatpush1.bf16.msra.mxu1 %v2214_v16  ;;  %v2316_v15 = vld [vmem:[#allocation4 + $0x8e0] sm:$0xff]  ;;  %v2318_v16 = vld [vmem:[#allocation4 + $0x8f0] sm:$0xff] }
 0x627   :  { %2968 = vmatprep.subr.bf16.mxu0 %v2221_v17  ;;  %3132 = vmatprep.subr.bf16.mxu1 %v2223_v21  ;;  %v2325_v17 = vld [vmem:[#allocation4 + $0x928] sm:$0xff]  ;;  %v2327_v21 = vld [vmem:[#allocation4 + $0x938] sm:$0xff] }
 0x62a   :  { %2969 = vmatpush1.bf16.msra.mxu0 %v2220_v6  ;;  %3133 = vmatpush1.bf16.msra.mxu1 %v2222_v42  ;;  %v2326_v6 = vld [vmem:[#allocation4 + $0x930] sm:$0xff]  ;;  %v2333_v42 = vld [vmem:[#allocation4 + $0x968] sm:$0xff] }
 0x62b   :  { %2970 = vmatprep.subr.bf16.mxu0 %v2229_v24  ;;  %3134 = vmatprep.subr.bf16.mxu1 %v2231_v0  ;;  %v2335_v24 = vld [vmem:[#allocation4 + $0x978] sm:$0xff]  ;;  %v2332_v0 = vld [vmem:[#allocation4 + $0x960] sm:$0xff] }
 0x62e   :  { %2971 = vmatpush1.bf16.msra.mxu0 %v2228_v40  ;;  %3135 = vmatpush1.bf16.msra.mxu1 %v2230_v25  ;;  %v2334_v40 = vld [vmem:[#allocation4 + $0x970] sm:$0xff]  ;;  %v2341_v25 = vld [vmem:[#allocation4 + $0x9a8] sm:$0xff] }
 0x62f   :  { %2972 = vmatprep.subr.bf16.mxu0 %v2237_v26  ;;  %3136 = vmatprep.subr.bf16.mxu1 %v2239_v27  ;;  %v2343_v26 = vld [vmem:[#allocation4 + $0x9b8] sm:$0xff]  ;;  %v2340_v27 = vld [vmem:[#allocation4 + $0x9a0] sm:$0xff] }
 0x632   :  { %2973 = vmatpush1.bf16.msra.mxu0 %v2236_v28  ;;  %3137 = vmatpush1.bf16.msra.mxu1 %v2238_v3  ;;  %v2342_v28 = vld [vmem:[#allocation4 + $0x9b0] sm:$0xff]  ;;  %v2349_v3 = vld [vmem:[#allocation4 + $0x9e8] sm:$0xff] }
 0x633   :  { %2974 = vmatprep.subr.bf16.mxu0 %v2245_v29  ;;  %3138 = vmatprep.subr.bf16.mxu1 %v2247_v30  ;;  %v2351_v29 = vld [vmem:[#allocation4 + $0x9f8] sm:$0xff]  ;;  %v2348_v30 = vld [vmem:[#allocation4 + $0x9e0] sm:$0xff] }
 0x636   :  { %2975 = vmatpush1.bf16.msra.mxu0 %v2244_v41  ;;  %3139 = vmatpush1.bf16.msra.mxu1 %v2246_v31  ;;  %v2350_v41 = vld [vmem:[#allocation4 + $0x9f0] sm:$0xff]  ;;  %v2357_v31 = vld [vmem:[#allocation4 + $0xa28] sm:$0xff] }
 0x637   :  { %2976 = vmatprep.subr.bf16.mxu0 %v2253_v1  ;;  %3140 = vmatprep.subr.bf16.mxu1 %v2255_v32  ;;  %v2359_v1 = vld [vmem:[#allocation4 + $0xa38] sm:$0xff]  ;;  %v2356_v32 = vld [vmem:[#allocation4 + $0xa20] sm:$0xff] }
 0x63a   :  { %2977 = vmatpush1.bf16.msra.mxu0 %v2252_v33  ;;  %3141 = vmatpush1.bf16.msra.mxu1 %v2254_v34  ;;  %v2358_v33 = vld [vmem:[#allocation4 + $0xa30] sm:$0xff]  ;;  %v2365_v34 = vld [vmem:[#allocation4 + $0xa68] sm:$0xff] }
 0x63b   :  { %2978 = vmatprep.subr.bf16.mxu0 %v2261_v45  ;;  %3142 = vmatprep.subr.bf16.mxu1 %v2263_v46  ;;  %v2367_v45 = vld [vmem:[#allocation4 + $0xa78] sm:$0xff]  ;;  %v2364_v46 = vld [vmem:[#allocation4 + $0xa60] sm:$0xff] }
 0x63e   :  { %2979 = vmatpush1.bf16.msra.mxu0 %v2260_v4  ;;  %3143 = vmatpush1.bf16.msra.mxu1 %v2262_v47  ;;  %v2366_v4 = vld [vmem:[#allocation4 + $0xa70] sm:$0xff]  ;;  %v2373_v47 = vld [vmem:[#allocation4 + $0xaa8] sm:$0xff] }
 0x63f   :  { %2980 = vmatprep.subr.bf16.mxu0 %v2269_v48  ;;  %3144 = vmatprep.subr.bf16.mxu1 %v2271_v49  ;;  %v2375_v48 = vld [vmem:[#allocation4 + $0xab8] sm:$0xff]  ;;  %v2372_v49 = vld [vmem:[#allocation4 + $0xaa0] sm:$0xff] }
 0x642   :  { %2981 = vmatpush1.bf16.msra.mxu0 %v2268_v37  ;;  %3145 = vmatpush1.bf16.msra.mxu1 %v2270_v50  ;;  %v2374_v37 = vld [vmem:[#allocation4 + $0xab0] sm:$0xff]  ;;  %v2381_v50 = vld [vmem:[#allocation4 + $0xae8] sm:$0xff] }
 0x643   :  { %2982 = vmatprep.subr.bf16.mxu0 %v2277_v51  ;;  %3146 = vmatprep.subr.bf16.mxu1 %v2279_v5  ;;  %v2383_v51 = vld [vmem:[#allocation4 + $0xaf8] sm:$0xff]  ;;  %v2380_v5 = vld [vmem:[#allocation4 + $0xae0] sm:$0xff] }
 0x646   :  { %2983 = vmatpush1.bf16.msra.mxu0 %v2276_v52  ;;  %3147 = vmatpush1.bf16.msra.mxu1 %v2278_v53  ;;  %v2382_v52 = vld [vmem:[#allocation4 + $0xaf0] sm:$0xff]  ;;  %v2389_v53 = vld [vmem:[#allocation4 + $0xb28] sm:$0xff] }
 0x647   :  { %2984 = vmatprep.subr.bf16.mxu0 %v2285_v54  ;;  %3148 = vmatprep.subr.bf16.mxu1 %v2287_v55  ;;  %v2391_v54 = vld [vmem:[#allocation4 + $0xb38] sm:$0xff]  ;;  %v2388_v55 = vld [vmem:[#allocation4 + $0xb20] sm:$0xff] }
 0x64a   :  { %2985 = vmatpush1.bf16.msra.mxu0 %v2284_v56  ;;  %3149 = vmatpush1.bf16.msra.mxu1 %v2286_v18  ;;  %v2390_v56 = vld [vmem:[#allocation4 + $0xb30] sm:$0xff]  ;;  %v2397_v18 = vld [vmem:[#allocation4 + $0xb68] sm:$0xff] }
 0x64b   :  { %2995 = vmatprep.subr.bf16.mxu0 %v2293_v35  ;;  %3159 = vmatprep.subr.bf16.mxu1 %v2295_v57  ;;  %v2399_v35 = vld [vmem:[#allocation4 + $0xb78] sm:$0xff]  ;;  %v2396_v57 = vld [vmem:[#allocation4 + $0xb60] sm:$0xff] }
 0x64d   :  { %2987 = vmatmul.mubr.bf16.vlgmr.msra.gmra.mrb[16].mxu0 %v8449_v36  ;;  %3151 = vmatmul.mubr.bf16.vlgmr.msra.gmra.mrb[16].mxu1 %v8449_v36  ;;  %v2319_v36 = vld [vmem:[#allocation4 + $0x8f8] sm:$0xff] }
 0x64e   :  { %2996 = vmatpush1.bf16.msra.mxu0 %v2292_v58  ;;  %3160 = vmatpush1.bf16.msra.mxu1 %v2294_v59  ;;  %v2398_v58 = vld [vmem:[#allocation4 + $0xb70] sm:$0xff]  ;;  %v2405_v59 = vld [vmem:[#allocation4 + $0xba8] sm:$0xff] }
 0x64f   :  { %2997 = vmatprep.subr.bf16.mxu0 %v2301_v60  ;;  %3161 = vmatprep.subr.bf16.mxu1 %v2303_v2  ;;  %v2407_v60 = vld [vmem:[#allocation4 + $0xbb8] sm:$0xff]  ;;  %v2404_v2 = vld [vmem:[#allocation4 + $0xba0] sm:$0xff] }
 0x650   :  { %3027 = vmatprep.mubr.bf16.mxu0 %v8475_v7  ;;  %3191 = vmatprep.mubr.bf16.mxu1 %v8475_v7  ;;  %v2324_v7 = vld [vmem:[#allocation4 + $0x920] sm:$0xff] }
 0x652   :  { %2998 = vmatpush1.bf16.msra.mxu0 %v2300_v61  ;;  %3162 = vmatpush1.bf16.msra.mxu1 %v2302_v9  ;;  %v2406_v61 = vld [vmem:[#allocation4 + $0xbb0] sm:$0xff]  ;;  %v2413_v9 = vld [vmem:[#allocation4 + $0xbe8] sm:$0xff] }
 0x653   :  { %2999 = vmatprep.subr.bf16.mxu0 %v2309_v10  ;;  %3163 = vmatprep.subr.bf16.mxu1 %v2311_v11  ;;  %v2415_v10 = vld [vmem:[#allocation4 + $0xbf8] sm:$0xff]  ;;  %v2412_v11 = vld [vmem:[#allocation4 + $0xbe0] sm:$0xff] }
 0x656   :  { %3000 = vmatpush1.bf16.msra.mxu0 %v2308_v12  ;;  %3164 = vmatpush1.bf16.msra.mxu1 %v2310_v13  ;;  %v2414_v12 = vld [vmem:[#allocation4 + $0xbf0] sm:$0xff]  ;;  %v2421_v13 = vld [vmem:[#allocation4 + $0xc28] sm:$0xff] }
 0x657   :  { %3001 = vmatprep.subr.bf16.mxu0 %v2317_v14  ;;  %3165 = vmatprep.subr.bf16.mxu1 %v2319_v36  ;;  %v2423_v14 = vld [vmem:[#allocation4 + $0xc38] sm:$0xff]  ;;  %v2420_v36 = vld [vmem:[#allocation4 + $0xc20] sm:$0xff] }
 0x65a   :  { %3002 = vmatpush1.bf16.msra.mxu0 %v2316_v15  ;;  %3166 = vmatpush1.bf16.msra.mxu1 %v2318_v16  ;;  %v2422_v15 = vld [vmem:[#allocation4 + $0xc30] sm:$0xff]  ;;  %v2429_v16 = vld [vmem:[#allocation4 + $0xc68] sm:$0xff] }
 0x65b   :  { %3003 = vmatprep.subr.bf16.mxu0 %v2325_v17  ;;  %3167 = vmatprep.subr.bf16.mxu1 %v2327_v21  ;;  %v2431_v17 = vld [vmem:[#allocation4 + $0xc78] sm:$0xff]  ;;  %v2428_v21 = vld [vmem:[#allocation4 + $0xc60] sm:$0xff] }
 0x65e   :  { %3004 = vmatpush1.bf16.msra.mxu0 %v2324_v7  ;;  %3168 = vmatpush1.bf16.msra.mxu1 %v2326_v6  ;;  %v2430_v7 = vld [vmem:[#allocation4 + $0xc70] sm:$0xff]  ;;  %v2437_v6 = vld [vmem:[#allocation4 + $0xca8] sm:$0xff] }
 0x65f   :  { %3005 = vmatprep.subr.bf16.mxu0 %v2333_v42  ;;  %3169 = vmatprep.subr.bf16.mxu1 %v2335_v24  ;;  %v2439_v42 = vld [vmem:[#allocation4 + $0xcb8] sm:$0xff]  ;;  %v2436_v24 = vld [vmem:[#allocation4 + $0xca0] sm:$0xff] }
 0x662   :  { %3006 = vmatpush1.bf16.msra.mxu0 %v2332_v0  ;;  %3170 = vmatpush1.bf16.msra.mxu1 %v2334_v40  ;;  %v2438_v0 = vld [vmem:[#allocation4 + $0xcb0] sm:$0xff]  ;;  %v2445_v40 = vld [vmem:[#allocation4 + $0xce8] sm:$0xff] }
 0x663   :  { %3007 = vmatprep.subr.bf16.mxu0 %v2341_v25  ;;  %3171 = vmatprep.subr.bf16.mxu1 %v2343_v26  ;;  %v2444_v25 = vld [vmem:[#allocation4 + $0xce0] sm:$0xff]  ;;  %v2446_v26 = vld [vmem:[#allocation4 + $0xcf0] sm:$0xff] }
 0x666   :  { %3008 = vmatpush1.bf16.msra.mxu0 %v2340_v27  ;;  %3172 = vmatpush1.bf16.msra.mxu1 %v2342_v28  ;;  %v2453_v27 = vld [vmem:[#allocation4 + $0xd28] sm:$0xff]  ;;  %v2455_v28 = vld [vmem:[#allocation4 + $0xd38] sm:$0xff] }
 0x667   :  { %3009 = vmatprep.subr.bf16.mxu0 %v2349_v3  ;;  %3173 = vmatprep.subr.bf16.mxu1 %v2351_v29  ;;  %v8509_v3 = vld [vmem:[#allocation13 + $0xc] sm:$0xff]  ;;  %v2454_v29 = vld [vmem:[#allocation4 + $0xd30] sm:$0xff] }
 0x66a   :  { %3010 = vmatpush1.bf16.msra.mxu0 %v2348_v30  ;;  %3174 = vmatpush1.bf16.msra.mxu1 %v2350_v41  ;;  %v2461_v30 = vld [vmem:[#allocation4 + $0xd68] sm:$0xff]  ;;  %v2463_v41 = vld [vmem:[#allocation4 + $0xd78] sm:$0xff] }
 0x66b   :  { %3011 = vmatprep.subr.bf16.mxu0 %v2357_v31  ;;  %3175 = vmatprep.subr.bf16.mxu1 %v2359_v1  ;;  %v2548_v31 = vrot.slane %v8509_v3, %v8404_v19  ;;  %v2556_v1 = vrot.slane %v8509_v3, %v8407_v20 }
 0x66e   :  { %3012 = vmatpush1.bf16.msra.mxu0 %v2356_v32  ;;  %3176 = vmatpush1.bf16.msra.mxu1 %v2358_v33  ;;  %v2552_v32 = vrot.slane %v8509_v3, %v8410_v22  ;;  %v2560_v33 = vrot.slane %v8509_v3, %v8413_v23 }
 0x66f   :  { %3013 = vmatprep.subr.bf16.mxu0 %v2365_v34  ;;  %3177 = vmatprep.subr.bf16.mxu1 %v2367_v45  ;;  %v2460_v34 = vld [vmem:[#allocation4 + $0xd60] sm:$0xff]  ;;  %v2462_v45 = vld [vmem:[#allocation4 + $0xd70] sm:$0xff] }
 0x672   :  { %3014 = vmatpush1.bf16.msra.mxu0 %v2364_v46  ;;  %3178 = vmatpush1.bf16.msra.mxu1 %v2366_v4 }
 0x673   :  { %3015 = vmatprep.subr.bf16.mxu0 %v2373_v47  ;;  %3179 = vmatprep.subr.bf16.mxu1 %v2375_v48  ;;  %v2469_v47 = vld [vmem:[#allocation4 + $0xda8] sm:$0xff]  ;;  %v2471_v48 = vld [vmem:[#allocation4 + $0xdb8] sm:$0xff] }
 0x676   :  { %3016 = vmatpush1.bf16.msra.mxu0 %v2372_v49  ;;  %3180 = vmatpush1.bf16.msra.mxu1 %v2374_v37 }
 0x677   :  { %3017 = vmatprep.subr.bf16.mxu0 %v2381_v50  ;;  %3181 = vmatprep.subr.bf16.mxu1 %v2383_v51 }
 0x67a   :  { %3018 = vmatpush1.bf16.msra.mxu0 %v2380_v5  ;;  %3182 = vmatpush1.bf16.msra.mxu1 %v2382_v52 }
 0x67b   :  { %3019 = vmatprep.subr.bf16.mxu0 %v2389_v53  ;;  %3183 = vmatprep.subr.bf16.mxu1 %v2391_v54 }
 0x67e   :  { %3020 = vmatpush1.bf16.msra.mxu0 %v2388_v55  ;;  %3184 = vmatpush1.bf16.msra.mxu1 %v2390_v56 }
 0x67f   :  { %3021 = vmatprep.subr.bf16.mxu0 %v2397_v18  ;;  %3185 = vmatprep.subr.bf16.mxu1 %v2399_v35 }
 0x682   :  { %3022 = vmatpush1.bf16.msra.mxu0 %v2396_v57  ;;  %3186 = vmatpush1.bf16.msra.mxu1 %v2398_v58  ;;  %v2468_v57 = vld [vmem:[#allocation4 + $0xda0] sm:$0xff]  ;;  %v2470_v58 = vld [vmem:[#allocation4 + $0xdb0] sm:$0xff] }
 0x683   :  { %3023 = vmatprep.subr.bf16.mxu0 %v2405_v59  ;;  %3187 = vmatprep.subr.bf16.mxu1 %v2407_v60 }
 0x686   :  { %3024 = vmatpush1.bf16.msra.mxu0 %v2404_v2  ;;  %3188 = vmatpush1.bf16.msra.mxu1 %v2406_v61  ;;  %v2477_v2 = vld [vmem:[#allocation4 + $0xde8] sm:$0xff]  ;;  %v2479_v61 = vld [vmem:[#allocation4 + $0xdf8] sm:$0xff] }
 0x687   :  { %3025 = vmatprep.subr.bf16.mxu0 %v2413_v9  ;;  %3189 = vmatprep.subr.bf16.mxu1 %v2415_v10 }
 0x68a   :  { %3026 = vmatpush1.bf16.msra.mxu0 %v2412_v11  ;;  %3190 = vmatpush1.bf16.msra.mxu1 %v2414_v12 }
 0x68b   :  { %3036 = vmatprep.subr.bf16.mxu0 %v2421_v13  ;;  %3200 = vmatprep.subr.bf16.mxu1 %v2423_v14  ;;  %v2476_v13 = vld [vmem:[#allocation4 + $0xde0] sm:$0xff]  ;;  %v2478_v14 = vld [vmem:[#allocation4 + $0xdf0] sm:$0xff] }
 0x68d   :  { %3028 = vmatmul.mubr.bf16.vlgmr.msra.gmra.mrb[16].mxu0 %v8471_v62  ;;  %3192 = vmatmul.mubr.bf16.vlgmr.msra.gmra.mrb[16].mxu1 %v8471_v62  ;;  %v2447_v62 = vld [vmem:[#allocation4 + $0xcf8] sm:$0xff] }
 0x68e   :  { %3037 = vmatpush1.bf16.msra.mxu0 %v2420_v36  ;;  %3201 = vmatpush1.bf16.msra.mxu1 %v2422_v15  ;;  %v2485_v36 = vld [vmem:[#allocation4 + $0xe28] sm:$0xff]  ;;  %v2487_v15 = vld [vmem:[#allocation4 + $0xe38] sm:$0xff] }
 0x68f   :  { %3038 = vmatprep.subr.bf16.mxu0 %v2429_v16  ;;  %3202 = vmatprep.subr.bf16.mxu1 %v2431_v17  ;;  %v2484_v16 = vld [vmem:[#allocation4 + $0xe20] sm:$0xff]  ;;  %v2486_v17 = vld [vmem:[#allocation4 + $0xe30] sm:$0xff] }
 0x690   :  { %3068 = vmatprep.mubr.bf16.mxu0 %v8477_v8  ;;  %3232 = vmatprep.mubr.bf16.mxu1 %v8477_v8  ;;  %v2452_v8 = vld [vmem:[#allocation4 + $0xd20] sm:$0xff] }
 0x692   :  { %3039 = vmatpush1.bf16.msra.mxu0 %v2428_v21  ;;  %3203 = vmatpush1.bf16.msra.mxu1 %v2430_v7  ;;  %v2493_v21 = vld [vmem:[#allocation4 + $0xe68] sm:$0xff]  ;;  %v2495_v7 = vld [vmem:[#allocation4 + $0xe78] sm:$0xff] }
 0x693   :  { %3040 = vmatprep.subr.bf16.mxu0 %v2437_v6  ;;  %3204 = vmatprep.subr.bf16.mxu1 %v2439_v42  ;;  %v2492_v6 = vld [vmem:[#allocation4 + $0xe60] sm:$0xff]  ;;  %v2494_v42 = vld [vmem:[#allocation4 + $0xe70] sm:$0xff] }
 0x696   :  { %3041 = vmatpush1.bf16.msra.mxu0 %v2436_v24  ;;  %3205 = vmatpush1.bf16.msra.mxu1 %v2438_v0  ;;  %v2501_v24 = vld [vmem:[#allocation4 + $0xea8] sm:$0xff]  ;;  %v2503_v0 = vld [vmem:[#allocation4 + $0xeb8] sm:$0xff] }
 0x697   :  { %3042 = vmatprep.subr.bf16.mxu0 %v2445_v40  ;;  %3206 = vmatprep.subr.bf16.mxu1 %v2447_v62  ;;  %v2500_v40 = vld [vmem:[#allocation4 + $0xea0] sm:$0xff]  ;;  %v2502_v62 = vld [vmem:[#allocation4 + $0xeb0] sm:$0xff] }
 0x69a   :  { %3043 = vmatpush1.bf16.msra.mxu0 %v2444_v25  ;;  %3207 = vmatpush1.bf16.msra.mxu1 %v2446_v26  ;;  %v2509_v25 = vld [vmem:[#allocation4 + $0xee8] sm:$0xff]  ;;  %v2511_v26 = vld [vmem:[#allocation4 + $0xef8] sm:$0xff] }
 0x69b   :  { %3044 = vmatprep.subr.bf16.mxu0 %v2453_v27  ;;  %3208 = vmatprep.subr.bf16.mxu1 %v2455_v28  ;;  %v2508_v27 = vld [vmem:[#allocation4 + $0xee0] sm:$0xff]  ;;  %v2510_v28 = vld [vmem:[#allocation4 + $0xef0] sm:$0xff] }
 0x69e   :  { %3045 = vmatpush1.bf16.msra.mxu0 %v2452_v8  ;;  %3209 = vmatpush1.bf16.msra.mxu1 %v2454_v29  ;;  %v2517_v8 = vld [vmem:[#allocation4 + $0xf28] sm:$0xff]  ;;  %v2519_v29 = vld [vmem:[#allocation4 + $0xf38] sm:$0xff] }
 0x69f   :  { %3046 = vmatprep.subr.bf16.mxu0 %v2461_v30  ;;  %3210 = vmatprep.subr.bf16.mxu1 %v2463_v41  ;;  %v2516_v30 = vld [vmem:[#allocation4 + $0xf20] sm:$0xff]  ;;  %v2518_v41 = vld [vmem:[#allocation4 + $0xf30] sm:$0xff] }
 0x6a0   :  { %v2742_v46 = vpop.f32.mrb[12].mxu0  ;;  %v2906_v4 = vpop.f32.mrb[12].mxu1 }
 0x6a1   :  { %v7733_v49 = vadd.f32 %v2742_v46, %v2548_v31  ;;  %v7735_v37 = vadd.f32 %v2906_v4, %v2556_v1  ;;  %v2744_v50 = vpop.f32.mrb[13].mxu0  ;;  %v2908_v51 = vpop.f32.mrb[13].mxu1  ;;  %v2525_v31 = vld [vmem:[#allocation4 + $0xf68] sm:$0xff]  ;;  %v2527_v1 = vld [vmem:[#allocation4 + $0xf78] sm:$0xff]  ;;  %v2532_v46 = vld [vmem:[#allocation4 + $0xfa0] sm:$0xff] }
 0x6a2   :  { %v7734_v5 = vadd.f32 %v2744_v50, %v2552_v32  ;;  %v7736_v52 = vadd.f32 %v2908_v51, %v2560_v33  ;;  %v2746_v53 = vpop.f32.mrb[14].mxu0  ;;  %v2910_v54 = vpop.f32.mrb[14].mxu1  ;;  %3047 = vmatpush1.bf16.msra.mxu0 %v2460_v34  ;;  %3211 = vmatpush1.bf16.msra.mxu1 %v2462_v45  ;;  %v2524_v32 = vld [vmem:[#allocation4 + $0xf60] sm:$0xff]  ;;  %v2526_v33 = vld [vmem:[#allocation4 + $0xf70] sm:$0xff]  ;;  %v2533_v34 = vld [vmem:[#allocation4 + $0xfa8] sm:$0xff]  ;;  %v2564_v50 = vrot.slane %v8509_v3, %v8456_v38 }
 0x6a3   :  { %v3241_v55 = vmax.f32 %v7733_v49, 0.0  ;;  %v3243_v56 = vmax.f32 %v7735_v37, 0.0  ;;  %v2747_v18 = vpop.f32.mrb[15].mxu0  ;;  %v2911_v35 = vpop.f32.mrb[15].mxu1  ;;  %3048 = vmatprep.subr.bf16.mxu0 %v2469_v47  ;;  %3212 = vmatprep.subr.bf16.mxu1 %v2471_v48  ;;  %v2535_v45 = vld [vmem:[#allocation4 + $0xfb8] sm:$0xff]  ;;  %v2534_v4 = vld [vmem:[#allocation4 + $0xfb0] sm:$0xff]  ;;  %v2572_v51 = vrot.slane %v8509_v3, %v8459_v39 }
 0x6a4   :  { %v3242_v59 = vmax.f32 %v7734_v5, 0.0  ;;  %v3244_v60 = vmax.f32 %v7736_v52, 0.0  ;;  %v2541_v47 = vld [vmem:[#allocation4 + $0xfe8] sm:$0xff]  ;;  %v2543_v48 = vld [vmem:[#allocation4 + $0xff8] sm:$0xff]  ;;  %v2540_v49 = vld [vmem:[#allocation4 + $0xfe0] sm:$0xff]  ;;  %v2568_v5 = vrot.slane %v8509_v3, %v8462_v43  ;;  %v2576_v52 = vrot.slane %v8509_v3, %v8465_v44 }
 0x6a5   :  { %v8519_v9 = vpack.c.bf16 %v3241_v55, %v3241_v55  ;;  %v8521_v10 = vpack.c.bf16 %v3243_v56, %v3243_v56  ;;  %v2542_v37 = vld [vmem:[#allocation4 + $0xff0] sm:$0xff] }
 0x6a6   :  { %v8523_v11 = vpack.c.bf16 %v3242_v59, %v3242_v59  ;;  %v8525_v12 = vpack.c.bf16 %v3244_v60, %v3244_v60  ;;  %3049 = vmatpush1.bf16.msra.mxu0 %v2468_v57  ;;  %3213 = vmatpush1.bf16.msra.mxu1 %v2470_v58 }
 0x6a7   :  { %3050 = vmatprep.subr.bf16.mxu0 %v2477_v2  ;;  %3214 = vmatprep.subr.bf16.mxu1 %v2479_v61 }
 0x6aa   :  { %3051 = vmatpush1.bf16.msra.mxu0 %v2476_v13  ;;  %3215 = vmatpush1.bf16.msra.mxu1 %v2478_v14 }
 0x6ab   :  { %3052 = vmatprep.subr.bf16.mxu0 %v2485_v36  ;;  %3216 = vmatprep.subr.bf16.mxu1 %v2487_v15 }
 0x6ae   :  { %3053 = vmatpush1.bf16.msra.mxu0 %v2484_v16  ;;  %3217 = vmatpush1.bf16.msra.mxu1 %v2486_v17 }
 0x6af   :  { %3054 = vmatprep.subr.bf16.mxu0 %v2493_v21  ;;  %3218 = vmatprep.subr.bf16.mxu1 %v2495_v7 }
 0x6b2   :  { %3055 = vmatpush1.bf16.msra.mxu0 %v2492_v6  ;;  %3219 = vmatpush1.bf16.msra.mxu1 %v2494_v42 }
 0x6b3   :  { %3056 = vmatprep.subr.bf16.mxu0 %v2501_v24  ;;  %3220 = vmatprep.subr.bf16.mxu1 %v2503_v0 }
 0x6b6   :  { %3057 = vmatpush1.bf16.msra.mxu0 %v2500_v40  ;;  %3221 = vmatpush1.bf16.msra.mxu1 %v2502_v62 }
 0x6b7   :  { %3058 = vmatprep.subr.bf16.mxu0 %v2509_v25  ;;  %3222 = vmatprep.subr.bf16.mxu1 %v2511_v26 }
 0x6ba   :  { %3059 = vmatpush1.bf16.msra.mxu0 %v2508_v27  ;;  %3223 = vmatpush1.bf16.msra.mxu1 %v2510_v28 }
 0x6bb   :  { %3060 = vmatprep.subr.bf16.mxu0 %v2517_v8  ;;  %3224 = vmatprep.subr.bf16.mxu1 %v2519_v29 }
 0x6be   :  { %3061 = vmatpush1.bf16.msra.mxu0 %v2516_v30  ;;  %3225 = vmatpush1.bf16.msra.mxu1 %v2518_v41 }
 0x6bf   :  { %3062 = vmatprep.subr.bf16.mxu0 %v2525_v31  ;;  %3226 = vmatprep.subr.bf16.mxu1 %v2527_v1 }
 0x6c2   :  { %3063 = vmatpush1.bf16.msra.mxu0 %v2524_v32  ;;  %3227 = vmatpush1.bf16.msra.mxu1 %v2526_v33 }
 0x6c3   :  { %3064 = vmatprep.subr.bf16.mxu0 %v2533_v34  ;;  %3228 = vmatprep.subr.bf16.mxu1 %v2535_v45 }
 0x6c6   :  { %3065 = vmatpush1.bf16.msra.mxu0 %v2532_v46  ;;  %3229 = vmatpush1.bf16.msra.mxu1 %v2534_v4 }
 0x6c7   :  { %3066 = vmatprep.subr.bf16.mxu0 %v2541_v47  ;;  %3230 = vmatprep.subr.bf16.mxu1 %v2543_v48 }
 0x6ca   :  { %3067 = vmatpush1.bf16.msra.mxu0 %v2540_v49  ;;  %3231 = vmatpush1.bf16.msra.mxu1 %v2542_v37 }
 0x6cd   :  { %3069 = vmatmul.mubr.bf16.vlgmr.msra.gmra.mrb[16].mxu0 %v8473_v63  ;;  %3233 = vmatmul.mubr.bf16.vlgmr.msra.gmra.mrb[16].mxu1 %v8473_v63 }
 0x7a0   :  { %v3070_v53 = vpop.f32.mrb[16].mxu0  ;;  %v3234_v54 = vpop.f32.mrb[16].mxu1 }
 0x7a1   :  { %v7737_v55 = vadd.f32 %v3070_v53, %v2564_v50  ;;  %v7739_v56 = vadd.f32 %v3234_v54, %v2572_v51  ;;  %v3072_v18 = vpop.f32.mrb[17].mxu0  ;;  %v3236_v35 = vpop.f32.mrb[17].mxu1 }
 0x7a2   :  { %v7738_v57 = vadd.f32 %v3072_v18, %v2568_v5  ;;  %v7740_v63 = vadd.f32 %v3236_v35, %v2576_v52  ;;  %v3074_v58 = vpop.f32.mrb[18].mxu0  ;;  %v3238_v59 = vpop.f32.mrb[18].mxu1 }
 0x7a3   :  { %v3245_v60 = vmax.f32 %v7737_v55, 0.0  ;;  %v3247_v2 = vmax.f32 %v7739_v56, 0.0  ;;  %v3075_v61 = vpop.f32.mrb[19].mxu0  ;;  %v3239_v13 = vpop.f32.mrb[19].mxu1 }
 0x7a4   :  { %v3246_v14 = vmax.f32 %v7738_v57, 0.0  ;;  %v3248_v36 = vmax.f32 %v7740_v63, 0.0 }
 0x7a5   :  { %v8537_v15 = vpack.c.bf16 %v3245_v60, %v3245_v60  ;;  %v8539_v16 = vpack.c.bf16 %v3247_v2, %v3247_v2 }
 0x7a6   :  { %v8541_v3 = vpack.c.bf16 %v3246_v14, %v3246_v14  ;;  %v8543_v17 = vpack.c.bf16 %v3248_v36, %v3248_v36 }
 0x7a7   :  { %8152 = dma.done.wait [#allocation9 + $0x3], 65536 }
 0x7a8   :  { %8153 = vsyncadd [#allocation9 + $0x3], 4294901760  ;;  %3851 = vmatprep.mubr.bf16.mxu0 %v8523_v11  ;;  %4015 = vmatprep.mubr.bf16.mxu1 %v8523_v11  ;;  %v3267_v21 = vld [vmem:[#allocation5 + $0x8] sm:$0xff]  ;;  %v3269_v7 = vld [vmem:[#allocation5 + $0x18] sm:$0xff] }
 0x7a9   :  { %v3266_v6 = vld [vmem:[#allocation5] sm:$0xff]  ;;  %3819 = vmatprep.subr.bf16.mxu0 %v3267_v21  ;;  %3983 = vmatprep.subr.bf16.mxu1 %v3269_v7  ;;  %v3268_v42 = vld [vmem:[#allocation5 + $0x10] sm:$0xff]  ;;  %v3275_v24 = vld [vmem:[#allocation5 + $0x48] sm:$0xff] }
 0x7aa   :  { %v3277_v0 = vld [vmem:[#allocation5 + $0x58] sm:$0xff]  ;;  %3820 = vmatpush1.bf16.msra.mxu0 %v3266_v6  ;;  %3984 = vmatpush1.bf16.msra.mxu1 %v3268_v42  ;;  %v3274_v40 = vld [vmem:[#allocation5 + $0x40] sm:$0xff]  ;;  %v3276_v62 = vld [vmem:[#allocation5 + $0x50] sm:$0xff] }
 0x7ab   :  { %3821 = vmatprep.subr.bf16.mxu0 %v3275_v24  ;;  %3985 = vmatprep.subr.bf16.mxu1 %v3277_v0  ;;  %v3283_v25 = vld [vmem:[#allocation5 + $0x88] sm:$0xff]  ;;  %v3285_v26 = vld [vmem:[#allocation5 + $0x98] sm:$0xff]  ;;  %v3282_v27 = vld [vmem:[#allocation5 + $0x80] sm:$0xff] }
 0x7ac   :  { %v3284_v28 = vld [vmem:[#allocation5 + $0x90] sm:$0xff]  ;;  %v3291_v8 = vld [vmem:[#allocation5 + $0xc8] sm:$0xff]  ;;  %v3293_v29 = vld [vmem:[#allocation5 + $0xd8] sm:$0xff] }
 0x7ad   :  { %v3290_v30 = vld [vmem:[#allocation5 + $0xc0] sm:$0xff]  ;;  %v3292_v41 = vld [vmem:[#allocation5 + $0xd0] sm:$0xff]  ;;  %v3299_v31 = vld [vmem:[#allocation5 + $0x108] sm:$0xff] }
 0x7ae   :  { %3822 = vmatpush1.bf16.msra.mxu0 %v3274_v40  ;;  %3986 = vmatpush1.bf16.msra.mxu1 %v3276_v62  ;;  %v3301_v1 = vld [vmem:[#allocation5 + $0x118] sm:$0xff]  ;;  %v3298_v32 = vld [vmem:[#allocation5 + $0x100] sm:$0xff]  ;;  %v3300_v33 = vld [vmem:[#allocation5 + $0x110] sm:$0xff] }
 0x7af   :  { %3823 = vmatprep.subr.bf16.mxu0 %v3283_v25  ;;  %3987 = vmatprep.subr.bf16.mxu1 %v3285_v26  ;;  %v3307_v34 = vld [vmem:[#allocation5 + $0x148] sm:$0xff]  ;;  %v3309_v45 = vld [vmem:[#allocation5 + $0x158] sm:$0xff]  ;;  %v3306_v46 = vld [vmem:[#allocation5 + $0x140] sm:$0xff] }
 0x7b0   :  { %v3308_v4 = vld [vmem:[#allocation5 + $0x150] sm:$0xff]  ;;  %v3315_v47 = vld [vmem:[#allocation5 + $0x188] sm:$0xff]  ;;  %v3317_v48 = vld [vmem:[#allocation5 + $0x198] sm:$0xff] }
 0x7b1   :  { %v3314_v49 = vld [vmem:[#allocation5 + $0x180] sm:$0xff]  ;;  %v3316_v37 = vld [vmem:[#allocation5 + $0x190] sm:$0xff]  ;;  %v3323_v50 = vld [vmem:[#allocation5 + $0x1c8] sm:$0xff] }
 0x7b2   :  { %3824 = vmatpush1.bf16.msra.mxu0 %v3282_v27  ;;  %3988 = vmatpush1.bf16.msra.mxu1 %v3284_v28  ;;  %v3325_v51 = vld [vmem:[#allocation5 + $0x1d8] sm:$0xff]  ;;  %v3322_v5 = vld [vmem:[#allocation5 + $0x1c0] sm:$0xff]  ;;  %v3324_v52 = vld [vmem:[#allocation5 + $0x1d0] sm:$0xff] }
 0x7b3   :  { %3825 = vmatprep.subr.bf16.mxu0 %v3291_v8  ;;  %3989 = vmatprep.subr.bf16.mxu1 %v3293_v29  ;;  %v3331_v53 = vld [vmem:[#allocation5 + $0x208] sm:$0xff]  ;;  %v3333_v54 = vld [vmem:[#allocation5 + $0x218] sm:$0xff]  ;;  %v3330_v55 = vld [vmem:[#allocation5 + $0x200] sm:$0xff] }
 0x7b4   :  { %v3332_v56 = vld [vmem:[#allocation5 + $0x210] sm:$0xff]  ;;  %v3339_v18 = vld [vmem:[#allocation5 + $0x248] sm:$0xff]  ;;  %v3341_v35 = vld [vmem:[#allocation5 + $0x258] sm:$0xff] }
 0x7b5   :  { %v3338_v57 = vld [vmem:[#allocation5 + $0x240] sm:$0xff]  ;;  %v3340_v63 = vld [vmem:[#allocation5 + $0x250] sm:$0xff]  ;;  %v3347_v58 = vld [vmem:[#allocation5 + $0x288] sm:$0xff] }
 0x7b6   :  { %3826 = vmatpush1.bf16.msra.mxu0 %v3290_v30  ;;  %3990 = vmatpush1.bf16.msra.mxu1 %v3292_v41  ;;  %v3349_v59 = vld [vmem:[#allocation5 + $0x298] sm:$0xff]  ;;  %v3346_v60 = vld [vmem:[#allocation5 + $0x280] sm:$0xff]  ;;  %v3348_v2 = vld [vmem:[#allocation5 + $0x290] sm:$0xff] }
 0x7b7   :  { %3827 = vmatprep.subr.bf16.mxu0 %v3299_v31  ;;  %3991 = vmatprep.subr.bf16.mxu1 %v3301_v1  ;;  %v3355_v61 = vld [vmem:[#allocation5 + $0x2c8] sm:$0xff]  ;;  %v3357_v13 = vld [vmem:[#allocation5 + $0x2d8] sm:$0xff]  ;;  %v3354_v14 = vld [vmem:[#allocation5 + $0x2c0] sm:$0xff] }
 0x7b8   :  { %v3356_v36 = vld [vmem:[#allocation5 + $0x2d0] sm:$0xff]  ;;  %v3363_v21 = vld [vmem:[#allocation5 + $0x308] sm:$0xff]  ;;  %v3365_v7 = vld [vmem:[#allocation5 + $0x318] sm:$0xff] }
 0x7b9   :  { %v3362_v6 = vld [vmem:[#allocation5 + $0x300] sm:$0xff]  ;;  %v3364_v42 = vld [vmem:[#allocation5 + $0x310] sm:$0xff]  ;;  %v3371_v24 = vld [vmem:[#allocation5 + $0x348] sm:$0xff] }
 0x7ba   :  { %3828 = vmatpush1.bf16.msra.mxu0 %v3298_v32  ;;  %3992 = vmatpush1.bf16.msra.mxu1 %v3300_v33  ;;  %v3373_v0 = vld [vmem:[#allocation5 + $0x358] sm:$0xff]  ;;  %v3370_v40 = vld [vmem:[#allocation5 + $0x340] sm:$0xff]  ;;  %v3372_v62 = vld [vmem:[#allocation5 + $0x350] sm:$0xff] }
 0x7bb   :  { %3829 = vmatprep.subr.bf16.mxu0 %v3307_v34  ;;  %3993 = vmatprep.subr.bf16.mxu1 %v3309_v45  ;;  %v3379_v25 = vld [vmem:[#allocation5 + $0x388] sm:$0xff]  ;;  %v3381_v26 = vld [vmem:[#allocation5 + $0x398] sm:$0xff]  ;;  %v3378_v27 = vld [vmem:[#allocation5 + $0x380] sm:$0xff] }
 0x7bc   :  { %v3380_v28 = vld [vmem:[#allocation5 + $0x390] sm:$0xff]  ;;  %v3387_v8 = vld [vmem:[#allocation5 + $0x3c8] sm:$0xff]  ;;  %v3389_v29 = vld [vmem:[#allocation5 + $0x3d8] sm:$0xff] }
 0x7bd   :  { %v3386_v30 = vld [vmem:[#allocation5 + $0x3c0] sm:$0xff]  ;;  %v3388_v41 = vld [vmem:[#allocation5 + $0x3d0] sm:$0xff]  ;;  %v3395_v31 = vld [vmem:[#allocation5 + $0x408] sm:$0xff] }
 0x7be   :  { %3830 = vmatpush1.bf16.msra.mxu0 %v3306_v46  ;;  %3994 = vmatpush1.bf16.msra.mxu1 %v3308_v4  ;;  %v3397_v1 = vld [vmem:[#allocation5 + $0x418] sm:$0xff]  ;;  %v3394_v32 = vld [vmem:[#allocation5 + $0x400] sm:$0xff]  ;;  %v3396_v33 = vld [vmem:[#allocation5 + $0x410] sm:$0xff] }
 0x7bf   :  { %3831 = vmatprep.subr.bf16.mxu0 %v3315_v47  ;;  %3995 = vmatprep.subr.bf16.mxu1 %v3317_v48  ;;  %v3403_v34 = vld [vmem:[#allocation5 + $0x448] sm:$0xff]  ;;  %v3405_v45 = vld [vmem:[#allocation5 + $0x458] sm:$0xff]  ;;  %v3402_v46 = vld [vmem:[#allocation5 + $0x440] sm:$0xff] }
 0x7c0   :  { %v3404_v4 = vld [vmem:[#allocation5 + $0x450] sm:$0xff]  ;;  %v3411_v47 = vld [vmem:[#allocation5 + $0x488] sm:$0xff]  ;;  %v3413_v48 = vld [vmem:[#allocation5 + $0x498] sm:$0xff] }
 0x7c2   :  { %3832 = vmatpush1.bf16.msra.mxu0 %v3314_v49  ;;  %3996 = vmatpush1.bf16.msra.mxu1 %v3316_v37  ;;  %v3410_v49 = vld [vmem:[#allocation5 + $0x480] sm:$0xff]  ;;  %v3412_v37 = vld [vmem:[#allocation5 + $0x490] sm:$0xff] }
 0x7c3   :  { %3833 = vmatprep.subr.bf16.mxu0 %v3323_v50  ;;  %3997 = vmatprep.subr.bf16.mxu1 %v3325_v51  ;;  %v3419_v50 = vld [vmem:[#allocation5 + $0x4c8] sm:$0xff]  ;;  %v3421_v51 = vld [vmem:[#allocation5 + $0x4d8] sm:$0xff] }
 0x7c6   :  { %3834 = vmatpush1.bf16.msra.mxu0 %v3322_v5  ;;  %3998 = vmatpush1.bf16.msra.mxu1 %v3324_v52  ;;  %v3418_v5 = vld [vmem:[#allocation5 + $0x4c0] sm:$0xff]  ;;  %v3420_v52 = vld [vmem:[#allocation5 + $0x4d0] sm:$0xff] }
 0x7c7   :  { %3835 = vmatprep.subr.bf16.mxu0 %v3331_v53  ;;  %3999 = vmatprep.subr.bf16.mxu1 %v3333_v54  ;;  %v3427_v53 = vld [vmem:[#allocation5 + $0x508] sm:$0xff]  ;;  %v3429_v54 = vld [vmem:[#allocation5 + $0x518] sm:$0xff] }
 0x7ca   :  { %3836 = vmatpush1.bf16.msra.mxu0 %v3330_v55  ;;  %4000 = vmatpush1.bf16.msra.mxu1 %v3332_v56  ;;  %v3426_v55 = vld [vmem:[#allocation5 + $0x500] sm:$0xff]  ;;  %v3428_v56 = vld [vmem:[#allocation5 + $0x510] sm:$0xff] }
 0x7cb   :  { %3837 = vmatprep.subr.bf16.mxu0 %v3339_v18  ;;  %4001 = vmatprep.subr.bf16.mxu1 %v3341_v35  ;;  %v3435_v18 = vld [vmem:[#allocation5 + $0x548] sm:$0xff]  ;;  %v3437_v35 = vld [vmem:[#allocation5 + $0x558] sm:$0xff] }
 0x7ce   :  { %3838 = vmatpush1.bf16.msra.mxu0 %v3338_v57  ;;  %4002 = vmatpush1.bf16.msra.mxu1 %v3340_v63  ;;  %v3434_v57 = vld [vmem:[#allocation5 + $0x540] sm:$0xff]  ;;  %v3436_v63 = vld [vmem:[#allocation5 + $0x550] sm:$0xff] }
 0x7cf   :  { %3839 = vmatprep.subr.bf16.mxu0 %v3347_v58  ;;  %4003 = vmatprep.subr.bf16.mxu1 %v3349_v59  ;;  %v3443_v58 = vld [vmem:[#allocation5 + $0x588] sm:$0xff]  ;;  %v3445_v59 = vld [vmem:[#allocation5 + $0x598] sm:$0xff] }
 0x7d2   :  { %3840 = vmatpush1.bf16.msra.mxu0 %v3346_v60  ;;  %4004 = vmatpush1.bf16.msra.mxu1 %v3348_v2  ;;  %v3442_v60 = vld [vmem:[#allocation5 + $0x580] sm:$0xff]  ;;  %v3444_v2 = vld [vmem:[#allocation5 + $0x590] sm:$0xff] }
 0x7d3   :  { %3841 = vmatprep.subr.bf16.mxu0 %v3355_v61  ;;  %4005 = vmatprep.subr.bf16.mxu1 %v3357_v13  ;;  %v3451_v61 = vld [vmem:[#allocation5 + $0x5c8] sm:$0xff]  ;;  %v3453_v13 = vld [vmem:[#allocation5 + $0x5d8] sm:$0xff] }
 0x7d6   :  { %3842 = vmatpush1.bf16.msra.mxu0 %v3354_v14  ;;  %4006 = vmatpush1.bf16.msra.mxu1 %v3356_v36  ;;  %v3450_v14 = vld [vmem:[#allocation5 + $0x5c0] sm:$0xff]  ;;  %v3452_v36 = vld [vmem:[#allocation5 + $0x5d0] sm:$0xff] }
 0x7d7   :  { %3843 = vmatprep.subr.bf16.mxu0 %v3363_v21  ;;  %4007 = vmatprep.subr.bf16.mxu1 %v3365_v7  ;;  %v3459_v21 = vld [vmem:[#allocation5 + $0x608] sm:$0xff]  ;;  %v3461_v7 = vld [vmem:[#allocation5 + $0x618] sm:$0xff] }
 0x7da   :  { %3844 = vmatpush1.bf16.msra.mxu0 %v3362_v6  ;;  %4008 = vmatpush1.bf16.msra.mxu1 %v3364_v42  ;;  %v3458_v6 = vld [vmem:[#allocation5 + $0x600] sm:$0xff]  ;;  %v3460_v42 = vld [vmem:[#allocation5 + $0x610] sm:$0xff] }
 0x7db   :  { %3845 = vmatprep.subr.bf16.mxu0 %v3371_v24  ;;  %4009 = vmatprep.subr.bf16.mxu1 %v3373_v0  ;;  %v3467_v24 = vld [vmem:[#allocation5 + $0x648] sm:$0xff]  ;;  %v3469_v0 = vld [vmem:[#allocation5 + $0x658] sm:$0xff] }
 0x7de   :  { %3846 = vmatpush1.bf16.msra.mxu0 %v3370_v40  ;;  %4010 = vmatpush1.bf16.msra.mxu1 %v3372_v62  ;;  %v3466_v40 = vld [vmem:[#allocation5 + $0x640] sm:$0xff]  ;;  %v3468_v62 = vld [vmem:[#allocation5 + $0x650] sm:$0xff] }
 0x7df   :  { %3847 = vmatprep.subr.bf16.mxu0 %v3379_v25  ;;  %4011 = vmatprep.subr.bf16.mxu1 %v3381_v26  ;;  %v3475_v25 = vld [vmem:[#allocation5 + $0x688] sm:$0xff]  ;;  %v3477_v26 = vld [vmem:[#allocation5 + $0x698] sm:$0xff] }
 0x7e2   :  { %3848 = vmatpush1.bf16.msra.mxu0 %v3378_v27  ;;  %4012 = vmatpush1.bf16.msra.mxu1 %v3380_v28  ;;  %v3474_v27 = vld [vmem:[#allocation5 + $0x680] sm:$0xff]  ;;  %v3476_v28 = vld [vmem:[#allocation5 + $0x690] sm:$0xff] }
 0x7e3   :  { %3849 = vmatprep.subr.bf16.mxu0 %v3387_v8  ;;  %4013 = vmatprep.subr.bf16.mxu1 %v3389_v29  ;;  %v3483_v8 = vld [vmem:[#allocation5 + $0x6c8] sm:$0xff]  ;;  %v3485_v29 = vld [vmem:[#allocation5 + $0x6d8] sm:$0xff] }
 0x7e6   :  { %3850 = vmatpush1.bf16.msra.mxu0 %v3386_v30  ;;  %4014 = vmatpush1.bf16.msra.mxu1 %v3388_v41  ;;  %v3482_v30 = vld [vmem:[#allocation5 + $0x6c0] sm:$0xff]  ;;  %v3484_v41 = vld [vmem:[#allocation5 + $0x6d0] sm:$0xff] }
 0x7e7   :  { %3860 = vmatprep.subr.bf16.mxu0 %v3395_v31  ;;  %4024 = vmatprep.subr.bf16.mxu1 %v3397_v1  ;;  %v3491_v31 = vld [vmem:[#allocation5 + $0x708] sm:$0xff]  ;;  %v3493_v1 = vld [vmem:[#allocation5 + $0x718] sm:$0xff] }
 0x7e9   :  { %3852 = vmatmul.mubr.bf16.vlgmr.msra.gmra.mrb[20].mxu0 %v8519_v9  ;;  %4016 = vmatmul.mubr.bf16.vlgmr.msra.gmra.mrb[20].mxu1 %v8519_v9 }
 0x7ea   :  { %3861 = vmatpush1.bf16.msra.mxu0 %v3394_v32  ;;  %4025 = vmatpush1.bf16.msra.mxu1 %v3396_v33  ;;  %v3490_v32 = vld [vmem:[#allocation5 + $0x700] sm:$0xff]  ;;  %v3492_v33 = vld [vmem:[#allocation5 + $0x710] sm:$0xff] }
 0x7eb   :  { %3862 = vmatprep.subr.bf16.mxu0 %v3403_v34  ;;  %4026 = vmatprep.subr.bf16.mxu1 %v3405_v45  ;;  %v3499_v34 = vld [vmem:[#allocation5 + $0x748] sm:$0xff]  ;;  %v3501_v45 = vld [vmem:[#allocation5 + $0x758] sm:$0xff] }
 0x7ec   :  { %3892 = vmatprep.mubr.bf16.mxu0 %v8525_v12  ;;  %4056 = vmatprep.mubr.bf16.mxu1 %v8525_v12 }
 0x7ee   :  { %3863 = vmatpush1.bf16.msra.mxu0 %v3402_v46  ;;  %4027 = vmatpush1.bf16.msra.mxu1 %v3404_v4  ;;  %v3498_v46 = vld [vmem:[#allocation5 + $0x740] sm:$0xff]  ;;  %v3500_v4 = vld [vmem:[#allocation5 + $0x750] sm:$0xff] }
 0x7ef   :  { %3864 = vmatprep.subr.bf16.mxu0 %v3411_v47  ;;  %4028 = vmatprep.subr.bf16.mxu1 %v3413_v48  ;;  %v3507_v47 = vld [vmem:[#allocation5 + $0x788] sm:$0xff]  ;;  %v3509_v48 = vld [vmem:[#allocation5 + $0x798] sm:$0xff] }
 0x7f2   :  { %3865 = vmatpush1.bf16.msra.mxu0 %v3410_v49  ;;  %4029 = vmatpush1.bf16.msra.mxu1 %v3412_v37  ;;  %v3506_v49 = vld [vmem:[#allocation5 + $0x780] sm:$0xff]  ;;  %v3508_v37 = vld [vmem:[#allocation5 + $0x790] sm:$0xff] }
 0x7f3   :  { %3866 = vmatprep.subr.bf16.mxu0 %v3419_v50  ;;  %4030 = vmatprep.subr.bf16.mxu1 %v3421_v51  ;;  %v3515_v50 = vld [vmem:[#allocation5 + $0x7c8] sm:$0xff]  ;;  %v3517_v51 = vld [vmem:[#allocation5 + $0x7d8] sm:$0xff] }
 0x7f6   :  { %3867 = vmatpush1.bf16.msra.mxu0 %v3418_v5  ;;  %4031 = vmatpush1.bf16.msra.mxu1 %v3420_v52  ;;  %v3514_v5 = vld [vmem:[#allocation5 + $0x7c0] sm:$0xff]  ;;  %v3516_v52 = vld [vmem:[#allocation5 + $0x7d0] sm:$0xff] }
 0x7f7   :  { %3868 = vmatprep.subr.bf16.mxu0 %v3427_v53  ;;  %4032 = vmatprep.subr.bf16.mxu1 %v3429_v54  ;;  %v3523_v53 = vld [vmem:[#allocation5 + $0x808] sm:$0xff]  ;;  %v3525_v54 = vld [vmem:[#allocation5 + $0x818] sm:$0xff] }
 0x7fa   :  { %3869 = vmatpush1.bf16.msra.mxu0 %v3426_v55  ;;  %4033 = vmatpush1.bf16.msra.mxu1 %v3428_v56  ;;  %v3522_v55 = vld [vmem:[#allocation5 + $0x800] sm:$0xff]  ;;  %v3524_v56 = vld [vmem:[#allocation5 + $0x810] sm:$0xff] }
 0x7fb   :  { %3870 = vmatprep.subr.bf16.mxu0 %v3435_v18  ;;  %4034 = vmatprep.subr.bf16.mxu1 %v3437_v35  ;;  %v3531_v18 = vld [vmem:[#allocation5 + $0x848] sm:$0xff]  ;;  %v3533_v35 = vld [vmem:[#allocation5 + $0x858] sm:$0xff] }
 0x7fe   :  { %3871 = vmatpush1.bf16.msra.mxu0 %v3434_v57  ;;  %4035 = vmatpush1.bf16.msra.mxu1 %v3436_v63  ;;  %v3530_v57 = vld [vmem:[#allocation5 + $0x840] sm:$0xff]  ;;  %v3532_v63 = vld [vmem:[#allocation5 + $0x850] sm:$0xff] }
 0x7ff   :  { %3872 = vmatprep.subr.bf16.mxu0 %v3443_v58  ;;  %4036 = vmatprep.subr.bf16.mxu1 %v3445_v59  ;;  %v3539_v58 = vld [vmem:[#allocation5 + $0x888] sm:$0xff]  ;;  %v3541_v59 = vld [vmem:[#allocation5 + $0x898] sm:$0xff] }
 0x802   :  { %3873 = vmatpush1.bf16.msra.mxu0 %v3442_v60  ;;  %4037 = vmatpush1.bf16.msra.mxu1 %v3444_v2  ;;  %v3538_v60 = vld [vmem:[#allocation5 + $0x880] sm:$0xff]  ;;  %v3540_v2 = vld [vmem:[#allocation5 + $0x890] sm:$0xff] }
 0x803   :  { %3874 = vmatprep.subr.bf16.mxu0 %v3451_v61  ;;  %4038 = vmatprep.subr.bf16.mxu1 %v3453_v13  ;;  %v3547_v61 = vld [vmem:[#allocation5 + $0x8c8] sm:$0xff]  ;;  %v3549_v13 = vld [vmem:[#allocation5 + $0x8d8] sm:$0xff] }
 0x806   :  { %3875 = vmatpush1.bf16.msra.mxu0 %v3450_v14  ;;  %4039 = vmatpush1.bf16.msra.mxu1 %v3452_v36  ;;  %v3546_v14 = vld [vmem:[#allocation5 + $0x8c0] sm:$0xff]  ;;  %v3548_v36 = vld [vmem:[#allocation5 + $0x8d0] sm:$0xff] }
 0x807   :  { %3876 = vmatprep.subr.bf16.mxu0 %v3459_v21  ;;  %4040 = vmatprep.subr.bf16.mxu1 %v3461_v7  ;;  %v3555_v21 = vld [vmem:[#allocation5 + $0x908] sm:$0xff]  ;;  %v3557_v7 = vld [vmem:[#allocation5 + $0x918] sm:$0xff] }
 0x80a   :  { %3877 = vmatpush1.bf16.msra.mxu0 %v3458_v6  ;;  %4041 = vmatpush1.bf16.msra.mxu1 %v3460_v42  ;;  %v3554_v6 = vld [vmem:[#allocation5 + $0x900] sm:$0xff]  ;;  %v3556_v42 = vld [vmem:[#allocation5 + $0x910] sm:$0xff] }
 0x80b   :  { %3878 = vmatprep.subr.bf16.mxu0 %v3467_v24  ;;  %4042 = vmatprep.subr.bf16.mxu1 %v3469_v0  ;;  %v3563_v24 = vld [vmem:[#allocation5 + $0x948] sm:$0xff]  ;;  %v3565_v0 = vld [vmem:[#allocation5 + $0x958] sm:$0xff] }
 0x80e   :  { %3879 = vmatpush1.bf16.msra.mxu0 %v3466_v40  ;;  %4043 = vmatpush1.bf16.msra.mxu1 %v3468_v62  ;;  %v3562_v40 = vld [vmem:[#allocation5 + $0x940] sm:$0xff]  ;;  %v3564_v62 = vld [vmem:[#allocation5 + $0x950] sm:$0xff] }
 0x80f   :  { %3880 = vmatprep.subr.bf16.mxu0 %v3475_v25  ;;  %4044 = vmatprep.subr.bf16.mxu1 %v3477_v26  ;;  %v3571_v25 = vld [vmem:[#allocation5 + $0x988] sm:$0xff]  ;;  %v3573_v26 = vld [vmem:[#allocation5 + $0x998] sm:$0xff] }
 0x812   :  { %3881 = vmatpush1.bf16.msra.mxu0 %v3474_v27  ;;  %4045 = vmatpush1.bf16.msra.mxu1 %v3476_v28  ;;  %v3570_v27 = vld [vmem:[#allocation5 + $0x980] sm:$0xff]  ;;  %v3572_v28 = vld [vmem:[#allocation5 + $0x990] sm:$0xff] }
 0x813   :  { %3882 = vmatprep.subr.bf16.mxu0 %v3483_v8  ;;  %4046 = vmatprep.subr.bf16.mxu1 %v3485_v29  ;;  %v3579_v8 = vld [vmem:[#allocation5 + $0x9c8] sm:$0xff]  ;;  %v3581_v29 = vld [vmem:[#allocation5 + $0x9d8] sm:$0xff] }
 0x816   :  { %3883 = vmatpush1.bf16.msra.mxu0 %v3482_v30  ;;  %4047 = vmatpush1.bf16.msra.mxu1 %v3484_v41  ;;  %v3578_v30 = vld [vmem:[#allocation5 + $0x9c0] sm:$0xff]  ;;  %v3580_v41 = vld [vmem:[#allocation5 + $0x9d0] sm:$0xff] }
 0x817   :  { %3884 = vmatprep.subr.bf16.mxu0 %v3491_v31  ;;  %4048 = vmatprep.subr.bf16.mxu1 %v3493_v1  ;;  %v3587_v31 = vld [vmem:[#allocation5 + $0xa08] sm:$0xff]  ;;  %v3589_v1 = vld [vmem:[#allocation5 + $0xa18] sm:$0xff] }
 0x81a   :  { %3885 = vmatpush1.bf16.msra.mxu0 %v3490_v32  ;;  %4049 = vmatpush1.bf16.msra.mxu1 %v3492_v33  ;;  %v3586_v32 = vld [vmem:[#allocation5 + $0xa00] sm:$0xff]  ;;  %v3588_v33 = vld [vmem:[#allocation5 + $0xa10] sm:$0xff] }
 0x81b   :  { %3886 = vmatprep.subr.bf16.mxu0 %v3499_v34  ;;  %4050 = vmatprep.subr.bf16.mxu1 %v3501_v45  ;;  %v3595_v34 = vld [vmem:[#allocation5 + $0xa48] sm:$0xff]  ;;  %v3597_v45 = vld [vmem:[#allocation5 + $0xa58] sm:$0xff] }
 0x81e   :  { %3887 = vmatpush1.bf16.msra.mxu0 %v3498_v46  ;;  %4051 = vmatpush1.bf16.msra.mxu1 %v3500_v4  ;;  %v3594_v46 = vld [vmem:[#allocation5 + $0xa40] sm:$0xff]  ;;  %v3596_v4 = vld [vmem:[#allocation5 + $0xa50] sm:$0xff] }
 0x81f   :  { %3888 = vmatprep.subr.bf16.mxu0 %v3507_v47  ;;  %4052 = vmatprep.subr.bf16.mxu1 %v3509_v48  ;;  %v3603_v47 = vld [vmem:[#allocation5 + $0xa88] sm:$0xff]  ;;  %v3605_v48 = vld [vmem:[#allocation5 + $0xa98] sm:$0xff] }
 0x822   :  { %3889 = vmatpush1.bf16.msra.mxu0 %v3506_v49  ;;  %4053 = vmatpush1.bf16.msra.mxu1 %v3508_v37  ;;  %v3602_v49 = vld [vmem:[#allocation5 + $0xa80] sm:$0xff]  ;;  %v3604_v37 = vld [vmem:[#allocation5 + $0xa90] sm:$0xff] }
 0x823   :  { %3890 = vmatprep.subr.bf16.mxu0 %v3515_v50  ;;  %4054 = vmatprep.subr.bf16.mxu1 %v3517_v51  ;;  %v3611_v50 = vld [vmem:[#allocation5 + $0xac8] sm:$0xff]  ;;  %v3613_v51 = vld [vmem:[#allocation5 + $0xad8] sm:$0xff] }
 0x826   :  { %3891 = vmatpush1.bf16.msra.mxu0 %v3514_v5  ;;  %4055 = vmatpush1.bf16.msra.mxu1 %v3516_v52  ;;  %v3610_v5 = vld [vmem:[#allocation5 + $0xac0] sm:$0xff]  ;;  %v3612_v52 = vld [vmem:[#allocation5 + $0xad0] sm:$0xff] }
 0x827   :  { %3901 = vmatprep.subr.bf16.mxu0 %v3523_v53  ;;  %4065 = vmatprep.subr.bf16.mxu1 %v3525_v54  ;;  %v3619_v53 = vld [vmem:[#allocation5 + $0xb08] sm:$0xff]  ;;  %v3621_v54 = vld [vmem:[#allocation5 + $0xb18] sm:$0xff] }
 0x829   :  { %3893 = vmatmul.mubr.bf16.vlgmr.msra.gmra.mrb[20].mxu0 %v8521_v10  ;;  %4057 = vmatmul.mubr.bf16.vlgmr.msra.gmra.mrb[20].mxu1 %v8521_v10 }
 0x82a   :  { %3902 = vmatpush1.bf16.msra.mxu0 %v3522_v55  ;;  %4066 = vmatpush1.bf16.msra.mxu1 %v3524_v56  ;;  %v3618_v55 = vld [vmem:[#allocation5 + $0xb00] sm:$0xff]  ;;  %v3620_v56 = vld [vmem:[#allocation5 + $0xb10] sm:$0xff] }
 0x82b   :  { %3903 = vmatprep.subr.bf16.mxu0 %v3531_v18  ;;  %4067 = vmatprep.subr.bf16.mxu1 %v3533_v35  ;;  %v3627_v18 = vld [vmem:[#allocation5 + $0xb48] sm:$0xff]  ;;  %v3629_v35 = vld [vmem:[#allocation5 + $0xb58] sm:$0xff] }
 0x82c   :  { %3933 = vmatprep.mubr.bf16.mxu0 %v8541_v3  ;;  %4097 = vmatprep.mubr.bf16.mxu1 %v8541_v3 }
 0x82e   :  { %3904 = vmatpush1.bf16.msra.mxu0 %v3530_v57  ;;  %4068 = vmatpush1.bf16.msra.mxu1 %v3532_v63  ;;  %v3626_v57 = vld [vmem:[#allocation5 + $0xb40] sm:$0xff]  ;;  %v3628_v63 = vld [vmem:[#allocation5 + $0xb50] sm:$0xff] }
 0x82f   :  { %3905 = vmatprep.subr.bf16.mxu0 %v3539_v58  ;;  %4069 = vmatprep.subr.bf16.mxu1 %v3541_v59  ;;  %v3635_v58 = vld [vmem:[#allocation5 + $0xb88] sm:$0xff]  ;;  %v3637_v59 = vld [vmem:[#allocation5 + $0xb98] sm:$0xff] }
 0x832   :  { %3906 = vmatpush1.bf16.msra.mxu0 %v3538_v60  ;;  %4070 = vmatpush1.bf16.msra.mxu1 %v3540_v2  ;;  %v3634_v60 = vld [vmem:[#allocation5 + $0xb80] sm:$0xff]  ;;  %v3636_v2 = vld [vmem:[#allocation5 + $0xb90] sm:$0xff] }
 0x833   :  { %3907 = vmatprep.subr.bf16.mxu0 %v3547_v61  ;;  %4071 = vmatprep.subr.bf16.mxu1 %v3549_v13  ;;  %v3643_v61 = vld [vmem:[#allocation5 + $0xbc8] sm:$0xff]  ;;  %v3645_v13 = vld [vmem:[#allocation5 + $0xbd8] sm:$0xff] }
 0x836   :  { %3908 = vmatpush1.bf16.msra.mxu0 %v3546_v14  ;;  %4072 = vmatpush1.bf16.msra.mxu1 %v3548_v36  ;;  %v3642_v14 = vld [vmem:[#allocation5 + $0xbc0] sm:$0xff]  ;;  %v3644_v36 = vld [vmem:[#allocation5 + $0xbd0] sm:$0xff] }
 0x837   :  { %3909 = vmatprep.subr.bf16.mxu0 %v3555_v21  ;;  %4073 = vmatprep.subr.bf16.mxu1 %v3557_v7  ;;  %v3651_v21 = vld [vmem:[#allocation5 + $0xc08] sm:$0xff]  ;;  %v3653_v7 = vld [vmem:[#allocation5 + $0xc18] sm:$0xff] }
 0x83a   :  { %3910 = vmatpush1.bf16.msra.mxu0 %v3554_v6  ;;  %4074 = vmatpush1.bf16.msra.mxu1 %v3556_v42  ;;  %v3650_v6 = vld [vmem:[#allocation5 + $0xc00] sm:$0xff]  ;;  %v3652_v42 = vld [vmem:[#allocation5 + $0xc10] sm:$0xff] }
 0x83b   :  { %3911 = vmatprep.subr.bf16.mxu0 %v3563_v24  ;;  %4075 = vmatprep.subr.bf16.mxu1 %v3565_v0  ;;  %v3659_v24 = vld [vmem:[#allocation5 + $0xc48] sm:$0xff]  ;;  %v3661_v0 = vld [vmem:[#allocation5 + $0xc58] sm:$0xff] }
 0x83e   :  { %3912 = vmatpush1.bf16.msra.mxu0 %v3562_v40  ;;  %4076 = vmatpush1.bf16.msra.mxu1 %v3564_v62  ;;  %v3658_v40 = vld [vmem:[#allocation5 + $0xc40] sm:$0xff]  ;;  %v3660_v62 = vld [vmem:[#allocation5 + $0xc50] sm:$0xff] }
 0x83f   :  { %3913 = vmatprep.subr.bf16.mxu0 %v3571_v25  ;;  %4077 = vmatprep.subr.bf16.mxu1 %v3573_v26  ;;  %v3667_v25 = vld [vmem:[#allocation5 + $0xc88] sm:$0xff]  ;;  %v3669_v26 = vld [vmem:[#allocation5 + $0xc98] sm:$0xff] }
 0x842   :  { %3914 = vmatpush1.bf16.msra.mxu0 %v3570_v27  ;;  %4078 = vmatpush1.bf16.msra.mxu1 %v3572_v28  ;;  %v3666_v27 = vld [vmem:[#allocation5 + $0xc80] sm:$0xff]  ;;  %v3668_v28 = vld [vmem:[#allocation5 + $0xc90] sm:$0xff] }
 0x843   :  { %3915 = vmatprep.subr.bf16.mxu0 %v3579_v8  ;;  %4079 = vmatprep.subr.bf16.mxu1 %v3581_v29  ;;  %v3675_v8 = vld [vmem:[#allocation5 + $0xcc8] sm:$0xff]  ;;  %v3677_v29 = vld [vmem:[#allocation5 + $0xcd8] sm:$0xff] }
 0x846   :  { %3916 = vmatpush1.bf16.msra.mxu0 %v3578_v30  ;;  %4080 = vmatpush1.bf16.msra.mxu1 %v3580_v41  ;;  %v3674_v30 = vld [vmem:[#allocation5 + $0xcc0] sm:$0xff]  ;;  %v3676_v41 = vld [vmem:[#allocation5 + $0xcd0] sm:$0xff] }
 0x847   :  { %3917 = vmatprep.subr.bf16.mxu0 %v3587_v31  ;;  %4081 = vmatprep.subr.bf16.mxu1 %v3589_v1  ;;  %v3683_v31 = vld [vmem:[#allocation5 + $0xd08] sm:$0xff]  ;;  %v3685_v1 = vld [vmem:[#allocation5 + $0xd18] sm:$0xff] }
 0x84a   :  { %3918 = vmatpush1.bf16.msra.mxu0 %v3586_v32  ;;  %4082 = vmatpush1.bf16.msra.mxu1 %v3588_v33  ;;  %v3682_v32 = vld [vmem:[#allocation5 + $0xd00] sm:$0xff]  ;;  %v3684_v33 = vld [vmem:[#allocation5 + $0xd10] sm:$0xff] }
 0x84b   :  { %3919 = vmatprep.subr.bf16.mxu0 %v3595_v34  ;;  %4083 = vmatprep.subr.bf16.mxu1 %v3597_v45  ;;  %v3691_v34 = vld [vmem:[#allocation5 + $0xd48] sm:$0xff]  ;;  %v3693_v45 = vld [vmem:[#allocation5 + $0xd58] sm:$0xff] }
 0x84e   :  { %3920 = vmatpush1.bf16.msra.mxu0 %v3594_v46  ;;  %4084 = vmatpush1.bf16.msra.mxu1 %v3596_v4  ;;  %v3690_v46 = vld [vmem:[#allocation5 + $0xd40] sm:$0xff]  ;;  %v3692_v4 = vld [vmem:[#allocation5 + $0xd50] sm:$0xff] }
 0x84f   :  { %3921 = vmatprep.subr.bf16.mxu0 %v3603_v47  ;;  %4085 = vmatprep.subr.bf16.mxu1 %v3605_v48  ;;  %v3699_v47 = vld [vmem:[#allocation5 + $0xd88] sm:$0xff]  ;;  %v3701_v48 = vld [vmem:[#allocation5 + $0xd98] sm:$0xff] }
 0x852   :  { %3922 = vmatpush1.bf16.msra.mxu0 %v3602_v49  ;;  %4086 = vmatpush1.bf16.msra.mxu1 %v3604_v37  ;;  %v3698_v49 = vld [vmem:[#allocation5 + $0xd80] sm:$0xff]  ;;  %v3700_v37 = vld [vmem:[#allocation5 + $0xd90] sm:$0xff] }
 0x853   :  { %3923 = vmatprep.subr.bf16.mxu0 %v3611_v50  ;;  %4087 = vmatprep.subr.bf16.mxu1 %v3613_v51  ;;  %v3707_v50 = vld [vmem:[#allocation5 + $0xdc8] sm:$0xff]  ;;  %v3709_v51 = vld [vmem:[#allocation5 + $0xdd8] sm:$0xff] }
 0x856   :  { %3924 = vmatpush1.bf16.msra.mxu0 %v3610_v5  ;;  %4088 = vmatpush1.bf16.msra.mxu1 %v3612_v52  ;;  %v3706_v5 = vld [vmem:[#allocation5 + $0xdc0] sm:$0xff]  ;;  %v3708_v52 = vld [vmem:[#allocation5 + $0xdd0] sm:$0xff] }
 0x857   :  { %3925 = vmatprep.subr.bf16.mxu0 %v3619_v53  ;;  %4089 = vmatprep.subr.bf16.mxu1 %v3621_v54  ;;  %v3715_v53 = vld [vmem:[#allocation5 + $0xe08] sm:$0xff]  ;;  %v3717_v54 = vld [vmem:[#allocation5 + $0xe18] sm:$0xff] }
 0x85a   :  { %3926 = vmatpush1.bf16.msra.mxu0 %v3618_v55  ;;  %4090 = vmatpush1.bf16.msra.mxu1 %v3620_v56  ;;  %v3714_v55 = vld [vmem:[#allocation5 + $0xe00] sm:$0xff]  ;;  %v3716_v56 = vld [vmem:[#allocation5 + $0xe10] sm:$0xff] }
 0x85b   :  { %3927 = vmatprep.subr.bf16.mxu0 %v3627_v18  ;;  %4091 = vmatprep.subr.bf16.mxu1 %v3629_v35  ;;  %v3723_v18 = vld [vmem:[#allocation5 + $0xe48] sm:$0xff]  ;;  %v3725_v35 = vld [vmem:[#allocation5 + $0xe58] sm:$0xff] }
 0x85e   :  { %3928 = vmatpush1.bf16.msra.mxu0 %v3626_v57  ;;  %4092 = vmatpush1.bf16.msra.mxu1 %v3628_v63  ;;  %v3722_v57 = vld [vmem:[#allocation5 + $0xe40] sm:$0xff]  ;;  %v3724_v63 = vld [vmem:[#allocation5 + $0xe50] sm:$0xff] }
 0x85f   :  { %3929 = vmatprep.subr.bf16.mxu0 %v3635_v58  ;;  %4093 = vmatprep.subr.bf16.mxu1 %v3637_v59  ;;  %v3731_v58 = vld [vmem:[#allocation5 + $0xe88] sm:$0xff]  ;;  %v3733_v59 = vld [vmem:[#allocation5 + $0xe98] sm:$0xff] }
 0x862   :  { %3930 = vmatpush1.bf16.msra.mxu0 %v3634_v60  ;;  %4094 = vmatpush1.bf16.msra.mxu1 %v3636_v2  ;;  %v3730_v60 = vld [vmem:[#allocation5 + $0xe80] sm:$0xff]  ;;  %v3732_v2 = vld [vmem:[#allocation5 + $0xe90] sm:$0xff] }
 0x863   :  { %3931 = vmatprep.subr.bf16.mxu0 %v3643_v61  ;;  %4095 = vmatprep.subr.bf16.mxu1 %v3645_v13  ;;  %v3739_v61 = vld [vmem:[#allocation5 + $0xec8] sm:$0xff]  ;;  %v3741_v13 = vld [vmem:[#allocation5 + $0xed8] sm:$0xff] }
 0x866   :  { %3932 = vmatpush1.bf16.msra.mxu0 %v3642_v14  ;;  %4096 = vmatpush1.bf16.msra.mxu1 %v3644_v36  ;;  %v3738_v14 = vld [vmem:[#allocation5 + $0xec0] sm:$0xff]  ;;  %v3740_v36 = vld [vmem:[#allocation5 + $0xed0] sm:$0xff] }
 0x867   :  { %3942 = vmatprep.subr.bf16.mxu0 %v3651_v21  ;;  %4106 = vmatprep.subr.bf16.mxu1 %v3653_v7  ;;  %v3747_v21 = vld [vmem:[#allocation5 + $0xf08] sm:$0xff]  ;;  %v3749_v7 = vld [vmem:[#allocation5 + $0xf18] sm:$0xff] }
 0x869   :  { %3934 = vmatmul.mubr.bf16.vlgmr.msra.gmra.mrb[20].mxu0 %v8537_v15  ;;  %4098 = vmatmul.mubr.bf16.vlgmr.msra.gmra.mrb[20].mxu1 %v8537_v15 }
 0x86a   :  { %3943 = vmatpush1.bf16.msra.mxu0 %v3650_v6  ;;  %4107 = vmatpush1.bf16.msra.mxu1 %v3652_v42  ;;  %v3746_v6 = vld [vmem:[#allocation5 + $0xf00] sm:$0xff]  ;;  %v3748_v42 = vld [vmem:[#allocation5 + $0xf10] sm:$0xff] }
 0x86b   :  { %3944 = vmatprep.subr.bf16.mxu0 %v3659_v24  ;;  %4108 = vmatprep.subr.bf16.mxu1 %v3661_v0  ;;  %v3755_v24 = vld [vmem:[#allocation5 + $0xf48] sm:$0xff]  ;;  %v3757_v0 = vld [vmem:[#allocation5 + $0xf58] sm:$0xff] }
 0x86c   :  { %3974 = vmatprep.mubr.bf16.mxu0 %v8543_v17  ;;  %4138 = vmatprep.mubr.bf16.mxu1 %v8543_v17 }
 0x86e   :  { %3945 = vmatpush1.bf16.msra.mxu0 %v3658_v40  ;;  %4109 = vmatpush1.bf16.msra.mxu1 %v3660_v62  ;;  %v3754_v40 = vld [vmem:[#allocation5 + $0xf40] sm:$0xff]  ;;  %v3756_v62 = vld [vmem:[#allocation5 + $0xf50] sm:$0xff] }
 0x86f   :  { %3946 = vmatprep.subr.bf16.mxu0 %v3667_v25  ;;  %4110 = vmatprep.subr.bf16.mxu1 %v3669_v26  ;;  %v3763_v25 = vld [vmem:[#allocation5 + $0xf88] sm:$0xff]  ;;  %v3765_v26 = vld [vmem:[#allocation5 + $0xf98] sm:$0xff] }
 0x872   :  { %3947 = vmatpush1.bf16.msra.mxu0 %v3666_v27  ;;  %4111 = vmatpush1.bf16.msra.mxu1 %v3668_v28  ;;  %v3762_v27 = vld [vmem:[#allocation5 + $0xf80] sm:$0xff]  ;;  %v3764_v28 = vld [vmem:[#allocation5 + $0xf90] sm:$0xff] }
 0x873   :  { %3948 = vmatprep.subr.bf16.mxu0 %v3675_v8  ;;  %4112 = vmatprep.subr.bf16.mxu1 %v3677_v29  ;;  %v3771_v8 = vld [vmem:[#allocation5 + $0xfc8] sm:$0xff]  ;;  %v3773_v29 = vld [vmem:[#allocation5 + $0xfd8] sm:$0xff] }
 0x876   :  { %3949 = vmatpush1.bf16.msra.mxu0 %v3674_v30  ;;  %4113 = vmatpush1.bf16.msra.mxu1 %v3676_v41  ;;  %v3770_v30 = vld [vmem:[#allocation5 + $0xfc0] sm:$0xff]  ;;  %v3772_v41 = vld [vmem:[#allocation5 + $0xfd0] sm:$0xff] }
 0x877   :  { %3950 = vmatprep.subr.bf16.mxu0 %v3683_v31  ;;  %4114 = vmatprep.subr.bf16.mxu1 %v3685_v1  ;;  %v3271_v31 = vld [vmem:[#allocation5 + $0x28] sm:$0xff]  ;;  %v3273_v1 = vld [vmem:[#allocation5 + $0x38] sm:$0xff] }
 0x87a   :  { %3951 = vmatpush1.bf16.msra.mxu0 %v3682_v32  ;;  %4115 = vmatpush1.bf16.msra.mxu1 %v3684_v33  ;;  %v3270_v32 = vld [vmem:[#allocation5 + $0x20] sm:$0xff]  ;;  %v3272_v33 = vld [vmem:[#allocation5 + $0x30] sm:$0xff] }
 0x87b   :  { %3952 = vmatprep.subr.bf16.mxu0 %v3691_v34  ;;  %4116 = vmatprep.subr.bf16.mxu1 %v3693_v45  ;;  %v3279_v34 = vld [vmem:[#allocation5 + $0x68] sm:$0xff]  ;;  %v3281_v45 = vld [vmem:[#allocation5 + $0x78] sm:$0xff] }
 0x87e   :  { %3953 = vmatpush1.bf16.msra.mxu0 %v3690_v46  ;;  %4117 = vmatpush1.bf16.msra.mxu1 %v3692_v4  ;;  %v3278_v46 = vld [vmem:[#allocation5 + $0x60] sm:$0xff]  ;;  %v3280_v4 = vld [vmem:[#allocation5 + $0x70] sm:$0xff] }
 0x87f   :  { %3954 = vmatprep.subr.bf16.mxu0 %v3699_v47  ;;  %4118 = vmatprep.subr.bf16.mxu1 %v3701_v48  ;;  %v3287_v47 = vld [vmem:[#allocation5 + $0xa8] sm:$0xff]  ;;  %v3289_v48 = vld [vmem:[#allocation5 + $0xb8] sm:$0xff] }
 0x882   :  { %3955 = vmatpush1.bf16.msra.mxu0 %v3698_v49  ;;  %4119 = vmatpush1.bf16.msra.mxu1 %v3700_v37  ;;  %v3286_v49 = vld [vmem:[#allocation5 + $0xa0] sm:$0xff]  ;;  %v3288_v37 = vld [vmem:[#allocation5 + $0xb0] sm:$0xff] }
 0x883   :  { %3956 = vmatprep.subr.bf16.mxu0 %v3707_v50  ;;  %4120 = vmatprep.subr.bf16.mxu1 %v3709_v51  ;;  %v3295_v50 = vld [vmem:[#allocation5 + $0xe8] sm:$0xff]  ;;  %v3297_v51 = vld [vmem:[#allocation5 + $0xf8] sm:$0xff] }
 0x886   :  { %3957 = vmatpush1.bf16.msra.mxu0 %v3706_v5  ;;  %4121 = vmatpush1.bf16.msra.mxu1 %v3708_v52  ;;  %v3294_v5 = vld [vmem:[#allocation5 + $0xe0] sm:$0xff]  ;;  %v3296_v52 = vld [vmem:[#allocation5 + $0xf0] sm:$0xff] }
 0x887   :  { %3958 = vmatprep.subr.bf16.mxu0 %v3715_v53  ;;  %4122 = vmatprep.subr.bf16.mxu1 %v3717_v54  ;;  %v3303_v53 = vld [vmem:[#allocation5 + $0x128] sm:$0xff]  ;;  %v3305_v54 = vld [vmem:[#allocation5 + $0x138] sm:$0xff] }
 0x88a   :  { %3959 = vmatpush1.bf16.msra.mxu0 %v3714_v55  ;;  %4123 = vmatpush1.bf16.msra.mxu1 %v3716_v56  ;;  %v3304_v55 = vld [vmem:[#allocation5 + $0x130] sm:$0xff]  ;;  %v3311_v56 = vld [vmem:[#allocation5 + $0x168] sm:$0xff] }
 0x88b   :  { %3960 = vmatprep.subr.bf16.mxu0 %v3723_v18  ;;  %4124 = vmatprep.subr.bf16.mxu1 %v3725_v35  ;;  %v3313_v18 = vld [vmem:[#allocation5 + $0x178] sm:$0xff]  ;;  %v3310_v35 = vld [vmem:[#allocation5 + $0x160] sm:$0xff] }
 0x88e   :  { %3961 = vmatpush1.bf16.msra.mxu0 %v3722_v57  ;;  %4125 = vmatpush1.bf16.msra.mxu1 %v3724_v63  ;;  %v3312_v57 = vld [vmem:[#allocation5 + $0x170] sm:$0xff]  ;;  %v3319_v63 = vld [vmem:[#allocation5 + $0x1a8] sm:$0xff] }
 0x88f   :  { %3962 = vmatprep.subr.bf16.mxu0 %v3731_v58  ;;  %4126 = vmatprep.subr.bf16.mxu1 %v3733_v59  ;;  %v3321_v58 = vld [vmem:[#allocation5 + $0x1b8] sm:$0xff]  ;;  %v3318_v59 = vld [vmem:[#allocation5 + $0x1a0] sm:$0xff] }
 0x892   :  { %3963 = vmatpush1.bf16.msra.mxu0 %v3730_v60  ;;  %4127 = vmatpush1.bf16.msra.mxu1 %v3732_v2  ;;  %v3320_v60 = vld [vmem:[#allocation5 + $0x1b0] sm:$0xff]  ;;  %v3327_v2 = vld [vmem:[#allocation5 + $0x1e8] sm:$0xff] }
 0x893   :  { %3964 = vmatprep.subr.bf16.mxu0 %v3739_v61  ;;  %4128 = vmatprep.subr.bf16.mxu1 %v3741_v13  ;;  %v3329_v61 = vld [vmem:[#allocation5 + $0x1f8] sm:$0xff]  ;;  %v3326_v13 = vld [vmem:[#allocation5 + $0x1e0] sm:$0xff] }
 0x896   :  { %3965 = vmatpush1.bf16.msra.mxu0 %v3738_v14  ;;  %4129 = vmatpush1.bf16.msra.mxu1 %v3740_v36  ;;  %v3328_v14 = vld [vmem:[#allocation5 + $0x1f0] sm:$0xff]  ;;  %v3335_v36 = vld [vmem:[#allocation5 + $0x228] sm:$0xff] }
 0x897   :  { %3966 = vmatprep.subr.bf16.mxu0 %v3747_v21  ;;  %4130 = vmatprep.subr.bf16.mxu1 %v3749_v7  ;;  %v3337_v21 = vld [vmem:[#allocation5 + $0x238] sm:$0xff]  ;;  %v3334_v7 = vld [vmem:[#allocation5 + $0x220] sm:$0xff] }
 0x89a   :  { %3967 = vmatpush1.bf16.msra.mxu0 %v3746_v6  ;;  %4131 = vmatpush1.bf16.msra.mxu1 %v3748_v42  ;;  %v3336_v6 = vld [vmem:[#allocation5 + $0x230] sm:$0xff]  ;;  %v3343_v42 = vld [vmem:[#allocation5 + $0x268] sm:$0xff] }
 0x89b   :  { %3968 = vmatprep.subr.bf16.mxu0 %v3755_v24  ;;  %4132 = vmatprep.subr.bf16.mxu1 %v3757_v0  ;;  %v3345_v24 = vld [vmem:[#allocation5 + $0x278] sm:$0xff]  ;;  %v3342_v0 = vld [vmem:[#allocation5 + $0x260] sm:$0xff] }
 0x89e   :  { %3969 = vmatpush1.bf16.msra.mxu0 %v3754_v40  ;;  %4133 = vmatpush1.bf16.msra.mxu1 %v3756_v62  ;;  %v3344_v40 = vld [vmem:[#allocation5 + $0x270] sm:$0xff]  ;;  %v3351_v62 = vld [vmem:[#allocation5 + $0x2a8] sm:$0xff] }
 0x89f   :  { %3970 = vmatprep.subr.bf16.mxu0 %v3763_v25  ;;  %4134 = vmatprep.subr.bf16.mxu1 %v3765_v26  ;;  %v3353_v25 = vld [vmem:[#allocation5 + $0x2b8] sm:$0xff]  ;;  %v3350_v26 = vld [vmem:[#allocation5 + $0x2a0] sm:$0xff] }
 0x8a2   :  { %3971 = vmatpush1.bf16.msra.mxu0 %v3762_v27  ;;  %4135 = vmatpush1.bf16.msra.mxu1 %v3764_v28  ;;  %v3352_v27 = vld [vmem:[#allocation5 + $0x2b0] sm:$0xff]  ;;  %v3359_v28 = vld [vmem:[#allocation5 + $0x2e8] sm:$0xff] }
 0x8a3   :  { %3972 = vmatprep.subr.bf16.mxu0 %v3771_v8  ;;  %4136 = vmatprep.subr.bf16.mxu1 %v3773_v29  ;;  %v3361_v8 = vld [vmem:[#allocation5 + $0x2f8] sm:$0xff]  ;;  %v3358_v29 = vld [vmem:[#allocation5 + $0x2e0] sm:$0xff] }
 0x8a6   :  { %3973 = vmatpush1.bf16.msra.mxu0 %v3770_v30  ;;  %4137 = vmatpush1.bf16.msra.mxu1 %v3772_v41  ;;  %v3360_v30 = vld [vmem:[#allocation5 + $0x2f0] sm:$0xff]  ;;  %v3367_v41 = vld [vmem:[#allocation5 + $0x328] sm:$0xff] }
 0x8a7   :  { %4147 = vmatprep.subr.bf16.mxu0 %v3271_v31  ;;  %4311 = vmatprep.subr.bf16.mxu1 %v3273_v1  ;;  %v3369_v31 = vld [vmem:[#allocation5 + $0x338] sm:$0xff]  ;;  %v3366_v1 = vld [vmem:[#allocation5 + $0x320] sm:$0xff] }
 0x8a9   :  { %3975 = vmatmul.mubr.bf16.vlgmr.msra.gmra.mrb[20].mxu0 %v8539_v16  ;;  %4139 = vmatmul.mubr.bf16.vlgmr.msra.gmra.mrb[20].mxu1 %v8539_v16 }
 0x8aa   :  { %4148 = vmatpush1.bf16.msra.mxu0 %v3270_v32  ;;  %4312 = vmatpush1.bf16.msra.mxu1 %v3272_v33  ;;  %v3368_v32 = vld [vmem:[#allocation5 + $0x330] sm:$0xff]  ;;  %v3375_v33 = vld [vmem:[#allocation5 + $0x368] sm:$0xff] }
 0x8ab   :  { %4149 = vmatprep.subr.bf16.mxu0 %v3279_v34  ;;  %4313 = vmatprep.subr.bf16.mxu1 %v3281_v45  ;;  %v3377_v34 = vld [vmem:[#allocation5 + $0x378] sm:$0xff]  ;;  %v3374_v45 = vld [vmem:[#allocation5 + $0x360] sm:$0xff] }
 0x8ac   :  { %4179 = vmatprep.mubr.bf16.mxu0 %v8523_v11  ;;  %4343 = vmatprep.mubr.bf16.mxu1 %v8523_v11  ;;  %v3302_v11 = vld [vmem:[#allocation5 + $0x120] sm:$0xff] }
 0x8ae   :  { %4150 = vmatpush1.bf16.msra.mxu0 %v3278_v46  ;;  %4314 = vmatpush1.bf16.msra.mxu1 %v3280_v4  ;;  %v3376_v46 = vld [vmem:[#allocation5 + $0x370] sm:$0xff]  ;;  %v3383_v4 = vld [vmem:[#allocation5 + $0x3a8] sm:$0xff] }
 0x8af   :  { %4151 = vmatprep.subr.bf16.mxu0 %v3287_v47  ;;  %4315 = vmatprep.subr.bf16.mxu1 %v3289_v48  ;;  %v3385_v47 = vld [vmem:[#allocation5 + $0x3b8] sm:$0xff]  ;;  %v3382_v48 = vld [vmem:[#allocation5 + $0x3a0] sm:$0xff] }
 0x8b2   :  { %4152 = vmatpush1.bf16.msra.mxu0 %v3286_v49  ;;  %4316 = vmatpush1.bf16.msra.mxu1 %v3288_v37  ;;  %v3384_v49 = vld [vmem:[#allocation5 + $0x3b0] sm:$0xff]  ;;  %v3391_v37 = vld [vmem:[#allocation5 + $0x3e8] sm:$0xff] }
 0x8b3   :  { %4153 = vmatprep.subr.bf16.mxu0 %v3295_v50  ;;  %4317 = vmatprep.subr.bf16.mxu1 %v3297_v51  ;;  %v3393_v50 = vld [vmem:[#allocation5 + $0x3f8] sm:$0xff]  ;;  %v3390_v51 = vld [vmem:[#allocation5 + $0x3e0] sm:$0xff] }
 0x8b6   :  { %4154 = vmatpush1.bf16.msra.mxu0 %v3294_v5  ;;  %4318 = vmatpush1.bf16.msra.mxu1 %v3296_v52  ;;  %v3392_v5 = vld [vmem:[#allocation5 + $0x3f0] sm:$0xff]  ;;  %v3399_v52 = vld [vmem:[#allocation5 + $0x428] sm:$0xff] }
 0x8b7   :  { %4155 = vmatprep.subr.bf16.mxu0 %v3303_v53  ;;  %4319 = vmatprep.subr.bf16.mxu1 %v3305_v54  ;;  %v3401_v53 = vld [vmem:[#allocation5 + $0x438] sm:$0xff]  ;;  %v3398_v54 = vld [vmem:[#allocation5 + $0x420] sm:$0xff] }
 0x8ba   :  { %4156 = vmatpush1.bf16.msra.mxu0 %v3302_v11  ;;  %4320 = vmatpush1.bf16.msra.mxu1 %v3304_v55  ;;  %v3400_v11 = vld [vmem:[#allocation5 + $0x430] sm:$0xff]  ;;  %v3407_v55 = vld [vmem:[#allocation5 + $0x468] sm:$0xff] }
 0x8bb   :  { %4157 = vmatprep.subr.bf16.mxu0 %v3311_v56  ;;  %4321 = vmatprep.subr.bf16.mxu1 %v3313_v18  ;;  %v3409_v56 = vld [vmem:[#allocation5 + $0x478] sm:$0xff]  ;;  %v3406_v18 = vld [vmem:[#allocation5 + $0x460] sm:$0xff] }
 0x8be   :  { %4158 = vmatpush1.bf16.msra.mxu0 %v3310_v35  ;;  %4322 = vmatpush1.bf16.msra.mxu1 %v3312_v57  ;;  %v3408_v35 = vld [vmem:[#allocation5 + $0x470] sm:$0xff]  ;;  %v3415_v57 = vld [vmem:[#allocation5 + $0x4a8] sm:$0xff] }
 0x8bf   :  { %4159 = vmatprep.subr.bf16.mxu0 %v3319_v63  ;;  %4323 = vmatprep.subr.bf16.mxu1 %v3321_v58  ;;  %v3417_v63 = vld [vmem:[#allocation5 + $0x4b8] sm:$0xff]  ;;  %v3414_v58 = vld [vmem:[#allocation5 + $0x4a0] sm:$0xff] }
 0x8c2   :  { %4160 = vmatpush1.bf16.msra.mxu0 %v3318_v59  ;;  %4324 = vmatpush1.bf16.msra.mxu1 %v3320_v60  ;;  %v3416_v59 = vld [vmem:[#allocation5 + $0x4b0] sm:$0xff]  ;;  %v3423_v60 = vld [vmem:[#allocation5 + $0x4e8] sm:$0xff] }
 0x8c3   :  { %4161 = vmatprep.subr.bf16.mxu0 %v3327_v2  ;;  %4325 = vmatprep.subr.bf16.mxu1 %v3329_v61  ;;  %v3422_v2 = vld [vmem:[#allocation5 + $0x4e0] sm:$0xff]  ;;  %v3424_v61 = vld [vmem:[#allocation5 + $0x4f0] sm:$0xff] }
 0x8c6   :  { %4162 = vmatpush1.bf16.msra.mxu0 %v3326_v13  ;;  %4326 = vmatpush1.bf16.msra.mxu1 %v3328_v14  ;;  %v3431_v13 = vld [vmem:[#allocation5 + $0x528] sm:$0xff]  ;;  %v3433_v14 = vld [vmem:[#allocation5 + $0x538] sm:$0xff] }
 0x8c7   :  { %4163 = vmatprep.subr.bf16.mxu0 %v3335_v36  ;;  %4327 = vmatprep.subr.bf16.mxu1 %v3337_v21  ;;  %v3432_v36 = vld [vmem:[#allocation5 + $0x530] sm:$0xff]  ;;  %v3439_v21 = vld [vmem:[#allocation5 + $0x568] sm:$0xff] }
 0x8ca   :  { %4164 = vmatpush1.bf16.msra.mxu0 %v3334_v7  ;;  %4328 = vmatpush1.bf16.msra.mxu1 %v3336_v6  ;;  %v3441_v7 = vld [vmem:[#allocation5 + $0x578] sm:$0xff]  ;;  %v3438_v6 = vld [vmem:[#allocation5 + $0x560] sm:$0xff] }
 0x8cb   :  { %4165 = vmatprep.subr.bf16.mxu0 %v3343_v42  ;;  %4329 = vmatprep.subr.bf16.mxu1 %v3345_v24  ;;  %v3440_v42 = vld [vmem:[#allocation5 + $0x570] sm:$0xff]  ;;  %v3447_v24 = vld [vmem:[#allocation5 + $0x5a8] sm:$0xff] }
 0x8ce   :  { %4166 = vmatpush1.bf16.msra.mxu0 %v3342_v0  ;;  %4330 = vmatpush1.bf16.msra.mxu1 %v3344_v40  ;;  %v3449_v0 = vld [vmem:[#allocation5 + $0x5b8] sm:$0xff]  ;;  %v3446_v40 = vld [vmem:[#allocation5 + $0x5a0] sm:$0xff] }
 0x8cf   :  { %4167 = vmatprep.subr.bf16.mxu0 %v3351_v62  ;;  %4331 = vmatprep.subr.bf16.mxu1 %v3353_v25  ;;  %v3448_v62 = vld [vmem:[#allocation5 + $0x5b0] sm:$0xff]  ;;  %v3455_v25 = vld [vmem:[#allocation5 + $0x5e8] sm:$0xff] }
 0x8d2   :  { %4168 = vmatpush1.bf16.msra.mxu0 %v3350_v26  ;;  %4332 = vmatpush1.bf16.msra.mxu1 %v3352_v27  ;;  %v3457_v26 = vld [vmem:[#allocation5 + $0x5f8] sm:$0xff]  ;;  %v3454_v27 = vld [vmem:[#allocation5 + $0x5e0] sm:$0xff] }
 0x8d3   :  { %4169 = vmatprep.subr.bf16.mxu0 %v3359_v28  ;;  %4333 = vmatprep.subr.bf16.mxu1 %v3361_v8  ;;  %v3456_v28 = vld [vmem:[#allocation5 + $0x5f0] sm:$0xff]  ;;  %v3463_v8 = vld [vmem:[#allocation5 + $0x628] sm:$0xff] }
 0x8d6   :  { %4170 = vmatpush1.bf16.msra.mxu0 %v3358_v29  ;;  %4334 = vmatpush1.bf16.msra.mxu1 %v3360_v30  ;;  %v3465_v29 = vld [vmem:[#allocation5 + $0x638] sm:$0xff]  ;;  %v3462_v30 = vld [vmem:[#allocation5 + $0x620] sm:$0xff] }
 0x8d7   :  { %4171 = vmatprep.subr.bf16.mxu0 %v3367_v41  ;;  %4335 = vmatprep.subr.bf16.mxu1 %v3369_v31  ;;  %v3464_v41 = vld [vmem:[#allocation5 + $0x630] sm:$0xff]  ;;  %v3471_v31 = vld [vmem:[#allocation5 + $0x668] sm:$0xff] }
 0x8da   :  { %4172 = vmatpush1.bf16.msra.mxu0 %v3366_v1  ;;  %4336 = vmatpush1.bf16.msra.mxu1 %v3368_v32  ;;  %v3473_v1 = vld [vmem:[#allocation5 + $0x678] sm:$0xff]  ;;  %v3470_v32 = vld [vmem:[#allocation5 + $0x660] sm:$0xff] }
 0x8db   :  { %4173 = vmatprep.subr.bf16.mxu0 %v3375_v33  ;;  %4337 = vmatprep.subr.bf16.mxu1 %v3377_v34  ;;  %v3472_v33 = vld [vmem:[#allocation5 + $0x670] sm:$0xff]  ;;  %v3479_v34 = vld [vmem:[#allocation5 + $0x6a8] sm:$0xff] }
 0x8de   :  { %4174 = vmatpush1.bf16.msra.mxu0 %v3374_v45  ;;  %4338 = vmatpush1.bf16.msra.mxu1 %v3376_v46  ;;  %v3481_v45 = vld [vmem:[#allocation5 + $0x6b8] sm:$0xff]  ;;  %v3478_v46 = vld [vmem:[#allocation5 + $0x6a0] sm:$0xff] }
 0x8df   :  { %4175 = vmatprep.subr.bf16.mxu0 %v3383_v4  ;;  %4339 = vmatprep.subr.bf16.mxu1 %v3385_v47  ;;  %v3480_v4 = vld [vmem:[#allocation5 + $0x6b0] sm:$0xff]  ;;  %v3487_v47 = vld [vmem:[#allocation5 + $0x6e8] sm:$0xff] }
 0x8e2   :  { %4176 = vmatpush1.bf16.msra.mxu0 %v3382_v48  ;;  %4340 = vmatpush1.bf16.msra.mxu1 %v3384_v49  ;;  %v3489_v48 = vld [vmem:[#allocation5 + $0x6f8] sm:$0xff]  ;;  %v3486_v49 = vld [vmem:[#allocation5 + $0x6e0] sm:$0xff] }
 0x8e3   :  { %4177 = vmatprep.subr.bf16.mxu0 %v3391_v37  ;;  %4341 = vmatprep.subr.bf16.mxu1 %v3393_v50  ;;  %v3488_v37 = vld [vmem:[#allocation5 + $0x6f0] sm:$0xff]  ;;  %v3495_v50 = vld [vmem:[#allocation5 + $0x728] sm:$0xff] }
 0x8e6   :  { %4178 = vmatpush1.bf16.msra.mxu0 %v3390_v51  ;;  %4342 = vmatpush1.bf16.msra.mxu1 %v3392_v5  ;;  %v3497_v51 = vld [vmem:[#allocation5 + $0x738] sm:$0xff]  ;;  %v3494_v5 = vld [vmem:[#allocation5 + $0x720] sm:$0xff] }
 0x8e7   :  { %4188 = vmatprep.subr.bf16.mxu0 %v3399_v52  ;;  %4352 = vmatprep.subr.bf16.mxu1 %v3401_v53  ;;  %v3496_v52 = vld [vmem:[#allocation5 + $0x730] sm:$0xff]  ;;  %v3503_v53 = vld [vmem:[#allocation5 + $0x768] sm:$0xff] }
 0x8e9   :  { %4180 = vmatmul.mubr.bf16.vlgmr.msra.gmra.mrb[24].mxu0 %v8519_v9  ;;  %4344 = vmatmul.mubr.bf16.vlgmr.msra.gmra.mrb[24].mxu1 %v8519_v9  ;;  %v3425_v9 = vld [vmem:[#allocation5 + $0x4f8] sm:$0xff] }
 0x8ea   :  { %4189 = vmatpush1.bf16.msra.mxu0 %v3398_v54  ;;  %4353 = vmatpush1.bf16.msra.mxu1 %v3400_v11  ;;  %v3505_v54 = vld [vmem:[#allocation5 + $0x778] sm:$0xff]  ;;  %v3502_v11 = vld [vmem:[#allocation5 + $0x760] sm:$0xff] }
 0x8eb   :  { %4190 = vmatprep.subr.bf16.mxu0 %v3407_v55  ;;  %4354 = vmatprep.subr.bf16.mxu1 %v3409_v56  ;;  %v3504_v55 = vld [vmem:[#allocation5 + $0x770] sm:$0xff]  ;;  %v3511_v56 = vld [vmem:[#allocation5 + $0x7a8] sm:$0xff] }
 0x8ec   :  { %4220 = vmatprep.mubr.bf16.mxu0 %v8525_v12  ;;  %4384 = vmatprep.mubr.bf16.mxu1 %v8525_v12  ;;  %v3430_v12 = vld [vmem:[#allocation5 + $0x520] sm:$0xff] }
 0x8ee   :  { %4191 = vmatpush1.bf16.msra.mxu0 %v3406_v18  ;;  %4355 = vmatpush1.bf16.msra.mxu1 %v3408_v35  ;;  %v3513_v18 = vld [vmem:[#allocation5 + $0x7b8] sm:$0xff]  ;;  %v3510_v35 = vld [vmem:[#allocation5 + $0x7a0] sm:$0xff] }
 0x8ef   :  { %4192 = vmatprep.subr.bf16.mxu0 %v3415_v57  ;;  %4356 = vmatprep.subr.bf16.mxu1 %v3417_v63  ;;  %v3512_v57 = vld [vmem:[#allocation5 + $0x7b0] sm:$0xff]  ;;  %v3519_v63 = vld [vmem:[#allocation5 + $0x7e8] sm:$0xff] }
 0x8f2   :  { %4193 = vmatpush1.bf16.msra.mxu0 %v3414_v58  ;;  %4357 = vmatpush1.bf16.msra.mxu1 %v3416_v59  ;;  %v3521_v58 = vld [vmem:[#allocation5 + $0x7f8] sm:$0xff]  ;;  %v3518_v59 = vld [vmem:[#allocation5 + $0x7e0] sm:$0xff] }
 0x8f3   :  { %4194 = vmatprep.subr.bf16.mxu0 %v3423_v60  ;;  %4358 = vmatprep.subr.bf16.mxu1 %v3425_v9  ;;  %v3520_v60 = vld [vmem:[#allocation5 + $0x7f0] sm:$0xff]  ;;  %v3527_v9 = vld [vmem:[#allocation5 + $0x828] sm:$0xff] }
 0x8f6   :  { %4195 = vmatpush1.bf16.msra.mxu0 %v3422_v2  ;;  %4359 = vmatpush1.bf16.msra.mxu1 %v3424_v61  ;;  %v3529_v2 = vld [vmem:[#allocation5 + $0x838] sm:$0xff]  ;;  %v3526_v61 = vld [vmem:[#allocation5 + $0x820] sm:$0xff] }
 0x8f7   :  { %4196 = vmatprep.subr.bf16.mxu0 %v3431_v13  ;;  %4360 = vmatprep.subr.bf16.mxu1 %v3433_v14  ;;  %v3528_v13 = vld [vmem:[#allocation5 + $0x830] sm:$0xff]  ;;  %v3535_v14 = vld [vmem:[#allocation5 + $0x868] sm:$0xff] }
 0x8fa   :  { %4197 = vmatpush1.bf16.msra.mxu0 %v3430_v12  ;;  %4361 = vmatpush1.bf16.msra.mxu1 %v3432_v36  ;;  %v3537_v12 = vld [vmem:[#allocation5 + $0x878] sm:$0xff]  ;;  %v3534_v36 = vld [vmem:[#allocation5 + $0x860] sm:$0xff] }
 0x8fb   :  { %4198 = vmatprep.subr.bf16.mxu0 %v3439_v21  ;;  %4362 = vmatprep.subr.bf16.mxu1 %v3441_v7  ;;  %v3536_v21 = vld [vmem:[#allocation5 + $0x870] sm:$0xff]  ;;  %v3543_v7 = vld [vmem:[#allocation5 + $0x8a8] sm:$0xff] }
 0x8fe   :  { %4199 = vmatpush1.bf16.msra.mxu0 %v3438_v6  ;;  %4363 = vmatpush1.bf16.msra.mxu1 %v3440_v42  ;;  %v3545_v6 = vld [vmem:[#allocation5 + $0x8b8] sm:$0xff]  ;;  %v3542_v42 = vld [vmem:[#allocation5 + $0x8a0] sm:$0xff] }
 0x8ff   :  { %4200 = vmatprep.subr.bf16.mxu0 %v3447_v24  ;;  %4364 = vmatprep.subr.bf16.mxu1 %v3449_v0  ;;  %v3544_v24 = vld [vmem:[#allocation5 + $0x8b0] sm:$0xff]  ;;  %v3551_v0 = vld [vmem:[#allocation5 + $0x8e8] sm:$0xff] }
 0x902   :  { %4201 = vmatpush1.bf16.msra.mxu0 %v3446_v40  ;;  %4365 = vmatpush1.bf16.msra.mxu1 %v3448_v62  ;;  %v3550_v40 = vld [vmem:[#allocation5 + $0x8e0] sm:$0xff]  ;;  %v3552_v62 = vld [vmem:[#allocation5 + $0x8f0] sm:$0xff] }
 0x903   :  { %4202 = vmatprep.subr.bf16.mxu0 %v3455_v25  ;;  %4366 = vmatprep.subr.bf16.mxu1 %v3457_v26  ;;  %v3559_v25 = vld [vmem:[#allocation5 + $0x928] sm:$0xff]  ;;  %v3561_v26 = vld [vmem:[#allocation5 + $0x938] sm:$0xff] }
 0x906   :  { %4203 = vmatpush1.bf16.msra.mxu0 %v3454_v27  ;;  %4367 = vmatpush1.bf16.msra.mxu1 %v3456_v28  ;;  %v3560_v27 = vld [vmem:[#allocation5 + $0x930] sm:$0xff]  ;;  %v3567_v28 = vld [vmem:[#allocation5 + $0x968] sm:$0xff] }
 0x907   :  { %4204 = vmatprep.subr.bf16.mxu0 %v3463_v8  ;;  %4368 = vmatprep.subr.bf16.mxu1 %v3465_v29  ;;  %v3569_v8 = vld [vmem:[#allocation5 + $0x978] sm:$0xff]  ;;  %v3566_v29 = vld [vmem:[#allocation5 + $0x960] sm:$0xff] }
 0x90a   :  { %4205 = vmatpush1.bf16.msra.mxu0 %v3462_v30  ;;  %4369 = vmatpush1.bf16.msra.mxu1 %v3464_v41  ;;  %v3568_v30 = vld [vmem:[#allocation5 + $0x970] sm:$0xff]  ;;  %v3575_v41 = vld [vmem:[#allocation5 + $0x9a8] sm:$0xff] }
 0x90b   :  { %4206 = vmatprep.subr.bf16.mxu0 %v3471_v31  ;;  %4370 = vmatprep.subr.bf16.mxu1 %v3473_v1  ;;  %v3577_v31 = vld [vmem:[#allocation5 + $0x9b8] sm:$0xff]  ;;  %v3574_v1 = vld [vmem:[#allocation5 + $0x9a0] sm:$0xff] }
 0x90e   :  { %4207 = vmatpush1.bf16.msra.mxu0 %v3470_v32  ;;  %4371 = vmatpush1.bf16.msra.mxu1 %v3472_v33  ;;  %v3576_v32 = vld [vmem:[#allocation5 + $0x9b0] sm:$0xff]  ;;  %v3583_v33 = vld [vmem:[#allocation5 + $0x9e8] sm:$0xff] }
 0x90f   :  { %4208 = vmatprep.subr.bf16.mxu0 %v3479_v34  ;;  %4372 = vmatprep.subr.bf16.mxu1 %v3481_v45  ;;  %v3585_v34 = vld [vmem:[#allocation5 + $0x9f8] sm:$0xff]  ;;  %v3582_v45 = vld [vmem:[#allocation5 + $0x9e0] sm:$0xff] }
 0x912   :  { %4209 = vmatpush1.bf16.msra.mxu0 %v3478_v46  ;;  %4373 = vmatpush1.bf16.msra.mxu1 %v3480_v4  ;;  %v3584_v46 = vld [vmem:[#allocation5 + $0x9f0] sm:$0xff]  ;;  %v3591_v4 = vld [vmem:[#allocation5 + $0xa28] sm:$0xff] }
 0x913   :  { %4210 = vmatprep.subr.bf16.mxu0 %v3487_v47  ;;  %4374 = vmatprep.subr.bf16.mxu1 %v3489_v48  ;;  %v3593_v47 = vld [vmem:[#allocation5 + $0xa38] sm:$0xff]  ;;  %v3590_v48 = vld [vmem:[#allocation5 + $0xa20] sm:$0xff] }
 0x916   :  { %4211 = vmatpush1.bf16.msra.mxu0 %v3486_v49  ;;  %4375 = vmatpush1.bf16.msra.mxu1 %v3488_v37  ;;  %v3592_v49 = vld [vmem:[#allocation5 + $0xa30] sm:$0xff]  ;;  %v3599_v37 = vld [vmem:[#allocation5 + $0xa68] sm:$0xff] }
 0x917   :  { %4212 = vmatprep.subr.bf16.mxu0 %v3495_v50  ;;  %4376 = vmatprep.subr.bf16.mxu1 %v3497_v51  ;;  %v3601_v50 = vld [vmem:[#allocation5 + $0xa78] sm:$0xff]  ;;  %v3598_v51 = vld [vmem:[#allocation5 + $0xa60] sm:$0xff] }
 0x91a   :  { %4213 = vmatpush1.bf16.msra.mxu0 %v3494_v5  ;;  %4377 = vmatpush1.bf16.msra.mxu1 %v3496_v52  ;;  %v3600_v5 = vld [vmem:[#allocation5 + $0xa70] sm:$0xff]  ;;  %v3607_v52 = vld [vmem:[#allocation5 + $0xaa8] sm:$0xff] }
 0x91b   :  { %4214 = vmatprep.subr.bf16.mxu0 %v3503_v53  ;;  %4378 = vmatprep.subr.bf16.mxu1 %v3505_v54  ;;  %v3609_v53 = vld [vmem:[#allocation5 + $0xab8] sm:$0xff]  ;;  %v3606_v54 = vld [vmem:[#allocation5 + $0xaa0] sm:$0xff] }
 0x91e   :  { %4215 = vmatpush1.bf16.msra.mxu0 %v3502_v11  ;;  %4379 = vmatpush1.bf16.msra.mxu1 %v3504_v55  ;;  %v3608_v11 = vld [vmem:[#allocation5 + $0xab0] sm:$0xff]  ;;  %v3615_v55 = vld [vmem:[#allocation5 + $0xae8] sm:$0xff] }
 0x91f   :  { %4216 = vmatprep.subr.bf16.mxu0 %v3511_v56  ;;  %4380 = vmatprep.subr.bf16.mxu1 %v3513_v18  ;;  %v3617_v56 = vld [vmem:[#allocation5 + $0xaf8] sm:$0xff]  ;;  %v3614_v18 = vld [vmem:[#allocation5 + $0xae0] sm:$0xff] }
 0x922   :  { %4217 = vmatpush1.bf16.msra.mxu0 %v3510_v35  ;;  %4381 = vmatpush1.bf16.msra.mxu1 %v3512_v57  ;;  %v3616_v35 = vld [vmem:[#allocation5 + $0xaf0] sm:$0xff]  ;;  %v3623_v57 = vld [vmem:[#allocation5 + $0xb28] sm:$0xff] }
 0x923   :  { %4218 = vmatprep.subr.bf16.mxu0 %v3519_v63  ;;  %4382 = vmatprep.subr.bf16.mxu1 %v3521_v58  ;;  %v3625_v63 = vld [vmem:[#allocation5 + $0xb38] sm:$0xff]  ;;  %v3622_v58 = vld [vmem:[#allocation5 + $0xb20] sm:$0xff] }
 0x926   :  { %4219 = vmatpush1.bf16.msra.mxu0 %v3518_v59  ;;  %4383 = vmatpush1.bf16.msra.mxu1 %v3520_v60  ;;  %v3624_v59 = vld [vmem:[#allocation5 + $0xb30] sm:$0xff]  ;;  %v3631_v60 = vld [vmem:[#allocation5 + $0xb68] sm:$0xff] }
 0x927   :  { %4229 = vmatprep.subr.bf16.mxu0 %v3527_v9  ;;  %4393 = vmatprep.subr.bf16.mxu1 %v3529_v2  ;;  %v3633_v9 = vld [vmem:[#allocation5 + $0xb78] sm:$0xff]  ;;  %v3630_v2 = vld [vmem:[#allocation5 + $0xb60] sm:$0xff] }
 0x929   :  { %4221 = vmatmul.mubr.bf16.vlgmr.msra.gmra.mrb[24].mxu0 %v8521_v10  ;;  %4385 = vmatmul.mubr.bf16.vlgmr.msra.gmra.mrb[24].mxu1 %v8521_v10  ;;  %v3553_v10 = vld [vmem:[#allocation5 + $0x8f8] sm:$0xff] }
 0x92a   :  { %4230 = vmatpush1.bf16.msra.mxu0 %v3526_v61  ;;  %4394 = vmatpush1.bf16.msra.mxu1 %v3528_v13  ;;  %v3632_v61 = vld [vmem:[#allocation5 + $0xb70] sm:$0xff]  ;;  %v3639_v13 = vld [vmem:[#allocation5 + $0xba8] sm:$0xff] }
 0x92b   :  { %4231 = vmatprep.subr.bf16.mxu0 %v3535_v14  ;;  %4395 = vmatprep.subr.bf16.mxu1 %v3537_v12  ;;  %v3641_v14 = vld [vmem:[#allocation5 + $0xbb8] sm:$0xff]  ;;  %v3638_v12 = vld [vmem:[#allocation5 + $0xba0] sm:$0xff] }
 0x92c   :  { %4261 = vmatprep.mubr.bf16.mxu0 %v8541_v3  ;;  %4425 = vmatprep.mubr.bf16.mxu1 %v8541_v3  ;;  %v3558_v3 = vld [vmem:[#allocation5 + $0x920] sm:$0xff] }
 0x92e   :  { %4232 = vmatpush1.bf16.msra.mxu0 %v3534_v36  ;;  %4396 = vmatpush1.bf16.msra.mxu1 %v3536_v21  ;;  %v3640_v36 = vld [vmem:[#allocation5 + $0xbb0] sm:$0xff]  ;;  %v3647_v21 = vld [vmem:[#allocation5 + $0xbe8] sm:$0xff] }
 0x92f   :  { %4233 = vmatprep.subr.bf16.mxu0 %v3543_v7  ;;  %4397 = vmatprep.subr.bf16.mxu1 %v3545_v6  ;;  %v3649_v7 = vld [vmem:[#allocation5 + $0xbf8] sm:$0xff]  ;;  %v3646_v6 = vld [vmem:[#allocation5 + $0xbe0] sm:$0xff] }
 0x932   :  { %4234 = vmatpush1.bf16.msra.mxu0 %v3542_v42  ;;  %4398 = vmatpush1.bf16.msra.mxu1 %v3544_v24  ;;  %v3648_v42 = vld [vmem:[#allocation5 + $0xbf0] sm:$0xff]  ;;  %v3655_v24 = vld [vmem:[#allocation5 + $0xc28] sm:$0xff] }
 0x933   :  { %4235 = vmatprep.subr.bf16.mxu0 %v3551_v0  ;;  %4399 = vmatprep.subr.bf16.mxu1 %v3553_v10  ;;  %v3657_v0 = vld [vmem:[#allocation5 + $0xc38] sm:$0xff]  ;;  %v3654_v10 = vld [vmem:[#allocation5 + $0xc20] sm:$0xff] }
 0x936   :  { %4236 = vmatpush1.bf16.msra.mxu0 %v3550_v40  ;;  %4400 = vmatpush1.bf16.msra.mxu1 %v3552_v62  ;;  %v3656_v40 = vld [vmem:[#allocation5 + $0xc30] sm:$0xff]  ;;  %v3663_v62 = vld [vmem:[#allocation5 + $0xc68] sm:$0xff] }
 0x937   :  { %4237 = vmatprep.subr.bf16.mxu0 %v3559_v25  ;;  %4401 = vmatprep.subr.bf16.mxu1 %v3561_v26  ;;  %v3665_v25 = vld [vmem:[#allocation5 + $0xc78] sm:$0xff]  ;;  %v3662_v26 = vld [vmem:[#allocation5 + $0xc60] sm:$0xff] }
 0x93a   :  { %4238 = vmatpush1.bf16.msra.mxu0 %v3558_v3  ;;  %4402 = vmatpush1.bf16.msra.mxu1 %v3560_v27  ;;  %v3664_v3 = vld [vmem:[#allocation5 + $0xc70] sm:$0xff]  ;;  %v3671_v27 = vld [vmem:[#allocation5 + $0xca8] sm:$0xff] }
 0x93b   :  { %4239 = vmatprep.subr.bf16.mxu0 %v3567_v28  ;;  %4403 = vmatprep.subr.bf16.mxu1 %v3569_v8  ;;  %v3673_v28 = vld [vmem:[#allocation5 + $0xcb8] sm:$0xff]  ;;  %v3670_v8 = vld [vmem:[#allocation5 + $0xca0] sm:$0xff] }
 0x93e   :  { %4240 = vmatpush1.bf16.msra.mxu0 %v3566_v29  ;;  %4404 = vmatpush1.bf16.msra.mxu1 %v3568_v30  ;;  %v3672_v29 = vld [vmem:[#allocation5 + $0xcb0] sm:$0xff]  ;;  %v3679_v30 = vld [vmem:[#allocation5 + $0xce8] sm:$0xff] }
 0x93f   :  { %4241 = vmatprep.subr.bf16.mxu0 %v3575_v41  ;;  %4405 = vmatprep.subr.bf16.mxu1 %v3577_v31  ;;  %v3678_v41 = vld [vmem:[#allocation5 + $0xce0] sm:$0xff]  ;;  %v3680_v31 = vld [vmem:[#allocation5 + $0xcf0] sm:$0xff] }
 0x942   :  { %4242 = vmatpush1.bf16.msra.mxu0 %v3574_v1  ;;  %4406 = vmatpush1.bf16.msra.mxu1 %v3576_v32  ;;  %v3687_v1 = vld [vmem:[#allocation5 + $0xd28] sm:$0xff]  ;;  %v3689_v32 = vld [vmem:[#allocation5 + $0xd38] sm:$0xff] }
 0x943   :  { %4243 = vmatprep.subr.bf16.mxu0 %v3583_v33  ;;  %4407 = vmatprep.subr.bf16.mxu1 %v3585_v34  ;;  %v8575_v33 = vld [vmem:[#allocation13 + $0x14] sm:$0xff]  ;;  %v3688_v34 = vld [vmem:[#allocation5 + $0xd30] sm:$0xff] }
 0x946   :  { %4244 = vmatpush1.bf16.msra.mxu0 %v3582_v45  ;;  %4408 = vmatpush1.bf16.msra.mxu1 %v3584_v46  ;;  %v3695_v45 = vld [vmem:[#allocation5 + $0xd68] sm:$0xff]  ;;  %v3697_v46 = vld [vmem:[#allocation5 + $0xd78] sm:$0xff] }
 0x947   :  { %4245 = vmatprep.subr.bf16.mxu0 %v3591_v4  ;;  %4409 = vmatprep.subr.bf16.mxu1 %v3593_v47  ;;  %v3782_v4 = vrot.slane %v8575_v33, %v8404_v19  ;;  %v3790_v47 = vrot.slane %v8575_v33, %v8407_v20 }
 0x94a   :  { %4246 = vmatpush1.bf16.msra.mxu0 %v3590_v48  ;;  %4410 = vmatpush1.bf16.msra.mxu1 %v3592_v49  ;;  %v3786_v48 = vrot.slane %v8575_v33, %v8410_v22  ;;  %v3794_v49 = vrot.slane %v8575_v33, %v8413_v23 }
 0x94b   :  { %4247 = vmatprep.subr.bf16.mxu0 %v3599_v37  ;;  %4411 = vmatprep.subr.bf16.mxu1 %v3601_v50  ;;  %v3694_v37 = vld [vmem:[#allocation5 + $0xd60] sm:$0xff]  ;;  %v3696_v50 = vld [vmem:[#allocation5 + $0xd70] sm:$0xff] }
 0x94e   :  { %4248 = vmatpush1.bf16.msra.mxu0 %v3598_v51  ;;  %4412 = vmatpush1.bf16.msra.mxu1 %v3600_v5 }
 0x94f   :  { %4249 = vmatprep.subr.bf16.mxu0 %v3607_v52  ;;  %4413 = vmatprep.subr.bf16.mxu1 %v3609_v53  ;;  %v3703_v52 = vld [vmem:[#allocation5 + $0xda8] sm:$0xff]  ;;  %v3705_v53 = vld [vmem:[#allocation5 + $0xdb8] sm:$0xff] }
 0x952   :  { %4250 = vmatpush1.bf16.msra.mxu0 %v3606_v54  ;;  %4414 = vmatpush1.bf16.msra.mxu1 %v3608_v11 }
 0x953   :  { %4251 = vmatprep.subr.bf16.mxu0 %v3615_v55  ;;  %4415 = vmatprep.subr.bf16.mxu1 %v3617_v56 }
 0x956   :  { %4252 = vmatpush1.bf16.msra.mxu0 %v3614_v18  ;;  %4416 = vmatpush1.bf16.msra.mxu1 %v3616_v35 }
 0x957   :  { %4253 = vmatprep.subr.bf16.mxu0 %v3623_v57  ;;  %4417 = vmatprep.subr.bf16.mxu1 %v3625_v63 }
 0x95a   :  { %4254 = vmatpush1.bf16.msra.mxu0 %v3622_v58  ;;  %4418 = vmatpush1.bf16.msra.mxu1 %v3624_v59 }
 0x95b   :  { %4255 = vmatprep.subr.bf16.mxu0 %v3631_v60  ;;  %4419 = vmatprep.subr.bf16.mxu1 %v3633_v9 }
 0x95e   :  { %4256 = vmatpush1.bf16.msra.mxu0 %v3630_v2  ;;  %4420 = vmatpush1.bf16.msra.mxu1 %v3632_v61  ;;  %v3702_v2 = vld [vmem:[#allocation5 + $0xda0] sm:$0xff]  ;;  %v3704_v61 = vld [vmem:[#allocation5 + $0xdb0] sm:$0xff] }
 0x95f   :  { %4257 = vmatprep.subr.bf16.mxu0 %v3639_v13  ;;  %4421 = vmatprep.subr.bf16.mxu1 %v3641_v14 }
 0x962   :  { %4258 = vmatpush1.bf16.msra.mxu0 %v3638_v12  ;;  %4422 = vmatpush1.bf16.msra.mxu1 %v3640_v36  ;;  %v3711_v12 = vld [vmem:[#allocation5 + $0xde8] sm:$0xff]  ;;  %v3713_v36 = vld [vmem:[#allocation5 + $0xdf8] sm:$0xff] }
 0x963   :  { %4259 = vmatprep.subr.bf16.mxu0 %v3647_v21  ;;  %4423 = vmatprep.subr.bf16.mxu1 %v3649_v7 }
 0x966   :  { %4260 = vmatpush1.bf16.msra.mxu0 %v3646_v6  ;;  %4424 = vmatpush1.bf16.msra.mxu1 %v3648_v42 }
 0x967   :  { %4270 = vmatprep.subr.bf16.mxu0 %v3655_v24  ;;  %4434 = vmatprep.subr.bf16.mxu1 %v3657_v0  ;;  %v3710_v24 = vld [vmem:[#allocation5 + $0xde0] sm:$0xff]  ;;  %v3712_v0 = vld [vmem:[#allocation5 + $0xdf0] sm:$0xff] }
 0x969   :  { %4262 = vmatmul.mubr.bf16.vlgmr.msra.gmra.mrb[24].mxu0 %v8537_v15  ;;  %4426 = vmatmul.mubr.bf16.vlgmr.msra.gmra.mrb[24].mxu1 %v8537_v15  ;;  %v3681_v15 = vld [vmem:[#allocation5 + $0xcf8] sm:$0xff] }
 0x96a   :  { %4271 = vmatpush1.bf16.msra.mxu0 %v3654_v10  ;;  %4435 = vmatpush1.bf16.msra.mxu1 %v3656_v40  ;;  %v3719_v10 = vld [vmem:[#allocation5 + $0xe28] sm:$0xff]  ;;  %v3721_v40 = vld [vmem:[#allocation5 + $0xe38] sm:$0xff] }
 0x96b   :  { %4272 = vmatprep.subr.bf16.mxu0 %v3663_v62  ;;  %4436 = vmatprep.subr.bf16.mxu1 %v3665_v25  ;;  %v3718_v62 = vld [vmem:[#allocation5 + $0xe20] sm:$0xff]  ;;  %v3720_v25 = vld [vmem:[#allocation5 + $0xe30] sm:$0xff] }
 0x96c   :  { %4302 = vmatprep.mubr.bf16.mxu0 %v8543_v17  ;;  %4466 = vmatprep.mubr.bf16.mxu1 %v8543_v17  ;;  %v3686_v17 = vld [vmem:[#allocation5 + $0xd20] sm:$0xff] }
 0x96e   :  { %4273 = vmatpush1.bf16.msra.mxu0 %v3662_v26  ;;  %4437 = vmatpush1.bf16.msra.mxu1 %v3664_v3  ;;  %v3727_v26 = vld [vmem:[#allocation5 + $0xe68] sm:$0xff]  ;;  %v3729_v3 = vld [vmem:[#allocation5 + $0xe78] sm:$0xff] }
 0x96f   :  { %4274 = vmatprep.subr.bf16.mxu0 %v3671_v27  ;;  %4438 = vmatprep.subr.bf16.mxu1 %v3673_v28  ;;  %v3726_v27 = vld [vmem:[#allocation5 + $0xe60] sm:$0xff]  ;;  %v3728_v28 = vld [vmem:[#allocation5 + $0xe70] sm:$0xff] }
 0x972   :  { %4275 = vmatpush1.bf16.msra.mxu0 %v3670_v8  ;;  %4439 = vmatpush1.bf16.msra.mxu1 %v3672_v29  ;;  %v3735_v8 = vld [vmem:[#allocation5 + $0xea8] sm:$0xff]  ;;  %v3737_v29 = vld [vmem:[#allocation5 + $0xeb8] sm:$0xff] }
 0x973   :  { %4276 = vmatprep.subr.bf16.mxu0 %v3679_v30  ;;  %4440 = vmatprep.subr.bf16.mxu1 %v3681_v15  ;;  %v3734_v30 = vld [vmem:[#allocation5 + $0xea0] sm:$0xff]  ;;  %v3736_v15 = vld [vmem:[#allocation5 + $0xeb0] sm:$0xff] }
 0x976   :  { %4277 = vmatpush1.bf16.msra.mxu0 %v3678_v41  ;;  %4441 = vmatpush1.bf16.msra.mxu1 %v3680_v31  ;;  %v3743_v41 = vld [vmem:[#allocation5 + $0xee8] sm:$0xff]  ;;  %v3745_v31 = vld [vmem:[#allocation5 + $0xef8] sm:$0xff] }
 0x977   :  { %4278 = vmatprep.subr.bf16.mxu0 %v3687_v1  ;;  %4442 = vmatprep.subr.bf16.mxu1 %v3689_v32  ;;  %v3742_v1 = vld [vmem:[#allocation5 + $0xee0] sm:$0xff]  ;;  %v3744_v32 = vld [vmem:[#allocation5 + $0xef0] sm:$0xff] }
 0x97a   :  { %4279 = vmatpush1.bf16.msra.mxu0 %v3686_v17  ;;  %4443 = vmatpush1.bf16.msra.mxu1 %v3688_v34  ;;  %v3751_v17 = vld [vmem:[#allocation5 + $0xf28] sm:$0xff]  ;;  %v3753_v34 = vld [vmem:[#allocation5 + $0xf38] sm:$0xff] }
 0x97b   :  { %4280 = vmatprep.subr.bf16.mxu0 %v3695_v45  ;;  %4444 = vmatprep.subr.bf16.mxu1 %v3697_v46  ;;  %v3750_v45 = vld [vmem:[#allocation5 + $0xf20] sm:$0xff]  ;;  %v3752_v46 = vld [vmem:[#allocation5 + $0xf30] sm:$0xff] }
 0x97c   :  { %v3976_v51 = vpop.f32.mrb[20].mxu0  ;;  %v4140_v5 = vpop.f32.mrb[20].mxu1 }
 0x97d   :  { %v7741_v54 = vadd.f32 %v3976_v51, %v3782_v4  ;;  %v7743_v11 = vadd.f32 %v4140_v5, %v3790_v47  ;;  %v3978_v55 = vpop.f32.mrb[21].mxu0  ;;  %v4142_v56 = vpop.f32.mrb[21].mxu1  ;;  %v3759_v4 = vld [vmem:[#allocation5 + $0xf68] sm:$0xff]  ;;  %v3761_v47 = vld [vmem:[#allocation5 + $0xf78] sm:$0xff]  ;;  %v3766_v51 = vld [vmem:[#allocation5 + $0xfa0] sm:$0xff] }
 0x97e   :  { %v7742_v18 = vadd.f32 %v3978_v55, %v3786_v48  ;;  %v7744_v35 = vadd.f32 %v4142_v56, %v3794_v49  ;;  %v3980_v57 = vpop.f32.mrb[22].mxu0  ;;  %v4144_v63 = vpop.f32.mrb[22].mxu1  ;;  %4281 = vmatpush1.bf16.msra.mxu0 %v3694_v37  ;;  %4445 = vmatpush1.bf16.msra.mxu1 %v3696_v50  ;;  %v3758_v48 = vld [vmem:[#allocation5 + $0xf60] sm:$0xff]  ;;  %v3760_v49 = vld [vmem:[#allocation5 + $0xf70] sm:$0xff]  ;;  %v3767_v37 = vld [vmem:[#allocation5 + $0xfa8] sm:$0xff]  ;;  %v3798_v55 = vrot.slane %v8575_v33, %v8456_v38 }
 0x97f   :  { %v4475_v58 = vmax.f32 %v7741_v54, 0.0  ;;  %v4477_v59 = vmax.f32 %v7743_v11, 0.0  ;;  %v3981_v60 = vpop.f32.mrb[23].mxu0  ;;  %v4145_v9 = vpop.f32.mrb[23].mxu1  ;;  %4282 = vmatprep.subr.bf16.mxu0 %v3703_v52  ;;  %4446 = vmatprep.subr.bf16.mxu1 %v3705_v53  ;;  %v3769_v50 = vld [vmem:[#allocation5 + $0xfb8] sm:$0xff]  ;;  %v3768_v5 = vld [vmem:[#allocation5 + $0xfb0] sm:$0xff]  ;;  %v3806_v56 = vrot.slane %v8575_v33, %v8459_v39 }
 0x980   :  { %v4476_v13 = vmax.f32 %v7742_v18, 0.0  ;;  %v4478_v14 = vmax.f32 %v7744_v35, 0.0  ;;  %v3775_v52 = vld [vmem:[#allocation5 + $0xfe8] sm:$0xff]  ;;  %v3777_v53 = vld [vmem:[#allocation5 + $0xff8] sm:$0xff]  ;;  %v3774_v54 = vld [vmem:[#allocation5 + $0xfe0] sm:$0xff]  ;;  %v3802_v18 = vrot.slane %v8575_v33, %v8462_v43  ;;  %v3810_v35 = vrot.slane %v8575_v33, %v8465_v44 }
 0x981   :  { %v8585_v21 = vpack.c.bf16 %v4475_v58, %v4475_v58  ;;  %v8587_v7 = vpack.c.bf16 %v4477_v59, %v4477_v59  ;;  %v3776_v11 = vld [vmem:[#allocation5 + $0xff0] sm:$0xff] }
 0x982   :  { %v8589_v6 = vpack.c.bf16 %v4476_v13, %v4476_v13  ;;  %v8591_v42 = vpack.c.bf16 %v4478_v14, %v4478_v14  ;;  %4283 = vmatpush1.bf16.msra.mxu0 %v3702_v2  ;;  %4447 = vmatpush1.bf16.msra.mxu1 %v3704_v61 }
 0x983   :  { %4284 = vmatprep.subr.bf16.mxu0 %v3711_v12  ;;  %4448 = vmatprep.subr.bf16.mxu1 %v3713_v36 }
 0x986   :  { %4285 = vmatpush1.bf16.msra.mxu0 %v3710_v24  ;;  %4449 = vmatpush1.bf16.msra.mxu1 %v3712_v0 }
 0x987   :  { %4286 = vmatprep.subr.bf16.mxu0 %v3719_v10  ;;  %4450 = vmatprep.subr.bf16.mxu1 %v3721_v40 }
 0x98a   :  { %4287 = vmatpush1.bf16.msra.mxu0 %v3718_v62  ;;  %4451 = vmatpush1.bf16.msra.mxu1 %v3720_v25 }
 0x98b   :  { %4288 = vmatprep.subr.bf16.mxu0 %v3727_v26  ;;  %4452 = vmatprep.subr.bf16.mxu1 %v3729_v3 }
 0x98e   :  { %4289 = vmatpush1.bf16.msra.mxu0 %v3726_v27  ;;  %4453 = vmatpush1.bf16.msra.mxu1 %v3728_v28 }
 0x98f   :  { %4290 = vmatprep.subr.bf16.mxu0 %v3735_v8  ;;  %4454 = vmatprep.subr.bf16.mxu1 %v3737_v29 }
 0x992   :  { %4291 = vmatpush1.bf16.msra.mxu0 %v3734_v30  ;;  %4455 = vmatpush1.bf16.msra.mxu1 %v3736_v15 }
 0x993   :  { %4292 = vmatprep.subr.bf16.mxu0 %v3743_v41  ;;  %4456 = vmatprep.subr.bf16.mxu1 %v3745_v31 }
 0x996   :  { %4293 = vmatpush1.bf16.msra.mxu0 %v3742_v1  ;;  %4457 = vmatpush1.bf16.msra.mxu1 %v3744_v32 }
 0x997   :  { %4294 = vmatprep.subr.bf16.mxu0 %v3751_v17  ;;  %4458 = vmatprep.subr.bf16.mxu1 %v3753_v34 }
 0x99a   :  { %4295 = vmatpush1.bf16.msra.mxu0 %v3750_v45  ;;  %4459 = vmatpush1.bf16.msra.mxu1 %v3752_v46 }
 0x99b   :  { %4296 = vmatprep.subr.bf16.mxu0 %v3759_v4  ;;  %4460 = vmatprep.subr.bf16.mxu1 %v3761_v47 }
 0x99e   :  { %4297 = vmatpush1.bf16.msra.mxu0 %v3758_v48  ;;  %4461 = vmatpush1.bf16.msra.mxu1 %v3760_v49 }
 0x99f   :  { %4298 = vmatprep.subr.bf16.mxu0 %v3767_v37  ;;  %4462 = vmatprep.subr.bf16.mxu1 %v3769_v50 }
 0x9a2   :  { %4299 = vmatpush1.bf16.msra.mxu0 %v3766_v51  ;;  %4463 = vmatpush1.bf16.msra.mxu1 %v3768_v5 }
 0x9a3   :  { %4300 = vmatprep.subr.bf16.mxu0 %v3775_v52  ;;  %4464 = vmatprep.subr.bf16.mxu1 %v3777_v53 }
 0x9a6   :  { %4301 = vmatpush1.bf16.msra.mxu0 %v3774_v54  ;;  %4465 = vmatpush1.bf16.msra.mxu1 %v3776_v11 }
 0x9a9   :  { %4303 = vmatmul.mubr.bf16.vlgmr.msra.gmra.mrb[24].mxu0 %v8539_v16  ;;  %4467 = vmatmul.mubr.bf16.vlgmr.msra.gmra.mrb[24].mxu1 %v8539_v16 }
 0xa7c   :  { %v4304_v57 = vpop.f32.mrb[24].mxu0  ;;  %v4468_v63 = vpop.f32.mrb[24].mxu1 }
 0xa7d   :  { %v7745_v58 = vadd.f32 %v4304_v57, %v3798_v55  ;;  %v7747_v59 = vadd.f32 %v4468_v63, %v3806_v56  ;;  %v4306_v60 = vpop.f32.mrb[25].mxu0  ;;  %v4470_v9 = vpop.f32.mrb[25].mxu1 }
 0xa7e   :  { %v7746_v2 = vadd.f32 %v4306_v60, %v3802_v18  ;;  %v7748_v16 = vadd.f32 %v4470_v9, %v3810_v35  ;;  %v4308_v61 = vpop.f32.mrb[26].mxu0  ;;  %v4472_v13 = vpop.f32.mrb[26].mxu1 }
 0xa7f   :  { %v4479_v14 = vmax.f32 %v7745_v58, 0.0  ;;  %v4481_v12 = vmax.f32 %v7747_v59, 0.0  ;;  %v4309_v36 = vpop.f32.mrb[27].mxu0  ;;  %v4473_v24 = vpop.f32.mrb[27].mxu1 }
 0xa80   :  { %v4480_v0 = vmax.f32 %v7746_v2, 0.0  ;;  %v4482_v10 = vmax.f32 %v7748_v16, 0.0 }
 0xa81   :  { %v8603_v40 = vpack.c.bf16 %v4479_v14, %v4479_v14  ;;  %v8605_v62 = vpack.c.bf16 %v4481_v12, %v4481_v12 }
 0xa82   :  { %v8607_v33 = vpack.c.bf16 %v4480_v0, %v4480_v0  ;;  %v8609_v25 = vpack.c.bf16 %v4482_v10, %v4482_v10 }
 0xa83   :  { %8154 = dma.done.wait [#allocation9 + $0x4], 65536 }
 0xa84   :  { %8155 = vsyncadd [#allocation9 + $0x4], 4294901760  ;;  %5085 = vmatprep.mubr.bf16.mxu0 %v8589_v6  ;;  %5249 = vmatprep.mubr.bf16.mxu1 %v8589_v6  ;;  %v4501_v26 = vld [vmem:[#allocation6 + $0x8] sm:$0xff]  ;;  %v4503_v3 = vld [vmem:[#allocation6 + $0x18] sm:$0xff] }
 0xa85   :  { %v4500_v27 = vld [vmem:[#allocation6] sm:$0xff]  ;;  %5053 = vmatprep.subr.bf16.mxu0 %v4501_v26  ;;  %5217 = vmatprep.subr.bf16.mxu1 %v4503_v3  ;;  %v4502_v28 = vld [vmem:[#allocation6 + $0x10] sm:$0xff]  ;;  %v4509_v8 = vld [vmem:[#allocation6 + $0x48] sm:$0xff] }
 0xa86   :  { %v4511_v29 = vld [vmem:[#allocation6 + $0x58] sm:$0xff]  ;;  %5054 = vmatpush1.bf16.msra.mxu0 %v4500_v27  ;;  %5218 = vmatpush1.bf16.msra.mxu1 %v4502_v28  ;;  %v4508_v30 = vld [vmem:[#allocation6 + $0x40] sm:$0xff]  ;;  %v4510_v15 = vld [vmem:[#allocation6 + $0x50] sm:$0xff] }
 0xa87   :  { %5055 = vmatprep.subr.bf16.mxu0 %v4509_v8  ;;  %5219 = vmatprep.subr.bf16.mxu1 %v4511_v29  ;;  %v4517_v41 = vld [vmem:[#allocation6 + $0x88] sm:$0xff]  ;;  %v4519_v31 = vld [vmem:[#allocation6 + $0x98] sm:$0xff]  ;;  %v4516_v1 = vld [vmem:[#allocation6 + $0x80] sm:$0xff] }
 0xa88   :  { %v4518_v32 = vld [vmem:[#allocation6 + $0x90] sm:$0xff]  ;;  %v4525_v17 = vld [vmem:[#allocation6 + $0xc8] sm:$0xff]  ;;  %v4527_v34 = vld [vmem:[#allocation6 + $0xd8] sm:$0xff] }
 0xa89   :  { %v4524_v45 = vld [vmem:[#allocation6 + $0xc0] sm:$0xff]  ;;  %v4526_v46 = vld [vmem:[#allocation6 + $0xd0] sm:$0xff]  ;;  %v4533_v4 = vld [vmem:[#allocation6 + $0x108] sm:$0xff] }
 0xa8a   :  { %5056 = vmatpush1.bf16.msra.mxu0 %v4508_v30  ;;  %5220 = vmatpush1.bf16.msra.mxu1 %v4510_v15  ;;  %v4535_v47 = vld [vmem:[#allocation6 + $0x118] sm:$0xff]  ;;  %v4532_v48 = vld [vmem:[#allocation6 + $0x100] sm:$0xff]  ;;  %v4534_v49 = vld [vmem:[#allocation6 + $0x110] sm:$0xff] }
 0xa8b   :  { %5057 = vmatprep.subr.bf16.mxu0 %v4517_v41  ;;  %5221 = vmatprep.subr.bf16.mxu1 %v4519_v31  ;;  %v4541_v37 = vld [vmem:[#allocation6 + $0x148] sm:$0xff]  ;;  %v4543_v50 = vld [vmem:[#allocation6 + $0x158] sm:$0xff]  ;;  %v4540_v51 = vld [vmem:[#allocation6 + $0x140] sm:$0xff] }
 0xa8c   :  { %v4542_v5 = vld [vmem:[#allocation6 + $0x150] sm:$0xff]  ;;  %v4549_v52 = vld [vmem:[#allocation6 + $0x188] sm:$0xff]  ;;  %v4551_v53 = vld [vmem:[#allocation6 + $0x198] sm:$0xff] }
 0xa8d   :  { %v4548_v54 = vld [vmem:[#allocation6 + $0x180] sm:$0xff]  ;;  %v4550_v11 = vld [vmem:[#allocation6 + $0x190] sm:$0xff]  ;;  %v4557_v55 = vld [vmem:[#allocation6 + $0x1c8] sm:$0xff] }
 0xa8e   :  { %5058 = vmatpush1.bf16.msra.mxu0 %v4516_v1  ;;  %5222 = vmatpush1.bf16.msra.mxu1 %v4518_v32  ;;  %v4559_v56 = vld [vmem:[#allocation6 + $0x1d8] sm:$0xff]  ;;  %v4556_v18 = vld [vmem:[#allocation6 + $0x1c0] sm:$0xff]  ;;  %v4558_v35 = vld [vmem:[#allocation6 + $0x1d0] sm:$0xff] }
 0xa8f   :  { %5059 = vmatprep.subr.bf16.mxu0 %v4525_v17  ;;  %5223 = vmatprep.subr.bf16.mxu1 %v4527_v34  ;;  %v4565_v57 = vld [vmem:[#allocation6 + $0x208] sm:$0xff]  ;;  %v4567_v63 = vld [vmem:[#allocation6 + $0x218] sm:$0xff]  ;;  %v4564_v58 = vld [vmem:[#allocation6 + $0x200] sm:$0xff] }
 0xa90   :  { %v4566_v59 = vld [vmem:[#allocation6 + $0x210] sm:$0xff]  ;;  %v4573_v60 = vld [vmem:[#allocation6 + $0x248] sm:$0xff]  ;;  %v4575_v9 = vld [vmem:[#allocation6 + $0x258] sm:$0xff] }
 0xa91   :  { %v4572_v2 = vld [vmem:[#allocation6 + $0x240] sm:$0xff]  ;;  %v4574_v16 = vld [vmem:[#allocation6 + $0x250] sm:$0xff]  ;;  %v4581_v61 = vld [vmem:[#allocation6 + $0x288] sm:$0xff] }
 0xa92   :  { %5060 = vmatpush1.bf16.msra.mxu0 %v4524_v45  ;;  %5224 = vmatpush1.bf16.msra.mxu1 %v4526_v46  ;;  %v4583_v13 = vld [vmem:[#allocation6 + $0x298] sm:$0xff]  ;;  %v4580_v14 = vld [vmem:[#allocation6 + $0x280] sm:$0xff]  ;;  %v4582_v12 = vld [vmem:[#allocation6 + $0x290] sm:$0xff] }
 0xa93   :  { %5061 = vmatprep.subr.bf16.mxu0 %v4533_v4  ;;  %5225 = vmatprep.subr.bf16.mxu1 %v4535_v47  ;;  %v4589_v36 = vld [vmem:[#allocation6 + $0x2c8] sm:$0xff]  ;;  %v4591_v24 = vld [vmem:[#allocation6 + $0x2d8] sm:$0xff]  ;;  %v4588_v0 = vld [vmem:[#allocation6 + $0x2c0] sm:$0xff] }
 0xa94   :  { %v4590_v10 = vld [vmem:[#allocation6 + $0x2d0] sm:$0xff]  ;;  %v4597_v26 = vld [vmem:[#allocation6 + $0x308] sm:$0xff]  ;;  %v4599_v3 = vld [vmem:[#allocation6 + $0x318] sm:$0xff] }
 0xa95   :  { %v4596_v27 = vld [vmem:[#allocation6 + $0x300] sm:$0xff]  ;;  %v4598_v28 = vld [vmem:[#allocation6 + $0x310] sm:$0xff]  ;;  %v4605_v8 = vld [vmem:[#allocation6 + $0x348] sm:$0xff] }
 0xa96   :  { %5062 = vmatpush1.bf16.msra.mxu0 %v4532_v48  ;;  %5226 = vmatpush1.bf16.msra.mxu1 %v4534_v49  ;;  %v4607_v29 = vld [vmem:[#allocation6 + $0x358] sm:$0xff]  ;;  %v4604_v30 = vld [vmem:[#allocation6 + $0x340] sm:$0xff]  ;;  %v4606_v15 = vld [vmem:[#allocation6 + $0x350] sm:$0xff] }
 0xa97   :  { %5063 = vmatprep.subr.bf16.mxu0 %v4541_v37  ;;  %5227 = vmatprep.subr.bf16.mxu1 %v4543_v50  ;;  %v4613_v41 = vld [vmem:[#allocation6 + $0x388] sm:$0xff]  ;;  %v4615_v31 = vld [vmem:[#allocation6 + $0x398] sm:$0xff]  ;;  %v4612_v1 = vld [vmem:[#allocation6 + $0x380] sm:$0xff] }
 0xa98   :  { %v4614_v32 = vld [vmem:[#allocation6 + $0x390] sm:$0xff]  ;;  %v4621_v17 = vld [vmem:[#allocation6 + $0x3c8] sm:$0xff]  ;;  %v4623_v34 = vld [vmem:[#allocation6 + $0x3d8] sm:$0xff] }
 0xa99   :  { %v4620_v45 = vld [vmem:[#allocation6 + $0x3c0] sm:$0xff]  ;;  %v4622_v46 = vld [vmem:[#allocation6 + $0x3d0] sm:$0xff]  ;;  %v4629_v4 = vld [vmem:[#allocation6 + $0x408] sm:$0xff] }
 0xa9a   :  { %5064 = vmatpush1.bf16.msra.mxu0 %v4540_v51  ;;  %5228 = vmatpush1.bf16.msra.mxu1 %v4542_v5  ;;  %v4631_v47 = vld [vmem:[#allocation6 + $0x418] sm:$0xff]  ;;  %v4628_v48 = vld [vmem:[#allocation6 + $0x400] sm:$0xff]  ;;  %v4630_v49 = vld [vmem:[#allocation6 + $0x410] sm:$0xff] }
 0xa9b   :  { %5065 = vmatprep.subr.bf16.mxu0 %v4549_v52  ;;  %5229 = vmatprep.subr.bf16.mxu1 %v4551_v53  ;;  %v4637_v37 = vld [vmem:[#allocation6 + $0x448] sm:$0xff]  ;;  %v4639_v50 = vld [vmem:[#allocation6 + $0x458] sm:$0xff]  ;;  %v4636_v51 = vld [vmem:[#allocation6 + $0x440] sm:$0xff] }
 0xa9c   :  { %v4638_v5 = vld [vmem:[#allocation6 + $0x450] sm:$0xff]  ;;  %v4645_v52 = vld [vmem:[#allocation6 + $0x488] sm:$0xff]  ;;  %v4647_v53 = vld [vmem:[#allocation6 + $0x498] sm:$0xff] }
 0xa9e   :  { %5066 = vmatpush1.bf16.msra.mxu0 %v4548_v54  ;;  %5230 = vmatpush1.bf16.msra.mxu1 %v4550_v11  ;;  %v4644_v54 = vld [vmem:[#allocation6 + $0x480] sm:$0xff]  ;;  %v4646_v11 = vld [vmem:[#allocation6 + $0x490] sm:$0xff] }
 0xa9f   :  { %5067 = vmatprep.subr.bf16.mxu0 %v4557_v55  ;;  %5231 = vmatprep.subr.bf16.mxu1 %v4559_v56  ;;  %v4653_v55 = vld [vmem:[#allocation6 + $0x4c8] sm:$0xff]  ;;  %v4655_v56 = vld [vmem:[#allocation6 + $0x4d8] sm:$0xff] }
 0xaa2   :  { %5068 = vmatpush1.bf16.msra.mxu0 %v4556_v18  ;;  %5232 = vmatpush1.bf16.msra.mxu1 %v4558_v35  ;;  %v4652_v18 = vld [vmem:[#allocation6 + $0x4c0] sm:$0xff]  ;;  %v4654_v35 = vld [vmem:[#allocation6 + $0x4d0] sm:$0xff] }
 0xaa3   :  { %5069 = vmatprep.subr.bf16.mxu0 %v4565_v57  ;;  %5233 = vmatprep.subr.bf16.mxu1 %v4567_v63  ;;  %v4661_v57 = vld [vmem:[#allocation6 + $0x508] sm:$0xff]  ;;  %v4663_v63 = vld [vmem:[#allocation6 + $0x518] sm:$0xff] }
 0xaa6   :  { %5070 = vmatpush1.bf16.msra.mxu0 %v4564_v58  ;;  %5234 = vmatpush1.bf16.msra.mxu1 %v4566_v59  ;;  %v4660_v58 = vld [vmem:[#allocation6 + $0x500] sm:$0xff]  ;;  %v4662_v59 = vld [vmem:[#allocation6 + $0x510] sm:$0xff] }
 0xaa7   :  { %5071 = vmatprep.subr.bf16.mxu0 %v4573_v60  ;;  %5235 = vmatprep.subr.bf16.mxu1 %v4575_v9  ;;  %v4669_v60 = vld [vmem:[#allocation6 + $0x548] sm:$0xff]  ;;  %v4671_v9 = vld [vmem:[#allocation6 + $0x558] sm:$0xff] }
 0xaaa   :  { %5072 = vmatpush1.bf16.msra.mxu0 %v4572_v2  ;;  %5236 = vmatpush1.bf16.msra.mxu1 %v4574_v16  ;;  %v4668_v2 = vld [vmem:[#allocation6 + $0x540] sm:$0xff]  ;;  %v4670_v16 = vld [vmem:[#allocation6 + $0x550] sm:$0xff] }
 0xaab   :  { %5073 = vmatprep.subr.bf16.mxu0 %v4581_v61  ;;  %5237 = vmatprep.subr.bf16.mxu1 %v4583_v13  ;;  %v4677_v61 = vld [vmem:[#allocation6 + $0x588] sm:$0xff]  ;;  %v4679_v13 = vld [vmem:[#allocation6 + $0x598] sm:$0xff] }
 0xaae   :  { %5074 = vmatpush1.bf16.msra.mxu0 %v4580_v14  ;;  %5238 = vmatpush1.bf16.msra.mxu1 %v4582_v12  ;;  %v4676_v14 = vld [vmem:[#allocation6 + $0x580] sm:$0xff]  ;;  %v4678_v12 = vld [vmem:[#allocation6 + $0x590] sm:$0xff] }
 0xaaf   :  { %5075 = vmatprep.subr.bf16.mxu0 %v4589_v36  ;;  %5239 = vmatprep.subr.bf16.mxu1 %v4591_v24  ;;  %v4685_v36 = vld [vmem:[#allocation6 + $0x5c8] sm:$0xff]  ;;  %v4687_v24 = vld [vmem:[#allocation6 + $0x5d8] sm:$0xff] }
 0xab2   :  { %5076 = vmatpush1.bf16.msra.mxu0 %v4588_v0  ;;  %5240 = vmatpush1.bf16.msra.mxu1 %v4590_v10  ;;  %v4684_v0 = vld [vmem:[#allocation6 + $0x5c0] sm:$0xff]  ;;  %v4686_v10 = vld [vmem:[#allocation6 + $0x5d0] sm:$0xff] }
 0xab3   :  { %5077 = vmatprep.subr.bf16.mxu0 %v4597_v26  ;;  %5241 = vmatprep.subr.bf16.mxu1 %v4599_v3  ;;  %v4693_v26 = vld [vmem:[#allocation6 + $0x608] sm:$0xff]  ;;  %v4695_v3 = vld [vmem:[#allocation6 + $0x618] sm:$0xff] }
 0xab6   :  { %5078 = vmatpush1.bf16.msra.mxu0 %v4596_v27  ;;  %5242 = vmatpush1.bf16.msra.mxu1 %v4598_v28  ;;  %v4692_v27 = vld [vmem:[#allocation6 + $0x600] sm:$0xff]  ;;  %v4694_v28 = vld [vmem:[#allocation6 + $0x610] sm:$0xff] }
 0xab7   :  { %5079 = vmatprep.subr.bf16.mxu0 %v4605_v8  ;;  %5243 = vmatprep.subr.bf16.mxu1 %v4607_v29  ;;  %v4701_v8 = vld [vmem:[#allocation6 + $0x648] sm:$0xff]  ;;  %v4703_v29 = vld [vmem:[#allocation6 + $0x658] sm:$0xff] }
 0xaba   :  { %5080 = vmatpush1.bf16.msra.mxu0 %v4604_v30  ;;  %5244 = vmatpush1.bf16.msra.mxu1 %v4606_v15  ;;  %v4700_v30 = vld [vmem:[#allocation6 + $0x640] sm:$0xff]  ;;  %v4702_v15 = vld [vmem:[#allocation6 + $0x650] sm:$0xff] }
 0xabb   :  { %5081 = vmatprep.subr.bf16.mxu0 %v4613_v41  ;;  %5245 = vmatprep.subr.bf16.mxu1 %v4615_v31  ;;  %v4709_v41 = vld [vmem:[#allocation6 + $0x688] sm:$0xff]  ;;  %v4711_v31 = vld [vmem:[#allocation6 + $0x698] sm:$0xff] }
 0xabe   :  { %5082 = vmatpush1.bf16.msra.mxu0 %v4612_v1  ;;  %5246 = vmatpush1.bf16.msra.mxu1 %v4614_v32  ;;  %v4708_v1 = vld [vmem:[#allocation6 + $0x680] sm:$0xff]  ;;  %v4710_v32 = vld [vmem:[#allocation6 + $0x690] sm:$0xff] }
 0xabf   :  { %5083 = vmatprep.subr.bf16.mxu0 %v4621_v17  ;;  %5247 = vmatprep.subr.bf16.mxu1 %v4623_v34  ;;  %v4717_v17 = vld [vmem:[#allocation6 + $0x6c8] sm:$0xff]  ;;  %v4719_v34 = vld [vmem:[#allocation6 + $0x6d8] sm:$0xff] }
 0xac2   :  { %5084 = vmatpush1.bf16.msra.mxu0 %v4620_v45  ;;  %5248 = vmatpush1.bf16.msra.mxu1 %v4622_v46  ;;  %v4716_v45 = vld [vmem:[#allocation6 + $0x6c0] sm:$0xff]  ;;  %v4718_v46 = vld [vmem:[#allocation6 + $0x6d0] sm:$0xff] }
 0xac3   :  { %5094 = vmatprep.subr.bf16.mxu0 %v4629_v4  ;;  %5258 = vmatprep.subr.bf16.mxu1 %v4631_v47  ;;  %v4725_v4 = vld [vmem:[#allocation6 + $0x708] sm:$0xff]  ;;  %v4727_v47 = vld [vmem:[#allocation6 + $0x718] sm:$0xff] }
 0xac5   :  { %5086 = vmatmul.mubr.bf16.vlgmr.msra.gmra.mrb[28].mxu0 %v8585_v21  ;;  %5250 = vmatmul.mubr.bf16.vlgmr.msra.gmra.mrb[28].mxu1 %v8585_v21 }
 0xac6   :  { %5095 = vmatpush1.bf16.msra.mxu0 %v4628_v48  ;;  %5259 = vmatpush1.bf16.msra.mxu1 %v4630_v49  ;;  %v4724_v48 = vld [vmem:[#allocation6 + $0x700] sm:$0xff]  ;;  %v4726_v49 = vld [vmem:[#allocation6 + $0x710] sm:$0xff] }
 0xac7   :  { %5096 = vmatprep.subr.bf16.mxu0 %v4637_v37  ;;  %5260 = vmatprep.subr.bf16.mxu1 %v4639_v50  ;;  %v4733_v37 = vld [vmem:[#allocation6 + $0x748] sm:$0xff]  ;;  %v4735_v50 = vld [vmem:[#allocation6 + $0x758] sm:$0xff] }
 0xac8   :  { %5126 = vmatprep.mubr.bf16.mxu0 %v8591_v42  ;;  %5290 = vmatprep.mubr.bf16.mxu1 %v8591_v42 }
 0xaca   :  { %5097 = vmatpush1.bf16.msra.mxu0 %v4636_v51  ;;  %5261 = vmatpush1.bf16.msra.mxu1 %v4638_v5  ;;  %v4732_v51 = vld [vmem:[#allocation6 + $0x740] sm:$0xff]  ;;  %v4734_v5 = vld [vmem:[#allocation6 + $0x750] sm:$0xff] }
 0xacb   :  { %5098 = vmatprep.subr.bf16.mxu0 %v4645_v52  ;;  %5262 = vmatprep.subr.bf16.mxu1 %v4647_v53  ;;  %v4741_v52 = vld [vmem:[#allocation6 + $0x788] sm:$0xff]  ;;  %v4743_v53 = vld [vmem:[#allocation6 + $0x798] sm:$0xff] }
 0xace   :  { %5099 = vmatpush1.bf16.msra.mxu0 %v4644_v54  ;;  %5263 = vmatpush1.bf16.msra.mxu1 %v4646_v11  ;;  %v4740_v54 = vld [vmem:[#allocation6 + $0x780] sm:$0xff]  ;;  %v4742_v11 = vld [vmem:[#allocation6 + $0x790] sm:$0xff] }
 0xacf   :  { %5100 = vmatprep.subr.bf16.mxu0 %v4653_v55  ;;  %5264 = vmatprep.subr.bf16.mxu1 %v4655_v56  ;;  %v4749_v55 = vld [vmem:[#allocation6 + $0x7c8] sm:$0xff]  ;;  %v4751_v56 = vld [vmem:[#allocation6 + $0x7d8] sm:$0xff] }
 0xad2   :  { %5101 = vmatpush1.bf16.msra.mxu0 %v4652_v18  ;;  %5265 = vmatpush1.bf16.msra.mxu1 %v4654_v35  ;;  %v4748_v18 = vld [vmem:[#allocation6 + $0x7c0] sm:$0xff]  ;;  %v4750_v35 = vld [vmem:[#allocation6 + $0x7d0] sm:$0xff] }
 0xad3   :  { %5102 = vmatprep.subr.bf16.mxu0 %v4661_v57  ;;  %5266 = vmatprep.subr.bf16.mxu1 %v4663_v63  ;;  %v4757_v57 = vld [vmem:[#allocation6 + $0x808] sm:$0xff]  ;;  %v4759_v63 = vld [vmem:[#allocation6 + $0x818] sm:$0xff] }
 0xad6   :  { %5103 = vmatpush1.bf16.msra.mxu0 %v4660_v58  ;;  %5267 = vmatpush1.bf16.msra.mxu1 %v4662_v59  ;;  %v4756_v58 = vld [vmem:[#allocation6 + $0x800] sm:$0xff]  ;;  %v4758_v59 = vld [vmem:[#allocation6 + $0x810] sm:$0xff] }
 0xad7   :  { %5104 = vmatprep.subr.bf16.mxu0 %v4669_v60  ;;  %5268 = vmatprep.subr.bf16.mxu1 %v4671_v9  ;;  %v4765_v60 = vld [vmem:[#allocation6 + $0x848] sm:$0xff]  ;;  %v4767_v9 = vld [vmem:[#allocation6 + $0x858] sm:$0xff] }
 0xada   :  { %5105 = vmatpush1.bf16.msra.mxu0 %v4668_v2  ;;  %5269 = vmatpush1.bf16.msra.mxu1 %v4670_v16  ;;  %v4764_v2 = vld [vmem:[#allocation6 + $0x840] sm:$0xff]  ;;  %v4766_v16 = vld [vmem:[#allocation6 + $0x850] sm:$0xff] }
 0xadb   :  { %5106 = vmatprep.subr.bf16.mxu0 %v4677_v61  ;;  %5270 = vmatprep.subr.bf16.mxu1 %v4679_v13  ;;  %v4773_v61 = vld [vmem:[#allocation6 + $0x888] sm:$0xff]  ;;  %v4775_v13 = vld [vmem:[#allocation6 + $0x898] sm:$0xff] }
 0xade   :  { %5107 = vmatpush1.bf16.msra.mxu0 %v4676_v14  ;;  %5271 = vmatpush1.bf16.msra.mxu1 %v4678_v12  ;;  %v4772_v14 = vld [vmem:[#allocation6 + $0x880] sm:$0xff]  ;;  %v4774_v12 = vld [vmem:[#allocation6 + $0x890] sm:$0xff] }
 0xadf   :  { %5108 = vmatprep.subr.bf16.mxu0 %v4685_v36  ;;  %5272 = vmatprep.subr.bf16.mxu1 %v4687_v24  ;;  %v4781_v36 = vld [vmem:[#allocation6 + $0x8c8] sm:$0xff]  ;;  %v4783_v24 = vld [vmem:[#allocation6 + $0x8d8] sm:$0xff] }
 0xae2   :  { %5109 = vmatpush1.bf16.msra.mxu0 %v4684_v0  ;;  %5273 = vmatpush1.bf16.msra.mxu1 %v4686_v10  ;;  %v4780_v0 = vld [vmem:[#allocation6 + $0x8c0] sm:$0xff]  ;;  %v4782_v10 = vld [vmem:[#allocation6 + $0x8d0] sm:$0xff] }
 0xae3   :  { %5110 = vmatprep.subr.bf16.mxu0 %v4693_v26  ;;  %5274 = vmatprep.subr.bf16.mxu1 %v4695_v3  ;;  %v4789_v26 = vld [vmem:[#allocation6 + $0x908] sm:$0xff]  ;;  %v4791_v3 = vld [vmem:[#allocation6 + $0x918] sm:$0xff] }
 0xae6   :  { %5111 = vmatpush1.bf16.msra.mxu0 %v4692_v27  ;;  %5275 = vmatpush1.bf16.msra.mxu1 %v4694_v28  ;;  %v4788_v27 = vld [vmem:[#allocation6 + $0x900] sm:$0xff]  ;;  %v4790_v28 = vld [vmem:[#allocation6 + $0x910] sm:$0xff] }
 0xae7   :  { %5112 = vmatprep.subr.bf16.mxu0 %v4701_v8  ;;  %5276 = vmatprep.subr.bf16.mxu1 %v4703_v29  ;;  %v4797_v8 = vld [vmem:[#allocation6 + $0x948] sm:$0xff]  ;;  %v4799_v29 = vld [vmem:[#allocation6 + $0x958] sm:$0xff] }
 0xaea   :  { %5113 = vmatpush1.bf16.msra.mxu0 %v4700_v30  ;;  %5277 = vmatpush1.bf16.msra.mxu1 %v4702_v15  ;;  %v4796_v30 = vld [vmem:[#allocation6 + $0x940] sm:$0xff]  ;;  %v4798_v15 = vld [vmem:[#allocation6 + $0x950] sm:$0xff] }
 0xaeb   :  { %5114 = vmatprep.subr.bf16.mxu0 %v4709_v41  ;;  %5278 = vmatprep.subr.bf16.mxu1 %v4711_v31  ;;  %v4805_v41 = vld [vmem:[#allocation6 + $0x988] sm:$0xff]  ;;  %v4807_v31 = vld [vmem:[#allocation6 + $0x998] sm:$0xff] }
 0xaee   :  { %5115 = vmatpush1.bf16.msra.mxu0 %v4708_v1  ;;  %5279 = vmatpush1.bf16.msra.mxu1 %v4710_v32  ;;  %v4804_v1 = vld [vmem:[#allocation6 + $0x980] sm:$0xff]  ;;  %v4806_v32 = vld [vmem:[#allocation6 + $0x990] sm:$0xff] }
 0xaef   :  { %5116 = vmatprep.subr.bf16.mxu0 %v4717_v17  ;;  %5280 = vmatprep.subr.bf16.mxu1 %v4719_v34  ;;  %v4813_v17 = vld [vmem:[#allocation6 + $0x9c8] sm:$0xff]  ;;  %v4815_v34 = vld [vmem:[#allocation6 + $0x9d8] sm:$0xff] }
 0xaf2   :  { %5117 = vmatpush1.bf16.msra.mxu0 %v4716_v45  ;;  %5281 = vmatpush1.bf16.msra.mxu1 %v4718_v46  ;;  %v4812_v45 = vld [vmem:[#allocation6 + $0x9c0] sm:$0xff]  ;;  %v4814_v46 = vld [vmem:[#allocation6 + $0x9d0] sm:$0xff] }
 0xaf3   :  { %5118 = vmatprep.subr.bf16.mxu0 %v4725_v4  ;;  %5282 = vmatprep.subr.bf16.mxu1 %v4727_v47  ;;  %v4821_v4 = vld [vmem:[#allocation6 + $0xa08] sm:$0xff]  ;;  %v4823_v47 = vld [vmem:[#allocation6 + $0xa18] sm:$0xff] }
 0xaf6   :  { %5119 = vmatpush1.bf16.msra.mxu0 %v4724_v48  ;;  %5283 = vmatpush1.bf16.msra.mxu1 %v4726_v49  ;;  %v4820_v48 = vld [vmem:[#allocation6 + $0xa00] sm:$0xff]  ;;  %v4822_v49 = vld [vmem:[#allocation6 + $0xa10] sm:$0xff] }
 0xaf7   :  { %5120 = vmatprep.subr.bf16.mxu0 %v4733_v37  ;;  %5284 = vmatprep.subr.bf16.mxu1 %v4735_v50  ;;  %v4829_v37 = vld [vmem:[#allocation6 + $0xa48] sm:$0xff]  ;;  %v4831_v50 = vld [vmem:[#allocation6 + $0xa58] sm:$0xff] }
 0xafa   :  { %5121 = vmatpush1.bf16.msra.mxu0 %v4732_v51  ;;  %5285 = vmatpush1.bf16.msra.mxu1 %v4734_v5  ;;  %v4828_v51 = vld [vmem:[#allocation6 + $0xa40] sm:$0xff]  ;;  %v4830_v5 = vld [vmem:[#allocation6 + $0xa50] sm:$0xff] }
 0xafb   :  { %5122 = vmatprep.subr.bf16.mxu0 %v4741_v52  ;;  %5286 = vmatprep.subr.bf16.mxu1 %v4743_v53  ;;  %v4837_v52 = vld [vmem:[#allocation6 + $0xa88] sm:$0xff]  ;;  %v4839_v53 = vld [vmem:[#allocation6 + $0xa98] sm:$0xff] }
 0xafe   :  { %5123 = vmatpush1.bf16.msra.mxu0 %v4740_v54  ;;  %5287 = vmatpush1.bf16.msra.mxu1 %v4742_v11  ;;  %v4836_v54 = vld [vmem:[#allocation6 + $0xa80] sm:$0xff]  ;;  %v4838_v11 = vld [vmem:[#allocation6 + $0xa90] sm:$0xff] }
 0xaff   :  { %5124 = vmatprep.subr.bf16.mxu0 %v4749_v55  ;;  %5288 = vmatprep.subr.bf16.mxu1 %v4751_v56  ;;  %v4845_v55 = vld [vmem:[#allocation6 + $0xac8] sm:$0xff]  ;;  %v4847_v56 = vld [vmem:[#allocation6 + $0xad8] sm:$0xff] }
 0xb02   :  { %5125 = vmatpush1.bf16.msra.mxu0 %v4748_v18  ;;  %5289 = vmatpush1.bf16.msra.mxu1 %v4750_v35  ;;  %v4844_v18 = vld [vmem:[#allocation6 + $0xac0] sm:$0xff]  ;;  %v4846_v35 = vld [vmem:[#allocation6 + $0xad0] sm:$0xff] }
 0xb03   :  { %5135 = vmatprep.subr.bf16.mxu0 %v4757_v57  ;;  %5299 = vmatprep.subr.bf16.mxu1 %v4759_v63  ;;  %v4853_v57 = vld [vmem:[#allocation6 + $0xb08] sm:$0xff]  ;;  %v4855_v63 = vld [vmem:[#allocation6 + $0xb18] sm:$0xff] }
 0xb05   :  { %5127 = vmatmul.mubr.bf16.vlgmr.msra.gmra.mrb[28].mxu0 %v8587_v7  ;;  %5291 = vmatmul.mubr.bf16.vlgmr.msra.gmra.mrb[28].mxu1 %v8587_v7 }
 0xb06   :  { %5136 = vmatpush1.bf16.msra.mxu0 %v4756_v58  ;;  %5300 = vmatpush1.bf16.msra.mxu1 %v4758_v59  ;;  %v4852_v58 = vld [vmem:[#allocation6 + $0xb00] sm:$0xff]  ;;  %v4854_v59 = vld [vmem:[#allocation6 + $0xb10] sm:$0xff] }
 0xb07   :  { %5137 = vmatprep.subr.bf16.mxu0 %v4765_v60  ;;  %5301 = vmatprep.subr.bf16.mxu1 %v4767_v9  ;;  %v4861_v60 = vld [vmem:[#allocation6 + $0xb48] sm:$0xff]  ;;  %v4863_v9 = vld [vmem:[#allocation6 + $0xb58] sm:$0xff] }
 0xb08   :  { %5167 = vmatprep.mubr.bf16.mxu0 %v8607_v33  ;;  %5331 = vmatprep.mubr.bf16.mxu1 %v8607_v33 }
 0xb0a   :  { %5138 = vmatpush1.bf16.msra.mxu0 %v4764_v2  ;;  %5302 = vmatpush1.bf16.msra.mxu1 %v4766_v16  ;;  %v4860_v2 = vld [vmem:[#allocation6 + $0xb40] sm:$0xff]  ;;  %v4862_v16 = vld [vmem:[#allocation6 + $0xb50] sm:$0xff] }
 0xb0b   :  { %5139 = vmatprep.subr.bf16.mxu0 %v4773_v61  ;;  %5303 = vmatprep.subr.bf16.mxu1 %v4775_v13  ;;  %v4869_v61 = vld [vmem:[#allocation6 + $0xb88] sm:$0xff]  ;;  %v4871_v13 = vld [vmem:[#allocation6 + $0xb98] sm:$0xff] }
 0xb0e   :  { %5140 = vmatpush1.bf16.msra.mxu0 %v4772_v14  ;;  %5304 = vmatpush1.bf16.msra.mxu1 %v4774_v12  ;;  %v4868_v14 = vld [vmem:[#allocation6 + $0xb80] sm:$0xff]  ;;  %v4870_v12 = vld [vmem:[#allocation6 + $0xb90] sm:$0xff] }
 0xb0f   :  { %5141 = vmatprep.subr.bf16.mxu0 %v4781_v36  ;;  %5305 = vmatprep.subr.bf16.mxu1 %v4783_v24  ;;  %v4877_v36 = vld [vmem:[#allocation6 + $0xbc8] sm:$0xff]  ;;  %v4879_v24 = vld [vmem:[#allocation6 + $0xbd8] sm:$0xff] }
 0xb12   :  { %5142 = vmatpush1.bf16.msra.mxu0 %v4780_v0  ;;  %5306 = vmatpush1.bf16.msra.mxu1 %v4782_v10  ;;  %v4876_v0 = vld [vmem:[#allocation6 + $0xbc0] sm:$0xff]  ;;  %v4878_v10 = vld [vmem:[#allocation6 + $0xbd0] sm:$0xff] }
 0xb13   :  { %5143 = vmatprep.subr.bf16.mxu0 %v4789_v26  ;;  %5307 = vmatprep.subr.bf16.mxu1 %v4791_v3  ;;  %v4885_v26 = vld [vmem:[#allocation6 + $0xc08] sm:$0xff]  ;;  %v4887_v3 = vld [vmem:[#allocation6 + $0xc18] sm:$0xff] }
 0xb16   :  { %5144 = vmatpush1.bf16.msra.mxu0 %v4788_v27  ;;  %5308 = vmatpush1.bf16.msra.mxu1 %v4790_v28  ;;  %v4884_v27 = vld [vmem:[#allocation6 + $0xc00] sm:$0xff]  ;;  %v4886_v28 = vld [vmem:[#allocation6 + $0xc10] sm:$0xff] }
 0xb17   :  { %5145 = vmatprep.subr.bf16.mxu0 %v4797_v8  ;;  %5309 = vmatprep.subr.bf16.mxu1 %v4799_v29  ;;  %v4893_v8 = vld [vmem:[#allocation6 + $0xc48] sm:$0xff]  ;;  %v4895_v29 = vld [vmem:[#allocation6 + $0xc58] sm:$0xff] }
 0xb1a   :  { %5146 = vmatpush1.bf16.msra.mxu0 %v4796_v30  ;;  %5310 = vmatpush1.bf16.msra.mxu1 %v4798_v15  ;;  %v4892_v30 = vld [vmem:[#allocation6 + $0xc40] sm:$0xff]  ;;  %v4894_v15 = vld [vmem:[#allocation6 + $0xc50] sm:$0xff] }
 0xb1b   :  { %5147 = vmatprep.subr.bf16.mxu0 %v4805_v41  ;;  %5311 = vmatprep.subr.bf16.mxu1 %v4807_v31  ;;  %v4901_v41 = vld [vmem:[#allocation6 + $0xc88] sm:$0xff]  ;;  %v4903_v31 = vld [vmem:[#allocation6 + $0xc98] sm:$0xff] }
 0xb1e   :  { %5148 = vmatpush1.bf16.msra.mxu0 %v4804_v1  ;;  %5312 = vmatpush1.bf16.msra.mxu1 %v4806_v32  ;;  %v4900_v1 = vld [vmem:[#allocation6 + $0xc80] sm:$0xff]  ;;  %v4902_v32 = vld [vmem:[#allocation6 + $0xc90] sm:$0xff] }
 0xb1f   :  { %5149 = vmatprep.subr.bf16.mxu0 %v4813_v17  ;;  %5313 = vmatprep.subr.bf16.mxu1 %v4815_v34  ;;  %v4909_v17 = vld [vmem:[#allocation6 + $0xcc8] sm:$0xff]  ;;  %v4911_v34 = vld [vmem:[#allocation6 + $0xcd8] sm:$0xff] }
 0xb22   :  { %5150 = vmatpush1.bf16.msra.mxu0 %v4812_v45  ;;  %5314 = vmatpush1.bf16.msra.mxu1 %v4814_v46  ;;  %v4908_v45 = vld [vmem:[#allocation6 + $0xcc0] sm:$0xff]  ;;  %v4910_v46 = vld [vmem:[#allocation6 + $0xcd0] sm:$0xff] }
 0xb23   :  { %5151 = vmatprep.subr.bf16.mxu0 %v4821_v4  ;;  %5315 = vmatprep.subr.bf16.mxu1 %v4823_v47  ;;  %v4917_v4 = vld [vmem:[#allocation6 + $0xd08] sm:$0xff]  ;;  %v4919_v47 = vld [vmem:[#allocation6 + $0xd18] sm:$0xff] }
 0xb26   :  { %5152 = vmatpush1.bf16.msra.mxu0 %v4820_v48  ;;  %5316 = vmatpush1.bf16.msra.mxu1 %v4822_v49  ;;  %v4916_v48 = vld [vmem:[#allocation6 + $0xd00] sm:$0xff]  ;;  %v4918_v49 = vld [vmem:[#allocation6 + $0xd10] sm:$0xff] }
 0xb27   :  { %5153 = vmatprep.subr.bf16.mxu0 %v4829_v37  ;;  %5317 = vmatprep.subr.bf16.mxu1 %v4831_v50  ;;  %v4925_v37 = vld [vmem:[#allocation6 + $0xd48] sm:$0xff]  ;;  %v4927_v50 = vld [vmem:[#allocation6 + $0xd58] sm:$0xff] }
 0xb2a   :  { %5154 = vmatpush1.bf16.msra.mxu0 %v4828_v51  ;;  %5318 = vmatpush1.bf16.msra.mxu1 %v4830_v5  ;;  %v4924_v51 = vld [vmem:[#allocation6 + $0xd40] sm:$0xff]  ;;  %v4926_v5 = vld [vmem:[#allocation6 + $0xd50] sm:$0xff] }
 0xb2b   :  { %5155 = vmatprep.subr.bf16.mxu0 %v4837_v52  ;;  %5319 = vmatprep.subr.bf16.mxu1 %v4839_v53  ;;  %v4933_v52 = vld [vmem:[#allocation6 + $0xd88] sm:$0xff]  ;;  %v4935_v53 = vld [vmem:[#allocation6 + $0xd98] sm:$0xff] }
 0xb2e   :  { %5156 = vmatpush1.bf16.msra.mxu0 %v4836_v54  ;;  %5320 = vmatpush1.bf16.msra.mxu1 %v4838_v11  ;;  %v4932_v54 = vld [vmem:[#allocation6 + $0xd80] sm:$0xff]  ;;  %v4934_v11 = vld [vmem:[#allocation6 + $0xd90] sm:$0xff] }
 0xb2f   :  { %5157 = vmatprep.subr.bf16.mxu0 %v4845_v55  ;;  %5321 = vmatprep.subr.bf16.mxu1 %v4847_v56  ;;  %v4941_v55 = vld [vmem:[#allocation6 + $0xdc8] sm:$0xff]  ;;  %v4943_v56 = vld [vmem:[#allocation6 + $0xdd8] sm:$0xff] }
 0xb32   :  { %5158 = vmatpush1.bf16.msra.mxu0 %v4844_v18  ;;  %5322 = vmatpush1.bf16.msra.mxu1 %v4846_v35  ;;  %v4940_v18 = vld [vmem:[#allocation6 + $0xdc0] sm:$0xff]  ;;  %v4942_v35 = vld [vmem:[#allocation6 + $0xdd0] sm:$0xff] }
 0xb33   :  { %5159 = vmatprep.subr.bf16.mxu0 %v4853_v57  ;;  %5323 = vmatprep.subr.bf16.mxu1 %v4855_v63  ;;  %v4949_v57 = vld [vmem:[#allocation6 + $0xe08] sm:$0xff]  ;;  %v4951_v63 = vld [vmem:[#allocation6 + $0xe18] sm:$0xff] }
 0xb36   :  { %5160 = vmatpush1.bf16.msra.mxu0 %v4852_v58  ;;  %5324 = vmatpush1.bf16.msra.mxu1 %v4854_v59  ;;  %v4948_v58 = vld [vmem:[#allocation6 + $0xe00] sm:$0xff]  ;;  %v4950_v59 = vld [vmem:[#allocation6 + $0xe10] sm:$0xff] }
 0xb37   :  { %5161 = vmatprep.subr.bf16.mxu0 %v4861_v60  ;;  %5325 = vmatprep.subr.bf16.mxu1 %v4863_v9  ;;  %v4957_v60 = vld [vmem:[#allocation6 + $0xe48] sm:$0xff]  ;;  %v4959_v9 = vld [vmem:[#allocation6 + $0xe58] sm:$0xff] }
 0xb3a   :  { %5162 = vmatpush1.bf16.msra.mxu0 %v4860_v2  ;;  %5326 = vmatpush1.bf16.msra.mxu1 %v4862_v16  ;;  %v4956_v2 = vld [vmem:[#allocation6 + $0xe40] sm:$0xff]  ;;  %v4958_v16 = vld [vmem:[#allocation6 + $0xe50] sm:$0xff] }
 0xb3b   :  { %5163 = vmatprep.subr.bf16.mxu0 %v4869_v61  ;;  %5327 = vmatprep.subr.bf16.mxu1 %v4871_v13  ;;  %v4965_v61 = vld [vmem:[#allocation6 + $0xe88] sm:$0xff]  ;;  %v4967_v13 = vld [vmem:[#allocation6 + $0xe98] sm:$0xff] }
 0xb3e   :  { %5164 = vmatpush1.bf16.msra.mxu0 %v4868_v14  ;;  %5328 = vmatpush1.bf16.msra.mxu1 %v4870_v12  ;;  %v4964_v14 = vld [vmem:[#allocation6 + $0xe80] sm:$0xff]  ;;  %v4966_v12 = vld [vmem:[#allocation6 + $0xe90] sm:$0xff] }
 0xb3f   :  { %5165 = vmatprep.subr.bf16.mxu0 %v4877_v36  ;;  %5329 = vmatprep.subr.bf16.mxu1 %v4879_v24  ;;  %v4973_v36 = vld [vmem:[#allocation6 + $0xec8] sm:$0xff]  ;;  %v4975_v24 = vld [vmem:[#allocation6 + $0xed8] sm:$0xff] }
 0xb42   :  { %5166 = vmatpush1.bf16.msra.mxu0 %v4876_v0  ;;  %5330 = vmatpush1.bf16.msra.mxu1 %v4878_v10  ;;  %v4972_v0 = vld [vmem:[#allocation6 + $0xec0] sm:$0xff]  ;;  %v4974_v10 = vld [vmem:[#allocation6 + $0xed0] sm:$0xff] }
 0xb43   :  { %5176 = vmatprep.subr.bf16.mxu0 %v4885_v26  ;;  %5340 = vmatprep.subr.bf16.mxu1 %v4887_v3  ;;  %v4981_v26 = vld [vmem:[#allocation6 + $0xf08] sm:$0xff]  ;;  %v4983_v3 = vld [vmem:[#allocation6 + $0xf18] sm:$0xff] }
 0xb45   :  { %5168 = vmatmul.mubr.bf16.vlgmr.msra.gmra.mrb[28].mxu0 %v8603_v40  ;;  %5332 = vmatmul.mubr.bf16.vlgmr.msra.gmra.mrb[28].mxu1 %v8603_v40 }
 0xb46   :  { %5177 = vmatpush1.bf16.msra.mxu0 %v4884_v27  ;;  %5341 = vmatpush1.bf16.msra.mxu1 %v4886_v28  ;;  %v4980_v27 = vld [vmem:[#allocation6 + $0xf00] sm:$0xff]  ;;  %v4982_v28 = vld [vmem:[#allocation6 + $0xf10] sm:$0xff] }
 0xb47   :  { %5178 = vmatprep.subr.bf16.mxu0 %v4893_v8  ;;  %5342 = vmatprep.subr.bf16.mxu1 %v4895_v29  ;;  %v4989_v8 = vld [vmem:[#allocation6 + $0xf48] sm:$0xff]  ;;  %v4991_v29 = vld [vmem:[#allocation6 + $0xf58] sm:$0xff] }
 0xb48   :  { %5208 = vmatprep.mubr.bf16.mxu0 %v8609_v25  ;;  %5372 = vmatprep.mubr.bf16.mxu1 %v8609_v25 }
 0xb4a   :  { %5179 = vmatpush1.bf16.msra.mxu0 %v4892_v30  ;;  %5343 = vmatpush1.bf16.msra.mxu1 %v4894_v15  ;;  %v4988_v30 = vld [vmem:[#allocation6 + $0xf40] sm:$0xff]  ;;  %v4990_v15 = vld [vmem:[#allocation6 + $0xf50] sm:$0xff] }
 0xb4b   :  { %5180 = vmatprep.subr.bf16.mxu0 %v4901_v41  ;;  %5344 = vmatprep.subr.bf16.mxu1 %v4903_v31  ;;  %v4997_v41 = vld [vmem:[#allocation6 + $0xf88] sm:$0xff]  ;;  %v4999_v31 = vld [vmem:[#allocation6 + $0xf98] sm:$0xff] }
 0xb4e   :  { %5181 = vmatpush1.bf16.msra.mxu0 %v4900_v1  ;;  %5345 = vmatpush1.bf16.msra.mxu1 %v4902_v32  ;;  %v4996_v1 = vld [vmem:[#allocation6 + $0xf80] sm:$0xff]  ;;  %v4998_v32 = vld [vmem:[#allocation6 + $0xf90] sm:$0xff] }
 0xb4f   :  { %5182 = vmatprep.subr.bf16.mxu0 %v4909_v17  ;;  %5346 = vmatprep.subr.bf16.mxu1 %v4911_v34  ;;  %v5005_v17 = vld [vmem:[#allocation6 + $0xfc8] sm:$0xff]  ;;  %v5007_v34 = vld [vmem:[#allocation6 + $0xfd8] sm:$0xff] }
 0xb52   :  { %5183 = vmatpush1.bf16.msra.mxu0 %v4908_v45  ;;  %5347 = vmatpush1.bf16.msra.mxu1 %v4910_v46  ;;  %v5004_v45 = vld [vmem:[#allocation6 + $0xfc0] sm:$0xff]  ;;  %v5006_v46 = vld [vmem:[#allocation6 + $0xfd0] sm:$0xff] }
 0xb53   :  { %5184 = vmatprep.subr.bf16.mxu0 %v4917_v4  ;;  %5348 = vmatprep.subr.bf16.mxu1 %v4919_v47  ;;  %v4505_v4 = vld [vmem:[#allocation6 + $0x28] sm:$0xff]  ;;  %v4507_v47 = vld [vmem:[#allocation6 + $0x38] sm:$0xff] }
 0xb56   :  { %5185 = vmatpush1.bf16.msra.mxu0 %v4916_v48  ;;  %5349 = vmatpush1.bf16.msra.mxu1 %v4918_v49  ;;  %v4504_v48 = vld [vmem:[#allocation6 + $0x20] sm:$0xff]  ;;  %v4506_v49 = vld [vmem:[#allocation6 + $0x30] sm:$0xff] }
 0xb57   :  { %5186 = vmatprep.subr.bf16.mxu0 %v4925_v37  ;;  %5350 = vmatprep.subr.bf16.mxu1 %v4927_v50  ;;  %v4513_v37 = vld [vmem:[#allocation6 + $0x68] sm:$0xff]  ;;  %v4515_v50 = vld [vmem:[#allocation6 + $0x78] sm:$0xff] }
 0xb5a   :  { %5187 = vmatpush1.bf16.msra.mxu0 %v4924_v51  ;;  %5351 = vmatpush1.bf16.msra.mxu1 %v4926_v5  ;;  %v4512_v51 = vld [vmem:[#allocation6 + $0x60] sm:$0xff]  ;;  %v4514_v5 = vld [vmem:[#allocation6 + $0x70] sm:$0xff] }
 0xb5b   :  { %5188 = vmatprep.subr.bf16.mxu0 %v4933_v52  ;;  %5352 = vmatprep.subr.bf16.mxu1 %v4935_v53  ;;  %v4521_v52 = vld [vmem:[#allocation6 + $0xa8] sm:$0xff]  ;;  %v4523_v53 = vld [vmem:[#allocation6 + $0xb8] sm:$0xff] }
 0xb5e   :  { %5189 = vmatpush1.bf16.msra.mxu0 %v4932_v54  ;;  %5353 = vmatpush1.bf16.msra.mxu1 %v4934_v11  ;;  %v4520_v54 = vld [vmem:[#allocation6 + $0xa0] sm:$0xff]  ;;  %v4522_v11 = vld [vmem:[#allocation6 + $0xb0] sm:$0xff] }
 0xb5f   :  { %5190 = vmatprep.subr.bf16.mxu0 %v4941_v55  ;;  %5354 = vmatprep.subr.bf16.mxu1 %v4943_v56  ;;  %v4529_v55 = vld [vmem:[#allocation6 + $0xe8] sm:$0xff]  ;;  %v4531_v56 = vld [vmem:[#allocation6 + $0xf8] sm:$0xff] }
 0xb62   :  { %5191 = vmatpush1.bf16.msra.mxu0 %v4940_v18  ;;  %5355 = vmatpush1.bf16.msra.mxu1 %v4942_v35  ;;  %v4528_v18 = vld [vmem:[#allocation6 + $0xe0] sm:$0xff]  ;;  %v4530_v35 = vld [vmem:[#allocation6 + $0xf0] sm:$0xff] }
 0xb63   :  { %5192 = vmatprep.subr.bf16.mxu0 %v4949_v57  ;;  %5356 = vmatprep.subr.bf16.mxu1 %v4951_v63  ;;  %v4537_v57 = vld [vmem:[#allocation6 + $0x128] sm:$0xff]  ;;  %v4539_v63 = vld [vmem:[#allocation6 + $0x138] sm:$0xff] }
 0xb66   :  { %5193 = vmatpush1.bf16.msra.mxu0 %v4948_v58  ;;  %5357 = vmatpush1.bf16.msra.mxu1 %v4950_v59  ;;  %v4538_v58 = vld [vmem:[#allocation6 + $0x130] sm:$0xff]  ;;  %v4545_v59 = vld [vmem:[#allocation6 + $0x168] sm:$0xff] }
 0xb67   :  { %5194 = vmatprep.subr.bf16.mxu0 %v4957_v60  ;;  %5358 = vmatprep.subr.bf16.mxu1 %v4959_v9  ;;  %v4547_v60 = vld [vmem:[#allocation6 + $0x178] sm:$0xff]  ;;  %v4544_v9 = vld [vmem:[#allocation6 + $0x160] sm:$0xff] }
 0xb6a   :  { %5195 = vmatpush1.bf16.msra.mxu0 %v4956_v2  ;;  %5359 = vmatpush1.bf16.msra.mxu1 %v4958_v16  ;;  %v4546_v2 = vld [vmem:[#allocation6 + $0x170] sm:$0xff]  ;;  %v4553_v16 = vld [vmem:[#allocation6 + $0x1a8] sm:$0xff] }
 0xb6b   :  { %5196 = vmatprep.subr.bf16.mxu0 %v4965_v61  ;;  %5360 = vmatprep.subr.bf16.mxu1 %v4967_v13  ;;  %v4555_v61 = vld [vmem:[#allocation6 + $0x1b8] sm:$0xff]  ;;  %v4552_v13 = vld [vmem:[#allocation6 + $0x1a0] sm:$0xff] }
 0xb6e   :  { %5197 = vmatpush1.bf16.msra.mxu0 %v4964_v14  ;;  %5361 = vmatpush1.bf16.msra.mxu1 %v4966_v12  ;;  %v4554_v14 = vld [vmem:[#allocation6 + $0x1b0] sm:$0xff]  ;;  %v4561_v12 = vld [vmem:[#allocation6 + $0x1e8] sm:$0xff] }
 0xb6f   :  { %5198 = vmatprep.subr.bf16.mxu0 %v4973_v36  ;;  %5362 = vmatprep.subr.bf16.mxu1 %v4975_v24  ;;  %v4563_v36 = vld [vmem:[#allocation6 + $0x1f8] sm:$0xff]  ;;  %v4560_v24 = vld [vmem:[#allocation6 + $0x1e0] sm:$0xff] }
 0xb72   :  { %5199 = vmatpush1.bf16.msra.mxu0 %v4972_v0  ;;  %5363 = vmatpush1.bf16.msra.mxu1 %v4974_v10  ;;  %v4562_v0 = vld [vmem:[#allocation6 + $0x1f0] sm:$0xff]  ;;  %v4569_v10 = vld [vmem:[#allocation6 + $0x228] sm:$0xff] }
 0xb73   :  { %5200 = vmatprep.subr.bf16.mxu0 %v4981_v26  ;;  %5364 = vmatprep.subr.bf16.mxu1 %v4983_v3  ;;  %v4571_v26 = vld [vmem:[#allocation6 + $0x238] sm:$0xff]  ;;  %v4568_v3 = vld [vmem:[#allocation6 + $0x220] sm:$0xff] }
 0xb76   :  { %5201 = vmatpush1.bf16.msra.mxu0 %v4980_v27  ;;  %5365 = vmatpush1.bf16.msra.mxu1 %v4982_v28  ;;  %v4570_v27 = vld [vmem:[#allocation6 + $0x230] sm:$0xff]  ;;  %v4577_v28 = vld [vmem:[#allocation6 + $0x268] sm:$0xff] }
 0xb77   :  { %5202 = vmatprep.subr.bf16.mxu0 %v4989_v8  ;;  %5366 = vmatprep.subr.bf16.mxu1 %v4991_v29  ;;  %v4579_v8 = vld [vmem:[#allocation6 + $0x278] sm:$0xff]  ;;  %v4576_v29 = vld [vmem:[#allocation6 + $0x260] sm:$0xff] }
 0xb7a   :  { %5203 = vmatpush1.bf16.msra.mxu0 %v4988_v30  ;;  %5367 = vmatpush1.bf16.msra.mxu1 %v4990_v15  ;;  %v4578_v30 = vld [vmem:[#allocation6 + $0x270] sm:$0xff]  ;;  %v4585_v15 = vld [vmem:[#allocation6 + $0x2a8] sm:$0xff] }
 0xb7b   :  { %5204 = vmatprep.subr.bf16.mxu0 %v4997_v41  ;;  %5368 = vmatprep.subr.bf16.mxu1 %v4999_v31  ;;  %v4587_v41 = vld [vmem:[#allocation6 + $0x2b8] sm:$0xff]  ;;  %v4584_v31 = vld [vmem:[#allocation6 + $0x2a0] sm:$0xff] }
 0xb7e   :  { %5205 = vmatpush1.bf16.msra.mxu0 %v4996_v1  ;;  %5369 = vmatpush1.bf16.msra.mxu1 %v4998_v32  ;;  %v4586_v1 = vld [vmem:[#allocation6 + $0x2b0] sm:$0xff]  ;;  %v4593_v32 = vld [vmem:[#allocation6 + $0x2e8] sm:$0xff] }
 0xb7f   :  { %5206 = vmatprep.subr.bf16.mxu0 %v5005_v17  ;;  %5370 = vmatprep.subr.bf16.mxu1 %v5007_v34  ;;  %v4595_v17 = vld [vmem:[#allocation6 + $0x2f8] sm:$0xff]  ;;  %v4592_v34 = vld [vmem:[#allocation6 + $0x2e0] sm:$0xff] }
 0xb82   :  { %5207 = vmatpush1.bf16.msra.mxu0 %v5004_v45  ;;  %5371 = vmatpush1.bf16.msra.mxu1 %v5006_v46  ;;  %v4594_v45 = vld [vmem:[#allocation6 + $0x2f0] sm:$0xff]  ;;  %v4601_v46 = vld [vmem:[#allocation6 + $0x328] sm:$0xff] }
 0xb83   :  { %5381 = vmatprep.subr.bf16.mxu0 %v4505_v4  ;;  %5545 = vmatprep.subr.bf16.mxu1 %v4507_v47  ;;  %v4603_v4 = vld [vmem:[#allocation6 + $0x338] sm:$0xff]  ;;  %v4600_v47 = vld [vmem:[#allocation6 + $0x320] sm:$0xff] }
 0xb85   :  { %5209 = vmatmul.mubr.bf16.vlgmr.msra.gmra.mrb[28].mxu0 %v8605_v62  ;;  %5373 = vmatmul.mubr.bf16.vlgmr.msra.gmra.mrb[28].mxu1 %v8605_v62 }
 0xb86   :  { %5382 = vmatpush1.bf16.msra.mxu0 %v4504_v48  ;;  %5546 = vmatpush1.bf16.msra.mxu1 %v4506_v49  ;;  %v4602_v48 = vld [vmem:[#allocation6 + $0x330] sm:$0xff]  ;;  %v4609_v49 = vld [vmem:[#allocation6 + $0x368] sm:$0xff] }
 0xb87   :  { %5383 = vmatprep.subr.bf16.mxu0 %v4513_v37  ;;  %5547 = vmatprep.subr.bf16.mxu1 %v4515_v50  ;;  %v4611_v37 = vld [vmem:[#allocation6 + $0x378] sm:$0xff]  ;;  %v4608_v50 = vld [vmem:[#allocation6 + $0x360] sm:$0xff] }
 0xb88   :  { %5413 = vmatprep.mubr.bf16.mxu0 %v8589_v6  ;;  %5577 = vmatprep.mubr.bf16.mxu1 %v8589_v6  ;;  %v4536_v6 = vld [vmem:[#allocation6 + $0x120] sm:$0xff] }
 0xb8a   :  { %5384 = vmatpush1.bf16.msra.mxu0 %v4512_v51  ;;  %5548 = vmatpush1.bf16.msra.mxu1 %v4514_v5  ;;  %v4610_v51 = vld [vmem:[#allocation6 + $0x370] sm:$0xff]  ;;  %v4617_v5 = vld [vmem:[#allocation6 + $0x3a8] sm:$0xff] }
 0xb8b   :  { %5385 = vmatprep.subr.bf16.mxu0 %v4521_v52  ;;  %5549 = vmatprep.subr.bf16.mxu1 %v4523_v53  ;;  %v4619_v52 = vld [vmem:[#allocation6 + $0x3b8] sm:$0xff]  ;;  %v4616_v53 = vld [vmem:[#allocation6 + $0x3a0] sm:$0xff] }
 0xb8e   :  { %5386 = vmatpush1.bf16.msra.mxu0 %v4520_v54  ;;  %5550 = vmatpush1.bf16.msra.mxu1 %v4522_v11  ;;  %v4618_v54 = vld [vmem:[#allocation6 + $0x3b0] sm:$0xff]  ;;  %v4625_v11 = vld [vmem:[#allocation6 + $0x3e8] sm:$0xff] }
 0xb8f   :  { %5387 = vmatprep.subr.bf16.mxu0 %v4529_v55  ;;  %5551 = vmatprep.subr.bf16.mxu1 %v4531_v56  ;;  %v4627_v55 = vld [vmem:[#allocation6 + $0x3f8] sm:$0xff]  ;;  %v4624_v56 = vld [vmem:[#allocation6 + $0x3e0] sm:$0xff] }
 0xb92   :  { %5388 = vmatpush1.bf16.msra.mxu0 %v4528_v18  ;;  %5552 = vmatpush1.bf16.msra.mxu1 %v4530_v35  ;;  %v4626_v18 = vld [vmem:[#allocation6 + $0x3f0] sm:$0xff]  ;;  %v4633_v35 = vld [vmem:[#allocation6 + $0x428] sm:$0xff] }
 0xb93   :  { %5389 = vmatprep.subr.bf16.mxu0 %v4537_v57  ;;  %5553 = vmatprep.subr.bf16.mxu1 %v4539_v63  ;;  %v4635_v57 = vld [vmem:[#allocation6 + $0x438] sm:$0xff]  ;;  %v4632_v63 = vld [vmem:[#allocation6 + $0x420] sm:$0xff] }
 0xb96   :  { %5390 = vmatpush1.bf16.msra.mxu0 %v4536_v6  ;;  %5554 = vmatpush1.bf16.msra.mxu1 %v4538_v58  ;;  %v4634_v6 = vld [vmem:[#allocation6 + $0x430] sm:$0xff]  ;;  %v4641_v58 = vld [vmem:[#allocation6 + $0x468] sm:$0xff] }
 0xb97   :  { %5391 = vmatprep.subr.bf16.mxu0 %v4545_v59  ;;  %5555 = vmatprep.subr.bf16.mxu1 %v4547_v60  ;;  %v4643_v59 = vld [vmem:[#allocation6 + $0x478] sm:$0xff]  ;;  %v4640_v60 = vld [vmem:[#allocation6 + $0x460] sm:$0xff] }
 0xb9a   :  { %5392 = vmatpush1.bf16.msra.mxu0 %v4544_v9  ;;  %5556 = vmatpush1.bf16.msra.mxu1 %v4546_v2  ;;  %v4642_v9 = vld [vmem:[#allocation6 + $0x470] sm:$0xff]  ;;  %v4649_v2 = vld [vmem:[#allocation6 + $0x4a8] sm:$0xff] }
 0xb9b   :  { %5393 = vmatprep.subr.bf16.mxu0 %v4553_v16  ;;  %5557 = vmatprep.subr.bf16.mxu1 %v4555_v61  ;;  %v4651_v16 = vld [vmem:[#allocation6 + $0x4b8] sm:$0xff]  ;;  %v4648_v61 = vld [vmem:[#allocation6 + $0x4a0] sm:$0xff] }
 0xb9e   :  { %5394 = vmatpush1.bf16.msra.mxu0 %v4552_v13  ;;  %5558 = vmatpush1.bf16.msra.mxu1 %v4554_v14  ;;  %v4650_v13 = vld [vmem:[#allocation6 + $0x4b0] sm:$0xff]  ;;  %v4657_v14 = vld [vmem:[#allocation6 + $0x4e8] sm:$0xff] }
 0xb9f   :  { %5395 = vmatprep.subr.bf16.mxu0 %v4561_v12  ;;  %5559 = vmatprep.subr.bf16.mxu1 %v4563_v36  ;;  %v4656_v12 = vld [vmem:[#allocation6 + $0x4e0] sm:$0xff]  ;;  %v4658_v36 = vld [vmem:[#allocation6 + $0x4f0] sm:$0xff] }
 0xba2   :  { %5396 = vmatpush1.bf16.msra.mxu0 %v4560_v24  ;;  %5560 = vmatpush1.bf16.msra.mxu1 %v4562_v0  ;;  %v4665_v24 = vld [vmem:[#allocation6 + $0x528] sm:$0xff]  ;;  %v4667_v0 = vld [vmem:[#allocation6 + $0x538] sm:$0xff] }
 0xba3   :  { %5397 = vmatprep.subr.bf16.mxu0 %v4569_v10  ;;  %5561 = vmatprep.subr.bf16.mxu1 %v4571_v26  ;;  %v4666_v10 = vld [vmem:[#allocation6 + $0x530] sm:$0xff]  ;;  %v4673_v26 = vld [vmem:[#allocation6 + $0x568] sm:$0xff] }
 0xba6   :  { %5398 = vmatpush1.bf16.msra.mxu0 %v4568_v3  ;;  %5562 = vmatpush1.bf16.msra.mxu1 %v4570_v27  ;;  %v4675_v3 = vld [vmem:[#allocation6 + $0x578] sm:$0xff]  ;;  %v4672_v27 = vld [vmem:[#allocation6 + $0x560] sm:$0xff] }
 0xba7   :  { %5399 = vmatprep.subr.bf16.mxu0 %v4577_v28  ;;  %5563 = vmatprep.subr.bf16.mxu1 %v4579_v8  ;;  %v4674_v28 = vld [vmem:[#allocation6 + $0x570] sm:$0xff]  ;;  %v4681_v8 = vld [vmem:[#allocation6 + $0x5a8] sm:$0xff] }
 0xbaa   :  { %5400 = vmatpush1.bf16.msra.mxu0 %v4576_v29  ;;  %5564 = vmatpush1.bf16.msra.mxu1 %v4578_v30  ;;  %v4683_v29 = vld [vmem:[#allocation6 + $0x5b8] sm:$0xff]  ;;  %v4680_v30 = vld [vmem:[#allocation6 + $0x5a0] sm:$0xff] }
 0xbab   :  { %5401 = vmatprep.subr.bf16.mxu0 %v4585_v15  ;;  %5565 = vmatprep.subr.bf16.mxu1 %v4587_v41  ;;  %v4682_v15 = vld [vmem:[#allocation6 + $0x5b0] sm:$0xff]  ;;  %v4689_v41 = vld [vmem:[#allocation6 + $0x5e8] sm:$0xff] }
 0xbae   :  { %5402 = vmatpush1.bf16.msra.mxu0 %v4584_v31  ;;  %5566 = vmatpush1.bf16.msra.mxu1 %v4586_v1  ;;  %v4691_v31 = vld [vmem:[#allocation6 + $0x5f8] sm:$0xff]  ;;  %v4688_v1 = vld [vmem:[#allocation6 + $0x5e0] sm:$0xff] }
 0xbaf   :  { %5403 = vmatprep.subr.bf16.mxu0 %v4593_v32  ;;  %5567 = vmatprep.subr.bf16.mxu1 %v4595_v17  ;;  %v4690_v32 = vld [vmem:[#allocation6 + $0x5f0] sm:$0xff]  ;;  %v4697_v17 = vld [vmem:[#allocation6 + $0x628] sm:$0xff] }
 0xbb2   :  { %5404 = vmatpush1.bf16.msra.mxu0 %v4592_v34  ;;  %5568 = vmatpush1.bf16.msra.mxu1 %v4594_v45  ;;  %v4699_v34 = vld [vmem:[#allocation6 + $0x638] sm:$0xff]  ;;  %v4696_v45 = vld [vmem:[#allocation6 + $0x620] sm:$0xff] }
 0xbb3   :  { %5405 = vmatprep.subr.bf16.mxu0 %v4601_v46  ;;  %5569 = vmatprep.subr.bf16.mxu1 %v4603_v4  ;;  %v4698_v46 = vld [vmem:[#allocation6 + $0x630] sm:$0xff]  ;;  %v4705_v4 = vld [vmem:[#allocation6 + $0x668] sm:$0xff] }
 0xbb6   :  { %5406 = vmatpush1.bf16.msra.mxu0 %v4600_v47  ;;  %5570 = vmatpush1.bf16.msra.mxu1 %v4602_v48  ;;  %v4707_v47 = vld [vmem:[#allocation6 + $0x678] sm:$0xff]  ;;  %v4704_v48 = vld [vmem:[#allocation6 + $0x660] sm:$0xff] }
 0xbb7   :  { %5407 = vmatprep.subr.bf16.mxu0 %v4609_v49  ;;  %5571 = vmatprep.subr.bf16.mxu1 %v4611_v37  ;;  %v4706_v49 = vld [vmem:[#allocation6 + $0x670] sm:$0xff]  ;;  %v4713_v37 = vld [vmem:[#allocation6 + $0x6a8] sm:$0xff] }
 0xbba   :  { %5408 = vmatpush1.bf16.msra.mxu0 %v4608_v50  ;;  %5572 = vmatpush1.bf16.msra.mxu1 %v4610_v51  ;;  %v4715_v50 = vld [vmem:[#allocation6 + $0x6b8] sm:$0xff]  ;;  %v4712_v51 = vld [vmem:[#allocation6 + $0x6a0] sm:$0xff] }
 0xbbb   :  { %5409 = vmatprep.subr.bf16.mxu0 %v4617_v5  ;;  %5573 = vmatprep.subr.bf16.mxu1 %v4619_v52  ;;  %v4714_v5 = vld [vmem:[#allocation6 + $0x6b0] sm:$0xff]  ;;  %v4721_v52 = vld [vmem:[#allocation6 + $0x6e8] sm:$0xff] }
 0xbbe   :  { %5410 = vmatpush1.bf16.msra.mxu0 %v4616_v53  ;;  %5574 = vmatpush1.bf16.msra.mxu1 %v4618_v54  ;;  %v4723_v53 = vld [vmem:[#allocation6 + $0x6f8] sm:$0xff]  ;;  %v4720_v54 = vld [vmem:[#allocation6 + $0x6e0] sm:$0xff] }
 0xbbf   :  { %5411 = vmatprep.subr.bf16.mxu0 %v4625_v11  ;;  %5575 = vmatprep.subr.bf16.mxu1 %v4627_v55  ;;  %v4722_v11 = vld [vmem:[#allocation6 + $0x6f0] sm:$0xff]  ;;  %v4729_v55 = vld [vmem:[#allocation6 + $0x728] sm:$0xff] }
 0xbc2   :  { %5412 = vmatpush1.bf16.msra.mxu0 %v4624_v56  ;;  %5576 = vmatpush1.bf16.msra.mxu1 %v4626_v18  ;;  %v4731_v56 = vld [vmem:[#allocation6 + $0x738] sm:$0xff]  ;;  %v4728_v18 = vld [vmem:[#allocation6 + $0x720] sm:$0xff] }
 0xbc3   :  { %5422 = vmatprep.subr.bf16.mxu0 %v4633_v35  ;;  %5586 = vmatprep.subr.bf16.mxu1 %v4635_v57  ;;  %v4730_v35 = vld [vmem:[#allocation6 + $0x730] sm:$0xff]  ;;  %v4737_v57 = vld [vmem:[#allocation6 + $0x768] sm:$0xff] }
 0xbc5   :  { %5414 = vmatmul.mubr.bf16.vlgmr.msra.gmra.mrb[32].mxu0 %v8585_v21  ;;  %5578 = vmatmul.mubr.bf16.vlgmr.msra.gmra.mrb[32].mxu1 %v8585_v21  ;;  %v4659_v21 = vld [vmem:[#allocation6 + $0x4f8] sm:$0xff] }
 0xbc6   :  { %5423 = vmatpush1.bf16.msra.mxu0 %v4632_v63  ;;  %5587 = vmatpush1.bf16.msra.mxu1 %v4634_v6  ;;  %v4739_v63 = vld [vmem:[#allocation6 + $0x778] sm:$0xff]  ;;  %v4736_v6 = vld [vmem:[#allocation6 + $0x760] sm:$0xff] }
 0xbc7   :  { %5424 = vmatprep.subr.bf16.mxu0 %v4641_v58  ;;  %5588 = vmatprep.subr.bf16.mxu1 %v4643_v59  ;;  %v4738_v58 = vld [vmem:[#allocation6 + $0x770] sm:$0xff]  ;;  %v4745_v59 = vld [vmem:[#allocation6 + $0x7a8] sm:$0xff] }
 0xbc8   :  { %5454 = vmatprep.mubr.bf16.mxu0 %v8591_v42  ;;  %5618 = vmatprep.mubr.bf16.mxu1 %v8591_v42  ;;  %v4664_v42 = vld [vmem:[#allocation6 + $0x520] sm:$0xff] }
 0xbca   :  { %5425 = vmatpush1.bf16.msra.mxu0 %v4640_v60  ;;  %5589 = vmatpush1.bf16.msra.mxu1 %v4642_v9  ;;  %v4747_v60 = vld [vmem:[#allocation6 + $0x7b8] sm:$0xff]  ;;  %v4744_v9 = vld [vmem:[#allocation6 + $0x7a0] sm:$0xff] }
 0xbcb   :  { %5426 = vmatprep.subr.bf16.mxu0 %v4649_v2  ;;  %5590 = vmatprep.subr.bf16.mxu1 %v4651_v16  ;;  %v4746_v2 = vld [vmem:[#allocation6 + $0x7b0] sm:$0xff]  ;;  %v4753_v16 = vld [vmem:[#allocation6 + $0x7e8] sm:$0xff] }
 0xbce   :  { %5427 = vmatpush1.bf16.msra.mxu0 %v4648_v61  ;;  %5591 = vmatpush1.bf16.msra.mxu1 %v4650_v13  ;;  %v4755_v61 = vld [vmem:[#allocation6 + $0x7f8] sm:$0xff]  ;;  %v4752_v13 = vld [vmem:[#allocation6 + $0x7e0] sm:$0xff] }
 0xbcf   :  { %5428 = vmatprep.subr.bf16.mxu0 %v4657_v14  ;;  %5592 = vmatprep.subr.bf16.mxu1 %v4659_v21  ;;  %v4754_v14 = vld [vmem:[#allocation6 + $0x7f0] sm:$0xff]  ;;  %v4761_v21 = vld [vmem:[#allocation6 + $0x828] sm:$0xff] }
 0xbd2   :  { %5429 = vmatpush1.bf16.msra.mxu0 %v4656_v12  ;;  %5593 = vmatpush1.bf16.msra.mxu1 %v4658_v36  ;;  %v4763_v12 = vld [vmem:[#allocation6 + $0x838] sm:$0xff]  ;;  %v4760_v36 = vld [vmem:[#allocation6 + $0x820] sm:$0xff] }
 0xbd3   :  { %5430 = vmatprep.subr.bf16.mxu0 %v4665_v24  ;;  %5594 = vmatprep.subr.bf16.mxu1 %v4667_v0  ;;  %v4762_v24 = vld [vmem:[#allocation6 + $0x830] sm:$0xff]  ;;  %v4769_v0 = vld [vmem:[#allocation6 + $0x868] sm:$0xff] }
 0xbd6   :  { %5431 = vmatpush1.bf16.msra.mxu0 %v4664_v42  ;;  %5595 = vmatpush1.bf16.msra.mxu1 %v4666_v10  ;;  %v4771_v42 = vld [vmem:[#allocation6 + $0x878] sm:$0xff]  ;;  %v4768_v10 = vld [vmem:[#allocation6 + $0x860] sm:$0xff] }
 0xbd7   :  { %5432 = vmatprep.subr.bf16.mxu0 %v4673_v26  ;;  %5596 = vmatprep.subr.bf16.mxu1 %v4675_v3  ;;  %v4770_v26 = vld [vmem:[#allocation6 + $0x870] sm:$0xff]  ;;  %v4777_v3 = vld [vmem:[#allocation6 + $0x8a8] sm:$0xff] }
 0xbda   :  { %5433 = vmatpush1.bf16.msra.mxu0 %v4672_v27  ;;  %5597 = vmatpush1.bf16.msra.mxu1 %v4674_v28  ;;  %v4779_v27 = vld [vmem:[#allocation6 + $0x8b8] sm:$0xff]  ;;  %v4776_v28 = vld [vmem:[#allocation6 + $0x8a0] sm:$0xff] }
 0xbdb   :  { %5434 = vmatprep.subr.bf16.mxu0 %v4681_v8  ;;  %5598 = vmatprep.subr.bf16.mxu1 %v4683_v29  ;;  %v4778_v8 = vld [vmem:[#allocation6 + $0x8b0] sm:$0xff]  ;;  %v4785_v29 = vld [vmem:[#allocation6 + $0x8e8] sm:$0xff] }
 0xbde   :  { %5435 = vmatpush1.bf16.msra.mxu0 %v4680_v30  ;;  %5599 = vmatpush1.bf16.msra.mxu1 %v4682_v15  ;;  %v4784_v30 = vld [vmem:[#allocation6 + $0x8e0] sm:$0xff]  ;;  %v4786_v15 = vld [vmem:[#allocation6 + $0x8f0] sm:$0xff] }
 0xbdf   :  { %5436 = vmatprep.subr.bf16.mxu0 %v4689_v41  ;;  %5600 = vmatprep.subr.bf16.mxu1 %v4691_v31  ;;  %v4793_v41 = vld [vmem:[#allocation6 + $0x928] sm:$0xff]  ;;  %v4795_v31 = vld [vmem:[#allocation6 + $0x938] sm:$0xff] }
 0xbe2   :  { %5437 = vmatpush1.bf16.msra.mxu0 %v4688_v1  ;;  %5601 = vmatpush1.bf16.msra.mxu1 %v4690_v32  ;;  %v4794_v1 = vld [vmem:[#allocation6 + $0x930] sm:$0xff]  ;;  %v4801_v32 = vld [vmem:[#allocation6 + $0x968] sm:$0xff] }
 0xbe3   :  { %5438 = vmatprep.subr.bf16.mxu0 %v4697_v17  ;;  %5602 = vmatprep.subr.bf16.mxu1 %v4699_v34  ;;  %v4803_v17 = vld [vmem:[#allocation6 + $0x978] sm:$0xff]  ;;  %v4800_v34 = vld [vmem:[#allocation6 + $0x960] sm:$0xff] }
 0xbe6   :  { %5439 = vmatpush1.bf16.msra.mxu0 %v4696_v45  ;;  %5603 = vmatpush1.bf16.msra.mxu1 %v4698_v46  ;;  %v4802_v45 = vld [vmem:[#allocation6 + $0x970] sm:$0xff]  ;;  %v4809_v46 = vld [vmem:[#allocation6 + $0x9a8] sm:$0xff] }
 0xbe7   :  { %5440 = vmatprep.subr.bf16.mxu0 %v4705_v4  ;;  %5604 = vmatprep.subr.bf16.mxu1 %v4707_v47  ;;  %v4811_v4 = vld [vmem:[#allocation6 + $0x9b8] sm:$0xff]  ;;  %v4808_v47 = vld [vmem:[#allocation6 + $0x9a0] sm:$0xff] }
 0xbea   :  { %5441 = vmatpush1.bf16.msra.mxu0 %v4704_v48  ;;  %5605 = vmatpush1.bf16.msra.mxu1 %v4706_v49  ;;  %v4810_v48 = vld [vmem:[#allocation6 + $0x9b0] sm:$0xff]  ;;  %v4817_v49 = vld [vmem:[#allocation6 + $0x9e8] sm:$0xff] }
 0xbeb   :  { %5442 = vmatprep.subr.bf16.mxu0 %v4713_v37  ;;  %5606 = vmatprep.subr.bf16.mxu1 %v4715_v50  ;;  %v4819_v37 = vld [vmem:[#allocation6 + $0x9f8] sm:$0xff]  ;;  %v4816_v50 = vld [vmem:[#allocation6 + $0x9e0] sm:$0xff] }
 0xbee   :  { %5443 = vmatpush1.bf16.msra.mxu0 %v4712_v51  ;;  %5607 = vmatpush1.bf16.msra.mxu1 %v4714_v5  ;;  %v4818_v51 = vld [vmem:[#allocation6 + $0x9f0] sm:$0xff]  ;;  %v4825_v5 = vld [vmem:[#allocation6 + $0xa28] sm:$0xff] }
 0xbef   :  { %5444 = vmatprep.subr.bf16.mxu0 %v4721_v52  ;;  %5608 = vmatprep.subr.bf16.mxu1 %v4723_v53  ;;  %v4827_v52 = vld [vmem:[#allocation6 + $0xa38] sm:$0xff]  ;;  %v4824_v53 = vld [vmem:[#allocation6 + $0xa20] sm:$0xff] }
 0xbf2   :  { %5445 = vmatpush1.bf16.msra.mxu0 %v4720_v54  ;;  %5609 = vmatpush1.bf16.msra.mxu1 %v4722_v11  ;;  %v4826_v54 = vld [vmem:[#allocation6 + $0xa30] sm:$0xff]  ;;  %v4833_v11 = vld [vmem:[#allocation6 + $0xa68] sm:$0xff] }
 0xbf3   :  { %5446 = vmatprep.subr.bf16.mxu0 %v4729_v55  ;;  %5610 = vmatprep.subr.bf16.mxu1 %v4731_v56  ;;  %v4835_v55 = vld [vmem:[#allocation6 + $0xa78] sm:$0xff]  ;;  %v4832_v56 = vld [vmem:[#allocation6 + $0xa60] sm:$0xff] }
 0xbf6   :  { %5447 = vmatpush1.bf16.msra.mxu0 %v4728_v18  ;;  %5611 = vmatpush1.bf16.msra.mxu1 %v4730_v35  ;;  %v4834_v18 = vld [vmem:[#allocation6 + $0xa70] sm:$0xff]  ;;  %v4841_v35 = vld [vmem:[#allocation6 + $0xaa8] sm:$0xff] }
 0xbf7   :  { %5448 = vmatprep.subr.bf16.mxu0 %v4737_v57  ;;  %5612 = vmatprep.subr.bf16.mxu1 %v4739_v63  ;;  %v4843_v57 = vld [vmem:[#allocation6 + $0xab8] sm:$0xff]  ;;  %v4840_v63 = vld [vmem:[#allocation6 + $0xaa0] sm:$0xff] }
 0xbfa   :  { %5449 = vmatpush1.bf16.msra.mxu0 %v4736_v6  ;;  %5613 = vmatpush1.bf16.msra.mxu1 %v4738_v58  ;;  %v4842_v6 = vld [vmem:[#allocation6 + $0xab0] sm:$0xff]  ;;  %v4849_v58 = vld [vmem:[#allocation6 + $0xae8] sm:$0xff] }
 0xbfb   :  { %5450 = vmatprep.subr.bf16.mxu0 %v4745_v59  ;;  %5614 = vmatprep.subr.bf16.mxu1 %v4747_v60  ;;  %v4851_v59 = vld [vmem:[#allocation6 + $0xaf8] sm:$0xff]  ;;  %v4848_v60 = vld [vmem:[#allocation6 + $0xae0] sm:$0xff] }
 0xbfe   :  { %5451 = vmatpush1.bf16.msra.mxu0 %v4744_v9  ;;  %5615 = vmatpush1.bf16.msra.mxu1 %v4746_v2  ;;  %v4850_v9 = vld [vmem:[#allocation6 + $0xaf0] sm:$0xff]  ;;  %v4857_v2 = vld [vmem:[#allocation6 + $0xb28] sm:$0xff] }
 0xbff   :  { %5452 = vmatprep.subr.bf16.mxu0 %v4753_v16  ;;  %5616 = vmatprep.subr.bf16.mxu1 %v4755_v61  ;;  %v4859_v16 = vld [vmem:[#allocation6 + $0xb38] sm:$0xff]  ;;  %v4856_v61 = vld [vmem:[#allocation6 + $0xb20] sm:$0xff] }
 0xc02   :  { %5453 = vmatpush1.bf16.msra.mxu0 %v4752_v13  ;;  %5617 = vmatpush1.bf16.msra.mxu1 %v4754_v14  ;;  %v4858_v13 = vld [vmem:[#allocation6 + $0xb30] sm:$0xff]  ;;  %v4865_v14 = vld [vmem:[#allocation6 + $0xb68] sm:$0xff] }
 0xc03   :  { %5463 = vmatprep.subr.bf16.mxu0 %v4761_v21  ;;  %5627 = vmatprep.subr.bf16.mxu1 %v4763_v12  ;;  %v4867_v21 = vld [vmem:[#allocation6 + $0xb78] sm:$0xff]  ;;  %v4864_v12 = vld [vmem:[#allocation6 + $0xb60] sm:$0xff] }
 0xc05   :  { %5455 = vmatmul.mubr.bf16.vlgmr.msra.gmra.mrb[32].mxu0 %v8587_v7  ;;  %5619 = vmatmul.mubr.bf16.vlgmr.msra.gmra.mrb[32].mxu1 %v8587_v7  ;;  %v4787_v7 = vld [vmem:[#allocation6 + $0x8f8] sm:$0xff] }
 0xc06   :  { %5464 = vmatpush1.bf16.msra.mxu0 %v4760_v36  ;;  %5628 = vmatpush1.bf16.msra.mxu1 %v4762_v24  ;;  %v4866_v36 = vld [vmem:[#allocation6 + $0xb70] sm:$0xff]  ;;  %v4873_v24 = vld [vmem:[#allocation6 + $0xba8] sm:$0xff] }
 0xc07   :  { %5465 = vmatprep.subr.bf16.mxu0 %v4769_v0  ;;  %5629 = vmatprep.subr.bf16.mxu1 %v4771_v42  ;;  %v4875_v0 = vld [vmem:[#allocation6 + $0xbb8] sm:$0xff]  ;;  %v4872_v42 = vld [vmem:[#allocation6 + $0xba0] sm:$0xff] }
 0xc08   :  { %5495 = vmatprep.mubr.bf16.mxu0 %v8607_v33  ;;  %5659 = vmatprep.mubr.bf16.mxu1 %v8607_v33  ;;  %v4792_v33 = vld [vmem:[#allocation6 + $0x920] sm:$0xff] }
 0xc0a   :  { %5466 = vmatpush1.bf16.msra.mxu0 %v4768_v10  ;;  %5630 = vmatpush1.bf16.msra.mxu1 %v4770_v26  ;;  %v4874_v10 = vld [vmem:[#allocation6 + $0xbb0] sm:$0xff]  ;;  %v4881_v26 = vld [vmem:[#allocation6 + $0xbe8] sm:$0xff] }
 0xc0b   :  { %5467 = vmatprep.subr.bf16.mxu0 %v4777_v3  ;;  %5631 = vmatprep.subr.bf16.mxu1 %v4779_v27  ;;  %v4883_v3 = vld [vmem:[#allocation6 + $0xbf8] sm:$0xff]  ;;  %v4880_v27 = vld [vmem:[#allocation6 + $0xbe0] sm:$0xff] }
 0xc0e   :  { %5468 = vmatpush1.bf16.msra.mxu0 %v4776_v28  ;;  %5632 = vmatpush1.bf16.msra.mxu1 %v4778_v8  ;;  %v4882_v28 = vld [vmem:[#allocation6 + $0xbf0] sm:$0xff]  ;;  %v4889_v8 = vld [vmem:[#allocation6 + $0xc28] sm:$0xff] }
 0xc0f   :  { %5469 = vmatprep.subr.bf16.mxu0 %v4785_v29  ;;  %5633 = vmatprep.subr.bf16.mxu1 %v4787_v7  ;;  %v4891_v29 = vld [vmem:[#allocation6 + $0xc38] sm:$0xff]  ;;  %v4888_v7 = vld [vmem:[#allocation6 + $0xc20] sm:$0xff] }
 0xc12   :  { %5470 = vmatpush1.bf16.msra.mxu0 %v4784_v30  ;;  %5634 = vmatpush1.bf16.msra.mxu1 %v4786_v15  ;;  %v4890_v30 = vld [vmem:[#allocation6 + $0xc30] sm:$0xff]  ;;  %v4897_v15 = vld [vmem:[#allocation6 + $0xc68] sm:$0xff] }
 0xc13   :  { %5471 = vmatprep.subr.bf16.mxu0 %v4793_v41  ;;  %5635 = vmatprep.subr.bf16.mxu1 %v4795_v31  ;;  %v4899_v41 = vld [vmem:[#allocation6 + $0xc78] sm:$0xff]  ;;  %v4896_v31 = vld [vmem:[#allocation6 + $0xc60] sm:$0xff] }
 0xc16   :  { %5472 = vmatpush1.bf16.msra.mxu0 %v4792_v33  ;;  %5636 = vmatpush1.bf16.msra.mxu1 %v4794_v1  ;;  %v4898_v33 = vld [vmem:[#allocation6 + $0xc70] sm:$0xff]  ;;  %v4905_v1 = vld [vmem:[#allocation6 + $0xca8] sm:$0xff] }
 0xc17   :  { %5473 = vmatprep.subr.bf16.mxu0 %v4801_v32  ;;  %5637 = vmatprep.subr.bf16.mxu1 %v4803_v17  ;;  %v4907_v32 = vld [vmem:[#allocation6 + $0xcb8] sm:$0xff]  ;;  %v4904_v17 = vld [vmem:[#allocation6 + $0xca0] sm:$0xff] }
 0xc1a   :  { %5474 = vmatpush1.bf16.msra.mxu0 %v4800_v34  ;;  %5638 = vmatpush1.bf16.msra.mxu1 %v4802_v45  ;;  %v4906_v34 = vld [vmem:[#allocation6 + $0xcb0] sm:$0xff]  ;;  %v4913_v45 = vld [vmem:[#allocation6 + $0xce8] sm:$0xff] }
 0xc1b   :  { %5475 = vmatprep.subr.bf16.mxu0 %v4809_v46  ;;  %5639 = vmatprep.subr.bf16.mxu1 %v4811_v4  ;;  %v4912_v46 = vld [vmem:[#allocation6 + $0xce0] sm:$0xff]  ;;  %v4914_v4 = vld [vmem:[#allocation6 + $0xcf0] sm:$0xff] }
 0xc1e   :  { %5476 = vmatpush1.bf16.msra.mxu0 %v4808_v47  ;;  %5640 = vmatpush1.bf16.msra.mxu1 %v4810_v48  ;;  %v4921_v47 = vld [vmem:[#allocation6 + $0xd28] sm:$0xff]  ;;  %v4923_v48 = vld [vmem:[#allocation6 + $0xd38] sm:$0xff] }
 0xc1f   :  { %5477 = vmatprep.subr.bf16.mxu0 %v4817_v49  ;;  %5641 = vmatprep.subr.bf16.mxu1 %v4819_v37  ;;  %v8641_v49 = vld [vmem:[#allocation13 + $0x1c] sm:$0xff] }
 0xc20   :  { %v4922_v37 = vld [vmem:[#allocation6 + $0xd30] sm:$0xff] }
 0xc22   :  { %5478 = vmatpush1.bf16.msra.mxu0 %v4816_v50  ;;  %5642 = vmatpush1.bf16.msra.mxu1 %v4818_v51  ;;  %v4929_v50 = vld [vmem:[#allocation6 + $0xd68] sm:$0xff]  ;;  %v4931_v51 = vld [vmem:[#allocation6 + $0xd78] sm:$0xff] }
 0xc23   :  { %5479 = vmatprep.subr.bf16.mxu0 %v4825_v5  ;;  %5643 = vmatprep.subr.bf16.mxu1 %v4827_v52  ;;  %v5016_v5 = vrot.slane %v8641_v49, %v8404_v19  ;;  %v5024_v52 = vrot.slane %v8641_v49, %v8407_v20 }
 0xc26   :  { %5480 = vmatpush1.bf16.msra.mxu0 %v4824_v53  ;;  %5644 = vmatpush1.bf16.msra.mxu1 %v4826_v54  ;;  %v5020_v53 = vrot.slane %v8641_v49, %v8410_v22  ;;  %v5028_v54 = vrot.slane %v8641_v49, %v8413_v23 }
 0xc27   :  { %5481 = vmatprep.subr.bf16.mxu0 %v4833_v11  ;;  %5645 = vmatprep.subr.bf16.mxu1 %v4835_v55  ;;  %v4928_v11 = vld [vmem:[#allocation6 + $0xd60] sm:$0xff]  ;;  %v4930_v55 = vld [vmem:[#allocation6 + $0xd70] sm:$0xff] }
 0xc2a   :  { %5482 = vmatpush1.bf16.msra.mxu0 %v4832_v56  ;;  %5646 = vmatpush1.bf16.msra.mxu1 %v4834_v18 }
 0xc2b   :  { %5483 = vmatprep.subr.bf16.mxu0 %v4841_v35  ;;  %5647 = vmatprep.subr.bf16.mxu1 %v4843_v57  ;;  %v4937_v35 = vld [vmem:[#allocation6 + $0xda8] sm:$0xff]  ;;  %v4939_v57 = vld [vmem:[#allocation6 + $0xdb8] sm:$0xff] }
 0xc2e   :  { %5484 = vmatpush1.bf16.msra.mxu0 %v4840_v63  ;;  %5648 = vmatpush1.bf16.msra.mxu1 %v4842_v6 }
 0xc2f   :  { %5485 = vmatprep.subr.bf16.mxu0 %v4849_v58  ;;  %5649 = vmatprep.subr.bf16.mxu1 %v4851_v59 }
 0xc32   :  { %5486 = vmatpush1.bf16.msra.mxu0 %v4848_v60  ;;  %5650 = vmatpush1.bf16.msra.mxu1 %v4850_v9 }
 0xc33   :  { %5487 = vmatprep.subr.bf16.mxu0 %v4857_v2  ;;  %5651 = vmatprep.subr.bf16.mxu1 %v4859_v16 }
 0xc36   :  { %5488 = vmatpush1.bf16.msra.mxu0 %v4856_v61  ;;  %5652 = vmatpush1.bf16.msra.mxu1 %v4858_v13 }
 0xc37   :  { %5489 = vmatprep.subr.bf16.mxu0 %v4865_v14  ;;  %5653 = vmatprep.subr.bf16.mxu1 %v4867_v21 }
 0xc3a   :  { %5490 = vmatpush1.bf16.msra.mxu0 %v4864_v12  ;;  %5654 = vmatpush1.bf16.msra.mxu1 %v4866_v36  ;;  %v4936_v12 = vld [vmem:[#allocation6 + $0xda0] sm:$0xff]  ;;  %v4938_v36 = vld [vmem:[#allocation6 + $0xdb0] sm:$0xff] }
 0xc3b   :  { %5491 = vmatprep.subr.bf16.mxu0 %v4873_v24  ;;  %5655 = vmatprep.subr.bf16.mxu1 %v4875_v0 }
 0xc3e   :  { %5492 = vmatpush1.bf16.msra.mxu0 %v4872_v42  ;;  %5656 = vmatpush1.bf16.msra.mxu1 %v4874_v10  ;;  %v4945_v42 = vld [vmem:[#allocation6 + $0xde8] sm:$0xff]  ;;  %v4947_v10 = vld [vmem:[#allocation6 + $0xdf8] sm:$0xff] }
 0xc3f   :  { %5493 = vmatprep.subr.bf16.mxu0 %v4881_v26  ;;  %5657 = vmatprep.subr.bf16.mxu1 %v4883_v3 }
 0xc42   :  { %5494 = vmatpush1.bf16.msra.mxu0 %v4880_v27  ;;  %5658 = vmatpush1.bf16.msra.mxu1 %v4882_v28 }
 0xc43   :  { %5504 = vmatprep.subr.bf16.mxu0 %v4889_v8  ;;  %5668 = vmatprep.subr.bf16.mxu1 %v4891_v29  ;;  %v4944_v8 = vld [vmem:[#allocation6 + $0xde0] sm:$0xff]  ;;  %v4946_v29 = vld [vmem:[#allocation6 + $0xdf0] sm:$0xff] }
 0xc45   :  { %5496 = vmatmul.mubr.bf16.vlgmr.msra.gmra.mrb[32].mxu0 %v8603_v40  ;;  %5660 = vmatmul.mubr.bf16.vlgmr.msra.gmra.mrb[32].mxu1 %v8603_v40  ;;  %v4915_v40 = vld [vmem:[#allocation6 + $0xcf8] sm:$0xff] }
 0xc46   :  { %5505 = vmatpush1.bf16.msra.mxu0 %v4888_v7  ;;  %5669 = vmatpush1.bf16.msra.mxu1 %v4890_v30  ;;  %v4953_v7 = vld [vmem:[#allocation6 + $0xe28] sm:$0xff]  ;;  %v4955_v30 = vld [vmem:[#allocation6 + $0xe38] sm:$0xff] }
 0xc47   :  { %5506 = vmatprep.subr.bf16.mxu0 %v4897_v15  ;;  %5670 = vmatprep.subr.bf16.mxu1 %v4899_v41  ;;  %v4952_v15 = vld [vmem:[#allocation6 + $0xe20] sm:$0xff]  ;;  %v4954_v41 = vld [vmem:[#allocation6 + $0xe30] sm:$0xff] }
 0xc48   :  { %5536 = vmatprep.mubr.bf16.mxu0 %v8609_v25  ;;  %5700 = vmatprep.mubr.bf16.mxu1 %v8609_v25  ;;  %v4920_v25 = vld [vmem:[#allocation6 + $0xd20] sm:$0xff] }
 0xc4a   :  { %5507 = vmatpush1.bf16.msra.mxu0 %v4896_v31  ;;  %5671 = vmatpush1.bf16.msra.mxu1 %v4898_v33  ;;  %v4961_v31 = vld [vmem:[#allocation6 + $0xe68] sm:$0xff]  ;;  %v4963_v33 = vld [vmem:[#allocation6 + $0xe78] sm:$0xff] }
 0xc4b   :  { %5508 = vmatprep.subr.bf16.mxu0 %v4905_v1  ;;  %5672 = vmatprep.subr.bf16.mxu1 %v4907_v32  ;;  %v4960_v1 = vld [vmem:[#allocation6 + $0xe60] sm:$0xff]  ;;  %v4962_v32 = vld [vmem:[#allocation6 + $0xe70] sm:$0xff] }
 0xc4e   :  { %5509 = vmatpush1.bf16.msra.mxu0 %v4904_v17  ;;  %5673 = vmatpush1.bf16.msra.mxu1 %v4906_v34  ;;  %v4969_v17 = vld [vmem:[#allocation6 + $0xea8] sm:$0xff]  ;;  %v4971_v34 = vld [vmem:[#allocation6 + $0xeb8] sm:$0xff] }
 0xc4f   :  { %5510 = vmatprep.subr.bf16.mxu0 %v4913_v45  ;;  %5674 = vmatprep.subr.bf16.mxu1 %v4915_v40  ;;  %v4968_v45 = vld [vmem:[#allocation6 + $0xea0] sm:$0xff]  ;;  %v4970_v40 = vld [vmem:[#allocation6 + $0xeb0] sm:$0xff] }
 0xc52   :  { %5511 = vmatpush1.bf16.msra.mxu0 %v4912_v46  ;;  %5675 = vmatpush1.bf16.msra.mxu1 %v4914_v4  ;;  %v4977_v46 = vld [vmem:[#allocation6 + $0xee8] sm:$0xff]  ;;  %v4979_v4 = vld [vmem:[#allocation6 + $0xef8] sm:$0xff] }
 0xc53   :  { %5512 = vmatprep.subr.bf16.mxu0 %v4921_v47  ;;  %5676 = vmatprep.subr.bf16.mxu1 %v4923_v48  ;;  %v4976_v47 = vld [vmem:[#allocation6 + $0xee0] sm:$0xff]  ;;  %v4978_v48 = vld [vmem:[#allocation6 + $0xef0] sm:$0xff] }
 0xc56   :  { %5513 = vmatpush1.bf16.msra.mxu0 %v4920_v25  ;;  %5677 = vmatpush1.bf16.msra.mxu1 %v4922_v37  ;;  %v4985_v25 = vld [vmem:[#allocation6 + $0xf28] sm:$0xff]  ;;  %v4987_v37 = vld [vmem:[#allocation6 + $0xf38] sm:$0xff] }
 0xc57   :  { %5514 = vmatprep.subr.bf16.mxu0 %v4929_v50  ;;  %5678 = vmatprep.subr.bf16.mxu1 %v4931_v51  ;;  %v4984_v50 = vld [vmem:[#allocation6 + $0xf20] sm:$0xff]  ;;  %v4986_v51 = vld [vmem:[#allocation6 + $0xf30] sm:$0xff] }
 0xc58   :  { %v5210_v56 = vpop.f32.mrb[28].mxu0  ;;  %v5374_v18 = vpop.f32.mrb[28].mxu1 }
 0xc59   :  { %v7749_v63 = vadd.f32 %v5210_v56, %v5016_v5  ;;  %v7751_v6 = vadd.f32 %v5374_v18, %v5024_v52  ;;  %v5212_v58 = vpop.f32.mrb[29].mxu0  ;;  %v5376_v59 = vpop.f32.mrb[29].mxu1  ;;  %v4993_v5 = vld [vmem:[#allocation6 + $0xf68] sm:$0xff]  ;;  %v4995_v52 = vld [vmem:[#allocation6 + $0xf78] sm:$0xff]  ;;  %v5000_v56 = vld [vmem:[#allocation6 + $0xfa0] sm:$0xff] }
 0xc5a   :  { %v7750_v60 = vadd.f32 %v5212_v58, %v5020_v53  ;;  %v7752_v9 = vadd.f32 %v5376_v59, %v5028_v54  ;;  %v5214_v2 = vpop.f32.mrb[30].mxu0  ;;  %v5378_v16 = vpop.f32.mrb[30].mxu1  ;;  %5515 = vmatpush1.bf16.msra.mxu0 %v4928_v11  ;;  %5679 = vmatpush1.bf16.msra.mxu1 %v4930_v55  ;;  %v4992_v53 = vld [vmem:[#allocation6 + $0xf60] sm:$0xff]  ;;  %v4994_v54 = vld [vmem:[#allocation6 + $0xf70] sm:$0xff]  ;;  %v5001_v11 = vld [vmem:[#allocation6 + $0xfa8] sm:$0xff]  ;;  %v5032_v58 = vrot.slane %v8641_v49, %v8456_v38 }
 0xc5b   :  { %v5709_v61 = vmax.f32 %v7749_v63, 0.0  ;;  %v5711_v13 = vmax.f32 %v7751_v6, 0.0  ;;  %v5215_v14 = vpop.f32.mrb[31].mxu0  ;;  %v5379_v21 = vpop.f32.mrb[31].mxu1  ;;  %5516 = vmatprep.subr.bf16.mxu0 %v4937_v35  ;;  %5680 = vmatprep.subr.bf16.mxu1 %v4939_v57  ;;  %v5003_v55 = vld [vmem:[#allocation6 + $0xfb8] sm:$0xff]  ;;  %v5002_v18 = vld [vmem:[#allocation6 + $0xfb0] sm:$0xff]  ;;  %v5040_v59 = vrot.slane %v8641_v49, %v8459_v39 }
 0xc5c   :  { %v5710_v24 = vmax.f32 %v7750_v60, 0.0  ;;  %v5712_v0 = vmax.f32 %v7752_v9, 0.0  ;;  %v5009_v35 = vld [vmem:[#allocation6 + $0xfe8] sm:$0xff]  ;;  %v5011_v57 = vld [vmem:[#allocation6 + $0xff8] sm:$0xff]  ;;  %v5008_v63 = vld [vmem:[#allocation6 + $0xfe0] sm:$0xff]  ;;  %v5036_v60 = vrot.slane %v8641_v49, %v8462_v43  ;;  %v5044_v9 = vrot.slane %v8641_v49, %v8465_v44 }
 0xc5d   :  { %v8651_v26 = vpack.c.bf16 %v5709_v61, %v5709_v61  ;;  %v8653_v3 = vpack.c.bf16 %v5711_v13, %v5711_v13  ;;  %v5010_v6 = vld [vmem:[#allocation6 + $0xff0] sm:$0xff] }
 0xc5e   :  { %v8655_v27 = vpack.c.bf16 %v5710_v24, %v5710_v24  ;;  %v8657_v28 = vpack.c.bf16 %v5712_v0, %v5712_v0  ;;  %5517 = vmatpush1.bf16.msra.mxu0 %v4936_v12  ;;  %5681 = vmatpush1.bf16.msra.mxu1 %v4938_v36 }
 0xc5f   :  { %5518 = vmatprep.subr.bf16.mxu0 %v4945_v42  ;;  %5682 = vmatprep.subr.bf16.mxu1 %v4947_v10 }
 0xc62   :  { %5519 = vmatpush1.bf16.msra.mxu0 %v4944_v8  ;;  %5683 = vmatpush1.bf16.msra.mxu1 %v4946_v29 }
 0xc63   :  { %5520 = vmatprep.subr.bf16.mxu0 %v4953_v7  ;;  %5684 = vmatprep.subr.bf16.mxu1 %v4955_v30 }
 0xc66   :  { %5521 = vmatpush1.bf16.msra.mxu0 %v4952_v15  ;;  %5685 = vmatpush1.bf16.msra.mxu1 %v4954_v41 }
 0xc67   :  { %5522 = vmatprep.subr.bf16.mxu0 %v4961_v31  ;;  %5686 = vmatprep.subr.bf16.mxu1 %v4963_v33 }
 0xc6a   :  { %5523 = vmatpush1.bf16.msra.mxu0 %v4960_v1  ;;  %5687 = vmatpush1.bf16.msra.mxu1 %v4962_v32 }
 0xc6b   :  { %5524 = vmatprep.subr.bf16.mxu0 %v4969_v17  ;;  %5688 = vmatprep.subr.bf16.mxu1 %v4971_v34 }
 0xc6e   :  { %5525 = vmatpush1.bf16.msra.mxu0 %v4968_v45  ;;  %5689 = vmatpush1.bf16.msra.mxu1 %v4970_v40 }
 0xc6f   :  { %5526 = vmatprep.subr.bf16.mxu0 %v4977_v46  ;;  %5690 = vmatprep.subr.bf16.mxu1 %v4979_v4 }
 0xc72   :  { %5527 = vmatpush1.bf16.msra.mxu0 %v4976_v47  ;;  %5691 = vmatpush1.bf16.msra.mxu1 %v4978_v48 }
 0xc73   :  { %5528 = vmatprep.subr.bf16.mxu0 %v4985_v25  ;;  %5692 = vmatprep.subr.bf16.mxu1 %v4987_v37 }
 0xc76   :  { %5529 = vmatpush1.bf16.msra.mxu0 %v4984_v50  ;;  %5693 = vmatpush1.bf16.msra.mxu1 %v4986_v51 }
 0xc77   :  { %5530 = vmatprep.subr.bf16.mxu0 %v4993_v5  ;;  %5694 = vmatprep.subr.bf16.mxu1 %v4995_v52 }
 0xc7a   :  { %5531 = vmatpush1.bf16.msra.mxu0 %v4992_v53  ;;  %5695 = vmatpush1.bf16.msra.mxu1 %v4994_v54 }
 0xc7b   :  { %5532 = vmatprep.subr.bf16.mxu0 %v5001_v11  ;;  %5696 = vmatprep.subr.bf16.mxu1 %v5003_v55 }
 0xc7e   :  { %5533 = vmatpush1.bf16.msra.mxu0 %v5000_v56  ;;  %5697 = vmatpush1.bf16.msra.mxu1 %v5002_v18 }
 0xc7f   :  { %5534 = vmatprep.subr.bf16.mxu0 %v5009_v35  ;;  %5698 = vmatprep.subr.bf16.mxu1 %v5011_v57 }
 0xc82   :  { %5535 = vmatpush1.bf16.msra.mxu0 %v5008_v63  ;;  %5699 = vmatpush1.bf16.msra.mxu1 %v5010_v6 }
 0xc85   :  { %5537 = vmatmul.mubr.bf16.vlgmr.msra.gmra.mrb[32].mxu0 %v8605_v62  ;;  %5701 = vmatmul.mubr.bf16.vlgmr.msra.gmra.mrb[32].mxu1 %v8605_v62 }
 0xd58   :  { %v5538_v2 = vpop.f32.mrb[32].mxu0  ;;  %v5702_v16 = vpop.f32.mrb[32].mxu1 }
 0xd59   :  { %v7753_v61 = vadd.f32 %v5538_v2, %v5032_v58  ;;  %v7755_v13 = vadd.f32 %v5702_v16, %v5040_v59  ;;  %v5540_v14 = vpop.f32.mrb[33].mxu0  ;;  %v5704_v21 = vpop.f32.mrb[33].mxu1 }
 0xd5a   :  { %v7754_v12 = vadd.f32 %v5540_v14, %v5036_v60  ;;  %v7756_v62 = vadd.f32 %v5704_v21, %v5044_v9  ;;  %v5542_v36 = vpop.f32.mrb[34].mxu0  ;;  %v5706_v24 = vpop.f32.mrb[34].mxu1 }
 0xd5b   :  { %v5713_v0 = vmax.f32 %v7753_v61, 0.0  ;;  %v5715_v42 = vmax.f32 %v7755_v13, 0.0  ;;  %v5543_v10 = vpop.f32.mrb[35].mxu0  ;;  %v5707_v8 = vpop.f32.mrb[35].mxu1 }
 0xd5c   :  { %v5714_v29 = vmax.f32 %v7754_v12, 0.0  ;;  %v5716_v7 = vmax.f32 %v7756_v62, 0.0 }
 0xd5d   :  { %v8669_v30 = vpack.c.bf16 %v5713_v0, %v5713_v0  ;;  %v8671_v15 = vpack.c.bf16 %v5715_v42, %v5715_v42 }
 0xd5e   :  { %v8673_v49 = vpack.c.bf16 %v5714_v29, %v5714_v29  ;;  %v8675_v41 = vpack.c.bf16 %v5716_v7, %v5716_v7 }
 0xd5f   :  { %8156 = dma.done.wait [#allocation9 + $0x5], 32768 }
 0xd60   :  { %8157 = vsyncadd [#allocation9 + $0x5], 4294934528  ;;  %6043 = vmatprep.mubr.bf16.mxu0 %v8655_v27  ;;  %6207 = vmatprep.mubr.bf16.mxu1 %v8655_v27  ;;  %v5735_v31 = vld [vmem:[#allocation7 + $0x8] sm:$0xff]  ;;  %v5737_v33 = vld [vmem:[#allocation7 + $0x18] sm:$0xff] }
 0xd61   :  { %v5734_v1 = vld [vmem:[#allocation7] sm:$0xff]  ;;  %6011 = vmatprep.subr.bf16.mxu0 %v5735_v31  ;;  %6175 = vmatprep.subr.bf16.mxu1 %v5737_v33  ;;  %v5736_v32 = vld [vmem:[#allocation7 + $0x10] sm:$0xff]  ;;  %v5739_v17 = vld [vmem:[#allocation7 + $0x28] sm:$0xff] }
 0xd62   :  { %v5741_v34 = vld [vmem:[#allocation7 + $0x38] sm:$0xff]  ;;  %6012 = vmatpush1.bf16.msra.mxu0 %v5734_v1  ;;  %6176 = vmatpush1.bf16.msra.mxu1 %v5736_v32  ;;  %v5738_v45 = vld [vmem:[#allocation7 + $0x20] sm:$0xff]  ;;  %v5740_v40 = vld [vmem:[#allocation7 + $0x30] sm:$0xff] }
 0xd63   :  { %6013 = vmatprep.subr.bf16.mxu0 %v5739_v17  ;;  %6177 = vmatprep.subr.bf16.mxu1 %v5741_v34  ;;  %v5743_v46 = vld [vmem:[#allocation7 + $0x48] sm:$0xff]  ;;  %v5745_v4 = vld [vmem:[#allocation7 + $0x58] sm:$0xff]  ;;  %v5742_v27 = vld [vmem:[#allocation7 + $0x40] sm:$0xff] }
 0xd64   :  { %v5744_v47 = vld [vmem:[#allocation7 + $0x50] sm:$0xff]  ;;  %v5747_v48 = vld [vmem:[#allocation7 + $0x68] sm:$0xff]  ;;  %v5749_v25 = vld [vmem:[#allocation7 + $0x78] sm:$0xff] }
 0xd65   :  { %v5746_v37 = vld [vmem:[#allocation7 + $0x60] sm:$0xff]  ;;  %v5748_v50 = vld [vmem:[#allocation7 + $0x70] sm:$0xff]  ;;  %v5751_v51 = vld [vmem:[#allocation7 + $0x88] sm:$0xff] }
 0xd66   :  { %6014 = vmatpush1.bf16.msra.mxu0 %v5738_v45  ;;  %6178 = vmatpush1.bf16.msra.mxu1 %v5740_v40  ;;  %v5753_v5 = vld [vmem:[#allocation7 + $0x98] sm:$0xff]  ;;  %v5750_v52 = vld [vmem:[#allocation7 + $0x80] sm:$0xff]  ;;  %v5752_v53 = vld [vmem:[#allocation7 + $0x90] sm:$0xff] }
 0xd67   :  { %6015 = vmatprep.subr.bf16.mxu0 %v5743_v46  ;;  %6179 = vmatprep.subr.bf16.mxu1 %v5745_v4  ;;  %v5755_v54 = vld [vmem:[#allocation7 + $0xa8] sm:$0xff]  ;;  %v5757_v11 = vld [vmem:[#allocation7 + $0xb8] sm:$0xff]  ;;  %v5754_v55 = vld [vmem:[#allocation7 + $0xa0] sm:$0xff] }
 0xd68   :  { %v5756_v56 = vld [vmem:[#allocation7 + $0xb0] sm:$0xff]  ;;  %v5759_v18 = vld [vmem:[#allocation7 + $0xc8] sm:$0xff]  ;;  %v5761_v35 = vld [vmem:[#allocation7 + $0xd8] sm:$0xff] }
 0xd69   :  { %v5758_v57 = vld [vmem:[#allocation7 + $0xc0] sm:$0xff]  ;;  %v5760_v63 = vld [vmem:[#allocation7 + $0xd0] sm:$0xff]  ;;  %v5763_v6 = vld [vmem:[#allocation7 + $0xe8] sm:$0xff] }
 0xd6a   :  { %6016 = vmatpush1.bf16.msra.mxu0 %v5742_v27  ;;  %6180 = vmatpush1.bf16.msra.mxu1 %v5744_v47  ;;  %v5765_v58 = vld [vmem:[#allocation7 + $0xf8] sm:$0xff]  ;;  %v5762_v59 = vld [vmem:[#allocation7 + $0xe0] sm:$0xff]  ;;  %v5764_v60 = vld [vmem:[#allocation7 + $0xf0] sm:$0xff] }
 0xd6b   :  { %6017 = vmatprep.subr.bf16.mxu0 %v5747_v48  ;;  %6181 = vmatprep.subr.bf16.mxu1 %v5749_v25  ;;  %v5767_v9 = vld [vmem:[#allocation7 + $0x108] sm:$0xff]  ;;  %v5769_v2 = vld [vmem:[#allocation7 + $0x118] sm:$0xff]  ;;  %v5766_v16 = vld [vmem:[#allocation7 + $0x100] sm:$0xff] }
 0xd6c   :  { %v5768_v61 = vld [vmem:[#allocation7 + $0x110] sm:$0xff]  ;;  %v5771_v13 = vld [vmem:[#allocation7 + $0x128] sm:$0xff]  ;;  %v5773_v14 = vld [vmem:[#allocation7 + $0x138] sm:$0xff] }
 0xd6d   :  { %v5770_v21 = vld [vmem:[#allocation7 + $0x120] sm:$0xff]  ;;  %v5772_v12 = vld [vmem:[#allocation7 + $0x130] sm:$0xff]  ;;  %v5775_v62 = vld [vmem:[#allocation7 + $0x148] sm:$0xff] }
 0xd6e   :  { %6018 = vmatpush1.bf16.msra.mxu0 %v5746_v37  ;;  %6182 = vmatpush1.bf16.msra.mxu1 %v5748_v50  ;;  %v5777_v36 = vld [vmem:[#allocation7 + $0x158] sm:$0xff]  ;;  %v5774_v24 = vld [vmem:[#allocation7 + $0x140] sm:$0xff]  ;;  %v5776_v0 = vld [vmem:[#allocation7 + $0x150] sm:$0xff] }
 0xd6f   :  { %6019 = vmatprep.subr.bf16.mxu0 %v5751_v51  ;;  %6183 = vmatprep.subr.bf16.mxu1 %v5753_v5  ;;  %v5779_v42 = vld [vmem:[#allocation7 + $0x168] sm:$0xff]  ;;  %v5781_v10 = vld [vmem:[#allocation7 + $0x178] sm:$0xff]  ;;  %v5778_v8 = vld [vmem:[#allocation7 + $0x160] sm:$0xff] }
 0xd70   :  { %v5780_v29 = vld [vmem:[#allocation7 + $0x170] sm:$0xff]  ;;  %v5783_v7 = vld [vmem:[#allocation7 + $0x188] sm:$0xff]  ;;  %v5785_v31 = vld [vmem:[#allocation7 + $0x198] sm:$0xff] }
 0xd71   :  { %v5782_v33 = vld [vmem:[#allocation7 + $0x180] sm:$0xff]  ;;  %v5784_v1 = vld [vmem:[#allocation7 + $0x190] sm:$0xff]  ;;  %v5787_v32 = vld [vmem:[#allocation7 + $0x1a8] sm:$0xff] }
 0xd72   :  { %6020 = vmatpush1.bf16.msra.mxu0 %v5750_v52  ;;  %6184 = vmatpush1.bf16.msra.mxu1 %v5752_v53  ;;  %v5789_v17 = vld [vmem:[#allocation7 + $0x1b8] sm:$0xff]  ;;  %v5786_v34 = vld [vmem:[#allocation7 + $0x1a0] sm:$0xff]  ;;  %v5788_v45 = vld [vmem:[#allocation7 + $0x1b0] sm:$0xff] }
 0xd73   :  { %6021 = vmatprep.subr.bf16.mxu0 %v5755_v54  ;;  %6185 = vmatprep.subr.bf16.mxu1 %v5757_v11  ;;  %v5791_v40 = vld [vmem:[#allocation7 + $0x1c8] sm:$0xff]  ;;  %v5793_v46 = vld [vmem:[#allocation7 + $0x1d8] sm:$0xff]  ;;  %v5790_v4 = vld [vmem:[#allocation7 + $0x1c0] sm:$0xff] }
 0xd74   :  { %v5792_v27 = vld [vmem:[#allocation7 + $0x1d0] sm:$0xff]  ;;  %v5795_v47 = vld [vmem:[#allocation7 + $0x1e8] sm:$0xff]  ;;  %v5797_v48 = vld [vmem:[#allocation7 + $0x1f8] sm:$0xff] }
 0xd75   :  { %v5794_v25 = vld [vmem:[#allocation7 + $0x1e0] sm:$0xff]  ;;  %v5796_v37 = vld [vmem:[#allocation7 + $0x1f0] sm:$0xff]  ;;  %v5799_v50 = vld [vmem:[#allocation7 + $0x208] sm:$0xff] }
 0xd76   :  { %6022 = vmatpush1.bf16.msra.mxu0 %v5754_v55  ;;  %6186 = vmatpush1.bf16.msra.mxu1 %v5756_v56  ;;  %v5801_v51 = vld [vmem:[#allocation7 + $0x218] sm:$0xff]  ;;  %v5798_v5 = vld [vmem:[#allocation7 + $0x200] sm:$0xff]  ;;  %v5800_v52 = vld [vmem:[#allocation7 + $0x210] sm:$0xff] }
 0xd77   :  { %6023 = vmatprep.subr.bf16.mxu0 %v5759_v18  ;;  %6187 = vmatprep.subr.bf16.mxu1 %v5761_v35  ;;  %v5803_v53 = vld [vmem:[#allocation7 + $0x228] sm:$0xff]  ;;  %v5805_v54 = vld [vmem:[#allocation7 + $0x238] sm:$0xff]  ;;  %v5802_v11 = vld [vmem:[#allocation7 + $0x220] sm:$0xff] }
 0xd78   :  { %v5804_v55 = vld [vmem:[#allocation7 + $0x230] sm:$0xff]  ;;  %v5807_v56 = vld [vmem:[#allocation7 + $0x248] sm:$0xff]  ;;  %v5809_v18 = vld [vmem:[#allocation7 + $0x258] sm:$0xff] }
 0xd79   :  { %v5806_v35 = vld [vmem:[#allocation7 + $0x240] sm:$0xff] }
 0xd7a   :  { %6024 = vmatpush1.bf16.msra.mxu0 %v5758_v57  ;;  %6188 = vmatpush1.bf16.msra.mxu1 %v5760_v63  ;;  %v5808_v57 = vld [vmem:[#allocation7 + $0x250] sm:$0xff]  ;;  %v5811_v63 = vld [vmem:[#allocation7 + $0x268] sm:$0xff] }
 0xd7b   :  { %6025 = vmatprep.subr.bf16.mxu0 %v5763_v6  ;;  %6189 = vmatprep.subr.bf16.mxu1 %v5765_v58  ;;  %v5810_v6 = vld [vmem:[#allocation7 + $0x260] sm:$0xff]  ;;  %v5812_v58 = vld [vmem:[#allocation7 + $0x270] sm:$0xff] }
 0xd7e   :  { %6026 = vmatpush1.bf16.msra.mxu0 %v5762_v59  ;;  %6190 = vmatpush1.bf16.msra.mxu1 %v5764_v60  ;;  %v5815_v59 = vld [vmem:[#allocation7 + $0x288] sm:$0xff]  ;;  %v5817_v60 = vld [vmem:[#allocation7 + $0x298] sm:$0xff] }
 0xd7f   :  { %6027 = vmatprep.subr.bf16.mxu0 %v5767_v9  ;;  %6191 = vmatprep.subr.bf16.mxu1 %v5769_v2  ;;  %v5816_v9 = vld [vmem:[#allocation7 + $0x290] sm:$0xff]  ;;  %v5819_v2 = vld [vmem:[#allocation7 + $0x2a8] sm:$0xff] }
 0xd82   :  { %6028 = vmatpush1.bf16.msra.mxu0 %v5766_v16  ;;  %6192 = vmatpush1.bf16.msra.mxu1 %v5768_v61  ;;  %v5821_v16 = vld [vmem:[#allocation7 + $0x2b8] sm:$0xff]  ;;  %v5818_v61 = vld [vmem:[#allocation7 + $0x2a0] sm:$0xff] }
 0xd83   :  { %6029 = vmatprep.subr.bf16.mxu0 %v5771_v13  ;;  %6193 = vmatprep.subr.bf16.mxu1 %v5773_v14  ;;  %v5820_v13 = vld [vmem:[#allocation7 + $0x2b0] sm:$0xff]  ;;  %v5823_v14 = vld [vmem:[#allocation7 + $0x2c8] sm:$0xff] }
 0xd86   :  { %6030 = vmatpush1.bf16.msra.mxu0 %v5770_v21  ;;  %6194 = vmatpush1.bf16.msra.mxu1 %v5772_v12  ;;  %v5825_v21 = vld [vmem:[#allocation7 + $0x2d8] sm:$0xff]  ;;  %v5822_v12 = vld [vmem:[#allocation7 + $0x2c0] sm:$0xff] }
 0xd87   :  { %6031 = vmatprep.subr.bf16.mxu0 %v5775_v62  ;;  %6195 = vmatprep.subr.bf16.mxu1 %v5777_v36  ;;  %v5824_v62 = vld [vmem:[#allocation7 + $0x2d0] sm:$0xff]  ;;  %v5827_v36 = vld [vmem:[#allocation7 + $0x2e8] sm:$0xff] }
 0xd8a   :  { %6032 = vmatpush1.bf16.msra.mxu0 %v5774_v24  ;;  %6196 = vmatpush1.bf16.msra.mxu1 %v5776_v0  ;;  %v5829_v24 = vld [vmem:[#allocation7 + $0x2f8] sm:$0xff]  ;;  %v5826_v0 = vld [vmem:[#allocation7 + $0x2e0] sm:$0xff] }
 0xd8b   :  { %6033 = vmatprep.subr.bf16.mxu0 %v5779_v42  ;;  %6197 = vmatprep.subr.bf16.mxu1 %v5781_v10  ;;  %v5828_v42 = vld [vmem:[#allocation7 + $0x2f0] sm:$0xff]  ;;  %v5831_v10 = vld [vmem:[#allocation7 + $0x308] sm:$0xff] }
 0xd8e   :  { %6034 = vmatpush1.bf16.msra.mxu0 %v5778_v8  ;;  %6198 = vmatpush1.bf16.msra.mxu1 %v5780_v29  ;;  %v5833_v8 = vld [vmem:[#allocation7 + $0x318] sm:$0xff]  ;;  %v5830_v29 = vld [vmem:[#allocation7 + $0x300] sm:$0xff] }
 0xd8f   :  { %6035 = vmatprep.subr.bf16.mxu0 %v5783_v7  ;;  %6199 = vmatprep.subr.bf16.mxu1 %v5785_v31  ;;  %v5832_v7 = vld [vmem:[#allocation7 + $0x310] sm:$0xff]  ;;  %v5835_v31 = vld [vmem:[#allocation7 + $0x328] sm:$0xff] }
 0xd92   :  { %6036 = vmatpush1.bf16.msra.mxu0 %v5782_v33  ;;  %6200 = vmatpush1.bf16.msra.mxu1 %v5784_v1  ;;  %v5837_v33 = vld [vmem:[#allocation7 + $0x338] sm:$0xff]  ;;  %v5834_v1 = vld [vmem:[#allocation7 + $0x320] sm:$0xff] }
 0xd93   :  { %6037 = vmatprep.subr.bf16.mxu0 %v5787_v32  ;;  %6201 = vmatprep.subr.bf16.mxu1 %v5789_v17  ;;  %v5836_v32 = vld [vmem:[#allocation7 + $0x330] sm:$0xff]  ;;  %v5839_v17 = vld [vmem:[#allocation7 + $0x348] sm:$0xff] }
 0xd96   :  { %6038 = vmatpush1.bf16.msra.mxu0 %v5786_v34  ;;  %6202 = vmatpush1.bf16.msra.mxu1 %v5788_v45  ;;  %v5841_v34 = vld [vmem:[#allocation7 + $0x358] sm:$0xff]  ;;  %v5838_v45 = vld [vmem:[#allocation7 + $0x340] sm:$0xff] }
 0xd97   :  { %6039 = vmatprep.subr.bf16.mxu0 %v5791_v40  ;;  %6203 = vmatprep.subr.bf16.mxu1 %v5793_v46  ;;  %v5840_v40 = vld [vmem:[#allocation7 + $0x350] sm:$0xff]  ;;  %v5843_v46 = vld [vmem:[#allocation7 + $0x368] sm:$0xff] }
 0xd9a   :  { %6040 = vmatpush1.bf16.msra.mxu0 %v5790_v4  ;;  %6204 = vmatpush1.bf16.msra.mxu1 %v5792_v27  ;;  %v5845_v4 = vld [vmem:[#allocation7 + $0x378] sm:$0xff]  ;;  %v5842_v27 = vld [vmem:[#allocation7 + $0x360] sm:$0xff] }
 0xd9b   :  { %6041 = vmatprep.subr.bf16.mxu0 %v5795_v47  ;;  %6205 = vmatprep.subr.bf16.mxu1 %v5797_v48  ;;  %v5844_v47 = vld [vmem:[#allocation7 + $0x370] sm:$0xff]  ;;  %v5847_v48 = vld [vmem:[#allocation7 + $0x388] sm:$0xff] }
 0xd9e   :  { %6042 = vmatpush1.bf16.msra.mxu0 %v5794_v25  ;;  %6206 = vmatpush1.bf16.msra.mxu1 %v5796_v37  ;;  %v5849_v25 = vld [vmem:[#allocation7 + $0x398] sm:$0xff]  ;;  %v5846_v37 = vld [vmem:[#allocation7 + $0x380] sm:$0xff] }
 0xd9f   :  { %6052 = vmatprep.subr.bf16.mxu0 %v5799_v50  ;;  %6216 = vmatprep.subr.bf16.mxu1 %v5801_v51  ;;  %v5848_v50 = vld [vmem:[#allocation7 + $0x390] sm:$0xff]  ;;  %v5851_v51 = vld [vmem:[#allocation7 + $0x3a8] sm:$0xff] }
 0xda1   :  { %6044 = vmatmul.mubr.bf16.vlgmr.msra.gmra.mrb[36].mxu0 %v8651_v26  ;;  %6208 = vmatmul.mubr.bf16.vlgmr.msra.gmra.mrb[36].mxu1 %v8651_v26  ;;  %v5813_v26 = vld [vmem:[#allocation7 + $0x278] sm:$0xff] }
 0xda2   :  { %6053 = vmatpush1.bf16.msra.mxu0 %v5798_v5  ;;  %6217 = vmatpush1.bf16.msra.mxu1 %v5800_v52  ;;  %v5853_v5 = vld [vmem:[#allocation7 + $0x3b8] sm:$0xff]  ;;  %v5850_v52 = vld [vmem:[#allocation7 + $0x3a0] sm:$0xff] }
 0xda3   :  { %6054 = vmatprep.subr.bf16.mxu0 %v5803_v53  ;;  %6218 = vmatprep.subr.bf16.mxu1 %v5805_v54  ;;  %v5852_v53 = vld [vmem:[#allocation7 + $0x3b0] sm:$0xff]  ;;  %v5855_v54 = vld [vmem:[#allocation7 + $0x3c8] sm:$0xff] }
 0xda4   :  { %6084 = vmatprep.mubr.bf16.mxu0 %v8657_v28  ;;  %6248 = vmatprep.mubr.bf16.mxu1 %v8657_v28  ;;  %v5814_v28 = vld [vmem:[#allocation7 + $0x280] sm:$0xff] }
 0xda6   :  { %6055 = vmatpush1.bf16.msra.mxu0 %v5802_v11  ;;  %6219 = vmatpush1.bf16.msra.mxu1 %v5804_v55  ;;  %v5857_v11 = vld [vmem:[#allocation7 + $0x3d8] sm:$0xff]  ;;  %v5854_v55 = vld [vmem:[#allocation7 + $0x3c0] sm:$0xff] }
 0xda7   :  { %6056 = vmatprep.subr.bf16.mxu0 %v5807_v56  ;;  %6220 = vmatprep.subr.bf16.mxu1 %v5809_v18  ;;  %v5856_v56 = vld [vmem:[#allocation7 + $0x3d0] sm:$0xff]  ;;  %v5859_v18 = vld [vmem:[#allocation7 + $0x3e8] sm:$0xff] }
 0xdaa   :  { %6057 = vmatpush1.bf16.msra.mxu0 %v5806_v35  ;;  %6221 = vmatpush1.bf16.msra.mxu1 %v5808_v57  ;;  %v5861_v35 = vld [vmem:[#allocation7 + $0x3f8] sm:$0xff]  ;;  %v5858_v57 = vld [vmem:[#allocation7 + $0x3e0] sm:$0xff] }
 0xdab   :  { %6058 = vmatprep.subr.bf16.mxu0 %v5811_v63  ;;  %6222 = vmatprep.subr.bf16.mxu1 %v5813_v26  ;;  %v5860_v63 = vld [vmem:[#allocation7 + $0x3f0] sm:$0xff]  ;;  %v5863_v26 = vld [vmem:[#allocation7 + $0x408] sm:$0xff] }
 0xdae   :  { %6059 = vmatpush1.bf16.msra.mxu0 %v5810_v6  ;;  %6223 = vmatpush1.bf16.msra.mxu1 %v5812_v58  ;;  %v5865_v6 = vld [vmem:[#allocation7 + $0x418] sm:$0xff]  ;;  %v5862_v58 = vld [vmem:[#allocation7 + $0x400] sm:$0xff] }
 0xdaf   :  { %6060 = vmatprep.subr.bf16.mxu0 %v5815_v59  ;;  %6224 = vmatprep.subr.bf16.mxu1 %v5817_v60  ;;  %v5864_v59 = vld [vmem:[#allocation7 + $0x410] sm:$0xff]  ;;  %v5867_v60 = vld [vmem:[#allocation7 + $0x428] sm:$0xff] }
 0xdb2   :  { %6061 = vmatpush1.bf16.msra.mxu0 %v5814_v28  ;;  %6225 = vmatpush1.bf16.msra.mxu1 %v5816_v9  ;;  %v5869_v28 = vld [vmem:[#allocation7 + $0x438] sm:$0xff]  ;;  %v5866_v9 = vld [vmem:[#allocation7 + $0x420] sm:$0xff] }
 0xdb3   :  { %6062 = vmatprep.subr.bf16.mxu0 %v5819_v2  ;;  %6226 = vmatprep.subr.bf16.mxu1 %v5821_v16  ;;  %v5868_v2 = vld [vmem:[#allocation7 + $0x430] sm:$0xff]  ;;  %v5871_v16 = vld [vmem:[#allocation7 + $0x448] sm:$0xff] }
 0xdb6   :  { %6063 = vmatpush1.bf16.msra.mxu0 %v5818_v61  ;;  %6227 = vmatpush1.bf16.msra.mxu1 %v5820_v13  ;;  %v5873_v61 = vld [vmem:[#allocation7 + $0x458] sm:$0xff]  ;;  %v5870_v13 = vld [vmem:[#allocation7 + $0x440] sm:$0xff] }
 0xdb7   :  { %6064 = vmatprep.subr.bf16.mxu0 %v5823_v14  ;;  %6228 = vmatprep.subr.bf16.mxu1 %v5825_v21  ;;  %v5872_v14 = vld [vmem:[#allocation7 + $0x450] sm:$0xff]  ;;  %v5875_v21 = vld [vmem:[#allocation7 + $0x468] sm:$0xff] }
 0xdba   :  { %6065 = vmatpush1.bf16.msra.mxu0 %v5822_v12  ;;  %6229 = vmatpush1.bf16.msra.mxu1 %v5824_v62  ;;  %v5874_v12 = vld [vmem:[#allocation7 + $0x460] sm:$0xff]  ;;  %v5876_v62 = vld [vmem:[#allocation7 + $0x470] sm:$0xff] }
 0xdbb   :  { %6066 = vmatprep.subr.bf16.mxu0 %v5827_v36  ;;  %6230 = vmatprep.subr.bf16.mxu1 %v5829_v24  ;;  %v5879_v36 = vld [vmem:[#allocation7 + $0x488] sm:$0xff]  ;;  %v5881_v24 = vld [vmem:[#allocation7 + $0x498] sm:$0xff] }
 0xdbe   :  { %6067 = vmatpush1.bf16.msra.mxu0 %v5826_v0  ;;  %6231 = vmatpush1.bf16.msra.mxu1 %v5828_v42  ;;  %v5880_v0 = vld [vmem:[#allocation7 + $0x490] sm:$0xff]  ;;  %v5883_v42 = vld [vmem:[#allocation7 + $0x4a8] sm:$0xff] }
 0xdbf   :  { %6068 = vmatprep.subr.bf16.mxu0 %v5831_v10  ;;  %6232 = vmatprep.subr.bf16.mxu1 %v5833_v8  ;;  %v5885_v10 = vld [vmem:[#allocation7 + $0x4b8] sm:$0xff]  ;;  %v5882_v8 = vld [vmem:[#allocation7 + $0x4a0] sm:$0xff] }
 0xdc2   :  { %6069 = vmatpush1.bf16.msra.mxu0 %v5830_v29  ;;  %6233 = vmatpush1.bf16.msra.mxu1 %v5832_v7  ;;  %v5884_v29 = vld [vmem:[#allocation7 + $0x4b0] sm:$0xff]  ;;  %v5887_v7 = vld [vmem:[#allocation7 + $0x4c8] sm:$0xff] }
 0xdc3   :  { %6070 = vmatprep.subr.bf16.mxu0 %v5835_v31  ;;  %6234 = vmatprep.subr.bf16.mxu1 %v5837_v33  ;;  %v5889_v31 = vld [vmem:[#allocation7 + $0x4d8] sm:$0xff]  ;;  %v5886_v33 = vld [vmem:[#allocation7 + $0x4c0] sm:$0xff] }
 0xdc6   :  { %6071 = vmatpush1.bf16.msra.mxu0 %v5834_v1  ;;  %6235 = vmatpush1.bf16.msra.mxu1 %v5836_v32  ;;  %v5888_v1 = vld [vmem:[#allocation7 + $0x4d0] sm:$0xff]  ;;  %v5891_v32 = vld [vmem:[#allocation7 + $0x4e8] sm:$0xff] }
 0xdc7   :  { %6072 = vmatprep.subr.bf16.mxu0 %v5839_v17  ;;  %6236 = vmatprep.subr.bf16.mxu1 %v5841_v34  ;;  %v5893_v17 = vld [vmem:[#allocation7 + $0x4f8] sm:$0xff]  ;;  %v5890_v34 = vld [vmem:[#allocation7 + $0x4e0] sm:$0xff] }
 0xdca   :  { %6073 = vmatpush1.bf16.msra.mxu0 %v5838_v45  ;;  %6237 = vmatpush1.bf16.msra.mxu1 %v5840_v40  ;;  %v5892_v45 = vld [vmem:[#allocation7 + $0x4f0] sm:$0xff]  ;;  %v5895_v40 = vld [vmem:[#allocation7 + $0x508] sm:$0xff] }
 0xdcb   :  { %6074 = vmatprep.subr.bf16.mxu0 %v5843_v46  ;;  %6238 = vmatprep.subr.bf16.mxu1 %v5845_v4  ;;  %v5897_v46 = vld [vmem:[#allocation7 + $0x518] sm:$0xff]  ;;  %v5894_v4 = vld [vmem:[#allocation7 + $0x500] sm:$0xff] }
 0xdce   :  { %6075 = vmatpush1.bf16.msra.mxu0 %v5842_v27  ;;  %6239 = vmatpush1.bf16.msra.mxu1 %v5844_v47  ;;  %v5896_v27 = vld [vmem:[#allocation7 + $0x510] sm:$0xff]  ;;  %v5899_v47 = vld [vmem:[#allocation7 + $0x528] sm:$0xff] }
 0xdcf   :  { %6076 = vmatprep.subr.bf16.mxu0 %v5847_v48  ;;  %6240 = vmatprep.subr.bf16.mxu1 %v5849_v25  ;;  %v5901_v48 = vld [vmem:[#allocation7 + $0x538] sm:$0xff]  ;;  %v5898_v25 = vld [vmem:[#allocation7 + $0x520] sm:$0xff] }
 0xdd2   :  { %6077 = vmatpush1.bf16.msra.mxu0 %v5846_v37  ;;  %6241 = vmatpush1.bf16.msra.mxu1 %v5848_v50  ;;  %v5900_v37 = vld [vmem:[#allocation7 + $0x530] sm:$0xff]  ;;  %v5903_v50 = vld [vmem:[#allocation7 + $0x548] sm:$0xff] }
 0xdd3   :  { %6078 = vmatprep.subr.bf16.mxu0 %v5851_v51  ;;  %6242 = vmatprep.subr.bf16.mxu1 %v5853_v5  ;;  %v5905_v51 = vld [vmem:[#allocation7 + $0x558] sm:$0xff]  ;;  %v5902_v5 = vld [vmem:[#allocation7 + $0x540] sm:$0xff] }
 0xdd6   :  { %6079 = vmatpush1.bf16.msra.mxu0 %v5850_v52  ;;  %6243 = vmatpush1.bf16.msra.mxu1 %v5852_v53  ;;  %v5904_v52 = vld [vmem:[#allocation7 + $0x550] sm:$0xff]  ;;  %v5907_v53 = vld [vmem:[#allocation7 + $0x568] sm:$0xff] }
 0xdd7   :  { %6080 = vmatprep.subr.bf16.mxu0 %v5855_v54  ;;  %6244 = vmatprep.subr.bf16.mxu1 %v5857_v11  ;;  %v5909_v54 = vld [vmem:[#allocation7 + $0x578] sm:$0xff]  ;;  %v5906_v11 = vld [vmem:[#allocation7 + $0x560] sm:$0xff] }
 0xdda   :  { %6081 = vmatpush1.bf16.msra.mxu0 %v5854_v55  ;;  %6245 = vmatpush1.bf16.msra.mxu1 %v5856_v56  ;;  %v5908_v55 = vld [vmem:[#allocation7 + $0x570] sm:$0xff]  ;;  %v5911_v56 = vld [vmem:[#allocation7 + $0x588] sm:$0xff] }
 0xddb   :  { %6082 = vmatprep.subr.bf16.mxu0 %v5859_v18  ;;  %6246 = vmatprep.subr.bf16.mxu1 %v5861_v35  ;;  %v5913_v18 = vld [vmem:[#allocation7 + $0x598] sm:$0xff]  ;;  %v5910_v35 = vld [vmem:[#allocation7 + $0x580] sm:$0xff] }
 0xdde   :  { %6083 = vmatpush1.bf16.msra.mxu0 %v5858_v57  ;;  %6247 = vmatpush1.bf16.msra.mxu1 %v5860_v63  ;;  %v5912_v57 = vld [vmem:[#allocation7 + $0x590] sm:$0xff]  ;;  %v5915_v63 = vld [vmem:[#allocation7 + $0x5a8] sm:$0xff] }
 0xddf   :  { %6093 = vmatprep.subr.bf16.mxu0 %v5863_v26  ;;  %6257 = vmatprep.subr.bf16.mxu1 %v5865_v6  ;;  %v5917_v26 = vld [vmem:[#allocation7 + $0x5b8] sm:$0xff]  ;;  %v5914_v6 = vld [vmem:[#allocation7 + $0x5a0] sm:$0xff] }
 0xde1   :  { %6085 = vmatmul.mubr.bf16.vlgmr.msra.gmra.mrb[36].mxu0 %v8653_v3  ;;  %6249 = vmatmul.mubr.bf16.vlgmr.msra.gmra.mrb[36].mxu1 %v8653_v3  ;;  %v5877_v3 = vld [vmem:[#allocation7 + $0x478] sm:$0xff] }
 0xde2   :  { %6094 = vmatpush1.bf16.msra.mxu0 %v5862_v58  ;;  %6258 = vmatpush1.bf16.msra.mxu1 %v5864_v59  ;;  %v5916_v58 = vld [vmem:[#allocation7 + $0x5b0] sm:$0xff]  ;;  %v5919_v59 = vld [vmem:[#allocation7 + $0x5c8] sm:$0xff] }
 0xde3   :  { %6095 = vmatprep.subr.bf16.mxu0 %v5867_v60  ;;  %6259 = vmatprep.subr.bf16.mxu1 %v5869_v28  ;;  %v5921_v60 = vld [vmem:[#allocation7 + $0x5d8] sm:$0xff]  ;;  %v5918_v28 = vld [vmem:[#allocation7 + $0x5c0] sm:$0xff] }
 0xde4   :  { %6125 = vmatprep.mubr.bf16.mxu0 %v8673_v49  ;;  %6289 = vmatprep.mubr.bf16.mxu1 %v8673_v49  ;;  %v5878_v49 = vld [vmem:[#allocation7 + $0x480] sm:$0xff] }
 0xde6   :  { %6096 = vmatpush1.bf16.msra.mxu0 %v5866_v9  ;;  %6260 = vmatpush1.bf16.msra.mxu1 %v5868_v2  ;;  %v5920_v9 = vld [vmem:[#allocation7 + $0x5d0] sm:$0xff]  ;;  %v5923_v2 = vld [vmem:[#allocation7 + $0x5e8] sm:$0xff] }
 0xde7   :  { %6097 = vmatprep.subr.bf16.mxu0 %v5871_v16  ;;  %6261 = vmatprep.subr.bf16.mxu1 %v5873_v61  ;;  %v5925_v16 = vld [vmem:[#allocation7 + $0x5f8] sm:$0xff]  ;;  %v5922_v61 = vld [vmem:[#allocation7 + $0x5e0] sm:$0xff] }
 0xdea   :  { %6098 = vmatpush1.bf16.msra.mxu0 %v5870_v13  ;;  %6262 = vmatpush1.bf16.msra.mxu1 %v5872_v14  ;;  %v5924_v13 = vld [vmem:[#allocation7 + $0x5f0] sm:$0xff]  ;;  %v5927_v14 = vld [vmem:[#allocation7 + $0x608] sm:$0xff] }
 0xdeb   :  { %6099 = vmatprep.subr.bf16.mxu0 %v5875_v21  ;;  %6263 = vmatprep.subr.bf16.mxu1 %v5877_v3  ;;  %v5929_v21 = vld [vmem:[#allocation7 + $0x618] sm:$0xff]  ;;  %v5926_v3 = vld [vmem:[#allocation7 + $0x600] sm:$0xff] }
 0xdee   :  { %6100 = vmatpush1.bf16.msra.mxu0 %v5874_v12  ;;  %6264 = vmatpush1.bf16.msra.mxu1 %v5876_v62  ;;  %v5928_v12 = vld [vmem:[#allocation7 + $0x610] sm:$0xff]  ;;  %v5931_v62 = vld [vmem:[#allocation7 + $0x628] sm:$0xff] }
 0xdef   :  { %6101 = vmatprep.subr.bf16.mxu0 %v5879_v36  ;;  %6265 = vmatprep.subr.bf16.mxu1 %v5881_v24  ;;  %v5933_v36 = vld [vmem:[#allocation7 + $0x638] sm:$0xff]  ;;  %v5930_v24 = vld [vmem:[#allocation7 + $0x620] sm:$0xff] }
 0xdf2   :  { %6102 = vmatpush1.bf16.msra.mxu0 %v5878_v49  ;;  %6266 = vmatpush1.bf16.msra.mxu1 %v5880_v0  ;;  %v5932_v49 = vld [vmem:[#allocation7 + $0x630] sm:$0xff]  ;;  %v5935_v0 = vld [vmem:[#allocation7 + $0x648] sm:$0xff] }
 0xdf3   :  { %6103 = vmatprep.subr.bf16.mxu0 %v5883_v42  ;;  %6267 = vmatprep.subr.bf16.mxu1 %v5885_v10  ;;  %v5937_v42 = vld [vmem:[#allocation7 + $0x658] sm:$0xff]  ;;  %v5934_v10 = vld [vmem:[#allocation7 + $0x640] sm:$0xff] }
 0xdf6   :  { %6104 = vmatpush1.bf16.msra.mxu0 %v5882_v8  ;;  %6268 = vmatpush1.bf16.msra.mxu1 %v5884_v29  ;;  %v5936_v8 = vld [vmem:[#allocation7 + $0x650] sm:$0xff]  ;;  %v5939_v29 = vld [vmem:[#allocation7 + $0x668] sm:$0xff] }
 0xdf7   :  { %6105 = vmatprep.subr.bf16.mxu0 %v5887_v7  ;;  %6269 = vmatprep.subr.bf16.mxu1 %v5889_v31  ;;  %v5938_v7 = vld [vmem:[#allocation7 + $0x660] sm:$0xff]  ;;  %v5940_v31 = vld [vmem:[#allocation7 + $0x670] sm:$0xff] }
 0xdfa   :  { %6106 = vmatpush1.bf16.msra.mxu0 %v5886_v33  ;;  %6270 = vmatpush1.bf16.msra.mxu1 %v5888_v1  ;;  %v5943_v33 = vld [vmem:[#allocation7 + $0x688] sm:$0xff]  ;;  %v5945_v1 = vld [vmem:[#allocation7 + $0x698] sm:$0xff] }
 0xdfb   :  { %6107 = vmatprep.subr.bf16.mxu0 %v5891_v32  ;;  %6271 = vmatprep.subr.bf16.mxu1 %v5893_v17  ;;  %v5944_v32 = vld [vmem:[#allocation7 + $0x690] sm:$0xff]  ;;  %v5947_v17 = vld [vmem:[#allocation7 + $0x6a8] sm:$0xff] }
 0xdfe   :  { %6108 = vmatpush1.bf16.msra.mxu0 %v5890_v34  ;;  %6272 = vmatpush1.bf16.msra.mxu1 %v5892_v45  ;;  %v5949_v34 = vld [vmem:[#allocation7 + $0x6b8] sm:$0xff]  ;;  %v5946_v45 = vld [vmem:[#allocation7 + $0x6a0] sm:$0xff] }
 0xdff   :  { %6109 = vmatprep.subr.bf16.mxu0 %v5895_v40  ;;  %6273 = vmatprep.subr.bf16.mxu1 %v5897_v46  ;;  %v5948_v40 = vld [vmem:[#allocation7 + $0x6b0] sm:$0xff]  ;;  %v5951_v46 = vld [vmem:[#allocation7 + $0x6c8] sm:$0xff] }
 0xe02   :  { %6110 = vmatpush1.bf16.msra.mxu0 %v5894_v4  ;;  %6274 = vmatpush1.bf16.msra.mxu1 %v5896_v27  ;;  %v5953_v4 = vld [vmem:[#allocation7 + $0x6d8] sm:$0xff]  ;;  %v5950_v27 = vld [vmem:[#allocation7 + $0x6c0] sm:$0xff] }
 0xe03   :  { %6111 = vmatprep.subr.bf16.mxu0 %v5899_v47  ;;  %6275 = vmatprep.subr.bf16.mxu1 %v5901_v48  ;;  %v5952_v47 = vld [vmem:[#allocation7 + $0x6d0] sm:$0xff]  ;;  %v5955_v48 = vld [vmem:[#allocation7 + $0x6e8] sm:$0xff] }
 0xe06   :  { %6112 = vmatpush1.bf16.msra.mxu0 %v5898_v25  ;;  %6276 = vmatpush1.bf16.msra.mxu1 %v5900_v37  ;;  %v5957_v25 = vld [vmem:[#allocation7 + $0x6f8] sm:$0xff]  ;;  %v5954_v37 = vld [vmem:[#allocation7 + $0x6e0] sm:$0xff] }
 0xe07   :  { %6113 = vmatprep.subr.bf16.mxu0 %v5903_v50  ;;  %6277 = vmatprep.subr.bf16.mxu1 %v5905_v51  ;;  %v5956_v50 = vld [vmem:[#allocation7 + $0x6f0] sm:$0xff]  ;;  %v5959_v51 = vld [vmem:[#allocation7 + $0x708] sm:$0xff] }
 0xe0a   :  { %6114 = vmatpush1.bf16.msra.mxu0 %v5902_v5  ;;  %6278 = vmatpush1.bf16.msra.mxu1 %v5904_v52  ;;  %v5961_v5 = vld [vmem:[#allocation7 + $0x718] sm:$0xff]  ;;  %v5958_v52 = vld [vmem:[#allocation7 + $0x700] sm:$0xff] }
 0xe0b   :  { %6115 = vmatprep.subr.bf16.mxu0 %v5907_v53  ;;  %6279 = vmatprep.subr.bf16.mxu1 %v5909_v54  ;;  %v5960_v53 = vld [vmem:[#allocation7 + $0x710] sm:$0xff]  ;;  %v5963_v54 = vld [vmem:[#allocation7 + $0x728] sm:$0xff] }
 0xe0e   :  { %6116 = vmatpush1.bf16.msra.mxu0 %v5906_v11  ;;  %6280 = vmatpush1.bf16.msra.mxu1 %v5908_v55  ;;  %v5965_v11 = vld [vmem:[#allocation7 + $0x738] sm:$0xff]  ;;  %v5962_v55 = vld [vmem:[#allocation7 + $0x720] sm:$0xff] }
 0xe0f   :  { %6117 = vmatprep.subr.bf16.mxu0 %v5911_v56  ;;  %6281 = vmatprep.subr.bf16.mxu1 %v5913_v18  ;;  %v5964_v56 = vld [vmem:[#allocation7 + $0x730] sm:$0xff]  ;;  %v5967_v18 = vld [vmem:[#allocation7 + $0x748] sm:$0xff] }
 0xe12   :  { %6118 = vmatpush1.bf16.msra.mxu0 %v5910_v35  ;;  %6282 = vmatpush1.bf16.msra.mxu1 %v5912_v57  ;;  %v5969_v35 = vld [vmem:[#allocation7 + $0x758] sm:$0xff]  ;;  %v5966_v57 = vld [vmem:[#allocation7 + $0x740] sm:$0xff] }
 0xe13   :  { %6119 = vmatprep.subr.bf16.mxu0 %v5915_v63  ;;  %6283 = vmatprep.subr.bf16.mxu1 %v5917_v26  ;;  %v5968_v63 = vld [vmem:[#allocation7 + $0x750] sm:$0xff]  ;;  %v5971_v26 = vld [vmem:[#allocation7 + $0x768] sm:$0xff] }
 0xe16   :  { %6120 = vmatpush1.bf16.msra.mxu0 %v5914_v6  ;;  %6284 = vmatpush1.bf16.msra.mxu1 %v5916_v58  ;;  %v5973_v6 = vld [vmem:[#allocation7 + $0x778] sm:$0xff]  ;;  %v5970_v58 = vld [vmem:[#allocation7 + $0x760] sm:$0xff] }
 0xe17   :  { %6121 = vmatprep.subr.bf16.mxu0 %v5919_v59  ;;  %6285 = vmatprep.subr.bf16.mxu1 %v5921_v60  ;;  %v5972_v59 = vld [vmem:[#allocation7 + $0x770] sm:$0xff]  ;;  %v5975_v60 = vld [vmem:[#allocation7 + $0x788] sm:$0xff] }
 0xe1a   :  { %6122 = vmatpush1.bf16.msra.mxu0 %v5918_v28  ;;  %6286 = vmatpush1.bf16.msra.mxu1 %v5920_v9  ;;  %v5977_v28 = vld [vmem:[#allocation7 + $0x798] sm:$0xff]  ;;  %v5974_v9 = vld [vmem:[#allocation7 + $0x780] sm:$0xff] }
 0xe1b   :  { %6123 = vmatprep.subr.bf16.mxu0 %v5923_v2  ;;  %6287 = vmatprep.subr.bf16.mxu1 %v5925_v16  ;;  %v5976_v2 = vld [vmem:[#allocation7 + $0x790] sm:$0xff]  ;;  %v5979_v16 = vld [vmem:[#allocation7 + $0x7a8] sm:$0xff] }
 0xe1e   :  { %6124 = vmatpush1.bf16.msra.mxu0 %v5922_v61  ;;  %6288 = vmatpush1.bf16.msra.mxu1 %v5924_v13  ;;  %v5981_v61 = vld [vmem:[#allocation7 + $0x7b8] sm:$0xff]  ;;  %v5978_v13 = vld [vmem:[#allocation7 + $0x7a0] sm:$0xff] }
 0xe1f   :  { %6134 = vmatprep.subr.bf16.mxu0 %v5927_v14  ;;  %6298 = vmatprep.subr.bf16.mxu1 %v5929_v21  ;;  %v5980_v14 = vld [vmem:[#allocation7 + $0x7b0] sm:$0xff]  ;;  %v5983_v21 = vld [vmem:[#allocation7 + $0x7c8] sm:$0xff] }
 0xe21   :  { %6126 = vmatmul.mubr.bf16.vlgmr.msra.gmra.mrb[36].mxu0 %v8669_v30  ;;  %6290 = vmatmul.mubr.bf16.vlgmr.msra.gmra.mrb[36].mxu1 %v8669_v30  ;;  %v5941_v30 = vld [vmem:[#allocation7 + $0x678] sm:$0xff] }
 0xe22   :  { %6135 = vmatpush1.bf16.msra.mxu0 %v5926_v3  ;;  %6299 = vmatpush1.bf16.msra.mxu1 %v5928_v12  ;;  %v5985_v3 = vld [vmem:[#allocation7 + $0x7d8] sm:$0xff]  ;;  %v5982_v12 = vld [vmem:[#allocation7 + $0x7c0] sm:$0xff] }
 0xe23   :  { %6136 = vmatprep.subr.bf16.mxu0 %v5931_v62  ;;  %6300 = vmatprep.subr.bf16.mxu1 %v5933_v36  ;;  %v5984_v62 = vld [vmem:[#allocation7 + $0x7d0] sm:$0xff]  ;;  %v5987_v36 = vld [vmem:[#allocation7 + $0x7e8] sm:$0xff] }
 0xe24   :  { %6166 = vmatprep.mubr.bf16.mxu0 %v8675_v41  ;;  %6330 = vmatprep.mubr.bf16.mxu1 %v8675_v41  ;;  %v5942_v41 = vld [vmem:[#allocation7 + $0x680] sm:$0xff] }
 0xe26   :  { %6137 = vmatpush1.bf16.msra.mxu0 %v5930_v24  ;;  %6301 = vmatpush1.bf16.msra.mxu1 %v5932_v49  ;;  %v5989_v24 = vld [vmem:[#allocation7 + $0x7f8] sm:$0xff]  ;;  %v5986_v49 = vld [vmem:[#allocation7 + $0x7e0] sm:$0xff] }
 0xe27   :  { %6138 = vmatprep.subr.bf16.mxu0 %v5935_v0  ;;  %6302 = vmatprep.subr.bf16.mxu1 %v5937_v42  ;;  %v5988_v0 = vld [vmem:[#allocation7 + $0x7f0] sm:$0xff]  ;;  %v5733_v42 = vld [vmem:[#allocation13 + $0x24] sm:$0xf] }
 0xe2a   :  { %6139 = vmatpush1.bf16.msra.mxu0 %v5934_v10  ;;  %6303 = vmatpush1.bf16.msra.mxu1 %v5936_v8  ;;  %v5994_v10 = vrot.slane %v5733_v42, %v8404_v19  ;;  %v6002_v8 = vrot.slane %v5733_v42, %v8407_v20 }
 0xe2b   :  { %6140 = vmatprep.subr.bf16.mxu0 %v5939_v29  ;;  %6304 = vmatprep.subr.bf16.mxu1 %v5941_v30  ;;  %v5998_v29 = vrot.slane %v5733_v42, %v8410_v22  ;;  %v6006_v30 = vrot.slane %v5733_v42, %v8413_v23 }
 0xe2e   :  { %6141 = vmatpush1.bf16.msra.mxu0 %v5938_v7  ;;  %6305 = vmatpush1.bf16.msra.mxu1 %v5940_v31 }
 0xe2f   :  { %6142 = vmatprep.subr.bf16.mxu0 %v5943_v33  ;;  %6306 = vmatprep.subr.bf16.mxu1 %v5945_v1 }
 0xe32   :  { %6143 = vmatpush1.bf16.msra.mxu0 %v5942_v41  ;;  %6307 = vmatpush1.bf16.msra.mxu1 %v5944_v32 }
 0xe33   :  { %6144 = vmatprep.subr.bf16.mxu0 %v5947_v17  ;;  %6308 = vmatprep.subr.bf16.mxu1 %v5949_v34 }
 0xe36   :  { %6145 = vmatpush1.bf16.msra.mxu0 %v5946_v45  ;;  %6309 = vmatpush1.bf16.msra.mxu1 %v5948_v40 }
 0xe37   :  { %6146 = vmatprep.subr.bf16.mxu0 %v5951_v46  ;;  %6310 = vmatprep.subr.bf16.mxu1 %v5953_v4 }
 0xe3a   :  { %6147 = vmatpush1.bf16.msra.mxu0 %v5950_v27  ;;  %6311 = vmatpush1.bf16.msra.mxu1 %v5952_v47 }
 0xe3b   :  { %6148 = vmatprep.subr.bf16.mxu0 %v5955_v48  ;;  %6312 = vmatprep.subr.bf16.mxu1 %v5957_v25 }
 0xe3e   :  { %6149 = vmatpush1.bf16.msra.mxu0 %v5954_v37  ;;  %6313 = vmatpush1.bf16.msra.mxu1 %v5956_v50 }
 0xe3f   :  { %6150 = vmatprep.subr.bf16.mxu0 %v5959_v51  ;;  %6314 = vmatprep.subr.bf16.mxu1 %v5961_v5 }
 0xe42   :  { %6151 = vmatpush1.bf16.msra.mxu0 %v5958_v52  ;;  %6315 = vmatpush1.bf16.msra.mxu1 %v5960_v53 }
 0xe43   :  { %6152 = vmatprep.subr.bf16.mxu0 %v5963_v54  ;;  %6316 = vmatprep.subr.bf16.mxu1 %v5965_v11 }
 0xe46   :  { %6153 = vmatpush1.bf16.msra.mxu0 %v5962_v55  ;;  %6317 = vmatpush1.bf16.msra.mxu1 %v5964_v56 }
 0xe47   :  { %6154 = vmatprep.subr.bf16.mxu0 %v5967_v18  ;;  %6318 = vmatprep.subr.bf16.mxu1 %v5969_v35 }
 0xe4a   :  { %6155 = vmatpush1.bf16.msra.mxu0 %v5966_v57  ;;  %6319 = vmatpush1.bf16.msra.mxu1 %v5968_v63 }
 0xe4b   :  { %6156 = vmatprep.subr.bf16.mxu0 %v5971_v26  ;;  %6320 = vmatprep.subr.bf16.mxu1 %v5973_v6 }
 0xe4e   :  { %6157 = vmatpush1.bf16.msra.mxu0 %v5970_v58  ;;  %6321 = vmatpush1.bf16.msra.mxu1 %v5972_v59 }
 0xe4f   :  { %6158 = vmatprep.subr.bf16.mxu0 %v5975_v60  ;;  %6322 = vmatprep.subr.bf16.mxu1 %v5977_v28 }
 0xe52   :  { %6159 = vmatpush1.bf16.msra.mxu0 %v5974_v9  ;;  %6323 = vmatpush1.bf16.msra.mxu1 %v5976_v2 }
 0xe53   :  { %6160 = vmatprep.subr.bf16.mxu0 %v5979_v16  ;;  %6324 = vmatprep.subr.bf16.mxu1 %v5981_v61 }
 0xe56   :  { %6161 = vmatpush1.bf16.msra.mxu0 %v5978_v13  ;;  %6325 = vmatpush1.bf16.msra.mxu1 %v5980_v14 }
 0xe57   :  { %6162 = vmatprep.subr.bf16.mxu0 %v5983_v21  ;;  %6326 = vmatprep.subr.bf16.mxu1 %v5985_v3 }
 0xe5a   :  { %6163 = vmatpush1.bf16.msra.mxu0 %v5982_v12  ;;  %6327 = vmatpush1.bf16.msra.mxu1 %v5984_v62 }
 0xe5b   :  { %6164 = vmatprep.subr.bf16.mxu0 %v5987_v36  ;;  %6328 = vmatprep.subr.bf16.mxu1 %v5989_v24 }
 0xe5e   :  { %6165 = vmatpush1.bf16.msra.mxu0 %v5986_v49  ;;  %6329 = vmatpush1.bf16.msra.mxu1 %v5988_v0 }
 0xe61   :  { %6167 = vmatmul.mubr.bf16.vlgmr.msra.gmra.mrb[36].mxu0 %v8671_v15  ;;  %6331 = vmatmul.mubr.bf16.vlgmr.msra.gmra.mrb[36].mxu1 %v8671_v15 }
 0xf34   :  { %v6168_v7 = vpop.f32.mrb[36].mxu0  ;;  %v6332_v31 = vpop.f32.mrb[36].mxu1 }
 0xf35   :  { %v7757_v33 = vadd.f32 %v6168_v7, %v5994_v10  ;;  %v7759_v1 = vadd.f32 %v6332_v31, %v6002_v8  ;;  %v6170_v41 = vpop.f32.mrb[37].mxu0  ;;  %v6334_v32 = vpop.f32.mrb[37].mxu1 }
 0xf36   :  { %v7758_v17 = vadd.f32 %v6170_v41, %v5998_v29  ;;  %v7760_v34 = vadd.f32 %v6334_v32, %v6006_v30  ;;  %v6172_v45 = vpop.f32.mrb[38].mxu0  ;;  %v6336_v40 = vpop.f32.mrb[38].mxu1 }
 0xf37   :  { %v6339_v15 = vmax.f32 %v7757_v33, 0.0  ;;  %v6341_v46 = vmax.f32 %v7759_v1, 0.0  ;;  %v6173_v4 = vpop.f32.mrb[39].mxu0  ;;  %v6337_v27 = vpop.f32.mrb[39].mxu1 }
 0xf38   :  { %v6340_v47 = vmax.f32 %v7758_v17, 0.0  ;;  %v6342_v48 = vmax.f32 %v7760_v34, 0.0 }
 0xf39   :  { %v8697_v25 = vpack.c.bf16 %v6339_v15, %v6339_v15  ;;  %v8699_v37 = vpack.c.bf16 %v6341_v46, %v6341_v46 }
 0xf3a   :  { %v8701_v50 = vpack.c.bf16 %v6340_v47, %v6340_v47  ;;  %v8703_v51 = vpack.c.bf16 %v6342_v48, %v6342_v48 }
 0xf3b   :  { %8158 = dma.done.wait [#allocation9 + $0x6], 65536 }
 0xf3c   :  { %8159 = vsyncadd [#allocation9 + $0x6], 4294901760  ;;  %6983 = vmatprep.mubr.bf16.mxu0 %v8701_v50  ;;  %7065 = vmatprep.mubr.bf16.mxu1 %v8701_v50  ;;  %v6358_v5 = vld [vmem:[#allocation8 + $0x8] sm:$0xff]  ;;  %v6360_v52 = vld [vmem:[#allocation8 + $0x18] sm:$0xff]  ;;  %s8196_s8 = smov [#allocation15]  }
 0xf3d   :  { %v6357_v53 = vld [vmem:[#allocation8] sm:$0xff]  ;;  %6951 = vmatprep.subr.bf16.mxu0 %v6358_v5  ;;  %7033 = vmatprep.subr.bf16.mxu1 %v6360_v52  ;;  %v6359_v54 = vld [vmem:[#allocation8 + $0x10] sm:$0xff]  ;;  %v6374_v11 = vld [vmem:[#allocation8 + $0x88] sm:$0xff]  ;;  %s7629_s16 = sshll.u32 %s8196_s8, 4  ;;  %s7630_s16 = int_to_ptr.vmem [resolvable:$true] %s7629_s16 }
 0xf3e   :  { %v6376_v55 = vld [vmem:[#allocation8 + $0x98] sm:$0xff]  ;;  %6952 = vmatpush1.bf16.msra.mxu0 %v6357_v53  ;;  %7034 = vmatpush1.bf16.msra.mxu1 %v6359_v54  ;;  %v6373_v56 = vld [vmem:[#allocation8 + $0x80] sm:$0xff]  ;;  %v6375_v18 = vld [vmem:[#allocation8 + $0x90] sm:$0xff]  ;;  %s8120_s17 = scalar_lea.vmem %s7630_s16, 2048  ;;  %p8125_p3 = scmp.lt.s32.totalorder %s7630_s16, %s7630_s16 }
 0xf3f   :  { %6953 = vmatprep.subr.bf16.mxu0 %v6374_v11  ;;  %7035 = vmatprep.subr.bf16.mxu1 %v6376_v55  ;;  %v6390_v35 = vld [vmem:[#allocation8 + $0x108] sm:$0xff]  ;;  %v6392_v57 = vld [vmem:[#allocation8 + $0x118] sm:$0xff]  ;;  %v6389_v63 = vld [vmem:[#allocation8 + $0x100] sm:$0xff]  ;;  %p8121_p2 = scmp.ne.s32.totalorder %s7630_s16, %s8120_s17  ;;  %p8126_p4 = scmp.lt.s32.totalorder %s8120_s17, %s8120_s17 }
 0xf40   :  { %v6391_v26 = vld [vmem:[#allocation8 + $0x110] sm:$0xff]  ;;  %v6406_v6 = vld [vmem:[#allocation8 + $0x188] sm:$0xff]  ;;  %v6408_v58 = vld [vmem:[#allocation8 + $0x198] sm:$0xff] }
 0xf41   :  { %v6405_v59 = vld [vmem:[#allocation8 + $0x180] sm:$0xff]  ;;  %v6407_v60 = vld [vmem:[#allocation8 + $0x190] sm:$0xff]  ;;  %v6422_v28 = vld [vmem:[#allocation8 + $0x208] sm:$0xff]  ;;  %p8127_p5 = por %p8126_p4, %p8125_p3 }
 0xf42   :  { %6954 = vmatpush1.bf16.msra.mxu0 %v6373_v56  ;;  %7036 = vmatpush1.bf16.msra.mxu1 %v6375_v18  ;;  %v6424_v9 = vld [vmem:[#allocation8 + $0x218] sm:$0xff]  ;;  %v6421_v2 = vld [vmem:[#allocation8 + $0x200] sm:$0xff]  ;;  %v6423_v16 = vld [vmem:[#allocation8 + $0x210] sm:$0xff] }
 0xf43   :  { %6955 = vmatprep.subr.bf16.mxu0 %v6390_v35  ;;  %7037 = vmatprep.subr.bf16.mxu1 %v6392_v57  ;;  %v6438_v61 = vld [vmem:[#allocation8 + $0x288] sm:$0xff]  ;;  %v6440_v13 = vld [vmem:[#allocation8 + $0x298] sm:$0xff]  ;;  %v6437_v14 = vld [vmem:[#allocation8 + $0x280] sm:$0xff]  ;;  %p8128_p6 = pnand %p8127_p5, %p8121_p2 }
 0xf44   :  { %v6439_v21 = vld [vmem:[#allocation8 + $0x290] sm:$0xff]  ;;  %v6454_v3 = vld [vmem:[#allocation8 + $0x308] sm:$0xff]  ;;  %v6456_v12 = vld [vmem:[#allocation8 + $0x318] sm:$0xff] }
 0xf45   :  { %v6453_v62 = vld [vmem:[#allocation8 + $0x300] sm:$0xff]  ;;  %v6455_v36 = vld [vmem:[#allocation8 + $0x310] sm:$0xff]  ;;  %v6470_v24 = vld [vmem:[#allocation8 + $0x388] sm:$0xff] }
 0xf46   :  { %6956 = vmatpush1.bf16.msra.mxu0 %v6389_v63  ;;  %7038 = vmatpush1.bf16.msra.mxu1 %v6391_v26  ;;  %v6472_v49 = vld [vmem:[#allocation8 + $0x398] sm:$0xff]  ;;  %v6469_v0 = vld [vmem:[#allocation8 + $0x380] sm:$0xff]  ;;  %v6471_v42 = vld [vmem:[#allocation8 + $0x390] sm:$0xff] }
 0xf47   :  { %6957 = vmatprep.subr.bf16.mxu0 %v6406_v6  ;;  %7039 = vmatprep.subr.bf16.mxu1 %v6408_v58  ;;  %v6486_v10 = vld [vmem:[#allocation8 + $0x408] sm:$0xff]  ;;  %v6488_v8 = vld [vmem:[#allocation8 + $0x418] sm:$0xff]  ;;  %v6485_v29 = vld [vmem:[#allocation8 + $0x400] sm:$0xff] }
 0xf48   :  { %v6487_v30 = vld [vmem:[#allocation8 + $0x410] sm:$0xff]  ;;  %v6502_v7 = vld [vmem:[#allocation8 + $0x488] sm:$0xff]  ;;  %v6504_v31 = vld [vmem:[#allocation8 + $0x498] sm:$0xff] }
 0xf49   :  { %v6501_v33 = vld [vmem:[#allocation8 + $0x480] sm:$0xff]  ;;  %v6503_v1 = vld [vmem:[#allocation8 + $0x490] sm:$0xff]  ;;  %v6518_v41 = vld [vmem:[#allocation8 + $0x508] sm:$0xff] }
 0xf4a   :  { %6958 = vmatpush1.bf16.msra.mxu0 %v6405_v59  ;;  %7040 = vmatpush1.bf16.msra.mxu1 %v6407_v60  ;;  %v6520_v32 = vld [vmem:[#allocation8 + $0x518] sm:$0xff]  ;;  %v6517_v17 = vld [vmem:[#allocation8 + $0x500] sm:$0xff]  ;;  %v6519_v34 = vld [vmem:[#allocation8 + $0x510] sm:$0xff] }
 0xf4b   :  { %6959 = vmatprep.subr.bf16.mxu0 %v6422_v28  ;;  %7041 = vmatprep.subr.bf16.mxu1 %v6424_v9  ;;  %v6534_v45 = vld [vmem:[#allocation8 + $0x588] sm:$0xff]  ;;  %v6536_v40 = vld [vmem:[#allocation8 + $0x598] sm:$0xff]  ;;  %v6533_v15 = vld [vmem:[#allocation8 + $0x580] sm:$0xff] }
 0xf4c   :  { %v6535_v46 = vld [vmem:[#allocation8 + $0x590] sm:$0xff]  ;;  %v6550_v4 = vld [vmem:[#allocation8 + $0x608] sm:$0xff]  ;;  %v6552_v27 = vld [vmem:[#allocation8 + $0x618] sm:$0xff] }
 0xf4d   :  { %v6549_v47 = vld [vmem:[#allocation8 + $0x600] sm:$0xff]  ;;  %v6551_v48 = vld [vmem:[#allocation8 + $0x610] sm:$0xff]  ;;  %v6566_v5 = vld [vmem:[#allocation8 + $0x688] sm:$0xff] }
 0xf4e   :  { %6960 = vmatpush1.bf16.msra.mxu0 %v6421_v2  ;;  %7042 = vmatpush1.bf16.msra.mxu1 %v6423_v16  ;;  %v6568_v52 = vld [vmem:[#allocation8 + $0x698] sm:$0xff]  ;;  %v6565_v53 = vld [vmem:[#allocation8 + $0x680] sm:$0xff]  ;;  %v6567_v54 = vld [vmem:[#allocation8 + $0x690] sm:$0xff] }
 0xf4f   :  { %6961 = vmatprep.subr.bf16.mxu0 %v6438_v61  ;;  %7043 = vmatprep.subr.bf16.mxu1 %v6440_v13  ;;  %v6582_v11 = vld [vmem:[#allocation8 + $0x708] sm:$0xff]  ;;  %v6584_v55 = vld [vmem:[#allocation8 + $0x718] sm:$0xff]  ;;  %v6581_v56 = vld [vmem:[#allocation8 + $0x700] sm:$0xff] }
 0xf50   :  { %v6583_v18 = vld [vmem:[#allocation8 + $0x710] sm:$0xff]  ;;  %v6598_v35 = vld [vmem:[#allocation8 + $0x788] sm:$0xff]  ;;  %v6600_v57 = vld [vmem:[#allocation8 + $0x798] sm:$0xff] }
 0xf51   :  { %v6597_v63 = vld [vmem:[#allocation8 + $0x780] sm:$0xff]  ;;  %v6599_v26 = vld [vmem:[#allocation8 + $0x790] sm:$0xff]  ;;  %v6614_v6 = vld [vmem:[#allocation8 + $0x808] sm:$0xff] }
 0xf52   :  { %6962 = vmatpush1.bf16.msra.mxu0 %v6437_v14  ;;  %7044 = vmatpush1.bf16.msra.mxu1 %v6439_v21  ;;  %v6616_v58 = vld [vmem:[#allocation8 + $0x818] sm:$0xff]  ;;  %v6613_v59 = vld [vmem:[#allocation8 + $0x800] sm:$0xff]  ;;  %v6615_v60 = vld [vmem:[#allocation8 + $0x810] sm:$0xff] }
 0xf53   :  { %6963 = vmatprep.subr.bf16.mxu0 %v6454_v3  ;;  %7045 = vmatprep.subr.bf16.mxu1 %v6456_v12  ;;  %v6630_v28 = vld [vmem:[#allocation8 + $0x888] sm:$0xff]  ;;  %v6632_v9 = vld [vmem:[#allocation8 + $0x898] sm:$0xff]  ;;  %v6629_v2 = vld [vmem:[#allocation8 + $0x880] sm:$0xff] }
 0xf54   :  { %v6631_v16 = vld [vmem:[#allocation8 + $0x890] sm:$0xff]  ;;  %v6646_v61 = vld [vmem:[#allocation8 + $0x908] sm:$0xff]  ;;  %v6648_v13 = vld [vmem:[#allocation8 + $0x918] sm:$0xff] }
 0xf55   :  { %v6645_v14 = vld [vmem:[#allocation8 + $0x900] sm:$0xff]  ;;  %v6647_v21 = vld [vmem:[#allocation8 + $0x910] sm:$0xff]  ;;  %v6662_v3 = vld [vmem:[#allocation8 + $0x988] sm:$0xff] }
 0xf56   :  { %6964 = vmatpush1.bf16.msra.mxu0 %v6453_v62  ;;  %7046 = vmatpush1.bf16.msra.mxu1 %v6455_v36  ;;  %v6664_v12 = vld [vmem:[#allocation8 + $0x998] sm:$0xff]  ;;  %v6661_v62 = vld [vmem:[#allocation8 + $0x980] sm:$0xff]  ;;  %v6663_v36 = vld [vmem:[#allocation8 + $0x990] sm:$0xff] }
 0xf57   :  { %6965 = vmatprep.subr.bf16.mxu0 %v6470_v24  ;;  %7047 = vmatprep.subr.bf16.mxu1 %v6472_v49  ;;  %v6678_v24 = vld [vmem:[#allocation8 + $0xa08] sm:$0xff]  ;;  %v6680_v49 = vld [vmem:[#allocation8 + $0xa18] sm:$0xff] }
 0xf5a   :  { %6966 = vmatpush1.bf16.msra.mxu0 %v6469_v0  ;;  %7048 = vmatpush1.bf16.msra.mxu1 %v6471_v42  ;;  %v6677_v0 = vld [vmem:[#allocation8 + $0xa00] sm:$0xff]  ;;  %v6679_v42 = vld [vmem:[#allocation8 + $0xa10] sm:$0xff] }
 0xf5b   :  { %6967 = vmatprep.subr.bf16.mxu0 %v6486_v10  ;;  %7049 = vmatprep.subr.bf16.mxu1 %v6488_v8  ;;  %v6694_v10 = vld [vmem:[#allocation8 + $0xa88] sm:$0xff]  ;;  %v6696_v8 = vld [vmem:[#allocation8 + $0xa98] sm:$0xff] }
 0xf5e   :  { %6968 = vmatpush1.bf16.msra.mxu0 %v6485_v29  ;;  %7050 = vmatpush1.bf16.msra.mxu1 %v6487_v30  ;;  %v6693_v29 = vld [vmem:[#allocation8 + $0xa80] sm:$0xff]  ;;  %v6695_v30 = vld [vmem:[#allocation8 + $0xa90] sm:$0xff] }
 0xf5f   :  { %6969 = vmatprep.subr.bf16.mxu0 %v6502_v7  ;;  %7051 = vmatprep.subr.bf16.mxu1 %v6504_v31  ;;  %v6710_v7 = vld [vmem:[#allocation8 + $0xb08] sm:$0xff]  ;;  %v6712_v31 = vld [vmem:[#allocation8 + $0xb18] sm:$0xff] }
 0xf62   :  { %6970 = vmatpush1.bf16.msra.mxu0 %v6501_v33  ;;  %7052 = vmatpush1.bf16.msra.mxu1 %v6503_v1  ;;  %v6709_v33 = vld [vmem:[#allocation8 + $0xb00] sm:$0xff]  ;;  %v6711_v1 = vld [vmem:[#allocation8 + $0xb10] sm:$0xff] }
 0xf63   :  { %6971 = vmatprep.subr.bf16.mxu0 %v6518_v41  ;;  %7053 = vmatprep.subr.bf16.mxu1 %v6520_v32  ;;  %v6726_v41 = vld [vmem:[#allocation8 + $0xb88] sm:$0xff]  ;;  %v6728_v32 = vld [vmem:[#allocation8 + $0xb98] sm:$0xff] }
 0xf66   :  { %6972 = vmatpush1.bf16.msra.mxu0 %v6517_v17  ;;  %7054 = vmatpush1.bf16.msra.mxu1 %v6519_v34  ;;  %v6725_v17 = vld [vmem:[#allocation8 + $0xb80] sm:$0xff]  ;;  %v6727_v34 = vld [vmem:[#allocation8 + $0xb90] sm:$0xff] }
 0xf67   :  { %6973 = vmatprep.subr.bf16.mxu0 %v6534_v45  ;;  %7055 = vmatprep.subr.bf16.mxu1 %v6536_v40  ;;  %v6742_v45 = vld [vmem:[#allocation8 + $0xc08] sm:$0xff]  ;;  %v6744_v40 = vld [vmem:[#allocation8 + $0xc18] sm:$0xff] }
 0xf6a   :  { %6974 = vmatpush1.bf16.msra.mxu0 %v6533_v15  ;;  %7056 = vmatpush1.bf16.msra.mxu1 %v6535_v46  ;;  %v6741_v15 = vld [vmem:[#allocation8 + $0xc00] sm:$0xff]  ;;  %v6743_v46 = vld [vmem:[#allocation8 + $0xc10] sm:$0xff] }
 0xf6b   :  { %6975 = vmatprep.subr.bf16.mxu0 %v6550_v4  ;;  %7057 = vmatprep.subr.bf16.mxu1 %v6552_v27  ;;  %v6758_v4 = vld [vmem:[#allocation8 + $0xc88] sm:$0xff]  ;;  %v6760_v27 = vld [vmem:[#allocation8 + $0xc98] sm:$0xff] }
 0xf6e   :  { %6976 = vmatpush1.bf16.msra.mxu0 %v6549_v47  ;;  %7058 = vmatpush1.bf16.msra.mxu1 %v6551_v48  ;;  %v6757_v47 = vld [vmem:[#allocation8 + $0xc80] sm:$0xff]  ;;  %v6759_v48 = vld [vmem:[#allocation8 + $0xc90] sm:$0xff] }
 0xf6f   :  { %6977 = vmatprep.subr.bf16.mxu0 %v6566_v5  ;;  %7059 = vmatprep.subr.bf16.mxu1 %v6568_v52  ;;  %v6774_v5 = vld [vmem:[#allocation8 + $0xd08] sm:$0xff]  ;;  %v6776_v52 = vld [vmem:[#allocation8 + $0xd18] sm:$0xff] }
 0xf72   :  { %6978 = vmatpush1.bf16.msra.mxu0 %v6565_v53  ;;  %7060 = vmatpush1.bf16.msra.mxu1 %v6567_v54  ;;  %v6773_v53 = vld [vmem:[#allocation8 + $0xd00] sm:$0xff]  ;;  %v6775_v54 = vld [vmem:[#allocation8 + $0xd10] sm:$0xff] }
 0xf73   :  { %6979 = vmatprep.subr.bf16.mxu0 %v6582_v11  ;;  %7061 = vmatprep.subr.bf16.mxu1 %v6584_v55  ;;  %v6790_v11 = vld [vmem:[#allocation8 + $0xd88] sm:$0xff]  ;;  %v6792_v55 = vld [vmem:[#allocation8 + $0xd98] sm:$0xff] }
 0xf76   :  { %6980 = vmatpush1.bf16.msra.mxu0 %v6581_v56  ;;  %7062 = vmatpush1.bf16.msra.mxu1 %v6583_v18  ;;  %v6789_v56 = vld [vmem:[#allocation8 + $0xd80] sm:$0xff]  ;;  %v6791_v18 = vld [vmem:[#allocation8 + $0xd90] sm:$0xff] }
 0xf77   :  { %6981 = vmatprep.subr.bf16.mxu0 %v6598_v35  ;;  %7063 = vmatprep.subr.bf16.mxu1 %v6600_v57  ;;  %v6806_v35 = vld [vmem:[#allocation8 + $0xe08] sm:$0xff]  ;;  %v6808_v57 = vld [vmem:[#allocation8 + $0xe18] sm:$0xff] }
 0xf7a   :  { %6982 = vmatpush1.bf16.msra.mxu0 %v6597_v63  ;;  %7064 = vmatpush1.bf16.msra.mxu1 %v6599_v26  ;;  %v6805_v63 = vld [vmem:[#allocation8 + $0xe00] sm:$0xff]  ;;  %v6807_v26 = vld [vmem:[#allocation8 + $0xe10] sm:$0xff] }
 0xf7b   :  { %6992 = vmatprep.subr.bf16.mxu0 %v6614_v6  ;;  %7074 = vmatprep.subr.bf16.mxu1 %v6616_v58  ;;  %v6822_v6 = vld [vmem:[#allocation8 + $0xe88] sm:$0xff]  ;;  %v6824_v58 = vld [vmem:[#allocation8 + $0xe98] sm:$0xff] }
 0xf7d   :  { %6984 = vmatmul.mubr.bf16.vlgmr.msra.gmra.mrb[40].mxu0 %v8697_v25  ;;  %7066 = vmatmul.mubr.bf16.vlgmr.msra.gmra.mrb[40].mxu1 %v8697_v25 }
 0xf7e   :  { %6993 = vmatpush1.bf16.msra.mxu0 %v6613_v59  ;;  %7075 = vmatpush1.bf16.msra.mxu1 %v6615_v60  ;;  %v6821_v59 = vld [vmem:[#allocation8 + $0xe80] sm:$0xff]  ;;  %v6823_v60 = vld [vmem:[#allocation8 + $0xe90] sm:$0xff] }
 0xf7f   :  { %6994 = vmatprep.subr.bf16.mxu0 %v6630_v28  ;;  %7076 = vmatprep.subr.bf16.mxu1 %v6632_v9  ;;  %v6838_v28 = vld [vmem:[#allocation8 + $0xf08] sm:$0xff]  ;;  %v6840_v9 = vld [vmem:[#allocation8 + $0xf18] sm:$0xff] }
 0xf80   :  { %7024 = vmatprep.mubr.bf16.mxu0 %v8703_v51  ;;  %7106 = vmatprep.mubr.bf16.mxu1 %v8703_v51 }
 0xf82   :  { %6995 = vmatpush1.bf16.msra.mxu0 %v6629_v2  ;;  %7077 = vmatpush1.bf16.msra.mxu1 %v6631_v16  ;;  %v6837_v2 = vld [vmem:[#allocation8 + $0xf00] sm:$0xff]  ;;  %v6839_v16 = vld [vmem:[#allocation8 + $0xf10] sm:$0xff] }
 0xf83   :  { %6996 = vmatprep.subr.bf16.mxu0 %v6646_v61  ;;  %7078 = vmatprep.subr.bf16.mxu1 %v6648_v13  ;;  %v6854_v61 = vld [vmem:[#allocation8 + $0xf88] sm:$0xff]  ;;  %v6856_v13 = vld [vmem:[#allocation8 + $0xf98] sm:$0xff] }
 0xf86   :  { %6997 = vmatpush1.bf16.msra.mxu0 %v6645_v14  ;;  %7079 = vmatpush1.bf16.msra.mxu1 %v6647_v21  ;;  %v6853_v14 = vld [vmem:[#allocation8 + $0xf80] sm:$0xff]  ;;  %v6855_v21 = vld [vmem:[#allocation8 + $0xf90] sm:$0xff] }
 0xf87   :  { %6998 = vmatprep.subr.bf16.mxu0 %v6662_v3  ;;  %7080 = vmatprep.subr.bf16.mxu1 %v6664_v12  ;;  %v6362_v3 = vld [vmem:[#allocation8 + $0x28] sm:$0xff]  ;;  %v6364_v12 = vld [vmem:[#allocation8 + $0x38] sm:$0xff] }
 0xf8a   :  { %6999 = vmatpush1.bf16.msra.mxu0 %v6661_v62  ;;  %7081 = vmatpush1.bf16.msra.mxu1 %v6663_v36  ;;  %v6361_v62 = vld [vmem:[#allocation8 + $0x20] sm:$0xff]  ;;  %v6363_v36 = vld [vmem:[#allocation8 + $0x30] sm:$0xff] }
 0xf8b   :  { %7000 = vmatprep.subr.bf16.mxu0 %v6678_v24  ;;  %7082 = vmatprep.subr.bf16.mxu1 %v6680_v49  ;;  %v6378_v24 = vld [vmem:[#allocation8 + $0xa8] sm:$0xff]  ;;  %v6380_v49 = vld [vmem:[#allocation8 + $0xb8] sm:$0xff] }
 0xf8e   :  { %7001 = vmatpush1.bf16.msra.mxu0 %v6677_v0  ;;  %7083 = vmatpush1.bf16.msra.mxu1 %v6679_v42  ;;  %v6377_v0 = vld [vmem:[#allocation8 + $0xa0] sm:$0xff]  ;;  %v6379_v42 = vld [vmem:[#allocation8 + $0xb0] sm:$0xff] }
 0xf8f   :  { %7002 = vmatprep.subr.bf16.mxu0 %v6694_v10  ;;  %7084 = vmatprep.subr.bf16.mxu1 %v6696_v8  ;;  %v6394_v10 = vld [vmem:[#allocation8 + $0x128] sm:$0xff]  ;;  %v6396_v8 = vld [vmem:[#allocation8 + $0x138] sm:$0xff] }
 0xf92   :  { %7003 = vmatpush1.bf16.msra.mxu0 %v6693_v29  ;;  %7085 = vmatpush1.bf16.msra.mxu1 %v6695_v30  ;;  %v6393_v29 = vld [vmem:[#allocation8 + $0x120] sm:$0xff]  ;;  %v6395_v30 = vld [vmem:[#allocation8 + $0x130] sm:$0xff] }
 0xf93   :  { %7004 = vmatprep.subr.bf16.mxu0 %v6710_v7  ;;  %7086 = vmatprep.subr.bf16.mxu1 %v6712_v31  ;;  %v6410_v7 = vld [vmem:[#allocation8 + $0x1a8] sm:$0xff]  ;;  %v6412_v31 = vld [vmem:[#allocation8 + $0x1b8] sm:$0xff] }
 0xf96   :  { %7005 = vmatpush1.bf16.msra.mxu0 %v6709_v33  ;;  %7087 = vmatpush1.bf16.msra.mxu1 %v6711_v1  ;;  %v6409_v33 = vld [vmem:[#allocation8 + $0x1a0] sm:$0xff]  ;;  %v6411_v1 = vld [vmem:[#allocation8 + $0x1b0] sm:$0xff] }
 0xf97   :  { %7006 = vmatprep.subr.bf16.mxu0 %v6726_v41  ;;  %7088 = vmatprep.subr.bf16.mxu1 %v6728_v32  ;;  %v6426_v41 = vld [vmem:[#allocation8 + $0x228] sm:$0xff]  ;;  %v6428_v32 = vld [vmem:[#allocation8 + $0x238] sm:$0xff] }
 0xf9a   :  { %7007 = vmatpush1.bf16.msra.mxu0 %v6725_v17  ;;  %7089 = vmatpush1.bf16.msra.mxu1 %v6727_v34  ;;  %v6425_v17 = vld [vmem:[#allocation8 + $0x220] sm:$0xff]  ;;  %v6427_v34 = vld [vmem:[#allocation8 + $0x230] sm:$0xff] }
 0xf9b   :  { %7008 = vmatprep.subr.bf16.mxu0 %v6742_v45  ;;  %7090 = vmatprep.subr.bf16.mxu1 %v6744_v40  ;;  %v6442_v45 = vld [vmem:[#allocation8 + $0x2a8] sm:$0xff]  ;;  %v6444_v40 = vld [vmem:[#allocation8 + $0x2b8] sm:$0xff] }
 0xf9e   :  { %7009 = vmatpush1.bf16.msra.mxu0 %v6741_v15  ;;  %7091 = vmatpush1.bf16.msra.mxu1 %v6743_v46  ;;  %v6441_v15 = vld [vmem:[#allocation8 + $0x2a0] sm:$0xff]  ;;  %v6443_v46 = vld [vmem:[#allocation8 + $0x2b0] sm:$0xff] }
 0xf9f   :  { %7010 = vmatprep.subr.bf16.mxu0 %v6758_v4  ;;  %7092 = vmatprep.subr.bf16.mxu1 %v6760_v27  ;;  %v6458_v4 = vld [vmem:[#allocation8 + $0x328] sm:$0xff]  ;;  %v6460_v27 = vld [vmem:[#allocation8 + $0x338] sm:$0xff] }
 0xfa2   :  { %7011 = vmatpush1.bf16.msra.mxu0 %v6757_v47  ;;  %7093 = vmatpush1.bf16.msra.mxu1 %v6759_v48  ;;  %v6457_v47 = vld [vmem:[#allocation8 + $0x320] sm:$0xff]  ;;  %v6459_v48 = vld [vmem:[#allocation8 + $0x330] sm:$0xff] }
 0xfa3   :  { %7012 = vmatprep.subr.bf16.mxu0 %v6774_v5  ;;  %7094 = vmatprep.subr.bf16.mxu1 %v6776_v52  ;;  %v6474_v5 = vld [vmem:[#allocation8 + $0x3a8] sm:$0xff]  ;;  %v6476_v52 = vld [vmem:[#allocation8 + $0x3b8] sm:$0xff] }
 0xfa6   :  { %7013 = vmatpush1.bf16.msra.mxu0 %v6773_v53  ;;  %7095 = vmatpush1.bf16.msra.mxu1 %v6775_v54  ;;  %v6473_v53 = vld [vmem:[#allocation8 + $0x3a0] sm:$0xff]  ;;  %v6475_v54 = vld [vmem:[#allocation8 + $0x3b0] sm:$0xff] }
 0xfa7   :  { %7014 = vmatprep.subr.bf16.mxu0 %v6790_v11  ;;  %7096 = vmatprep.subr.bf16.mxu1 %v6792_v55  ;;  %v6490_v11 = vld [vmem:[#allocation8 + $0x428] sm:$0xff]  ;;  %v6492_v55 = vld [vmem:[#allocation8 + $0x438] sm:$0xff] }
 0xfaa   :  { %7015 = vmatpush1.bf16.msra.mxu0 %v6789_v56  ;;  %7097 = vmatpush1.bf16.msra.mxu1 %v6791_v18  ;;  %v6489_v56 = vld [vmem:[#allocation8 + $0x420] sm:$0xff]  ;;  %v6491_v18 = vld [vmem:[#allocation8 + $0x430] sm:$0xff] }
 0xfab   :  { %7016 = vmatprep.subr.bf16.mxu0 %v6806_v35  ;;  %7098 = vmatprep.subr.bf16.mxu1 %v6808_v57  ;;  %v6506_v35 = vld [vmem:[#allocation8 + $0x4a8] sm:$0xff]  ;;  %v6508_v57 = vld [vmem:[#allocation8 + $0x4b8] sm:$0xff] }
 0xfae   :  { %7017 = vmatpush1.bf16.msra.mxu0 %v6805_v63  ;;  %7099 = vmatpush1.bf16.msra.mxu1 %v6807_v26  ;;  %v6505_v63 = vld [vmem:[#allocation8 + $0x4a0] sm:$0xff]  ;;  %v6507_v26 = vld [vmem:[#allocation8 + $0x4b0] sm:$0xff] }
 0xfaf   :  { %7018 = vmatprep.subr.bf16.mxu0 %v6822_v6  ;;  %7100 = vmatprep.subr.bf16.mxu1 %v6824_v58  ;;  %v6522_v6 = vld [vmem:[#allocation8 + $0x528] sm:$0xff]  ;;  %v6524_v58 = vld [vmem:[#allocation8 + $0x538] sm:$0xff] }
 0xfb2   :  { %7019 = vmatpush1.bf16.msra.mxu0 %v6821_v59  ;;  %7101 = vmatpush1.bf16.msra.mxu1 %v6823_v60  ;;  %v6521_v59 = vld [vmem:[#allocation8 + $0x520] sm:$0xff]  ;;  %v6523_v60 = vld [vmem:[#allocation8 + $0x530] sm:$0xff] }
 0xfb3   :  { %7020 = vmatprep.subr.bf16.mxu0 %v6838_v28  ;;  %7102 = vmatprep.subr.bf16.mxu1 %v6840_v9  ;;  %v6538_v28 = vld [vmem:[#allocation8 + $0x5a8] sm:$0xff]  ;;  %v6540_v9 = vld [vmem:[#allocation8 + $0x5b8] sm:$0xff] }
 0xfb6   :  { %7021 = vmatpush1.bf16.msra.mxu0 %v6837_v2  ;;  %7103 = vmatpush1.bf16.msra.mxu1 %v6839_v16  ;;  %v6537_v2 = vld [vmem:[#allocation8 + $0x5a0] sm:$0xff]  ;;  %v6539_v16 = vld [vmem:[#allocation8 + $0x5b0] sm:$0xff] }
 0xfb7   :  { %7022 = vmatprep.subr.bf16.mxu0 %v6854_v61  ;;  %7104 = vmatprep.subr.bf16.mxu1 %v6856_v13  ;;  %v6554_v61 = vld [vmem:[#allocation8 + $0x628] sm:$0xff]  ;;  %v6556_v13 = vld [vmem:[#allocation8 + $0x638] sm:$0xff] }
 0xfba   :  { %7023 = vmatpush1.bf16.msra.mxu0 %v6853_v14  ;;  %7105 = vmatpush1.bf16.msra.mxu1 %v6855_v21  ;;  %v6553_v14 = vld [vmem:[#allocation8 + $0x620] sm:$0xff]  ;;  %v6555_v21 = vld [vmem:[#allocation8 + $0x630] sm:$0xff] }
 0xfbb   :  { %7115 = vmatprep.subr.bf16.mxu0 %v6362_v3  ;;  %7197 = vmatprep.subr.bf16.mxu1 %v6364_v12  ;;  %v6570_v3 = vld [vmem:[#allocation8 + $0x6a8] sm:$0xff]  ;;  %v6572_v12 = vld [vmem:[#allocation8 + $0x6b8] sm:$0xff] }
 0xfbd   :  { %7025 = vmatmul.mubr.bf16.vlgmr.msra.gmra.mrb[40].mxu0 %v8699_v37  ;;  %7107 = vmatmul.mubr.bf16.vlgmr.msra.gmra.mrb[40].mxu1 %v8699_v37 }
 0xfbe   :  { %7116 = vmatpush1.bf16.msra.mxu0 %v6361_v62  ;;  %7198 = vmatpush1.bf16.msra.mxu1 %v6363_v36  ;;  %v6569_v62 = vld [vmem:[#allocation8 + $0x6a0] sm:$0xff]  ;;  %v6571_v36 = vld [vmem:[#allocation8 + $0x6b0] sm:$0xff] }
 0xfbf   :  { %7117 = vmatprep.subr.bf16.mxu0 %v6378_v24  ;;  %7199 = vmatprep.subr.bf16.mxu1 %v6380_v49  ;;  %v6586_v24 = vld [vmem:[#allocation8 + $0x728] sm:$0xff]  ;;  %v6588_v49 = vld [vmem:[#allocation8 + $0x738] sm:$0xff] }
 0xfc0   :  { %7147 = vmatprep.mubr.bf16.mxu0 %v8701_v50  ;;  %7229 = vmatprep.mubr.bf16.mxu1 %v8701_v50 }
 0xfc2   :  { %7118 = vmatpush1.bf16.msra.mxu0 %v6377_v0  ;;  %7200 = vmatpush1.bf16.msra.mxu1 %v6379_v42  ;;  %v6585_v0 = vld [vmem:[#allocation8 + $0x720] sm:$0xff]  ;;  %v6587_v42 = vld [vmem:[#allocation8 + $0x730] sm:$0xff] }
 0xfc3   :  { %7119 = vmatprep.subr.bf16.mxu0 %v6394_v10  ;;  %7201 = vmatprep.subr.bf16.mxu1 %v6396_v8  ;;  %v6602_v10 = vld [vmem:[#allocation8 + $0x7a8] sm:$0xff]  ;;  %v6604_v8 = vld [vmem:[#allocation8 + $0x7b8] sm:$0xff] }
 0xfc6   :  { %7120 = vmatpush1.bf16.msra.mxu0 %v6393_v29  ;;  %7202 = vmatpush1.bf16.msra.mxu1 %v6395_v30  ;;  %v6601_v29 = vld [vmem:[#allocation8 + $0x7a0] sm:$0xff]  ;;  %v6603_v30 = vld [vmem:[#allocation8 + $0x7b0] sm:$0xff] }
 0xfc7   :  { %7121 = vmatprep.subr.bf16.mxu0 %v6410_v7  ;;  %7203 = vmatprep.subr.bf16.mxu1 %v6412_v31  ;;  %v6618_v7 = vld [vmem:[#allocation8 + $0x828] sm:$0xff]  ;;  %v6620_v31 = vld [vmem:[#allocation8 + $0x838] sm:$0xff] }
 0xfca   :  { %7122 = vmatpush1.bf16.msra.mxu0 %v6409_v33  ;;  %7204 = vmatpush1.bf16.msra.mxu1 %v6411_v1  ;;  %v6617_v33 = vld [vmem:[#allocation8 + $0x820] sm:$0xff]  ;;  %v6619_v1 = vld [vmem:[#allocation8 + $0x830] sm:$0xff] }
 0xfcb   :  { %7123 = vmatprep.subr.bf16.mxu0 %v6426_v41  ;;  %7205 = vmatprep.subr.bf16.mxu1 %v6428_v32  ;;  %v6634_v41 = vld [vmem:[#allocation8 + $0x8a8] sm:$0xff]  ;;  %v6636_v32 = vld [vmem:[#allocation8 + $0x8b8] sm:$0xff] }
 0xfce   :  { %7124 = vmatpush1.bf16.msra.mxu0 %v6425_v17  ;;  %7206 = vmatpush1.bf16.msra.mxu1 %v6427_v34  ;;  %v6633_v17 = vld [vmem:[#allocation8 + $0x8a0] sm:$0xff]  ;;  %v6635_v34 = vld [vmem:[#allocation8 + $0x8b0] sm:$0xff] }
 0xfcf   :  { %7125 = vmatprep.subr.bf16.mxu0 %v6442_v45  ;;  %7207 = vmatprep.subr.bf16.mxu1 %v6444_v40  ;;  %v6650_v45 = vld [vmem:[#allocation8 + $0x928] sm:$0xff]  ;;  %v6652_v40 = vld [vmem:[#allocation8 + $0x938] sm:$0xff] }
 0xfd2   :  { %7126 = vmatpush1.bf16.msra.mxu0 %v6441_v15  ;;  %7208 = vmatpush1.bf16.msra.mxu1 %v6443_v46  ;;  %v6649_v15 = vld [vmem:[#allocation8 + $0x920] sm:$0xff]  ;;  %v6651_v46 = vld [vmem:[#allocation8 + $0x930] sm:$0xff] }
 0xfd3   :  { %7127 = vmatprep.subr.bf16.mxu0 %v6458_v4  ;;  %7209 = vmatprep.subr.bf16.mxu1 %v6460_v27  ;;  %v6666_v4 = vld [vmem:[#allocation8 + $0x9a8] sm:$0xff]  ;;  %v6668_v27 = vld [vmem:[#allocation8 + $0x9b8] sm:$0xff] }
 0xfd6   :  { %7128 = vmatpush1.bf16.msra.mxu0 %v6457_v47  ;;  %7210 = vmatpush1.bf16.msra.mxu1 %v6459_v48  ;;  %v6665_v47 = vld [vmem:[#allocation8 + $0x9a0] sm:$0xff]  ;;  %v6667_v48 = vld [vmem:[#allocation8 + $0x9b0] sm:$0xff] }
 0xfd7   :  { %7129 = vmatprep.subr.bf16.mxu0 %v6474_v5  ;;  %7211 = vmatprep.subr.bf16.mxu1 %v6476_v52  ;;  %v6682_v5 = vld [vmem:[#allocation8 + $0xa28] sm:$0xff]  ;;  %v6684_v52 = vld [vmem:[#allocation8 + $0xa38] sm:$0xff] }
 0xfda   :  { %7130 = vmatpush1.bf16.msra.mxu0 %v6473_v53  ;;  %7212 = vmatpush1.bf16.msra.mxu1 %v6475_v54  ;;  %v6681_v53 = vld [vmem:[#allocation8 + $0xa20] sm:$0xff]  ;;  %v6683_v54 = vld [vmem:[#allocation8 + $0xa30] sm:$0xff] }
 0xfdb   :  { %7131 = vmatprep.subr.bf16.mxu0 %v6490_v11  ;;  %7213 = vmatprep.subr.bf16.mxu1 %v6492_v55  ;;  %v6698_v11 = vld [vmem:[#allocation8 + $0xaa8] sm:$0xff]  ;;  %v6700_v55 = vld [vmem:[#allocation8 + $0xab8] sm:$0xff] }
 0xfde   :  { %7132 = vmatpush1.bf16.msra.mxu0 %v6489_v56  ;;  %7214 = vmatpush1.bf16.msra.mxu1 %v6491_v18  ;;  %v6697_v56 = vld [vmem:[#allocation8 + $0xaa0] sm:$0xff]  ;;  %v6699_v18 = vld [vmem:[#allocation8 + $0xab0] sm:$0xff] }
 0xfdf   :  { %7133 = vmatprep.subr.bf16.mxu0 %v6506_v35  ;;  %7215 = vmatprep.subr.bf16.mxu1 %v6508_v57  ;;  %v6714_v35 = vld [vmem:[#allocation8 + $0xb28] sm:$0xff]  ;;  %v6716_v57 = vld [vmem:[#allocation8 + $0xb38] sm:$0xff] }
 0xfe2   :  { %7134 = vmatpush1.bf16.msra.mxu0 %v6505_v63  ;;  %7216 = vmatpush1.bf16.msra.mxu1 %v6507_v26  ;;  %v6713_v63 = vld [vmem:[#allocation8 + $0xb20] sm:$0xff]  ;;  %v6715_v26 = vld [vmem:[#allocation8 + $0xb30] sm:$0xff] }
 0xfe3   :  { %7135 = vmatprep.subr.bf16.mxu0 %v6522_v6  ;;  %7217 = vmatprep.subr.bf16.mxu1 %v6524_v58  ;;  %v6730_v6 = vld [vmem:[#allocation8 + $0xba8] sm:$0xff]  ;;  %v6732_v58 = vld [vmem:[#allocation8 + $0xbb8] sm:$0xff] }
 0xfe6   :  { %7136 = vmatpush1.bf16.msra.mxu0 %v6521_v59  ;;  %7218 = vmatpush1.bf16.msra.mxu1 %v6523_v60  ;;  %v6729_v59 = vld [vmem:[#allocation8 + $0xba0] sm:$0xff]  ;;  %v6731_v60 = vld [vmem:[#allocation8 + $0xbb0] sm:$0xff] }
 0xfe7   :  { %7137 = vmatprep.subr.bf16.mxu0 %v6538_v28  ;;  %7219 = vmatprep.subr.bf16.mxu1 %v6540_v9  ;;  %v6746_v28 = vld [vmem:[#allocation8 + $0xc28] sm:$0xff]  ;;  %v6748_v9 = vld [vmem:[#allocation8 + $0xc38] sm:$0xff] }
 0xfea   :  { %7138 = vmatpush1.bf16.msra.mxu0 %v6537_v2  ;;  %7220 = vmatpush1.bf16.msra.mxu1 %v6539_v16  ;;  %v6745_v2 = vld [vmem:[#allocation8 + $0xc20] sm:$0xff]  ;;  %v6747_v16 = vld [vmem:[#allocation8 + $0xc30] sm:$0xff] }
 0xfeb   :  { %7139 = vmatprep.subr.bf16.mxu0 %v6554_v61  ;;  %7221 = vmatprep.subr.bf16.mxu1 %v6556_v13  ;;  %v6762_v61 = vld [vmem:[#allocation8 + $0xca8] sm:$0xff]  ;;  %v6764_v13 = vld [vmem:[#allocation8 + $0xcb8] sm:$0xff] }
 0xfee   :  { %7140 = vmatpush1.bf16.msra.mxu0 %v6553_v14  ;;  %7222 = vmatpush1.bf16.msra.mxu1 %v6555_v21  ;;  %v6761_v14 = vld [vmem:[#allocation8 + $0xca0] sm:$0xff]  ;;  %v6763_v21 = vld [vmem:[#allocation8 + $0xcb0] sm:$0xff] }
 0xfef   :  { %7141 = vmatprep.subr.bf16.mxu0 %v6570_v3  ;;  %7223 = vmatprep.subr.bf16.mxu1 %v6572_v12  ;;  %v6778_v3 = vld [vmem:[#allocation8 + $0xd28] sm:$0xff]  ;;  %v6780_v12 = vld [vmem:[#allocation8 + $0xd38] sm:$0xff] }
 0xff2   :  { %7142 = vmatpush1.bf16.msra.mxu0 %v6569_v62  ;;  %7224 = vmatpush1.bf16.msra.mxu1 %v6571_v36  ;;  %v6777_v62 = vld [vmem:[#allocation8 + $0xd20] sm:$0xff]  ;;  %v6779_v36 = vld [vmem:[#allocation8 + $0xd30] sm:$0xff] }
 0xff3   :  { %7143 = vmatprep.subr.bf16.mxu0 %v6586_v24  ;;  %7225 = vmatprep.subr.bf16.mxu1 %v6588_v49  ;;  %v6794_v24 = vld [vmem:[#allocation8 + $0xda8] sm:$0xff]  ;;  %v6796_v49 = vld [vmem:[#allocation8 + $0xdb8] sm:$0xff] }
 0xff6   :  { %7144 = vmatpush1.bf16.msra.mxu0 %v6585_v0  ;;  %7226 = vmatpush1.bf16.msra.mxu1 %v6587_v42  ;;  %v6793_v0 = vld [vmem:[#allocation8 + $0xda0] sm:$0xff]  ;;  %v6795_v42 = vld [vmem:[#allocation8 + $0xdb0] sm:$0xff] }
 0xff7   :  { %7145 = vmatprep.subr.bf16.mxu0 %v6602_v10  ;;  %7227 = vmatprep.subr.bf16.mxu1 %v6604_v8  ;;  %v6810_v10 = vld [vmem:[#allocation8 + $0xe28] sm:$0xff]  ;;  %v6812_v8 = vld [vmem:[#allocation8 + $0xe38] sm:$0xff] }
 0xffa   :  { %7146 = vmatpush1.bf16.msra.mxu0 %v6601_v29  ;;  %7228 = vmatpush1.bf16.msra.mxu1 %v6603_v30  ;;  %v6809_v29 = vld [vmem:[#allocation8 + $0xe20] sm:$0xff]  ;;  %v6811_v30 = vld [vmem:[#allocation8 + $0xe30] sm:$0xff] }
 0xffb   :  { %7156 = vmatprep.subr.bf16.mxu0 %v6618_v7  ;;  %7238 = vmatprep.subr.bf16.mxu1 %v6620_v31  ;;  %v6826_v7 = vld [vmem:[#allocation8 + $0xea8] sm:$0xff]  ;;  %v6828_v31 = vld [vmem:[#allocation8 + $0xeb8] sm:$0xff] }
 0xffd   :  { %7148 = vmatmul.mubr.bf16.vlgmr.msra.gmra.mrb[44].mxu0 %v8697_v25  ;;  %7230 = vmatmul.mubr.bf16.vlgmr.msra.gmra.mrb[44].mxu1 %v8697_v25 }
 0xffe   :  { %7157 = vmatpush1.bf16.msra.mxu0 %v6617_v33  ;;  %7239 = vmatpush1.bf16.msra.mxu1 %v6619_v1  ;;  %v6825_v33 = vld [vmem:[#allocation8 + $0xea0] sm:$0xff]  ;;  %v6827_v1 = vld [vmem:[#allocation8 + $0xeb0] sm:$0xff] }
 0xfff   :  { %7158 = vmatprep.subr.bf16.mxu0 %v6634_v41  ;;  %7240 = vmatprep.subr.bf16.mxu1 %v6636_v32  ;;  %v6842_v41 = vld [vmem:[#allocation8 + $0xf28] sm:$0xff]  ;;  %v6844_v32 = vld [vmem:[#allocation8 + $0xf38] sm:$0xff] }
0x1000   :  { %7188 = vmatprep.mubr.bf16.mxu0 %v8703_v51  ;;  %7270 = vmatprep.mubr.bf16.mxu1 %v8703_v51 }
0x1002   :  { %7159 = vmatpush1.bf16.msra.mxu0 %v6633_v17  ;;  %7241 = vmatpush1.bf16.msra.mxu1 %v6635_v34  ;;  %v6841_v17 = vld [vmem:[#allocation8 + $0xf20] sm:$0xff]  ;;  %v6843_v34 = vld [vmem:[#allocation8 + $0xf30] sm:$0xff] }
0x1003   :  { %7160 = vmatprep.subr.bf16.mxu0 %v6650_v45  ;;  %7242 = vmatprep.subr.bf16.mxu1 %v6652_v40  ;;  %v6858_v45 = vld [vmem:[#allocation8 + $0xfa8] sm:$0xff]  ;;  %v6860_v40 = vld [vmem:[#allocation8 + $0xfb8] sm:$0xff] }
0x1006   :  { %7161 = vmatpush1.bf16.msra.mxu0 %v6649_v15  ;;  %7243 = vmatpush1.bf16.msra.mxu1 %v6651_v46  ;;  %v6857_v15 = vld [vmem:[#allocation8 + $0xfa0] sm:$0xff]  ;;  %v6859_v46 = vld [vmem:[#allocation8 + $0xfb0] sm:$0xff] }
0x1007   :  { %7162 = vmatprep.subr.bf16.mxu0 %v6666_v4  ;;  %7244 = vmatprep.subr.bf16.mxu1 %v6668_v27  ;;  %v6366_v4 = vld [vmem:[#allocation8 + $0x48] sm:$0xff]  ;;  %v6368_v27 = vld [vmem:[#allocation8 + $0x58] sm:$0xff] }
0x100a   :  { %7163 = vmatpush1.bf16.msra.mxu0 %v6665_v47  ;;  %7245 = vmatpush1.bf16.msra.mxu1 %v6667_v48  ;;  %v6365_v47 = vld [vmem:[#allocation8 + $0x40] sm:$0xff]  ;;  %v6367_v48 = vld [vmem:[#allocation8 + $0x50] sm:$0xff] }
0x100b   :  { %7164 = vmatprep.subr.bf16.mxu0 %v6682_v5  ;;  %7246 = vmatprep.subr.bf16.mxu1 %v6684_v52  ;;  %v6382_v5 = vld [vmem:[#allocation8 + $0xc8] sm:$0xff]  ;;  %v6384_v52 = vld [vmem:[#allocation8 + $0xd8] sm:$0xff] }
0x100e   :  { %7165 = vmatpush1.bf16.msra.mxu0 %v6681_v53  ;;  %7247 = vmatpush1.bf16.msra.mxu1 %v6683_v54  ;;  %v6381_v53 = vld [vmem:[#allocation8 + $0xc0] sm:$0xff]  ;;  %v6383_v54 = vld [vmem:[#allocation8 + $0xd0] sm:$0xff] }
0x100f   :  { %7166 = vmatprep.subr.bf16.mxu0 %v6698_v11  ;;  %7248 = vmatprep.subr.bf16.mxu1 %v6700_v55  ;;  %v6398_v11 = vld [vmem:[#allocation8 + $0x148] sm:$0xff]  ;;  %v6400_v55 = vld [vmem:[#allocation8 + $0x158] sm:$0xff] }
0x1012   :  { %7167 = vmatpush1.bf16.msra.mxu0 %v6697_v56  ;;  %7249 = vmatpush1.bf16.msra.mxu1 %v6699_v18  ;;  %v6397_v56 = vld [vmem:[#allocation8 + $0x140] sm:$0xff]  ;;  %v6399_v18 = vld [vmem:[#allocation8 + $0x150] sm:$0xff] }
0x1013   :  { %7168 = vmatprep.subr.bf16.mxu0 %v6714_v35  ;;  %7250 = vmatprep.subr.bf16.mxu1 %v6716_v57  ;;  %v6414_v35 = vld [vmem:[#allocation8 + $0x1c8] sm:$0xff]  ;;  %v6416_v57 = vld [vmem:[#allocation8 + $0x1d8] sm:$0xff] }
0x1016   :  { %7169 = vmatpush1.bf16.msra.mxu0 %v6713_v63  ;;  %7251 = vmatpush1.bf16.msra.mxu1 %v6715_v26  ;;  %v6413_v63 = vld [vmem:[#allocation8 + $0x1c0] sm:$0xff]  ;;  %v6415_v26 = vld [vmem:[#allocation8 + $0x1d0] sm:$0xff] }
0x1017   :  { %7170 = vmatprep.subr.bf16.mxu0 %v6730_v6  ;;  %7252 = vmatprep.subr.bf16.mxu1 %v6732_v58  ;;  %v6430_v6 = vld [vmem:[#allocation8 + $0x248] sm:$0xff]  ;;  %v6432_v58 = vld [vmem:[#allocation8 + $0x258] sm:$0xff] }
0x101a   :  { %7171 = vmatpush1.bf16.msra.mxu0 %v6729_v59  ;;  %7253 = vmatpush1.bf16.msra.mxu1 %v6731_v60  ;;  %v6429_v59 = vld [vmem:[#allocation8 + $0x240] sm:$0xff]  ;;  %v6431_v60 = vld [vmem:[#allocation8 + $0x250] sm:$0xff] }
0x101b   :  { %7172 = vmatprep.subr.bf16.mxu0 %v6746_v28  ;;  %7254 = vmatprep.subr.bf16.mxu1 %v6748_v9  ;;  %v6446_v28 = vld [vmem:[#allocation8 + $0x2c8] sm:$0xff]  ;;  %v6448_v9 = vld [vmem:[#allocation8 + $0x2d8] sm:$0xff] }
0x101e   :  { %7173 = vmatpush1.bf16.msra.mxu0 %v6745_v2  ;;  %7255 = vmatpush1.bf16.msra.mxu1 %v6747_v16  ;;  %v6445_v2 = vld [vmem:[#allocation8 + $0x2c0] sm:$0xff]  ;;  %v6447_v16 = vld [vmem:[#allocation8 + $0x2d0] sm:$0xff] }
0x101f   :  { %7174 = vmatprep.subr.bf16.mxu0 %v6762_v61  ;;  %7256 = vmatprep.subr.bf16.mxu1 %v6764_v13  ;;  %v6462_v61 = vld [vmem:[#allocation8 + $0x348] sm:$0xff]  ;;  %v6464_v13 = vld [vmem:[#allocation8 + $0x358] sm:$0xff] }
0x1022   :  { %7175 = vmatpush1.bf16.msra.mxu0 %v6761_v14  ;;  %7257 = vmatpush1.bf16.msra.mxu1 %v6763_v21  ;;  %v6461_v14 = vld [vmem:[#allocation8 + $0x340] sm:$0xff]  ;;  %v6463_v21 = vld [vmem:[#allocation8 + $0x350] sm:$0xff] }
0x1023   :  { %7176 = vmatprep.subr.bf16.mxu0 %v6778_v3  ;;  %7258 = vmatprep.subr.bf16.mxu1 %v6780_v12  ;;  %v6478_v3 = vld [vmem:[#allocation8 + $0x3c8] sm:$0xff]  ;;  %v6480_v12 = vld [vmem:[#allocation8 + $0x3d8] sm:$0xff] }
0x1026   :  { %7177 = vmatpush1.bf16.msra.mxu0 %v6777_v62  ;;  %7259 = vmatpush1.bf16.msra.mxu1 %v6779_v36  ;;  %v6477_v62 = vld [vmem:[#allocation8 + $0x3c0] sm:$0xff]  ;;  %v6479_v36 = vld [vmem:[#allocation8 + $0x3d0] sm:$0xff] }
0x1027   :  { %7178 = vmatprep.subr.bf16.mxu0 %v6794_v24  ;;  %7260 = vmatprep.subr.bf16.mxu1 %v6796_v49  ;;  %v6494_v24 = vld [vmem:[#allocation8 + $0x448] sm:$0xff]  ;;  %v6496_v49 = vld [vmem:[#allocation8 + $0x458] sm:$0xff] }
0x102a   :  { %7179 = vmatpush1.bf16.msra.mxu0 %v6793_v0  ;;  %7261 = vmatpush1.bf16.msra.mxu1 %v6795_v42  ;;  %v6493_v0 = vld [vmem:[#allocation8 + $0x440] sm:$0xff]  ;;  %v6495_v42 = vld [vmem:[#allocation8 + $0x450] sm:$0xff] }
0x102b   :  { %7180 = vmatprep.subr.bf16.mxu0 %v6810_v10  ;;  %7262 = vmatprep.subr.bf16.mxu1 %v6812_v8  ;;  %v6510_v10 = vld [vmem:[#allocation8 + $0x4c8] sm:$0xff]  ;;  %v6512_v8 = vld [vmem:[#allocation8 + $0x4d8] sm:$0xff] }
0x102e   :  { %7181 = vmatpush1.bf16.msra.mxu0 %v6809_v29  ;;  %7263 = vmatpush1.bf16.msra.mxu1 %v6811_v30  ;;  %v6509_v29 = vld [vmem:[#allocation8 + $0x4c0] sm:$0xff]  ;;  %v6511_v30 = vld [vmem:[#allocation8 + $0x4d0] sm:$0xff] }
0x102f   :  { %7182 = vmatprep.subr.bf16.mxu0 %v6826_v7  ;;  %7264 = vmatprep.subr.bf16.mxu1 %v6828_v31  ;;  %v6526_v7 = vld [vmem:[#allocation8 + $0x548] sm:$0xff]  ;;  %v6528_v31 = vld [vmem:[#allocation8 + $0x558] sm:$0xff] }
0x1032   :  { %7183 = vmatpush1.bf16.msra.mxu0 %v6825_v33  ;;  %7265 = vmatpush1.bf16.msra.mxu1 %v6827_v1  ;;  %v6525_v33 = vld [vmem:[#allocation8 + $0x540] sm:$0xff]  ;;  %v6527_v1 = vld [vmem:[#allocation8 + $0x550] sm:$0xff] }
0x1033   :  { %7184 = vmatprep.subr.bf16.mxu0 %v6842_v41  ;;  %7266 = vmatprep.subr.bf16.mxu1 %v6844_v32  ;;  %v6542_v41 = vld [vmem:[#allocation8 + $0x5c8] sm:$0xff]  ;;  %v6544_v32 = vld [vmem:[#allocation8 + $0x5d8] sm:$0xff] }
0x1036   :  { %7185 = vmatpush1.bf16.msra.mxu0 %v6841_v17  ;;  %7267 = vmatpush1.bf16.msra.mxu1 %v6843_v34  ;;  %v6541_v17 = vld [vmem:[#allocation8 + $0x5c0] sm:$0xff]  ;;  %v6543_v34 = vld [vmem:[#allocation8 + $0x5d0] sm:$0xff] }
0x1037   :  { %7186 = vmatprep.subr.bf16.mxu0 %v6858_v45  ;;  %7268 = vmatprep.subr.bf16.mxu1 %v6860_v40  ;;  %v6558_v45 = vld [vmem:[#allocation8 + $0x648] sm:$0xff]  ;;  %v6560_v40 = vld [vmem:[#allocation8 + $0x658] sm:$0xff] }
0x103a   :  { %7187 = vmatpush1.bf16.msra.mxu0 %v6857_v15  ;;  %7269 = vmatpush1.bf16.msra.mxu1 %v6859_v46  ;;  %v6557_v15 = vld [vmem:[#allocation8 + $0x640] sm:$0xff]  ;;  %v6559_v46 = vld [vmem:[#allocation8 + $0x650] sm:$0xff] }
0x103b   :  { %7279 = vmatprep.subr.bf16.mxu0 %v6366_v4  ;;  %7361 = vmatprep.subr.bf16.mxu1 %v6368_v27  ;;  %v6574_v4 = vld [vmem:[#allocation8 + $0x6c8] sm:$0xff]  ;;  %v6576_v27 = vld [vmem:[#allocation8 + $0x6d8] sm:$0xff] }
0x103d   :  { %7189 = vmatmul.mubr.bf16.vlgmr.msra.gmra.mrb[44].mxu0 %v8699_v37  ;;  %7271 = vmatmul.mubr.bf16.vlgmr.msra.gmra.mrb[44].mxu1 %v8699_v37 }
0x103e   :  { %7280 = vmatpush1.bf16.msra.mxu0 %v6365_v47  ;;  %7362 = vmatpush1.bf16.msra.mxu1 %v6367_v48  ;;  %v6573_v47 = vld [vmem:[#allocation8 + $0x6c0] sm:$0xff]  ;;  %v6575_v48 = vld [vmem:[#allocation8 + $0x6d0] sm:$0xff] }
0x103f   :  { %7281 = vmatprep.subr.bf16.mxu0 %v6382_v5  ;;  %7363 = vmatprep.subr.bf16.mxu1 %v6384_v52  ;;  %v6590_v5 = vld [vmem:[#allocation8 + $0x748] sm:$0xff]  ;;  %v6592_v52 = vld [vmem:[#allocation8 + $0x758] sm:$0xff] }
0x1040   :  { %7311 = vmatprep.mubr.bf16.mxu0 %v8701_v50  ;;  %7393 = vmatprep.mubr.bf16.mxu1 %v8701_v50 }
0x1042   :  { %7282 = vmatpush1.bf16.msra.mxu0 %v6381_v53  ;;  %7364 = vmatpush1.bf16.msra.mxu1 %v6383_v54  ;;  %v6589_v53 = vld [vmem:[#allocation8 + $0x740] sm:$0xff]  ;;  %v6591_v54 = vld [vmem:[#allocation8 + $0x750] sm:$0xff] }
0x1043   :  { %7283 = vmatprep.subr.bf16.mxu0 %v6398_v11  ;;  %7365 = vmatprep.subr.bf16.mxu1 %v6400_v55  ;;  %v6606_v11 = vld [vmem:[#allocation8 + $0x7c8] sm:$0xff]  ;;  %v6608_v55 = vld [vmem:[#allocation8 + $0x7d8] sm:$0xff] }
0x1046   :  { %7284 = vmatpush1.bf16.msra.mxu0 %v6397_v56  ;;  %7366 = vmatpush1.bf16.msra.mxu1 %v6399_v18  ;;  %v6605_v56 = vld [vmem:[#allocation8 + $0x7c0] sm:$0xff]  ;;  %v6607_v18 = vld [vmem:[#allocation8 + $0x7d0] sm:$0xff] }
0x1047   :  { %7285 = vmatprep.subr.bf16.mxu0 %v6414_v35  ;;  %7367 = vmatprep.subr.bf16.mxu1 %v6416_v57  ;;  %v6622_v35 = vld [vmem:[#allocation8 + $0x848] sm:$0xff]  ;;  %v6624_v57 = vld [vmem:[#allocation8 + $0x858] sm:$0xff] }
0x104a   :  { %7286 = vmatpush1.bf16.msra.mxu0 %v6413_v63  ;;  %7368 = vmatpush1.bf16.msra.mxu1 %v6415_v26  ;;  %v6621_v63 = vld [vmem:[#allocation8 + $0x840] sm:$0xff]  ;;  %v6623_v26 = vld [vmem:[#allocation8 + $0x850] sm:$0xff] }
0x104b   :  { %7287 = vmatprep.subr.bf16.mxu0 %v6430_v6  ;;  %7369 = vmatprep.subr.bf16.mxu1 %v6432_v58  ;;  %v6638_v6 = vld [vmem:[#allocation8 + $0x8c8] sm:$0xff]  ;;  %v6640_v58 = vld [vmem:[#allocation8 + $0x8d8] sm:$0xff] }
0x104e   :  { %7288 = vmatpush1.bf16.msra.mxu0 %v6429_v59  ;;  %7370 = vmatpush1.bf16.msra.mxu1 %v6431_v60  ;;  %v6637_v59 = vld [vmem:[#allocation8 + $0x8c0] sm:$0xff]  ;;  %v6639_v60 = vld [vmem:[#allocation8 + $0x8d0] sm:$0xff] }
0x104f   :  { %7289 = vmatprep.subr.bf16.mxu0 %v6446_v28  ;;  %7371 = vmatprep.subr.bf16.mxu1 %v6448_v9  ;;  %v6654_v28 = vld [vmem:[#allocation8 + $0x948] sm:$0xff]  ;;  %v6656_v9 = vld [vmem:[#allocation8 + $0x958] sm:$0xff] }
0x1052   :  { %7290 = vmatpush1.bf16.msra.mxu0 %v6445_v2  ;;  %7372 = vmatpush1.bf16.msra.mxu1 %v6447_v16  ;;  %v6653_v2 = vld [vmem:[#allocation8 + $0x940] sm:$0xff]  ;;  %v6655_v16 = vld [vmem:[#allocation8 + $0x950] sm:$0xff] }
0x1053   :  { %7291 = vmatprep.subr.bf16.mxu0 %v6462_v61  ;;  %7373 = vmatprep.subr.bf16.mxu1 %v6464_v13  ;;  %v6670_v61 = vld [vmem:[#allocation8 + $0x9c8] sm:$0xff]  ;;  %v6672_v13 = vld [vmem:[#allocation8 + $0x9d8] sm:$0xff] }
0x1056   :  { %7292 = vmatpush1.bf16.msra.mxu0 %v6461_v14  ;;  %7374 = vmatpush1.bf16.msra.mxu1 %v6463_v21  ;;  %v6669_v14 = vld [vmem:[#allocation8 + $0x9c0] sm:$0xff]  ;;  %v6671_v21 = vld [vmem:[#allocation8 + $0x9d0] sm:$0xff] }
0x1057   :  { %7293 = vmatprep.subr.bf16.mxu0 %v6478_v3  ;;  %7375 = vmatprep.subr.bf16.mxu1 %v6480_v12  ;;  %v6686_v3 = vld [vmem:[#allocation8 + $0xa48] sm:$0xff]  ;;  %v6688_v12 = vld [vmem:[#allocation8 + $0xa58] sm:$0xff] }
0x105a   :  { %7294 = vmatpush1.bf16.msra.mxu0 %v6477_v62  ;;  %7376 = vmatpush1.bf16.msra.mxu1 %v6479_v36  ;;  %v8727_v62 = vld [vmem:[#allocation13 + $0x28] sm:$0xff] }
0x105b   :  { %7295 = vmatprep.subr.bf16.mxu0 %v6494_v24  ;;  %7377 = vmatprep.subr.bf16.mxu1 %v6496_v49  ;;  %v6685_v36 = vld [vmem:[#allocation8 + $0xa40] sm:$0xff]  ;;  %v6687_v24 = vld [vmem:[#allocation8 + $0xa50] sm:$0xff]  ;;  %v6702_v49 = vld [vmem:[#allocation8 + $0xac8] sm:$0xff] }
0x105e   :  { %7296 = vmatpush1.bf16.msra.mxu0 %v6493_v0  ;;  %7378 = vmatpush1.bf16.msra.mxu1 %v6495_v42  ;;  %v6704_v0 = vld [vmem:[#allocation8 + $0xad8] sm:$0xff]  ;;  %v6874_v42 = vrot.slane %v8727_v62, %v8404_v19 }
0x105f   :  { %7297 = vmatprep.subr.bf16.mxu0 %v6510_v10  ;;  %7379 = vmatprep.subr.bf16.mxu1 %v6512_v8  ;;  %v6882_v10 = vrot.slane %v8727_v62, %v8407_v20  ;;  %v6878_v8 = vrot.slane %v8727_v62, %v8410_v22 }
0x1062   :  { %7298 = vmatpush1.bf16.msra.mxu0 %v6509_v29  ;;  %7380 = vmatpush1.bf16.msra.mxu1 %v6511_v30  ;;  %v6886_v29 = vrot.slane %v8727_v62, %v8413_v23  ;;  %v6701_v30 = vld [vmem:[#allocation8 + $0xac0] sm:$0xff] }
0x1063   :  { %7299 = vmatprep.subr.bf16.mxu0 %v6526_v7  ;;  %7381 = vmatprep.subr.bf16.mxu1 %v6528_v31  ;;  %v6703_v7 = vld [vmem:[#allocation8 + $0xad0] sm:$0xff] }
0x1066   :  { %7300 = vmatpush1.bf16.msra.mxu0 %v6525_v33  ;;  %7382 = vmatpush1.bf16.msra.mxu1 %v6527_v1  ;;  %v6718_v1 = vld [vmem:[#allocation8 + $0xb48] sm:$0xff] }
0x1067   :  { %7301 = vmatprep.subr.bf16.mxu0 %v6542_v41  ;;  %7383 = vmatprep.subr.bf16.mxu1 %v6544_v32  ;;  %v6720_v41 = vld [vmem:[#allocation8 + $0xb58] sm:$0xff] }
0x106a   :  { %7302 = vmatpush1.bf16.msra.mxu0 %v6541_v17  ;;  %7384 = vmatpush1.bf16.msra.mxu1 %v6543_v34 }
0x106b   :  { %7303 = vmatprep.subr.bf16.mxu0 %v6558_v45  ;;  %7385 = vmatprep.subr.bf16.mxu1 %v6560_v40 }
0x106e   :  { %7304 = vmatpush1.bf16.msra.mxu0 %v6557_v15  ;;  %7386 = vmatpush1.bf16.msra.mxu1 %v6559_v46 }
0x106f   :  { %7305 = vmatprep.subr.bf16.mxu0 %v6574_v4  ;;  %7387 = vmatprep.subr.bf16.mxu1 %v6576_v27 }
0x1072   :  { %7306 = vmatpush1.bf16.msra.mxu0 %v6573_v47  ;;  %7388 = vmatpush1.bf16.msra.mxu1 %v6575_v48  ;;  %v6717_v48 = vld [vmem:[#allocation8 + $0xb40] sm:$0xff] }
0x1073   :  { %7307 = vmatprep.subr.bf16.mxu0 %v6590_v5  ;;  %7389 = vmatprep.subr.bf16.mxu1 %v6592_v52  ;;  %v6719_v5 = vld [vmem:[#allocation8 + $0xb50] sm:$0xff]  ;;  %v6734_v52 = vld [vmem:[#allocation8 + $0xbc8] sm:$0xff] }
0x1076   :  { %7308 = vmatpush1.bf16.msra.mxu0 %v6589_v53  ;;  %7390 = vmatpush1.bf16.msra.mxu1 %v6591_v54  ;;  %v6736_v53 = vld [vmem:[#allocation8 + $0xbd8] sm:$0xff]  ;;  %v6733_v54 = vld [vmem:[#allocation8 + $0xbc0] sm:$0xff] }
0x1077   :  { %7309 = vmatprep.subr.bf16.mxu0 %v6606_v11  ;;  %7391 = vmatprep.subr.bf16.mxu1 %v6608_v55  ;;  %v6735_v11 = vld [vmem:[#allocation8 + $0xbd0] sm:$0xff]  ;;  %v6750_v55 = vld [vmem:[#allocation8 + $0xc48] sm:$0xff] }
0x107a   :  { %7310 = vmatpush1.bf16.msra.mxu0 %v6605_v56  ;;  %7392 = vmatpush1.bf16.msra.mxu1 %v6607_v18  ;;  %v6752_v56 = vld [vmem:[#allocation8 + $0xc58] sm:$0xff]  ;;  %v6749_v18 = vld [vmem:[#allocation8 + $0xc40] sm:$0xff] }
0x107b   :  { %7320 = vmatprep.subr.bf16.mxu0 %v6622_v35  ;;  %7402 = vmatprep.subr.bf16.mxu1 %v6624_v57  ;;  %v6751_v35 = vld [vmem:[#allocation8 + $0xc50] sm:$0xff]  ;;  %v6766_v57 = vld [vmem:[#allocation8 + $0xcc8] sm:$0xff] }
0x107d   :  { %7312 = vmatmul.mubr.bf16.vlgmr.msra.gmra.mrb[48].mxu0 %v8697_v25  ;;  %7394 = vmatmul.mubr.bf16.vlgmr.msra.gmra.mrb[48].mxu1 %v8697_v25 }
0x107e   :  { %7321 = vmatpush1.bf16.msra.mxu0 %v6621_v63  ;;  %7403 = vmatpush1.bf16.msra.mxu1 %v6623_v26  ;;  %v6768_v63 = vld [vmem:[#allocation8 + $0xcd8] sm:$0xff]  ;;  %v6765_v26 = vld [vmem:[#allocation8 + $0xcc0] sm:$0xff] }
0x107f   :  { %7322 = vmatprep.subr.bf16.mxu0 %v6638_v6  ;;  %7404 = vmatprep.subr.bf16.mxu1 %v6640_v58  ;;  %v6767_v6 = vld [vmem:[#allocation8 + $0xcd0] sm:$0xff]  ;;  %v6782_v58 = vld [vmem:[#allocation8 + $0xd48] sm:$0xff] }
0x1080   :  { %7352 = vmatprep.mubr.bf16.mxu0 %v8703_v51  ;;  %7434 = vmatprep.mubr.bf16.mxu1 %v8703_v51 }
0x1082   :  { %7323 = vmatpush1.bf16.msra.mxu0 %v6637_v59  ;;  %7405 = vmatpush1.bf16.msra.mxu1 %v6639_v60  ;;  %v6784_v59 = vld [vmem:[#allocation8 + $0xd58] sm:$0xff]  ;;  %v6781_v60 = vld [vmem:[#allocation8 + $0xd40] sm:$0xff] }
0x1083   :  { %7324 = vmatprep.subr.bf16.mxu0 %v6654_v28  ;;  %7406 = vmatprep.subr.bf16.mxu1 %v6656_v9  ;;  %v6783_v28 = vld [vmem:[#allocation8 + $0xd50] sm:$0xff]  ;;  %v6798_v9 = vld [vmem:[#allocation8 + $0xdc8] sm:$0xff] }
0x1086   :  { %7325 = vmatpush1.bf16.msra.mxu0 %v6653_v2  ;;  %7407 = vmatpush1.bf16.msra.mxu1 %v6655_v16  ;;  %v6800_v2 = vld [vmem:[#allocation8 + $0xdd8] sm:$0xff]  ;;  %v6797_v16 = vld [vmem:[#allocation8 + $0xdc0] sm:$0xff] }
0x1087   :  { %7326 = vmatprep.subr.bf16.mxu0 %v6670_v61  ;;  %7408 = vmatprep.subr.bf16.mxu1 %v6672_v13  ;;  %v6799_v61 = vld [vmem:[#allocation8 + $0xdd0] sm:$0xff]  ;;  %v6814_v13 = vld [vmem:[#allocation8 + $0xe48] sm:$0xff] }
0x108a   :  { %7327 = vmatpush1.bf16.msra.mxu0 %v6669_v14  ;;  %7409 = vmatpush1.bf16.msra.mxu1 %v6671_v21  ;;  %v6816_v14 = vld [vmem:[#allocation8 + $0xe58] sm:$0xff]  ;;  %v6813_v21 = vld [vmem:[#allocation8 + $0xe40] sm:$0xff] }
0x108b   :  { %7328 = vmatprep.subr.bf16.mxu0 %v6686_v3  ;;  %7410 = vmatprep.subr.bf16.mxu1 %v6688_v12  ;;  %v6815_v3 = vld [vmem:[#allocation8 + $0xe50] sm:$0xff]  ;;  %v6830_v12 = vld [vmem:[#allocation8 + $0xec8] sm:$0xff] }
0x108e   :  { %7329 = vmatpush1.bf16.msra.mxu0 %v6685_v36  ;;  %7411 = vmatpush1.bf16.msra.mxu1 %v6687_v24  ;;  %v6832_v36 = vld [vmem:[#allocation8 + $0xed8] sm:$0xff]  ;;  %v6829_v24 = vld [vmem:[#allocation8 + $0xec0] sm:$0xff] }
0x108f   :  { %7330 = vmatprep.subr.bf16.mxu0 %v6702_v49  ;;  %7412 = vmatprep.subr.bf16.mxu1 %v6704_v0  ;;  %v6831_v49 = vld [vmem:[#allocation8 + $0xed0] sm:$0xff]  ;;  %v6846_v0 = vld [vmem:[#allocation8 + $0xf48] sm:$0xff] }
0x1090   :  { %v7026_v31 = vpop.f32.mrb[40].mxu0  ;;  %v7108_v33 = vpop.f32.mrb[40].mxu1 }
0x1091   :  { %v7761_v32 = vadd.f32 %v7026_v31, %v6874_v42  ;;  %v7763_v17 = vadd.f32 %v7108_v33, %v6882_v10  ;;  %v7028_v34 = vpop.f32.mrb[41].mxu0  ;;  %v7110_v45 = vpop.f32.mrb[41].mxu1  ;;  %v6848_v42 = vld [vmem:[#allocation8 + $0xf58] sm:$0xff]  ;;  %v6845_v10 = vld [vmem:[#allocation8 + $0xf40] sm:$0xff]  ;;  %v6863_v31 = vld [vmem:[#allocation8 + $0xfd0] sm:$0xff] }
0x1092   :  { %v7762_v40 = vadd.f32 %v7028_v34, %v6878_v8  ;;  %v7764_v15 = vadd.f32 %v7110_v45, %v6886_v29  ;;  %v7030_v46 = vpop.f32.mrb[42].mxu0  ;;  %v7112_v4 = vpop.f32.mrb[42].mxu1  ;;  %7331 = vmatpush1.bf16.msra.mxu0 %v6701_v30  ;;  %7413 = vmatpush1.bf16.msra.mxu1 %v6703_v7  ;;  %v6847_v8 = vld [vmem:[#allocation8 + $0xf50] sm:$0xff]  ;;  %v6862_v29 = vld [vmem:[#allocation8 + $0xfc8] sm:$0xff]  ;;  %v6864_v30 = vld [vmem:[#allocation8 + $0xfd8] sm:$0xff] }
0x1093   :  { %7607 = vst [vmem:[#allocation15] sm:$0xff] %v7761_v32  ;;  %7609 = vst [vmem:[#allocation15 + $0x10] sm:$0xff] %v7763_v17  ;;  %v7031_v27 = vpop.f32.mrb[43].mxu0  ;;  %v7113_v47 = vpop.f32.mrb[43].mxu1  ;;  %7332 = vmatprep.subr.bf16.mxu0 %v6718_v1  ;;  %7414 = vmatprep.subr.bf16.mxu1 %v6720_v41  ;;  %v6861_v7 = vld [vmem:[#allocation8 + $0xfc0] sm:$0xff]  ;;  %v6370_v33 = vld [vmem:[#allocation8 + $0x68] sm:$0xff] }
0x1094   :  { %7608 = vst [vmem:[#allocation15 + $0x8] sm:$0xff] %v7762_v40  ;;  %7610 = vst [vmem:[#allocation15 + $0x18] sm:$0xff] %v7764_v15  ;;  %v6372_v1 = vld [vmem:[#allocation8 + $0x78] sm:$0xff]  ;;  %v6369_v41 = vld [vmem:[#allocation8 + $0x60] sm:$0xff] }
0x1095   :  { %v6371_v32 = vld [vmem:[#allocation8 + $0x70] sm:$0xff]  ;;  %v6386_v17 = vld [vmem:[#allocation8 + $0xe8] sm:$0xff]  ;;  %v6388_v34 = vld [vmem:[#allocation8 + $0xf8] sm:$0xff] }
0x1096   :  { %7333 = vmatpush1.bf16.msra.mxu0 %v6717_v48  ;;  %7415 = vmatpush1.bf16.msra.mxu1 %v6719_v5  ;;  %v6385_v45 = vld [vmem:[#allocation8 + $0xe0] sm:$0xff]  ;;  %v6387_v40 = vld [vmem:[#allocation8 + $0xf0] sm:$0xff]  ;;  %v6402_v15 = vld [vmem:[#allocation8 + $0x168] sm:$0xff] }
0x1097   :  { %7334 = vmatprep.subr.bf16.mxu0 %v6734_v52  ;;  %7416 = vmatprep.subr.bf16.mxu1 %v6736_v53  ;;  %v6404_v46 = vld [vmem:[#allocation8 + $0x178] sm:$0xff]  ;;  %v6401_v4 = vld [vmem:[#allocation8 + $0x160] sm:$0xff]  ;;  %v6403_v27 = vld [vmem:[#allocation8 + $0x170] sm:$0xff] }
0x1098   :  { %v6418_v47 = vld [vmem:[#allocation8 + $0x1e8] sm:$0xff]  ;;  %v6420_v48 = vld [vmem:[#allocation8 + $0x1f8] sm:$0xff]  ;;  %v6417_v5 = vld [vmem:[#allocation8 + $0x1e0] sm:$0xff] }
0x1099   :  { %v6419_v52 = vld [vmem:[#allocation8 + $0x1f0] sm:$0xff]  ;;  %v6434_v53 = vld [vmem:[#allocation8 + $0x268] sm:$0xff] }
0x109a   :  { %7335 = vmatpush1.bf16.msra.mxu0 %v6733_v54  ;;  %7417 = vmatpush1.bf16.msra.mxu1 %v6735_v11  ;;  %v6436_v54 = vld [vmem:[#allocation8 + $0x278] sm:$0xff]  ;;  %v6435_v11 = vld [vmem:[#allocation8 + $0x270] sm:$0xff] }
0x109b   :  { %7336 = vmatprep.subr.bf16.mxu0 %v6750_v55  ;;  %7418 = vmatprep.subr.bf16.mxu1 %v6752_v56  ;;  %v6450_v55 = vld [vmem:[#allocation8 + $0x2e8] sm:$0xff]  ;;  %v6452_v56 = vld [vmem:[#allocation8 + $0x2f8] sm:$0xff] }
0x109e   :  { %7337 = vmatpush1.bf16.msra.mxu0 %v6749_v18  ;;  %7419 = vmatpush1.bf16.msra.mxu1 %v6751_v35  ;;  %v6449_v18 = vld [vmem:[#allocation8 + $0x2e0] sm:$0xff]  ;;  %v6451_v35 = vld [vmem:[#allocation8 + $0x2f0] sm:$0xff] }
0x109f   :  { %7338 = vmatprep.subr.bf16.mxu0 %v6766_v57  ;;  %7420 = vmatprep.subr.bf16.mxu1 %v6768_v63  ;;  %v6466_v57 = vld [vmem:[#allocation8 + $0x368] sm:$0xff]  ;;  %v6468_v63 = vld [vmem:[#allocation8 + $0x378] sm:$0xff] }
0x10a2   :  { %7339 = vmatpush1.bf16.msra.mxu0 %v6765_v26  ;;  %7421 = vmatpush1.bf16.msra.mxu1 %v6767_v6  ;;  %v6465_v26 = vld [vmem:[#allocation8 + $0x360] sm:$0xff]  ;;  %v6467_v6 = vld [vmem:[#allocation8 + $0x370] sm:$0xff] }
0x10a3   :  { %7340 = vmatprep.subr.bf16.mxu0 %v6782_v58  ;;  %7422 = vmatprep.subr.bf16.mxu1 %v6784_v59  ;;  %v6482_v58 = vld [vmem:[#allocation8 + $0x3e8] sm:$0xff]  ;;  %v6484_v59 = vld [vmem:[#allocation8 + $0x3f8] sm:$0xff] }
0x10a6   :  { %7341 = vmatpush1.bf16.msra.mxu0 %v6781_v60  ;;  %7423 = vmatpush1.bf16.msra.mxu1 %v6783_v28  ;;  %v6481_v60 = vld [vmem:[#allocation8 + $0x3e0] sm:$0xff]  ;;  %v6483_v28 = vld [vmem:[#allocation8 + $0x3f0] sm:$0xff] }
0x10a7   :  { %7342 = vmatprep.subr.bf16.mxu0 %v6798_v9  ;;  %7424 = vmatprep.subr.bf16.mxu1 %v6800_v2  ;;  %v6498_v9 = vld [vmem:[#allocation8 + $0x468] sm:$0xff]  ;;  %v6500_v2 = vld [vmem:[#allocation8 + $0x478] sm:$0xff] }
0x10aa   :  { %7343 = vmatpush1.bf16.msra.mxu0 %v6797_v16  ;;  %7425 = vmatpush1.bf16.msra.mxu1 %v6799_v61  ;;  %v6497_v16 = vld [vmem:[#allocation8 + $0x460] sm:$0xff]  ;;  %v6499_v61 = vld [vmem:[#allocation8 + $0x470] sm:$0xff] }
0x10ab   :  { %7344 = vmatprep.subr.bf16.mxu0 %v6814_v13  ;;  %7426 = vmatprep.subr.bf16.mxu1 %v6816_v14  ;;  %v6514_v13 = vld [vmem:[#allocation8 + $0x4e8] sm:$0xff]  ;;  %v6516_v14 = vld [vmem:[#allocation8 + $0x4f8] sm:$0xff] }
0x10ae   :  { %7345 = vmatpush1.bf16.msra.mxu0 %v6813_v21  ;;  %7427 = vmatpush1.bf16.msra.mxu1 %v6815_v3  ;;  %v6513_v21 = vld [vmem:[#allocation8 + $0x4e0] sm:$0xff]  ;;  %v6515_v3 = vld [vmem:[#allocation8 + $0x4f0] sm:$0xff] }
0x10af   :  { %7346 = vmatprep.subr.bf16.mxu0 %v6830_v12  ;;  %7428 = vmatprep.subr.bf16.mxu1 %v6832_v36  ;;  %v6530_v12 = vld [vmem:[#allocation8 + $0x568] sm:$0xff]  ;;  %v6532_v36 = vld [vmem:[#allocation8 + $0x578] sm:$0xff] }
0x10b2   :  { %7347 = vmatpush1.bf16.msra.mxu0 %v6829_v24  ;;  %7429 = vmatpush1.bf16.msra.mxu1 %v6831_v49  ;;  %v6529_v24 = vld [vmem:[#allocation8 + $0x560] sm:$0xff]  ;;  %v6531_v49 = vld [vmem:[#allocation8 + $0x570] sm:$0xff] }
0x10b3   :  { %7348 = vmatprep.subr.bf16.mxu0 %v6846_v0  ;;  %7430 = vmatprep.subr.bf16.mxu1 %v6848_v42  ;;  %v6546_v0 = vld [vmem:[#allocation8 + $0x5e8] sm:$0xff]  ;;  %v6548_v42 = vld [vmem:[#allocation8 + $0x5f8] sm:$0xff] }
0x10b6   :  { %7349 = vmatpush1.bf16.msra.mxu0 %v6845_v10  ;;  %7431 = vmatpush1.bf16.msra.mxu1 %v6847_v8  ;;  %v6545_v10 = vld [vmem:[#allocation8 + $0x5e0] sm:$0xff]  ;;  %v6547_v8 = vld [vmem:[#allocation8 + $0x5f0] sm:$0xff] }
0x10b7   :  { %7350 = vmatprep.subr.bf16.mxu0 %v6862_v29  ;;  %7432 = vmatprep.subr.bf16.mxu1 %v6864_v30  ;;  %v6562_v29 = vld [vmem:[#allocation8 + $0x668] sm:$0xff]  ;;  %v6564_v30 = vld [vmem:[#allocation8 + $0x678] sm:$0xff] }
0x10ba   :  { %7351 = vmatpush1.bf16.msra.mxu0 %v6861_v7  ;;  %7433 = vmatpush1.bf16.msra.mxu1 %v6863_v31  ;;  %v6561_v7 = vld [vmem:[#allocation8 + $0x660] sm:$0xff]  ;;  %v6563_v31 = vld [vmem:[#allocation8 + $0x670] sm:$0xff] }
0x10bb   :  { %7443 = vmatprep.subr.bf16.mxu0 %v6370_v33  ;;  %7525 = vmatprep.subr.bf16.mxu1 %v6372_v1  ;;  %v6578_v33 = vld [vmem:[#allocation8 + $0x6e8] sm:$0xff]  ;;  %v6580_v1 = vld [vmem:[#allocation8 + $0x6f8] sm:$0xff] }
0x10bd   :  { %7353 = vmatmul.mubr.bf16.vlgmr.msra.gmra.mrb[48].mxu0 %v8699_v37  ;;  %7435 = vmatmul.mubr.bf16.vlgmr.msra.gmra.mrb[48].mxu1 %v8699_v37 }
0x10be   :  { %7444 = vmatpush1.bf16.msra.mxu0 %v6369_v41  ;;  %7526 = vmatpush1.bf16.msra.mxu1 %v6371_v32  ;;  %v6577_v41 = vld [vmem:[#allocation8 + $0x6e0] sm:$0xff]  ;;  %v6579_v32 = vld [vmem:[#allocation8 + $0x6f0] sm:$0xff] }
0x10bf   :  { %7445 = vmatprep.subr.bf16.mxu0 %v6386_v17  ;;  %7527 = vmatprep.subr.bf16.mxu1 %v6388_v34  ;;  %v6594_v17 = vld [vmem:[#allocation8 + $0x768] sm:$0xff]  ;;  %v6596_v34 = vld [vmem:[#allocation8 + $0x778] sm:$0xff] }
0x10c0   :  { %7475 = vmatprep.mubr.bf16.mxu0 %v8701_v50  ;;  %7557 = vmatprep.mubr.bf16.mxu1 %v8701_v50  ;;  %v6433_v50 = vld [vmem:[#allocation8 + $0x260] sm:$0xff] }
0x10c2   :  { %7446 = vmatpush1.bf16.msra.mxu0 %v6385_v45  ;;  %7528 = vmatpush1.bf16.msra.mxu1 %v6387_v40  ;;  %v6593_v45 = vld [vmem:[#allocation8 + $0x760] sm:$0xff]  ;;  %v6595_v40 = vld [vmem:[#allocation8 + $0x770] sm:$0xff] }
0x10c3   :  { %7447 = vmatprep.subr.bf16.mxu0 %v6402_v15  ;;  %7529 = vmatprep.subr.bf16.mxu1 %v6404_v46  ;;  %v6610_v15 = vld [vmem:[#allocation8 + $0x7e8] sm:$0xff]  ;;  %v6612_v46 = vld [vmem:[#allocation8 + $0x7f8] sm:$0xff] }
0x10c6   :  { %7448 = vmatpush1.bf16.msra.mxu0 %v6401_v4  ;;  %7530 = vmatpush1.bf16.msra.mxu1 %v6403_v27  ;;  %v6609_v4 = vld [vmem:[#allocation8 + $0x7e0] sm:$0xff]  ;;  %v6611_v27 = vld [vmem:[#allocation8 + $0x7f0] sm:$0xff] }
0x10c7   :  { %7449 = vmatprep.subr.bf16.mxu0 %v6418_v47  ;;  %7531 = vmatprep.subr.bf16.mxu1 %v6420_v48  ;;  %v6626_v47 = vld [vmem:[#allocation8 + $0x868] sm:$0xff]  ;;  %v6628_v48 = vld [vmem:[#allocation8 + $0x878] sm:$0xff] }
0x10ca   :  { %7450 = vmatpush1.bf16.msra.mxu0 %v6417_v5  ;;  %7532 = vmatpush1.bf16.msra.mxu1 %v6419_v52  ;;  %v6625_v5 = vld [vmem:[#allocation8 + $0x860] sm:$0xff]  ;;  %v6627_v52 = vld [vmem:[#allocation8 + $0x870] sm:$0xff] }
0x10cb   :  { %7451 = vmatprep.subr.bf16.mxu0 %v6434_v53  ;;  %7533 = vmatprep.subr.bf16.mxu1 %v6436_v54  ;;  %v6642_v53 = vld [vmem:[#allocation8 + $0x8e8] sm:$0xff]  ;;  %v6644_v54 = vld [vmem:[#allocation8 + $0x8f8] sm:$0xff] }
0x10ce   :  { %7452 = vmatpush1.bf16.msra.mxu0 %v6433_v50  ;;  %7534 = vmatpush1.bf16.msra.mxu1 %v6435_v11  ;;  %v6641_v50 = vld [vmem:[#allocation8 + $0x8e0] sm:$0xff]  ;;  %v6643_v11 = vld [vmem:[#allocation8 + $0x8f0] sm:$0xff] }
0x10cf   :  { %7453 = vmatprep.subr.bf16.mxu0 %v6450_v55  ;;  %7535 = vmatprep.subr.bf16.mxu1 %v6452_v56  ;;  %v6658_v55 = vld [vmem:[#allocation8 + $0x968] sm:$0xff]  ;;  %v6660_v56 = vld [vmem:[#allocation8 + $0x978] sm:$0xff] }
0x10d2   :  { %7454 = vmatpush1.bf16.msra.mxu0 %v6449_v18  ;;  %7536 = vmatpush1.bf16.msra.mxu1 %v6451_v35  ;;  %v6657_v18 = vld [vmem:[#allocation8 + $0x960] sm:$0xff]  ;;  %v6659_v35 = vld [vmem:[#allocation8 + $0x970] sm:$0xff] }
0x10d3   :  { %7455 = vmatprep.subr.bf16.mxu0 %v6466_v57  ;;  %7537 = vmatprep.subr.bf16.mxu1 %v6468_v63  ;;  %v6674_v57 = vld [vmem:[#allocation8 + $0x9e8] sm:$0xff]  ;;  %v6673_v63 = vld [vmem:[#allocation8 + $0x9e0] sm:$0xff] }
0x10d6   :  { %7456 = vmatpush1.bf16.msra.mxu0 %v6465_v26  ;;  %7538 = vmatpush1.bf16.msra.mxu1 %v6467_v6  ;;  %v6675_v26 = vld [vmem:[#allocation8 + $0x9f0] sm:$0xff]  ;;  %v6690_v6 = vld [vmem:[#allocation8 + $0xa68] sm:$0xff] }
0x10d7   :  { %7457 = vmatprep.subr.bf16.mxu0 %v6482_v58  ;;  %7539 = vmatprep.subr.bf16.mxu1 %v6484_v59  ;;  %v6692_v58 = vld [vmem:[#allocation8 + $0xa78] sm:$0xff]  ;;  %v6691_v59 = vld [vmem:[#allocation8 + $0xa70] sm:$0xff] }
0x10da   :  { %7458 = vmatpush1.bf16.msra.mxu0 %v6481_v60  ;;  %7540 = vmatpush1.bf16.msra.mxu1 %v6483_v28  ;;  %v6706_v60 = vld [vmem:[#allocation8 + $0xae8] sm:$0xff]  ;;  %v6708_v28 = vld [vmem:[#allocation8 + $0xaf8] sm:$0xff] }
0x10db   :  { %7459 = vmatprep.subr.bf16.mxu0 %v6498_v9  ;;  %7541 = vmatprep.subr.bf16.mxu1 %v6500_v2  ;;  %v6890_v9 = vrot.slane %v8727_v62, %v8456_v38  ;;  %v6898_v2 = vrot.slane %v8727_v62, %v8459_v39 }
0x10de   :  { %7460 = vmatpush1.bf16.msra.mxu0 %v6497_v16  ;;  %7542 = vmatpush1.bf16.msra.mxu1 %v6499_v61  ;;  %v6894_v16 = vrot.slane %v8727_v62, %v8462_v43  ;;  %v6902_v61 = vrot.slane %v8727_v62, %v8465_v44 }
0x10df   :  { %7461 = vmatprep.subr.bf16.mxu0 %v6514_v13  ;;  %7543 = vmatprep.subr.bf16.mxu1 %v6516_v14  ;;  %v6705_v13 = vld [vmem:[#allocation8 + $0xae0] sm:$0xff]  ;;  %v6707_v14 = vld [vmem:[#allocation8 + $0xaf0] sm:$0xff] }
0x10e2   :  { %7462 = vmatpush1.bf16.msra.mxu0 %v6513_v21  ;;  %7544 = vmatpush1.bf16.msra.mxu1 %v6515_v3 }
0x10e3   :  { %7463 = vmatprep.subr.bf16.mxu0 %v6530_v12  ;;  %7545 = vmatprep.subr.bf16.mxu1 %v6532_v36  ;;  %v6722_v12 = vld [vmem:[#allocation8 + $0xb68] sm:$0xff]  ;;  %v6724_v36 = vld [vmem:[#allocation8 + $0xb78] sm:$0xff] }
0x10e6   :  { %7464 = vmatpush1.bf16.msra.mxu0 %v6529_v24  ;;  %7546 = vmatpush1.bf16.msra.mxu1 %v6531_v49 }
0x10e7   :  { %7465 = vmatprep.subr.bf16.mxu0 %v6546_v0  ;;  %7547 = vmatprep.subr.bf16.mxu1 %v6548_v42 }
0x10ea   :  { %7466 = vmatpush1.bf16.msra.mxu0 %v6545_v10  ;;  %7548 = vmatpush1.bf16.msra.mxu1 %v6547_v8 }
0x10eb   :  { %7467 = vmatprep.subr.bf16.mxu0 %v6562_v29  ;;  %7549 = vmatprep.subr.bf16.mxu1 %v6564_v30 }
0x10ee   :  { %7468 = vmatpush1.bf16.msra.mxu0 %v6561_v7  ;;  %7550 = vmatpush1.bf16.msra.mxu1 %v6563_v31  ;;  %v6721_v31 = vld [vmem:[#allocation8 + $0xb60] sm:$0xff] }
0x10ef   :  { %7469 = vmatprep.subr.bf16.mxu0 %v6578_v33  ;;  %7551 = vmatprep.subr.bf16.mxu1 %v6580_v1  ;;  %v6723_v33 = vld [vmem:[#allocation8 + $0xb70] sm:$0xff]  ;;  %v6738_v1 = vld [vmem:[#allocation8 + $0xbe8] sm:$0xff] }
0x10f2   :  { %7470 = vmatpush1.bf16.msra.mxu0 %v6577_v41  ;;  %7552 = vmatpush1.bf16.msra.mxu1 %v6579_v32  ;;  %v6740_v41 = vld [vmem:[#allocation8 + $0xbf8] sm:$0xff]  ;;  %v6737_v32 = vld [vmem:[#allocation8 + $0xbe0] sm:$0xff] }
0x10f3   :  { %7471 = vmatprep.subr.bf16.mxu0 %v6594_v17  ;;  %7553 = vmatprep.subr.bf16.mxu1 %v6596_v34  ;;  %v6739_v17 = vld [vmem:[#allocation8 + $0xbf0] sm:$0xff]  ;;  %v6754_v34 = vld [vmem:[#allocation8 + $0xc68] sm:$0xff] }
0x10f6   :  { %7472 = vmatpush1.bf16.msra.mxu0 %v6593_v45  ;;  %7554 = vmatpush1.bf16.msra.mxu1 %v6595_v40  ;;  %v6756_v45 = vld [vmem:[#allocation8 + $0xc78] sm:$0xff]  ;;  %v6753_v40 = vld [vmem:[#allocation8 + $0xc60] sm:$0xff] }
0x10f7   :  { %7473 = vmatprep.subr.bf16.mxu0 %v6610_v15  ;;  %7555 = vmatprep.subr.bf16.mxu1 %v6612_v46  ;;  %v6755_v15 = vld [vmem:[#allocation8 + $0xc70] sm:$0xff]  ;;  %v6770_v46 = vld [vmem:[#allocation8 + $0xce8] sm:$0xff] }
0x10fa   :  { %7474 = vmatpush1.bf16.msra.mxu0 %v6609_v4  ;;  %7556 = vmatpush1.bf16.msra.mxu1 %v6611_v27  ;;  %v6772_v4 = vld [vmem:[#allocation8 + $0xcf8] sm:$0xff]  ;;  %v6769_v27 = vld [vmem:[#allocation8 + $0xce0] sm:$0xff] }
0x10fb   :  { %7484 = vmatprep.subr.bf16.mxu0 %v6626_v47  ;;  %7566 = vmatprep.subr.bf16.mxu1 %v6628_v48  ;;  %v6771_v47 = vld [vmem:[#allocation8 + $0xcf0] sm:$0xff]  ;;  %v6786_v48 = vld [vmem:[#allocation8 + $0xd68] sm:$0xff] }
0x10fd   :  { %7476 = vmatmul.mubr.bf16.vlgmr.msra.gmra.mrb[52].mxu0 %v8697_v25  ;;  %7558 = vmatmul.mubr.bf16.vlgmr.msra.gmra.mrb[52].mxu1 %v8697_v25  ;;  %v6676_v25 = vld [vmem:[#allocation8 + $0x9f8] sm:$0xff] }
0x10fe   :  { %7485 = vmatpush1.bf16.msra.mxu0 %v6625_v5  ;;  %7567 = vmatpush1.bf16.msra.mxu1 %v6627_v52  ;;  %v6788_v5 = vld [vmem:[#allocation8 + $0xd78] sm:$0xff]  ;;  %v6785_v52 = vld [vmem:[#allocation8 + $0xd60] sm:$0xff] }
0x10ff   :  { %7486 = vmatprep.subr.bf16.mxu0 %v6642_v53  ;;  %7568 = vmatprep.subr.bf16.mxu1 %v6644_v54  ;;  %v6787_v53 = vld [vmem:[#allocation8 + $0xd70] sm:$0xff]  ;;  %v6802_v54 = vld [vmem:[#allocation8 + $0xde8] sm:$0xff] }
0x1100   :  { %7516 = vmatprep.mubr.bf16.mxu0 %v8703_v51  ;;  %7598 = vmatprep.mubr.bf16.mxu1 %v8703_v51  ;;  %v6689_v51 = vld [vmem:[#allocation8 + $0xa60] sm:$0xff] }
0x1102   :  { %7487 = vmatpush1.bf16.msra.mxu0 %v6641_v50  ;;  %7569 = vmatpush1.bf16.msra.mxu1 %v6643_v11  ;;  %v6804_v50 = vld [vmem:[#allocation8 + $0xdf8] sm:$0xff]  ;;  %v6801_v11 = vld [vmem:[#allocation8 + $0xde0] sm:$0xff] }
0x1103   :  { %7488 = vmatprep.subr.bf16.mxu0 %v6658_v55  ;;  %7570 = vmatprep.subr.bf16.mxu1 %v6660_v56  ;;  %v6803_v55 = vld [vmem:[#allocation8 + $0xdf0] sm:$0xff]  ;;  %v6818_v56 = vld [vmem:[#allocation8 + $0xe68] sm:$0xff] }
0x1106   :  { %7489 = vmatpush1.bf16.msra.mxu0 %v6657_v18  ;;  %7571 = vmatpush1.bf16.msra.mxu1 %v6659_v35  ;;  %v6820_v18 = vld [vmem:[#allocation8 + $0xe78] sm:$0xff]  ;;  %v6817_v35 = vld [vmem:[#allocation8 + $0xe60] sm:$0xff] }
0x1107   :  { %7490 = vmatprep.subr.bf16.mxu0 %v6674_v57  ;;  %7572 = vmatprep.subr.bf16.mxu1 %v6676_v25  ;;  %v6819_v57 = vld [vmem:[#allocation8 + $0xe70] sm:$0xff]  ;;  %v6834_v25 = vld [vmem:[#allocation8 + $0xee8] sm:$0xff] }
0x110a   :  { %7491 = vmatpush1.bf16.msra.mxu0 %v6673_v63  ;;  %7573 = vmatpush1.bf16.msra.mxu1 %v6675_v26  ;;  %v6836_v63 = vld [vmem:[#allocation8 + $0xef8] sm:$0xff]  ;;  %v6833_v26 = vld [vmem:[#allocation8 + $0xee0] sm:$0xff] }
0x110b   :  { %7492 = vmatprep.subr.bf16.mxu0 %v6690_v6  ;;  %7574 = vmatprep.subr.bf16.mxu1 %v6692_v58  ;;  %v6835_v6 = vld [vmem:[#allocation8 + $0xef0] sm:$0xff]  ;;  %v6850_v58 = vld [vmem:[#allocation8 + $0xf68] sm:$0xff] }
0x110e   :  { %7493 = vmatpush1.bf16.msra.mxu0 %v6689_v51  ;;  %7575 = vmatpush1.bf16.msra.mxu1 %v6691_v59  ;;  %v6852_v51 = vld [vmem:[#allocation8 + $0xf78] sm:$0xff]  ;;  %v6849_v59 = vld [vmem:[#allocation8 + $0xf60] sm:$0xff] }
0x110f   :  { %7494 = vmatprep.subr.bf16.mxu0 %v6706_v60  ;;  %7576 = vmatprep.subr.bf16.mxu1 %v6708_v28  ;;  %v6851_v60 = vld [vmem:[#allocation8 + $0xf70] sm:$0xff]  ;;  %v6866_v28 = vld [vmem:[#allocation8 + $0xfe8] sm:$0xff] }
0x1110   :  { %v7190_v21 = vpop.f32.mrb[44].mxu0  ;;  %v7272_v3 = vpop.f32.mrb[44].mxu1 }
0x1111   :  { %v7765_v24 = vadd.f32 %v7190_v21, %v6890_v9  ;;  %v7767_v49 = vadd.f32 %v7272_v3, %v6898_v2  ;;  %v7192_v0 = vpop.f32.mrb[45].mxu0  ;;  %v7274_v42 = vpop.f32.mrb[45].mxu1  ;;  %v6868_v9 = vld [vmem:[#allocation8 + $0xff8] sm:$0xff]  ;;  %v6865_v2 = vld [vmem:[#allocation8 + $0xfe0] sm:$0xff] }
0x1112   :  { %v7766_v10 = vadd.f32 %v7192_v0, %v6894_v16  ;;  %v7768_v8 = vadd.f32 %v7274_v42, %v6902_v61  ;;  %v7194_v29 = vpop.f32.mrb[46].mxu0  ;;  %v7276_v30 = vpop.f32.mrb[46].mxu1  ;;  %7495 = vmatpush1.bf16.msra.mxu0 %v6705_v13  ;;  %7577 = vmatpush1.bf16.msra.mxu1 %v6707_v14  ;;  %v6867_v16 = vld [vmem:[#allocation8 + $0xff0] sm:$0xff]  ;;  %v6356_v61 = vld [vmem:[#allocation13 + $0x30] sm:$0xff] }
0x1113   :  { %7611 = vst [vmem:[#allocation15 + $0x20] sm:$0xff] %v7765_v24  ;;  %7613 = vst [vmem:[#allocation15 + $0x30] sm:$0xff] %v7767_v49  ;;  %v7195_v62 = vpop.f32.mrb[47].mxu0  ;;  %v7277_v7 = vpop.f32.mrb[47].mxu1  ;;  %7496 = vmatprep.subr.bf16.mxu0 %v6722_v12  ;;  %7578 = vmatprep.subr.bf16.mxu1 %v6724_v36  ;;  %v6906_v13 = vrot.slane %v6356_v61, %v8404_v19  ;;  %v6914_v14 = vrot.slane %v6356_v61, %v8407_v20 }
0x1114   :  { %7612 = vst [vmem:[#allocation15 + $0x28] sm:$0xff] %v7766_v10  ;;  %7614 = vst [vmem:[#allocation15 + $0x38] sm:$0xff] %v7768_v8  ;;  %v6910_v21 = vrot.slane %v6356_v61, %v8410_v22  ;;  %v6918_v3 = vrot.slane %v6356_v61, %v8413_v23  ;;  %v6922_v20 = vrot.slane %v6356_v61, %v8456_v38 }
0x1115   :  { %v6930_v22 = vrot.slane %v6356_v61, %v8459_v39  ;;  %v6926_v23 = vrot.slane %v6356_v61, %v8462_v43  ;;  %v6934_v62 = vrot.slane %v6356_v61, %v8465_v44 }
0x1116   :  { %7497 = vmatpush1.bf16.msra.mxu0 %v6721_v31  ;;  %7579 = vmatpush1.bf16.msra.mxu1 %v6723_v33 }
0x1117   :  { %7498 = vmatprep.subr.bf16.mxu0 %v6738_v1  ;;  %7580 = vmatprep.subr.bf16.mxu1 %v6740_v41 }
0x111a   :  { %7499 = vmatpush1.bf16.msra.mxu0 %v6737_v32  ;;  %7581 = vmatpush1.bf16.msra.mxu1 %v6739_v17 }
0x111b   :  { %7500 = vmatprep.subr.bf16.mxu0 %v6754_v34  ;;  %7582 = vmatprep.subr.bf16.mxu1 %v6756_v45 }
0x111e   :  { %7501 = vmatpush1.bf16.msra.mxu0 %v6753_v40  ;;  %7583 = vmatpush1.bf16.msra.mxu1 %v6755_v15 }
0x111f   :  { %7502 = vmatprep.subr.bf16.mxu0 %v6770_v46  ;;  %7584 = vmatprep.subr.bf16.mxu1 %v6772_v4 }
0x1122   :  { %7503 = vmatpush1.bf16.msra.mxu0 %v6769_v27  ;;  %7585 = vmatpush1.bf16.msra.mxu1 %v6771_v47 }
0x1123   :  { %7504 = vmatprep.subr.bf16.mxu0 %v6786_v48  ;;  %7586 = vmatprep.subr.bf16.mxu1 %v6788_v5 }
0x1126   :  { %7505 = vmatpush1.bf16.msra.mxu0 %v6785_v52  ;;  %7587 = vmatpush1.bf16.msra.mxu1 %v6787_v53 }
0x1127   :  { %7506 = vmatprep.subr.bf16.mxu0 %v6802_v54  ;;  %7588 = vmatprep.subr.bf16.mxu1 %v6804_v50 }
0x112a   :  { %7507 = vmatpush1.bf16.msra.mxu0 %v6801_v11  ;;  %7589 = vmatpush1.bf16.msra.mxu1 %v6803_v55 }
0x112b   :  { %7508 = vmatprep.subr.bf16.mxu0 %v6818_v56  ;;  %7590 = vmatprep.subr.bf16.mxu1 %v6820_v18 }
0x112e   :  { %7509 = vmatpush1.bf16.msra.mxu0 %v6817_v35  ;;  %7591 = vmatpush1.bf16.msra.mxu1 %v6819_v57 }
0x112f   :  { %7510 = vmatprep.subr.bf16.mxu0 %v6834_v25  ;;  %7592 = vmatprep.subr.bf16.mxu1 %v6836_v63 }
0x1132   :  { %7511 = vmatpush1.bf16.msra.mxu0 %v6833_v26  ;;  %7593 = vmatpush1.bf16.msra.mxu1 %v6835_v6 }
0x1133   :  { %7512 = vmatprep.subr.bf16.mxu0 %v6850_v58  ;;  %7594 = vmatprep.subr.bf16.mxu1 %v6852_v51 }
0x1136   :  { %7513 = vmatpush1.bf16.msra.mxu0 %v6849_v59  ;;  %7595 = vmatpush1.bf16.msra.mxu1 %v6851_v60 }
0x1137   :  { %7514 = vmatprep.subr.bf16.mxu0 %v6866_v28  ;;  %7596 = vmatprep.subr.bf16.mxu1 %v6868_v9 }
0x113a   :  { %7515 = vmatpush1.bf16.msra.mxu0 %v6865_v2  ;;  %7597 = vmatpush1.bf16.msra.mxu1 %v6867_v16 }
0x113d   :  { %7517 = vmatmul.mubr.bf16.vlgmr.msra.gmra.mrb[52].mxu0 %v8699_v37  ;;  %7599 = vmatmul.mubr.bf16.vlgmr.msra.gmra.mrb[52].mxu1 %v8699_v37 }
0x1190   :  { %v7354_v12 = vpop.f32.mrb[48].mxu0  ;;  %v7436_v36 = vpop.f32.mrb[48].mxu1 }
0x1191   :  { %v7769_v24 = vadd.f32 %v7354_v12, %v6906_v13  ;;  %v7771_v49 = vadd.f32 %v7436_v36, %v6914_v14  ;;  %v7356_v0 = vpop.f32.mrb[49].mxu0  ;;  %v7438_v42 = vpop.f32.mrb[49].mxu1 }
0x1192   :  { %v7770_v10 = vadd.f32 %v7356_v0, %v6910_v21  ;;  %v7772_v8 = vadd.f32 %v7438_v42, %v6918_v3  ;;  %v7358_v29 = vpop.f32.mrb[50].mxu0  ;;  %v7440_v30 = vpop.f32.mrb[50].mxu1 }
0x1193   :  { %7615 = vst [vmem:[#allocation15 + $0x40] sm:$0xff] %v7769_v24  ;;  %7617 = vst [vmem:[#allocation15 + $0x50] sm:$0xff] %v7771_v49  ;;  %v7359_v37 = vpop.f32.mrb[51].mxu0  ;;  %v7441_v19 = vpop.f32.mrb[51].mxu1 }
0x1194   :  { %7616 = vst [vmem:[#allocation15 + $0x48] sm:$0xff] %v7770_v10  ;;  %7618 = vst [vmem:[#allocation15 + $0x58] sm:$0xff] %v7772_v8 }
0x1210   :  { %v7518_v7 = vpop.f32.mrb[52].mxu0  ;;  %v7600_v31 = vpop.f32.mrb[52].mxu1 }
0x1211   :  { %v7773_v33 = vadd.f32 %v7518_v7, %v6922_v20  ;;  %v7775_v1 = vadd.f32 %v7600_v31, %v6930_v22  ;;  %v7520_v41 = vpop.f32.mrb[53].mxu0  ;;  %v7602_v32 = vpop.f32.mrb[53].mxu1 }
0x1212   :  { %v7774_v17 = vadd.f32 %v7520_v41, %v6926_v23  ;;  %v7776_v34 = vadd.f32 %v7602_v32, %v6934_v62  ;;  %v7522_v45 = vpop.f32.mrb[54].mxu0  ;;  %v7604_v40 = vpop.f32.mrb[54].mxu1 }
0x1213   :  { %7619 = vst [vmem:[#allocation15 + $0x60] sm:$0xff] %v7773_v33  ;;  %7621 = vst [vmem:[#allocation15 + $0x70] sm:$0xff] %v7775_v1  ;;  %v7523_v38 = vpop.f32.mrb[55].mxu0  ;;  %v7605_v39 = vpop.f32.mrb[55].mxu1 }
0x1214   :  { %7620 = vst [vmem:[#allocation15 + $0x68] sm:$0xff] %v7774_v17  ;;  %7622 = vst [vmem:[#allocation15 + $0x78] sm:$0xff] %v7776_v34 }
0x1215   :  { %8131 = shalt.err (!%p8128_p6)
}
0x1216   :  { %s8132_s19 = scalar_lea.hbm %s8784_s9, 2048 }
0x1217   :  { %p8133_p7 = scmp.ne.s32.totalorder %s8784_s9, %s8132_s19  ;;  %p8136_p8 = scmp.lt.u32.totalorder %s8132_s19, %s8784_s9 }
0x1219   :  { %p8138_p9 = pnand %p8136_p8, %p8133_p7 }
0x121b   :  { %8141 = shalt.err (!%p8138_p9)
}
0x121c   :  { %7632 = dma.vmem_to_hbm [thread:$0]  %s7630_s16, 2048, %s8784_s9, [#allocation12]  }
0x121d   :  { %8160 = dma.done.wait [#allocation12], 2048  }
0x121e   :  { %8161 = vsyncadd [#allocation12], 4294965248 }
0x121f   :  { %7636 = vsyncpa [#allocation11], 1 }
0x1220   :  { %7637 = vsyncpa [#allocation14], 1 }
0x1221   :  { %7638 = vsyncpa [#allocation12], 1 }
0x1222   :  { %7639 = vsyncmov [#allocation9] }
0x1225   :  { %s7640_s5 = vpop.sfrf %7639 }
0x1226   :  { %p7714_p10 = scmp.ne.s32.totalorder %s7640_s5, 0 }
0x1228   :  { %7644 = shalt.err (%p7714_p10)  }
0x1229   :  { %7646 = vsyncmov [#allocation9 + $0x1] }
0x122c   :  { %s7647_s29 = vpop.sfrf %7646 }
0x122d   :  { %p7715_p11 = scmp.ne.s32.totalorder %s7647_s29, 0 }
0x122f   :  { %7651 = shalt.err (%p7715_p11)  }
0x1230   :  { %7653 = vsyncmov [#allocation9 + $0x2] }
0x1233   :  { %s7654_s30 = vpop.sfrf %7653 }
0x1234   :  { %p7716_p12 = scmp.ne.s32.totalorder %s7654_s30, 0 }
0x1236   :  { %7658 = shalt.err (%p7716_p12)  }
0x1237   :  { %7660 = vsyncmov [#allocation9 + $0x3] }
0x123a   :  { %s7661_s0 = vpop.sfrf %7660 }
0x123b   :  { %p7717_p13 = scmp.ne.s32.totalorder %s7661_s0, 0 }
0x123d   :  { %7665 = shalt.err (%p7717_p13)  }
0x123e   :  { %7667 = vsyncmov [#allocation9 + $0x4] }
0x1241   :  { %s7668_s9 = vpop.sfrf %7667 }
0x1242   :  { %p7718_p0 = scmp.ne.s32.totalorder %s7668_s9, 0 }
0x1244   :  { %7672 = shalt.err (%p7718_p0)  }
0x1245   :  { %7674 = vsyncmov [#allocation9 + $0x5] }
0x1248   :  { %s7675_s26 = vpop.sfrf %7674 }
0x1249   :  { %p7719_p1 = scmp.ne.s32.totalorder %s7675_s26, 0 }
0x124b   :  { %7679 = shalt.err (%p7719_p1)  }
0x124c   :  { %7681 = vsyncmov [#allocation9 + $0x6] }
0x124f   :  { %s7682_s10 = vpop.sfrf %7681 }
0x1250   :  { %p7720_p2 = scmp.ne.s32.totalorder %s7682_s10, 0 }
0x1252   :  { %7686 = shalt.err (%p7720_p2)  }

</bundles_post_ra>
